<compile_context>
chip_gen: v7x
topology: tpu7x:2x2x1
jax: 0.10.0
libtpu: 0.0.40
codegen_flags: <defaults>
</compile_context>

<pallas_src>
import functools

import jax
import jax.numpy as jnp
from jax.experimental import pallas as pl
from jax.experimental.pallas import tpu as pltpu


def _silu(x):
    return x * jax.nn.sigmoid(x)


_dot = functools.partial(jnp.dot, preferred_element_type=jnp.float32)

# Per-layer [H, H] weight-slab sections (rows zero-padded to H where needed).
S_W2, S_WNH, S_WNA, S_WN2, S_WN0, S_W1RE = range(6)
NSEC = 6
# Misc weight slab [4, H, H]: embedding, node_dec[0], node_dec[2], graph_dec[0].
M_EMB, M_ND1, M_ND2, M_GD1 = range(4)
NMISC = 4
# Misc bias slab [6, H]: emb_b, nd1_b, nd2_b, gd1_b, graph_dec[2].W^T, graph_dec[2].b.


# ----------------------------------------------------------------------------
# Fused kernel: embedding -> n_layers x E_GCL_mask -> node_dec -> graph readout
# ----------------------------------------------------------------------------
def egnn_fused_kernel(h0_ref, x_ref, ea_ref, em_ref, nmask_ref,
                      wsd_ref, wl_ref, bl_ref, wm_ref, bm_ref, out_ref):
    GN, F = h0_ref.shape            # G graphs * N nodes in this block
    GNE, E = ea_ref.shape           # GNE = G * N * N edges
    H = wm_ref.shape[2]
    L = bl_ref.shape[0]
    N = GNE // GN
    G = GN // N
    bf16 = jnp.bfloat16

    h0 = h0_ref[...]                                    # [GN, F] f32
    h0_b = h0.astype(bf16)
    x = x_ref[...]                                      # [GN, 3] f32
    em = em_ref[...]                                    # [GNE, 1] f32

    # ---- geometry (coords never updated by E_GCL_mask -> layer-invariant) --
    # edge e = (g, i, j), i = source/row (outer), j = target/col (inner):
    #   src-gather = repeat node rows N times, dst-gather = tile the per-graph block.
    x_src = jnp.broadcast_to(x[:, None, :], (GN, N, 3)).reshape(GNE, 3)
    x_dst = jnp.broadcast_to(x.reshape(G, N, 3)[:, None, :, :],
                             (G, N, N, 3)).reshape(GNE, 3)
    diff = x_src - x_dst
    radial = jnp.sum(diff * diff, axis=-1, keepdims=True)          # [GNE, 1]

    # [radial | edge_attr] is layer-invariant: build once, one K=(1+E) matmul/layer.
    ea_full = jnp.concatenate([radial, ea_ref[...]], axis=1).astype(bf16)   # [GNE, 1+E]

    # ---- embedding: h = h0 @ We + be ---------------------------------------
    h = _dot(h0_b, wm_ref[M_EMB][0:F, :]) + bm_ref[0:1, :]          # [GN, H] f32

    # ---- L x E_GCL_mask layers, statically unrolled; h stays on-chip -------
    for l in range(L):
        base = l * NSEC
        bl = bl_ref[l]                                              # [4, H] f32
        h_b = h.astype(bf16)

        # edge model: first layer hoisted to node granularity, src/dst weights
        # fused into a single [H, 2H] matmul (wider MXU N per push).
        hsd = _dot(h_b, wsd_ref[l])                                 # [GN, 2H] f32
        hw_s = hsd[:, 0:H]
        hw_d = hsd[:, H:2 * H]
        src_e = jnp.broadcast_to(hw_s[:, None, :], (GN, N, H)).reshape(GNE, H)
        dst_e = jnp.broadcast_to(hw_d.reshape(G, N, H)[:, None, :, :],
                                 (G, N, N, H)).reshape(GNE, H)
        pre = (src_e + dst_e + bl[0:1, :]
               + _dot(ea_full, wl_ref[base + S_W1RE][0:1 + E, :]))
        m = _silu(pre)
        ef = _silu(_dot(m.astype(bf16), wl_ref[base + S_W2]) + bl[1:2, :]) * em

        # unsorted_segment_sum over the source node == sum over the target axis.
        agg = jnp.sum(ef.reshape(GN, N, H), axis=1)                 # [GN, H]

        # node model (node_attr = h0), recurrent residual.
        u = _silu(_dot(h_b, wl_ref[base + S_WNH])
                  + _dot(agg.astype(bf16), wl_ref[base + S_WNA])
                  + _dot(h0_b, wl_ref[base + S_WN0][0:F, :])
                  + bl[2:3, :])
        h = h + _dot(u.astype(bf16), wl_ref[base + S_WN2]) + bl[3:4, :]

    # ---- readout: node_dec -> *node_mask -> per-graph sum -> graph_dec -----
    t = _silu(_dot(h.astype(bf16), wm_ref[M_ND1]) + bm_ref[1:2, :])
    t = (_dot(t.astype(bf16), wm_ref[M_ND2]) + bm_ref[2:3, :]) * nmask_ref[...]
    s = jnp.sum(t.reshape(G, N, H), axis=1)                         # [G, H]
    g = _silu(_dot(s.astype(bf16), wm_ref[M_GD1]) + bm_ref[3:4, :])
    pred = jnp.sum(g * bm_ref[4:5, :], axis=-1, keepdims=True) + bm_ref[5:6, 0:1]
    out_ref[0] = pred                                               # [G, 1]


# ----------------------------------------------------------------------------
# Wrapper
# ----------------------------------------------------------------------------
def egnn_forward(h0, x, edge_attr, node_mask, edge_mask, n_nodes, params,
                 num_blocks=2):
    """Full EGNN forward as one fused pallas_call.

    num_blocks splits the batch over a ('parallel') grid: >=2 overlaps block i+1's
    activation DMA with block i's compute and keeps both v7x TensorCores busy.
    Pick it so each block's node rows (B // num_blocks * n_nodes) stay 8-aligned.
    """
    BN, F = h0.shape
    N = n_nodes
    B = BN // N
    H = params["w_misc"].shape[2]
    E = edge_attr.shape[1]
    L = params["b_layers"].shape[0]
    assert B % num_blocks == 0
    G = B // num_blocks                  # graphs per grid step
    GN, GNE = G * N, G * N * N
    if num_blocks > 1:
        assert GN % 8 == 0, "pick num_blocks so per-block node rows are 8-aligned"

    # bf16 MXU operands (f32 masters stay in params for the reference / training).
    w_sd = params["w_sd"].astype(jnp.bfloat16)
    w_layers = params["w_layers"].astype(jnp.bfloat16)
    w_misc = params["w_misc"].astype(jnp.bfloat16)
    b_layers, b_misc = params["b_layers"], params["b_misc"]

    # VMEM budget: single-buffered weights + pipelined activations + in-kernel
    # edge/node temporaries, with headroom; capped for v7x (64 MiB / TensorCore).
    w_bytes = 2 * (w_sd.size + w_layers.size + w_misc.size) \
        + 4 * (b_layers.size + b_misc.size)
    act_bytes = 4 * (GNE * (4 * H + 2 * (1 + E) + 4) + GN * (F + 3 + 6 * H + 1))
    vmem_limit = int(min(max(w_bytes + 3 * act_bytes, 32 << 20), 64 << 20))

    def _run(single_buffer_invariants):
        inv = ({"pipeline_mode": pl.Buffered(1)}
               if single_buffer_invariants and hasattr(pl, "Buffered") else {})
        return pl.pallas_call(
            egnn_fused_kernel,
            grid=(num_blocks,),
            out_shape=jax.ShapeDtypeStruct((num_blocks, G, 1), jnp.float32),
            in_specs=[
                pl.BlockSpec((GN, F), lambda b: (b, 0)),                     # h0
                pl.BlockSpec((GN, 3), lambda b: (b, 0)),                     # x
                pl.BlockSpec((GNE, E), lambda b: (b, 0)),                    # edge_attr
                pl.BlockSpec((GNE, 1), lambda b: (b, 0)),                    # edge_mask
                pl.BlockSpec((GN, 1), lambda b: (b, 0)),                     # node_mask
                pl.BlockSpec((L, H, 2 * H), lambda b: (0, 0, 0), **inv),     # fused src|dst W1
                pl.BlockSpec((L * NSEC, H, H), lambda b: (0, 0, 0), **inv),  # per-layer weights
                pl.BlockSpec((L, 4, H), lambda b: (0, 0, 0), **inv),         # per-layer biases
                pl.BlockSpec((NMISC, H, H), lambda b: (0, 0, 0), **inv),     # misc weights
                pl.BlockSpec((6, H), lambda b: (0, 0), **inv),               # misc biases
            ],
            out_specs=pl.BlockSpec((1, G, 1), lambda b: (b, 0, 0)),
            compiler_params=pltpu.CompilerParams(
                dimension_semantics=("parallel",),
                vmem_limit_bytes=vmem_limit),
        )(h0, x, edge_attr, edge_mask, node_mask,
          w_sd, w_layers, b_layers, w_misc, b_misc)

    try:
        out = _run(True)
    except Exception:
        # Older jax without BlockSpec.pipeline_mode / Buffered(1): fall back to the
        # default double-buffered invariant slabs (identical results).
        out = _run(False)
    return out.reshape(B)


# ----------------------------------------------------------------------------
# Parameters (deterministic, mimics nn.Linear default init), packed for the kernel
# ----------------------------------------------------------------------------
def linear_init(key, fan_in, fan_out):
    k = 1.0 / jnp.sqrt(float(fan_in))
    kw, kb = jax.random.split(key)
    w = jax.random.uniform(kw, (fan_in, fan_out), jnp.float32, -k, k)
    b = jax.random.uniform(kb, (1, fan_out), jnp.float32, -k, k)
    return w, b


def _pad_rows(w, rows):
    return jnp.concatenate(
        [w, jnp.zeros((rows - w.shape[0], w.shape[1]), w.dtype)], axis=0)


def init_params(key, in_node_nf, in_edge_nf, hidden_nf, n_layers):
    H, F, E = hidden_nf, in_node_nf, in_edge_nf
    assert F <= H and (1 + E) <= H, "weight-slab sections are padded to H rows"
    keys = jax.random.split(key, 2 + n_layers)

    embed_w, embed_b = linear_init(keys[0], F, H)

    w_sd, w_secs, b_rows = [], [], []
    for l in range(n_layers):
        k = jax.random.split(keys[1 + l], 4)
        w1, b1 = linear_init(k[0], 2 * H + 1 + E, H)   # edge_mlp[0]: cat[src,dst,radial,ea]
        w2, b2 = linear_init(k[1], H, H)               # edge_mlp[2]
        wn1, bn1 = linear_init(k[2], 2 * H + F, H)     # node_mlp[0]: cat[h, agg, h0]
        wn2, bn2 = linear_init(k[3], H, H)             # node_mlp[2]
        w_sd.append(jnp.concatenate([w1[:H], w1[H:2 * H]], axis=1))   # [H, 2H] (src|dst)
        secs = [None] * NSEC
        secs[S_W2] = w2
        secs[S_WNH] = wn1[:H]
        secs[S_WNA] = wn1[H:2 * H]
        secs[S_WN2] = wn2
        secs[S_WN0] = _pad_rows(wn1[2 * H:], H)
        secs[S_W1RE] = _pad_rows(w1[2 * H:], H)        # rows: [radial ; edge_attr]
        w_secs.extend(secs)
        b_rows.append(jnp.concatenate([b1, b2, bn1, bn2], axis=0))    # [4, H]

    kd = jax.random.split(keys[-1], 4)
    wd1, bd1 = linear_init(kd[0], H, H)    # node_dec[0]
    wd2, bd2 = linear_init(kd[1], H, H)    # node_dec[2]
    wg1, bg1 = linear_init(kd[2], H, H)    # graph_dec[0]
    wg2, bg2 = linear_init(kd[3], H, 1)    # graph_dec[2]

    w_misc = jnp.stack([_pad_rows(embed_w, H), wd1, wd2, wg1])        # [4, H, H]
    b_misc = jnp.concatenate(
        [embed_b, bd1, bd2, bg1, wg2.T,
         jnp.concatenate([bg2, jnp.zeros((1, H - 1), jnp.float32)], axis=1)],
        axis=0)                                                       # [6, H]

    return {
        "w_sd": jnp.stack(w_sd),            # [L, H, 2H]    f32 masters
        "w_layers": jnp.stack(w_secs),      # [L*6, H, H]
        "b_layers": jnp.stack(b_rows),      # [L, 4, H]
        "w_misc": w_misc,                   # [4, H, H]
        "b_misc": b_misc,                   # [6, H]
    }


# ----------------------------------------------------------------------------
# Pure-JAX reference (no pallas, f32) for correctness checking
# ----------------------------------------------------------------------------
def egnn_reference(h0, x, edge_attr, node_mask, edge_mask, n_nodes, params):
    BN, F = h0.shape
    N = n_nodes
    B = BN // N
    H = params["w_misc"].shape[2]
    L = params["b_layers"].shape[0]
    E = edge_attr.shape[1]
    dot = functools.partial(jnp.dot, precision=jax.lax.Precision.HIGHEST)
    wsd, wl, bl_all = params["w_sd"], params["w_layers"], params["b_layers"]
    wm, bm = params["w_misc"], params["b_misc"]

    e = jnp.arange(B * N * N)
    g_idx = e // (N * N)
    src = g_idx * N + (e // N) % N       # get_adj_matrix ordering: i outer, j inner
    dst = g_idx * N + e % N

    h = dot(h0, wm[M_EMB][:F]) + bm[0:1]
    diff = x[src] - x[dst]
    radial = jnp.sum(diff * diff, axis=-1, keepdims=True)
    for l in range(L):
        base = l * NSEC
        bl = bl_all[l]
        hsd = dot(h, wsd[l])
        pre = (hsd[src, :H] + hsd[dst, H:]
               + radial * wl[base + S_W1RE][0:1]
               + dot(edge_attr, wl[base + S_W1RE][1:1 + E]) + bl[0:1])
        m = pre * jax.nn.sigmoid(pre)
        ef = dot(m, wl[base + S_W2]) + bl[1:2]
        ef = (ef * jax.nn.sigmoid(ef)) * edge_mask
        agg = jnp.zeros((BN, H), jnp.float32).at[src].add(ef)
        u = (dot(h, wl[base + S_WNH]) + dot(agg, wl[base + S_WNA])
             + dot(h0, wl[base + S_WN0][:F]) + bl[2:3])
        u = u * jax.nn.sigmoid(u)
        h = h + dot(u, wl[base + S_WN2]) + bl[3:4]
    t = dot(h, wm[M_ND1]) + bm[1:2]
    t = t * jax.nn.sigmoid(t)
    t = (dot(t, wm[M_ND2]) + bm[2:3]) * node_mask
    s = jnp.sum(t.reshape(B, N, H), axis=1)
    gr = dot(s, wm[M_GD1]) + bm[3:4]
    gr = gr * jax.nn.sigmoid(gr)
    return jnp.sum(gr * bm[4:5], axis=-1) + bm[5, 0]


# ----------------------------------------------------------------------------
if __name__ == "__main__":
    B, N = 2, 8          # batch, n_nodes
    F_IN = 16            # in_node_nf
    E_IN = 4             # in_edge_nf
    H = 32               # hidden_nf
    L = 4                # n_layers
    NE = N * N

    key = jax.random.PRNGKey(0)
    k1, k2, k3, kp = jax.random.split(key, 4)

    h0 = jax.random.normal(k1, (B * N, F_IN), dtype=jnp.float32)
    x = jax.random.normal(k2, (B * N, 3), dtype=jnp.float32)
    edge_attr = jax.random.normal(k3, (B * NE, E_IN), dtype=jnp.float32)

    # node / edge masks (graph 0 has 6 real atoms, graph 1 has 8)
    counts = jnp.array([6, 8])
    node_mask_2d = (jnp.arange(N)[None, :] < counts[:, None]).astype(jnp.float32)
    edge_mask_3d = (node_mask_2d[:, :, None] * node_mask_2d[:, None, :]
                    * (1.0 - jnp.eye(N, dtype=jnp.float32))[None])
    node_mask = node_mask_2d.reshape(B * N, 1)
    edge_mask = edge_mask_3d.reshape(B * NE, 1)

    params = init_params(kp, F_IN, E_IN, H, L)

    # Two 'parallel' grid steps: DMA/compute overlap on v5e/v6e, megacore on v7x.
    pred = egnn_forward(h0, x, edge_attr, node_mask, edge_mask, N, params,
                        num_blocks=2)
    pred = jax.block_until_ready(pred)

    # Same fused kernel, whole batch in one fat step (also a supported layout).
    pred1 = egnn_forward(h0, x, edge_attr, node_mask, edge_mask, N, params,
                         num_blocks=1)
    pred1 = jax.block_until_ready(pred1)

    ref = egnn_reference(h0, x, edge_attr, node_mask, edge_mask, N, params)
    assert pred.shape == (B,)
    assert bool(jnp.all(jnp.isfinite(pred)))
    assert jnp.allclose(pred, ref, rtol=5e-2, atol=5e-2)      # bf16 MXU, f32 accumulate
    assert jnp.allclose(pred1, ref, rtol=5e-2, atol=5e-2)
    print("KERNEL_OK")
</pallas_src>

<mosaic_0001>
module attributes {stable_mosaic.version = 11 : i64} {
  func.func @egnn_fused_kernel(%arg0: i32, %arg1: memref<8x16xf32, #tpu.memory_space<vmem>>, %arg2: memref<8x3xf32, #tpu.memory_space<vmem>>, %arg3: memref<64x4xf32, #tpu.memory_space<vmem>>, %arg4: memref<64x1xf32, #tpu.memory_space<vmem>>, %arg5: memref<8x1xf32, #tpu.memory_space<vmem>>, %arg6: memref<4x32x64xbf16, #tpu.memory_space<vmem>>, %arg7: memref<24x32x32xbf16, #tpu.memory_space<vmem>>, %arg8: memref<4x4x32xf32, #tpu.memory_space<vmem>>, %arg9: memref<4x32x32xbf16, #tpu.memory_space<vmem>>, %arg10: memref<6x32xf32, #tpu.memory_space<vmem>>, %arg11: memref<1x1x1xf32, #tpu.memory_space<vmem>>) attributes {dimension_semantics = [#tpu.dimension_semantics<parallel>], iteration_bounds = array<i64: 2>, scalar_prefetch = 0 : i64, scratch_operands = 0 : i64, tpu.core_type = #tpu.core_type<tc>, window_params = [{transform_indices = @transform_0, window_bounds = array<i64: 8, 16>}, {transform_indices = @transform_1, window_bounds = array<i64: 8, 3>}, {transform_indices = @transform_2, window_bounds = array<i64: 64, 4>}, {transform_indices = @transform_3, window_bounds = array<i64: 64, 1>}, {transform_indices = @transform_4, window_bounds = array<i64: 8, 1>}, {pipeline_mode = #tpu.pipeline_mode<synchronous>, transform_indices = @transform_5, window_bounds = array<i64: 4, 32, 64>}, {pipeline_mode = #tpu.pipeline_mode<synchronous>, transform_indices = @transform_6, window_bounds = array<i64: 24, 32, 32>}, {pipeline_mode = #tpu.pipeline_mode<synchronous>, transform_indices = @transform_7, window_bounds = array<i64: 4, 4, 32>}, {pipeline_mode = #tpu.pipeline_mode<synchronous>, transform_indices = @transform_8, window_bounds = array<i64: 4, 32, 32>}, {pipeline_mode = #tpu.pipeline_mode<synchronous>, transform_indices = @transform_9, window_bounds = array<i64: 6, 32>}, {transform_indices = @transform_10, window_bounds = array<i64: 1, 1, 1>}]} {
    %c0 = arith.constant 0 : index
    %c0_0 = arith.constant 0 : index
    %0 = vector.load %arg1[%c0, %c0_0] : memref<8x16xf32, #tpu.memory_space<vmem>>, vector<8x16xf32>
    %1 = arith.truncf %0 : vector<8x16xf32> to vector<8x16xbf16>
    %c0_1 = arith.constant 0 : index
    %c0_2 = arith.constant 0 : index
    %2 = vector.load %arg2[%c0_1, %c0_2] : memref<8x3xf32, #tpu.memory_space<vmem>>, vector<8x3xf32>
    %c0_3 = arith.constant 0 : index
    %c0_4 = arith.constant 0 : index
    %3 = vector.load %arg4[%c0_3, %c0_4] : memref<64x1xf32, #tpu.memory_space<vmem>>, vector<64x1xf32>
    %4 = vector.shape_cast %2 : vector<8x3xf32> to vector<8x1x3xf32>
    %5 = vector.shape_cast %4 : vector<8x1x3xf32> to vector<8x1x3xf32>
    %6 = vector.broadcast %5 : vector<8x1x3xf32> to vector<8x8x3xf32>
    %7 = vector.shape_cast %6 : vector<8x8x3xf32> to vector<64x3xf32>
    %8 = vector.shape_cast %2 : vector<8x3xf32> to vector<1x8x3xf32>
    %9 = vector.shape_cast %8 : vector<1x8x3xf32> to vector<1x1x8x3xf32>
    %10 = vector.shape_cast %9 : vector<1x1x8x3xf32> to vector<1x1x8x3xf32>
    %11 = vector.broadcast %10 : vector<1x1x8x3xf32> to vector<1x8x8x3xf32>
    %12 = vector.shape_cast %11 : vector<1x8x8x3xf32> to vector<64x3xf32>
    %13 = arith.subf %7, %12 : vector<64x3xf32>
    %14 = arith.mulf %13, %13 : vector<64x3xf32>
    %cst = arith.constant dense<0.000000e+00> : vector<64xf32>
    %15 = vector.multi_reduction <add>, %14, %cst [1] : vector<64x3xf32> to vector<64xf32>
    %16 = vector.shape_cast %15 : vector<64xf32> to vector<64x1xf32>
    %c0_5 = arith.constant 0 : index
    %c0_6 = arith.constant 0 : index
    %17 = vector.load %arg3[%c0_5, %c0_6] : memref<64x4xf32, #tpu.memory_space<vmem>>, vector<64x4xf32>
    %18 = tpu.concatenate %16, %17 in 1 : vector<64x1xf32>, vector<64x4xf32> -> vector<64x5xf32>
    %19 = arith.truncf %18 : vector<64x5xf32> to vector<64x5xbf16>
    %c0_7 = arith.constant 0 : index
    %c0_8 = arith.constant 0 : index
    %c0_9 = arith.constant 0 : index
    %20 = vector.load %arg9[%c0_7, %c0_8, %c0_9] : memref<4x32x32xbf16, #tpu.memory_space<vmem>>, vector<1x32x32xbf16>
    %21 = vector.shape_cast %20 : vector<1x32x32xbf16> to vector<32x32xbf16>
    %22 = vector.extract_strided_slice %21 {offsets = [0, 0], sizes = [16, 32], strides = [1, 1]} : vector<32x32xbf16> to vector<16x32xbf16>
    %cst_10 = arith.constant dense<0.000000e+00> : vector<8x32xf32>
    %23 = tpu.matmul %1, %22, %cst_10 {dimension_numbers = #tpu.dot_dimension_numbers<[1], [0], [0], [1], [0, 0, 1, 1], [], []>} : vector<8x16xbf16>, vector<16x32xbf16>, vector<8x32xf32> -> vector<8x32xf32>
    %c0_11 = arith.constant 0 : index
    %c0_12 = arith.constant 0 : index
    %24 = vector.load %arg10[%c0_11, %c0_12] : memref<6x32xf32, #tpu.memory_space<vmem>>, vector<1x32xf32>
    %25 = vector.broadcast %24 : vector<1x32xf32> to vector<8x32xf32>
    %26 = arith.addf %23, %25 : vector<8x32xf32>
    %c0_13 = arith.constant 0 : index
    %c0_14 = arith.constant 0 : index
    %c0_15 = arith.constant 0 : index
    %27 = vector.load %arg8[%c0_13, %c0_14, %c0_15] : memref<4x4x32xf32, #tpu.memory_space<vmem>>, vector<1x4x32xf32>
    %28 = vector.shape_cast %27 : vector<1x4x32xf32> to vector<4x32xf32>
    %29 = arith.truncf %26 : vector<8x32xf32> to vector<8x32xbf16>
    %c0_16 = arith.constant 0 : index
    %c0_17 = arith.constant 0 : index
    %c0_18 = arith.constant 0 : index
    %30 = vector.load %arg6[%c0_16, %c0_17, %c0_18] : memref<4x32x64xbf16, #tpu.memory_space<vmem>>, vector<1x32x64xbf16>
    %31 = vector.shape_cast %30 : vector<1x32x64xbf16> to vector<32x64xbf16>
    %cst_19 = arith.constant dense<0.000000e+00> : vector<8x64xf32>
    %32 = tpu.matmul %29, %31, %cst_19 {dimension_numbers = #tpu.dot_dimension_numbers<[1], [0], [0], [1], [0, 0, 1, 1], [], []>} : vector<8x32xbf16>, vector<32x64xbf16>, vector<8x64xf32> -> vector<8x64xf32>
    %33 = vector.extract_strided_slice %32 {offsets = [0, 0], sizes = [8, 32], strides = [1, 1]} : vector<8x64xf32> to vector<8x32xf32>
    %34 = vector.extract_strided_slice %32 {offsets = [0, 32], sizes = [8, 32], strides = [1, 1]} : vector<8x64xf32> to vector<8x32xf32>
    %35 = vector.shape_cast %33 : vector<8x32xf32> to vector<8x1x32xf32>
    %36 = vector.shape_cast %35 : vector<8x1x32xf32> to vector<8x1x32xf32>
    %37 = vector.broadcast %36 : vector<8x1x32xf32> to vector<8x8x32xf32>
    %38 = vector.shape_cast %37 : vector<8x8x32xf32> to vector<64x32xf32>
    %39 = vector.shape_cast %34 : vector<8x32xf32> to vector<1x8x32xf32>
    %40 = vector.shape_cast %39 : vector<1x8x32xf32> to vector<1x1x8x32xf32>
    %41 = vector.shape_cast %40 : vector<1x1x8x32xf32> to vector<1x1x8x32xf32>
    %42 = vector.broadcast %41 : vector<1x1x8x32xf32> to vector<1x8x8x32xf32>
    %43 = vector.shape_cast %42 : vector<1x8x8x32xf32> to vector<64x32xf32>
    %44 = arith.addf %38, %43 : vector<64x32xf32>
    %45 = vector.extract_strided_slice %28 {offsets = [0, 0], sizes = [1, 32], strides = [1, 1]} : vector<4x32xf32> to vector<1x32xf32>
    %46 = vector.broadcast %45 : vector<1x32xf32> to vector<64x32xf32>
    %47 = arith.addf %44, %46 : vector<64x32xf32>
    %c5 = arith.constant 5 : index
    %c0_20 = arith.constant 0 : index
    %c0_21 = arith.constant 0 : index
    %48 = vector.load %arg7[%c5, %c0_20, %c0_21] : memref<24x32x32xbf16, #tpu.memory_space<vmem>>, vector<1x32x32xbf16>
    %49 = vector.shape_cast %48 : vector<1x32x32xbf16> to vector<32x32xbf16>
    %50 = vector.extract_strided_slice %49 {offsets = [0, 0], sizes = [5, 32], strides = [1, 1]} : vector<32x32xbf16> to vector<5x32xbf16>
    %cst_22 = arith.constant dense<0.000000e+00> : vector<64x32xf32>
    %51 = tpu.matmul %19, %50, %cst_22 {dimension_numbers = #tpu.dot_dimension_numbers<[1], [0], [0], [1], [0, 0, 1, 1], [], []>} : vector<64x5xbf16>, vector<5x32xbf16>, vector<64x32xf32> -> vector<64x32xf32>
    %52 = arith.addf %47, %51 : vector<64x32xf32>
    %53 = arith.negf %52 : vector<64x32xf32>
    %54 = math.exp %53 : vector<64x32xf32>
    %cst_23 = arith.constant 1.000000e+00 : f32
    %55 = vector.broadcast %cst_23 : f32 to vector<64x32xf32>
    %56 = arith.addf %55, %54 : vector<64x32xf32>
    %57 = arith.divf %55, %56 : vector<64x32xf32>
    %58 = arith.mulf %52, %57 : vector<64x32xf32>
    %59 = arith.truncf %58 : vector<64x32xf32> to vector<64x32xbf16>
    %c0_24 = arith.constant 0 : index
    %c0_25 = arith.constant 0 : index
    %c0_26 = arith.constant 0 : index
    %60 = vector.load %arg7[%c0_24, %c0_25, %c0_26] : memref<24x32x32xbf16, #tpu.memory_space<vmem>>, vector<1x32x32xbf16>
    %61 = vector.shape_cast %60 : vector<1x32x32xbf16> to vector<32x32xbf16>
    %cst_27 = arith.constant dense<0.000000e+00> : vector<64x32xf32>
    %62 = tpu.matmul %59, %61, %cst_27 {dimension_numbers = #tpu.dot_dimension_numbers<[1], [0], [0], [1], [0, 0, 1, 1], [], []>} : vector<64x32xbf16>, vector<32x32xbf16>, vector<64x32xf32> -> vector<64x32xf32>
    %63 = vector.extract_strided_slice %28 {offsets = [1, 0], sizes = [1, 32], strides = [1, 1]} : vector<4x32xf32> to vector<1x32xf32>
    %64 = vector.broadcast %63 : vector<1x32xf32> to vector<64x32xf32>
    %65 = arith.addf %62, %64 : vector<64x32xf32>
    %66 = arith.negf %65 : vector<64x32xf32>
    %67 = math.exp %66 : vector<64x32xf32>
    %cst_28 = arith.constant 1.000000e+00 : f32
    %68 = vector.broadcast %cst_28 : f32 to vector<64x32xf32>
    %69 = arith.addf %68, %67 : vector<64x32xf32>
    %70 = arith.divf %68, %69 : vector<64x32xf32>
    %71 = arith.mulf %65, %70 : vector<64x32xf32>
    %72 = vector.broadcast %3 : vector<64x1xf32> to vector<64x32xf32>
    %73 = arith.mulf %71, %72 : vector<64x32xf32>
    %74 = vector.shape_cast %73 : vector<64x32xf32> to vector<8x8x32xf32>
    %cst_29 = arith.constant dense<0.000000e+00> : vector<8x32xf32>
    %75 = vector.multi_reduction <add>, %74, %cst_29 [1] : vector<8x8x32xf32> to vector<8x32xf32>
    %c1 = arith.constant 1 : index
    %c0_30 = arith.constant 0 : index
    %c0_31 = arith.constant 0 : index
    %76 = vector.load %arg7[%c1, %c0_30, %c0_31] : memref<24x32x32xbf16, #tpu.memory_space<vmem>>, vector<1x32x32xbf16>
    %77 = vector.shape_cast %76 : vector<1x32x32xbf16> to vector<32x32xbf16>
    %cst_32 = arith.constant dense<0.000000e+00> : vector<8x32xf32>
    %78 = tpu.matmul %29, %77, %cst_32 {dimension_numbers = #tpu.dot_dimension_numbers<[1], [0], [0], [1], [0, 0, 1, 1], [], []>} : vector<8x32xbf16>, vector<32x32xbf16>, vector<8x32xf32> -> vector<8x32xf32>
    %79 = arith.truncf %75 : vector<8x32xf32> to vector<8x32xbf16>
    %c2 = arith.constant 2 : index
    %c0_33 = arith.constant 0 : index
    %c0_34 = arith.constant 0 : index
    %80 = vector.load %arg7[%c2, %c0_33, %c0_34] : memref<24x32x32xbf16, #tpu.memory_space<vmem>>, vector<1x32x32xbf16>
    %81 = vector.shape_cast %80 : vector<1x32x32xbf16> to vector<32x32xbf16>
    %cst_35 = arith.constant dense<0.000000e+00> : vector<8x32xf32>
    %82 = tpu.matmul %79, %81, %cst_35 {dimension_numbers = #tpu.dot_dimension_numbers<[1], [0], [0], [1], [0, 0, 1, 1], [], []>} : vector<8x32xbf16>, vector<32x32xbf16>, vector<8x32xf32> -> vector<8x32xf32>
    %83 = arith.addf %78, %82 : vector<8x32xf32>
    %c4 = arith.constant 4 : index
    %c0_36 = arith.constant 0 : index
    %c0_37 = arith.constant 0 : index
    %84 = vector.load %arg7[%c4, %c0_36, %c0_37] : memref<24x32x32xbf16, #tpu.memory_space<vmem>>, vector<1x32x32xbf16>
    %85 = vector.shape_cast %84 : vector<1x32x32xbf16> to vector<32x32xbf16>
    %86 = vector.extract_strided_slice %85 {offsets = [0, 0], sizes = [16, 32], strides = [1, 1]} : vector<32x32xbf16> to vector<16x32xbf16>
    %cst_38 = arith.constant dense<0.000000e+00> : vector<8x32xf32>
    %87 = tpu.matmul %1, %86, %cst_38 {dimension_numbers = #tpu.dot_dimension_numbers<[1], [0], [0], [1], [0, 0, 1, 1], [], []>} : vector<8x16xbf16>, vector<16x32xbf16>, vector<8x32xf32> -> vector<8x32xf32>
    %88 = arith.addf %83, %87 : vector<8x32xf32>
    %89 = vector.extract_strided_slice %28 {offsets = [2, 0], sizes = [1, 32], strides = [1, 1]} : vector<4x32xf32> to vector<1x32xf32>
    %90 = vector.broadcast %89 : vector<1x32xf32> to vector<8x32xf32>
    %91 = arith.addf %88, %90 : vector<8x32xf32>
    %92 = arith.negf %91 : vector<8x32xf32>
    %93 = math.exp %92 : vector<8x32xf32>
    %cst_39 = arith.constant 1.000000e+00 : f32
    %94 = vector.broadcast %cst_39 : f32 to vector<8x32xf32>
    %95 = arith.addf %94, %93 : vector<8x32xf32>
    %96 = arith.divf %94, %95 : vector<8x32xf32>
    %97 = arith.mulf %91, %96 : vector<8x32xf32>
    %98 = arith.truncf %97 : vector<8x32xf32> to vector<8x32xbf16>
    %c3 = arith.constant 3 : index
    %c0_40 = arith.constant 0 : index
    %c0_41 = arith.constant 0 : index
    %99 = vector.load %arg7[%c3, %c0_40, %c0_41] : memref<24x32x32xbf16, #tpu.memory_space<vmem>>, vector<1x32x32xbf16>
    %100 = vector.shape_cast %99 : vector<1x32x32xbf16> to vector<32x32xbf16>
    %cst_42 = arith.constant dense<0.000000e+00> : vector<8x32xf32>
    %101 = tpu.matmul %98, %100, %cst_42 {dimension_numbers = #tpu.dot_dimension_numbers<[1], [0], [0], [1], [0, 0, 1, 1], [], []>} : vector<8x32xbf16>, vector<32x32xbf16>, vector<8x32xf32> -> vector<8x32xf32>
    %102 = arith.addf %26, %101 : vector<8x32xf32>
    %103 = vector.extract_strided_slice %28 {offsets = [3, 0], sizes = [1, 32], strides = [1, 1]} : vector<4x32xf32> to vector<1x32xf32>
    %104 = vector.broadcast %103 : vector<1x32xf32> to vector<8x32xf32>
    %105 = arith.addf %102, %104 : vector<8x32xf32>
    %c1_43 = arith.constant 1 : index
    %c0_44 = arith.constant 0 : index
    %c0_45 = arith.constant 0 : index
    %106 = vector.load %arg8[%c1_43, %c0_44, %c0_45] : memref<4x4x32xf32, #tpu.memory_space<vmem>>, vector<1x4x32xf32>
    %107 = vector.shape_cast %106 : vector<1x4x32xf32> to vector<4x32xf32>
    %108 = arith.truncf %105 : vector<8x32xf32> to vector<8x32xbf16>
    %c1_46 = arith.constant 1 : index
    %c0_47 = arith.constant 0 : index
    %c0_48 = arith.constant 0 : index
    %109 = vector.load %arg6[%c1_46, %c0_47, %c0_48] : memref<4x32x64xbf16, #tpu.memory_space<vmem>>, vector<1x32x64xbf16>
    %110 = vector.shape_cast %109 : vector<1x32x64xbf16> to vector<32x64xbf16>
    %cst_49 = arith.constant dense<0.000000e+00> : vector<8x64xf32>
    %111 = tpu.matmul %108, %110, %cst_49 {dimension_numbers = #tpu.dot_dimension_numbers<[1], [0], [0], [1], [0, 0, 1, 1], [], []>} : vector<8x32xbf16>, vector<32x64xbf16>, vector<8x64xf32> -> vector<8x64xf32>
    %112 = vector.extract_strided_slice %111 {offsets = [0, 0], sizes = [8, 32], strides = [1, 1]} : vector<8x64xf32> to vector<8x32xf32>
    %113 = vector.extract_strided_slice %111 {offsets = [0, 32], sizes = [8, 32], strides = [1, 1]} : vector<8x64xf32> to vector<8x32xf32>
    %114 = vector.shape_cast %112 : vector<8x32xf32> to vector<8x1x32xf32>
    %115 = vector.shape_cast %114 : vector<8x1x32xf32> to vector<8x1x32xf32>
    %116 = vector.broadcast %115 : vector<8x1x32xf32> to vector<8x8x32xf32>
    %117 = vector.shape_cast %116 : vector<8x8x32xf32> to vector<64x32xf32>
    %118 = vector.shape_cast %113 : vector<8x32xf32> to vector<1x8x32xf32>
    %119 = vector.shape_cast %118 : vector<1x8x32xf32> to vector<1x1x8x32xf32>
    %120 = vector.shape_cast %119 : vector<1x1x8x32xf32> to vector<1x1x8x32xf32>
    %121 = vector.broadcast %120 : vector<1x1x8x32xf32> to vector<1x8x8x32xf32>
    %122 = vector.shape_cast %121 : vector<1x8x8x32xf32> to vector<64x32xf32>
    %123 = arith.addf %117, %122 : vector<64x32xf32>
    %124 = vector.extract_strided_slice %107 {offsets = [0, 0], sizes = [1, 32], strides = [1, 1]} : vector<4x32xf32> to vector<1x32xf32>
    %125 = vector.broadcast %124 : vector<1x32xf32> to vector<64x32xf32>
    %126 = arith.addf %123, %125 : vector<64x32xf32>
    %c11 = arith.constant 11 : index
    %c0_50 = arith.constant 0 : index
    %c0_51 = arith.constant 0 : index
    %127 = vector.load %arg7[%c11, %c0_50, %c0_51] : memref<24x32x32xbf16, #tpu.memory_space<vmem>>, vector<1x32x32xbf16>
    %128 = vector.shape_cast %127 : vector<1x32x32xbf16> to vector<32x32xbf16>
    %129 = vector.extract_strided_slice %128 {offsets = [0, 0], sizes = [5, 32], strides = [1, 1]} : vector<32x32xbf16> to vector<5x32xbf16>
    %cst_52 = arith.constant dense<0.000000e+00> : vector<64x32xf32>
    %130 = tpu.matmul %19, %129, %cst_52 {dimension_numbers = #tpu.dot_dimension_numbers<[1], [0], [0], [1], [0, 0, 1, 1], [], []>} : vector<64x5xbf16>, vector<5x32xbf16>, vector<64x32xf32> -> vector<64x32xf32>
    %131 = arith.addf %126, %130 : vector<64x32xf32>
    %132 = arith.negf %131 : vector<64x32xf32>
    %133 = math.exp %132 : vector<64x32xf32>
    %cst_53 = arith.constant 1.000000e+00 : f32
    %134 = vector.broadcast %cst_53 : f32 to vector<64x32xf32>
    %135 = arith.addf %134, %133 : vector<64x32xf32>
    %136 = arith.divf %134, %135 : vector<64x32xf32>
    %137 = arith.mulf %131, %136 : vector<64x32xf32>
    %138 = arith.truncf %137 : vector<64x32xf32> to vector<64x32xbf16>
    %c6 = arith.constant 6 : index
    %c0_54 = arith.constant 0 : index
    %c0_55 = arith.constant 0 : index
    %139 = vector.load %arg7[%c6, %c0_54, %c0_55] : memref<24x32x32xbf16, #tpu.memory_space<vmem>>, vector<1x32x32xbf16>
    %140 = vector.shape_cast %139 : vector<1x32x32xbf16> to vector<32x32xbf16>
    %cst_56 = arith.constant dense<0.000000e+00> : vector<64x32xf32>
    %141 = tpu.matmul %138, %140, %cst_56 {dimension_numbers = #tpu.dot_dimension_numbers<[1], [0], [0], [1], [0, 0, 1, 1], [], []>} : vector<64x32xbf16>, vector<32x32xbf16>, vector<64x32xf32> -> vector<64x32xf32>
    %142 = vector.extract_strided_slice %107 {offsets = [1, 0], sizes = [1, 32], strides = [1, 1]} : vector<4x32xf32> to vector<1x32xf32>
    %143 = vector.broadcast %142 : vector<1x32xf32> to vector<64x32xf32>
    %144 = arith.addf %141, %143 : vector<64x32xf32>
    %145 = arith.negf %144 : vector<64x32xf32>
    %146 = math.exp %145 : vector<64x32xf32>
    %cst_57 = arith.constant 1.000000e+00 : f32
    %147 = vector.broadcast %cst_57 : f32 to vector<64x32xf32>
    %148 = arith.addf %147, %146 : vector<64x32xf32>
    %149 = arith.divf %147, %148 : vector<64x32xf32>
    %150 = arith.mulf %144, %149 : vector<64x32xf32>
    %151 = vector.broadcast %3 : vector<64x1xf32> to vector<64x32xf32>
    %152 = arith.mulf %150, %151 : vector<64x32xf32>
    %153 = vector.shape_cast %152 : vector<64x32xf32> to vector<8x8x32xf32>
    %cst_58 = arith.constant dense<0.000000e+00> : vector<8x32xf32>
    %154 = vector.multi_reduction <add>, %153, %cst_58 [1] : vector<8x8x32xf32> to vector<8x32xf32>
    %c7 = arith.constant 7 : index
    %c0_59 = arith.constant 0 : index
    %c0_60 = arith.constant 0 : index
    %155 = vector.load %arg7[%c7, %c0_59, %c0_60] : memref<24x32x32xbf16, #tpu.memory_space<vmem>>, vector<1x32x32xbf16>
    %156 = vector.shape_cast %155 : vector<1x32x32xbf16> to vector<32x32xbf16>
    %cst_61 = arith.constant dense<0.000000e+00> : vector<8x32xf32>
    %157 = tpu.matmul %108, %156, %cst_61 {dimension_numbers = #tpu.dot_dimension_numbers<[1], [0], [0], [1], [0, 0, 1, 1], [], []>} : vector<8x32xbf16>, vector<32x32xbf16>, vector<8x32xf32> -> vector<8x32xf32>
    %158 = arith.truncf %154 : vector<8x32xf32> to vector<8x32xbf16>
    %c8 = arith.constant 8 : index
    %c0_62 = arith.constant 0 : index
    %c0_63 = arith.constant 0 : index
    %159 = vector.load %arg7[%c8, %c0_62, %c0_63] : memref<24x32x32xbf16, #tpu.memory_space<vmem>>, vector<1x32x32xbf16>
    %160 = vector.shape_cast %159 : vector<1x32x32xbf16> to vector<32x32xbf16>
    %cst_64 = arith.constant dense<0.000000e+00> : vector<8x32xf32>
    %161 = tpu.matmul %158, %160, %cst_64 {dimension_numbers = #tpu.dot_dimension_numbers<[1], [0], [0], [1], [0, 0, 1, 1], [], []>} : vector<8x32xbf16>, vector<32x32xbf16>, vector<8x32xf32> -> vector<8x32xf32>
    %162 = arith.addf %157, %161 : vector<8x32xf32>
    %c10 = arith.constant 10 : index
    %c0_65 = arith.constant 0 : index
    %c0_66 = arith.constant 0 : index
    %163 = vector.load %arg7[%c10, %c0_65, %c0_66] : memref<24x32x32xbf16, #tpu.memory_space<vmem>>, vector<1x32x32xbf16>
    %164 = vector.shape_cast %163 : vector<1x32x32xbf16> to vector<32x32xbf16>
    %165 = vector.extract_strided_slice %164 {offsets = [0, 0], sizes = [16, 32], strides = [1, 1]} : vector<32x32xbf16> to vector<16x32xbf16>
    %cst_67 = arith.constant dense<0.000000e+00> : vector<8x32xf32>
    %166 = tpu.matmul %1, %165, %cst_67 {dimension_numbers = #tpu.dot_dimension_numbers<[1], [0], [0], [1], [0, 0, 1, 1], [], []>} : vector<8x16xbf16>, vector<16x32xbf16>, vector<8x32xf32> -> vector<8x32xf32>
    %167 = arith.addf %162, %166 : vector<8x32xf32>
    %168 = vector.extract_strided_slice %107 {offsets = [2, 0], sizes = [1, 32], strides = [1, 1]} : vector<4x32xf32> to vector<1x32xf32>
    %169 = vector.broadcast %168 : vector<1x32xf32> to vector<8x32xf32>
    %170 = arith.addf %167, %169 : vector<8x32xf32>
    %171 = arith.negf %170 : vector<8x32xf32>
    %172 = math.exp %171 : vector<8x32xf32>
    %cst_68 = arith.constant 1.000000e+00 : f32
    %173 = vector.broadcast %cst_68 : f32 to vector<8x32xf32>
    %174 = arith.addf %173, %172 : vector<8x32xf32>
    %175 = arith.divf %173, %174 : vector<8x32xf32>
    %176 = arith.mulf %170, %175 : vector<8x32xf32>
    %177 = arith.truncf %176 : vector<8x32xf32> to vector<8x32xbf16>
    %c9 = arith.constant 9 : index
    %c0_69 = arith.constant 0 : index
    %c0_70 = arith.constant 0 : index
    %178 = vector.load %arg7[%c9, %c0_69, %c0_70] : memref<24x32x32xbf16, #tpu.memory_space<vmem>>, vector<1x32x32xbf16>
    %179 = vector.shape_cast %178 : vector<1x32x32xbf16> to vector<32x32xbf16>
    %cst_71 = arith.constant dense<0.000000e+00> : vector<8x32xf32>
    %180 = tpu.matmul %177, %179, %cst_71 {dimension_numbers = #tpu.dot_dimension_numbers<[1], [0], [0], [1], [0, 0, 1, 1], [], []>} : vector<8x32xbf16>, vector<32x32xbf16>, vector<8x32xf32> -> vector<8x32xf32>
    %181 = arith.addf %105, %180 : vector<8x32xf32>
    %182 = vector.extract_strided_slice %107 {offsets = [3, 0], sizes = [1, 32], strides = [1, 1]} : vector<4x32xf32> to vector<1x32xf32>
    %183 = vector.broadcast %182 : vector<1x32xf32> to vector<8x32xf32>
    %184 = arith.addf %181, %183 : vector<8x32xf32>
    %c2_72 = arith.constant 2 : index
    %c0_73 = arith.constant 0 : index
    %c0_74 = arith.constant 0 : index
    %185 = vector.load %arg8[%c2_72, %c0_73, %c0_74] : memref<4x4x32xf32, #tpu.memory_space<vmem>>, vector<1x4x32xf32>
    %186 = vector.shape_cast %185 : vector<1x4x32xf32> to vector<4x32xf32>
    %187 = arith.truncf %184 : vector<8x32xf32> to vector<8x32xbf16>
    %c2_75 = arith.constant 2 : index
    %c0_76 = arith.constant 0 : index
    %c0_77 = arith.constant 0 : index
    %188 = vector.load %arg6[%c2_75, %c0_76, %c0_77] : memref<4x32x64xbf16, #tpu.memory_space<vmem>>, vector<1x32x64xbf16>
    %189 = vector.shape_cast %188 : vector<1x32x64xbf16> to vector<32x64xbf16>
    %cst_78 = arith.constant dense<0.000000e+00> : vector<8x64xf32>
    %190 = tpu.matmul %187, %189, %cst_78 {dimension_numbers = #tpu.dot_dimension_numbers<[1], [0], [0], [1], [0, 0, 1, 1], [], []>} : vector<8x32xbf16>, vector<32x64xbf16>, vector<8x64xf32> -> vector<8x64xf32>
    %191 = vector.extract_strided_slice %190 {offsets = [0, 0], sizes = [8, 32], strides = [1, 1]} : vector<8x64xf32> to vector<8x32xf32>
    %192 = vector.extract_strided_slice %190 {offsets = [0, 32], sizes = [8, 32], strides = [1, 1]} : vector<8x64xf32> to vector<8x32xf32>
    %193 = vector.shape_cast %191 : vector<8x32xf32> to vector<8x1x32xf32>
    %194 = vector.shape_cast %193 : vector<8x1x32xf32> to vector<8x1x32xf32>
    %195 = vector.broadcast %194 : vector<8x1x32xf32> to vector<8x8x32xf32>
    %196 = vector.shape_cast %195 : vector<8x8x32xf32> to vector<64x32xf32>
    %197 = vector.shape_cast %192 : vector<8x32xf32> to vector<1x8x32xf32>
    %198 = vector.shape_cast %197 : vector<1x8x32xf32> to vector<1x1x8x32xf32>
    %199 = vector.shape_cast %198 : vector<1x1x8x32xf32> to vector<1x1x8x32xf32>
    %200 = vector.broadcast %199 : vector<1x1x8x32xf32> to vector<1x8x8x32xf32>
    %201 = vector.shape_cast %200 : vector<1x8x8x32xf32> to vector<64x32xf32>
    %202 = arith.addf %196, %201 : vector<64x32xf32>
    %203 = vector.extract_strided_slice %186 {offsets = [0, 0], sizes = [1, 32], strides = [1, 1]} : vector<4x32xf32> to vector<1x32xf32>
    %204 = vector.broadcast %203 : vector<1x32xf32> to vector<64x32xf32>
    %205 = arith.addf %202, %204 : vector<64x32xf32>
    %c17 = arith.constant 17 : index
    %c0_79 = arith.constant 0 : index
    %c0_80 = arith.constant 0 : index
    %206 = vector.load %arg7[%c17, %c0_79, %c0_80] : memref<24x32x32xbf16, #tpu.memory_space<vmem>>, vector<1x32x32xbf16>
    %207 = vector.shape_cast %206 : vector<1x32x32xbf16> to vector<32x32xbf16>
    %208 = vector.extract_strided_slice %207 {offsets = [0, 0], sizes = [5, 32], strides = [1, 1]} : vector<32x32xbf16> to vector<5x32xbf16>
    %cst_81 = arith.constant dense<0.000000e+00> : vector<64x32xf32>
    %209 = tpu.matmul %19, %208, %cst_81 {dimension_numbers = #tpu.dot_dimension_numbers<[1], [0], [0], [1], [0, 0, 1, 1], [], []>} : vector<64x5xbf16>, vector<5x32xbf16>, vector<64x32xf32> -> vector<64x32xf32>
    %210 = arith.addf %205, %209 : vector<64x32xf32>
    %211 = arith.negf %210 : vector<64x32xf32>
    %212 = math.exp %211 : vector<64x32xf32>
    %cst_82 = arith.constant 1.000000e+00 : f32
    %213 = vector.broadcast %cst_82 : f32 to vector<64x32xf32>
    %214 = arith.addf %213, %212 : vector<64x32xf32>
    %215 = arith.divf %213, %214 : vector<64x32xf32>
    %216 = arith.mulf %210, %215 : vector<64x32xf32>
    %217 = arith.truncf %216 : vector<64x32xf32> to vector<64x32xbf16>
    %c12 = arith.constant 12 : index
    %c0_83 = arith.constant 0 : index
    %c0_84 = arith.constant 0 : index
    %218 = vector.load %arg7[%c12, %c0_83, %c0_84] : memref<24x32x32xbf16, #tpu.memory_space<vmem>>, vector<1x32x32xbf16>
    %219 = vector.shape_cast %218 : vector<1x32x32xbf16> to vector<32x32xbf16>
    %cst_85 = arith.constant dense<0.000000e+00> : vector<64x32xf32>
    %220 = tpu.matmul %217, %219, %cst_85 {dimension_numbers = #tpu.dot_dimension_numbers<[1], [0], [0], [1], [0, 0, 1, 1], [], []>} : vector<64x32xbf16>, vector<32x32xbf16>, vector<64x32xf32> -> vector<64x32xf32>
    %221 = vector.extract_strided_slice %186 {offsets = [1, 0], sizes = [1, 32], strides = [1, 1]} : vector<4x32xf32> to vector<1x32xf32>
    %222 = vector.broadcast %221 : vector<1x32xf32> to vector<64x32xf32>
    %223 = arith.addf %220, %222 : vector<64x32xf32>
    %224 = arith.negf %223 : vector<64x32xf32>
    %225 = math.exp %224 : vector<64x32xf32>
    %cst_86 = arith.constant 1.000000e+00 : f32
    %226 = vector.broadcast %cst_86 : f32 to vector<64x32xf32>
    %227 = arith.addf %226, %225 : vector<64x32xf32>
    %228 = arith.divf %226, %227 : vector<64x32xf32>
    %229 = arith.mulf %223, %228 : vector<64x32xf32>
    %230 = vector.broadcast %3 : vector<64x1xf32> to vector<64x32xf32>
    %231 = arith.mulf %229, %230 : vector<64x32xf32>
    %232 = vector.shape_cast %231 : vector<64x32xf32> to vector<8x8x32xf32>
    %cst_87 = arith.constant dense<0.000000e+00> : vector<8x32xf32>
    %233 = vector.multi_reduction <add>, %232, %cst_87 [1] : vector<8x8x32xf32> to vector<8x32xf32>
    %c13 = arith.constant 13 : index
    %c0_88 = arith.constant 0 : index
    %c0_89 = arith.constant 0 : index
    %234 = vector.load %arg7[%c13, %c0_88, %c0_89] : memref<24x32x32xbf16, #tpu.memory_space<vmem>>, vector<1x32x32xbf16>
    %235 = vector.shape_cast %234 : vector<1x32x32xbf16> to vector<32x32xbf16>
    %cst_90 = arith.constant dense<0.000000e+00> : vector<8x32xf32>
    %236 = tpu.matmul %187, %235, %cst_90 {dimension_numbers = #tpu.dot_dimension_numbers<[1], [0], [0], [1], [0, 0, 1, 1], [], []>} : vector<8x32xbf16>, vector<32x32xbf16>, vector<8x32xf32> -> vector<8x32xf32>
    %237 = arith.truncf %233 : vector<8x32xf32> to vector<8x32xbf16>
    %c14 = arith.constant 14 : index
    %c0_91 = arith.constant 0 : index
    %c0_92 = arith.constant 0 : index
    %238 = vector.load %arg7[%c14, %c0_91, %c0_92] : memref<24x32x32xbf16, #tpu.memory_space<vmem>>, vector<1x32x32xbf16>
    %239 = vector.shape_cast %238 : vector<1x32x32xbf16> to vector<32x32xbf16>
    %cst_93 = arith.constant dense<0.000000e+00> : vector<8x32xf32>
    %240 = tpu.matmul %237, %239, %cst_93 {dimension_numbers = #tpu.dot_dimension_numbers<[1], [0], [0], [1], [0, 0, 1, 1], [], []>} : vector<8x32xbf16>, vector<32x32xbf16>, vector<8x32xf32> -> vector<8x32xf32>
    %241 = arith.addf %236, %240 : vector<8x32xf32>
    %c16 = arith.constant 16 : index
    %c0_94 = arith.constant 0 : index
    %c0_95 = arith.constant 0 : index
    %242 = vector.load %arg7[%c16, %c0_94, %c0_95] : memref<24x32x32xbf16, #tpu.memory_space<vmem>>, vector<1x32x32xbf16>
    %243 = vector.shape_cast %242 : vector<1x32x32xbf16> to vector<32x32xbf16>
    %244 = vector.extract_strided_slice %243 {offsets = [0, 0], sizes = [16, 32], strides = [1, 1]} : vector<32x32xbf16> to vector<16x32xbf16>
    %cst_96 = arith.constant dense<0.000000e+00> : vector<8x32xf32>
    %245 = tpu.matmul %1, %244, %cst_96 {dimension_numbers = #tpu.dot_dimension_numbers<[1], [0], [0], [1], [0, 0, 1, 1], [], []>} : vector<8x16xbf16>, vector<16x32xbf16>, vector<8x32xf32> -> vector<8x32xf32>
    %246 = arith.addf %241, %245 : vector<8x32xf32>
    %247 = vector.extract_strided_slice %186 {offsets = [2, 0], sizes = [1, 32], strides = [1, 1]} : vector<4x32xf32> to vector<1x32xf32>
    %248 = vector.broadcast %247 : vector<1x32xf32> to vector<8x32xf32>
    %249 = arith.addf %246, %248 : vector<8x32xf32>
    %250 = arith.negf %249 : vector<8x32xf32>
    %251 = math.exp %250 : vector<8x32xf32>
    %cst_97 = arith.constant 1.000000e+00 : f32
    %252 = vector.broadcast %cst_97 : f32 to vector<8x32xf32>
    %253 = arith.addf %252, %251 : vector<8x32xf32>
    %254 = arith.divf %252, %253 : vector<8x32xf32>
    %255 = arith.mulf %249, %254 : vector<8x32xf32>
    %256 = arith.truncf %255 : vector<8x32xf32> to vector<8x32xbf16>
    %c15 = arith.constant 15 : index
    %c0_98 = arith.constant 0 : index
    %c0_99 = arith.constant 0 : index
    %257 = vector.load %arg7[%c15, %c0_98, %c0_99] : memref<24x32x32xbf16, #tpu.memory_space<vmem>>, vector<1x32x32xbf16>
    %258 = vector.shape_cast %257 : vector<1x32x32xbf16> to vector<32x32xbf16>
    %cst_100 = arith.constant dense<0.000000e+00> : vector<8x32xf32>
    %259 = tpu.matmul %256, %258, %cst_100 {dimension_numbers = #tpu.dot_dimension_numbers<[1], [0], [0], [1], [0, 0, 1, 1], [], []>} : vector<8x32xbf16>, vector<32x32xbf16>, vector<8x32xf32> -> vector<8x32xf32>
    %260 = arith.addf %184, %259 : vector<8x32xf32>
    %261 = vector.extract_strided_slice %186 {offsets = [3, 0], sizes = [1, 32], strides = [1, 1]} : vector<4x32xf32> to vector<1x32xf32>
    %262 = vector.broadcast %261 : vector<1x32xf32> to vector<8x32xf32>
    %263 = arith.addf %260, %262 : vector<8x32xf32>
    %c3_101 = arith.constant 3 : index
    %c0_102 = arith.constant 0 : index
    %c0_103 = arith.constant 0 : index
    %264 = vector.load %arg8[%c3_101, %c0_102, %c0_103] : memref<4x4x32xf32, #tpu.memory_space<vmem>>, vector<1x4x32xf32>
    %265 = vector.shape_cast %264 : vector<1x4x32xf32> to vector<4x32xf32>
    %266 = arith.truncf %263 : vector<8x32xf32> to vector<8x32xbf16>
    %c3_104 = arith.constant 3 : index
    %c0_105 = arith.constant 0 : index
    %c0_106 = arith.constant 0 : index
    %267 = vector.load %arg6[%c3_104, %c0_105, %c0_106] : memref<4x32x64xbf16, #tpu.memory_space<vmem>>, vector<1x32x64xbf16>
    %268 = vector.shape_cast %267 : vector<1x32x64xbf16> to vector<32x64xbf16>
    %cst_107 = arith.constant dense<0.000000e+00> : vector<8x64xf32>
    %269 = tpu.matmul %266, %268, %cst_107 {dimension_numbers = #tpu.dot_dimension_numbers<[1], [0], [0], [1], [0, 0, 1, 1], [], []>} : vector<8x32xbf16>, vector<32x64xbf16>, vector<8x64xf32> -> vector<8x64xf32>
    %270 = vector.extract_strided_slice %269 {offsets = [0, 0], sizes = [8, 32], strides = [1, 1]} : vector<8x64xf32> to vector<8x32xf32>
    %271 = vector.extract_strided_slice %269 {offsets = [0, 32], sizes = [8, 32], strides = [1, 1]} : vector<8x64xf32> to vector<8x32xf32>
    %272 = vector.shape_cast %270 : vector<8x32xf32> to vector<8x1x32xf32>
    %273 = vector.shape_cast %272 : vector<8x1x32xf32> to vector<8x1x32xf32>
    %274 = vector.broadcast %273 : vector<8x1x32xf32> to vector<8x8x32xf32>
    %275 = vector.shape_cast %274 : vector<8x8x32xf32> to vector<64x32xf32>
    %276 = vector.shape_cast %271 : vector<8x32xf32> to vector<1x8x32xf32>
    %277 = vector.shape_cast %276 : vector<1x8x32xf32> to vector<1x1x8x32xf32>
    %278 = vector.shape_cast %277 : vector<1x1x8x32xf32> to vector<1x1x8x32xf32>
    %279 = vector.broadcast %278 : vector<1x1x8x32xf32> to vector<1x8x8x32xf32>
    %280 = vector.shape_cast %279 : vector<1x8x8x32xf32> to vector<64x32xf32>
    %281 = arith.addf %275, %280 : vector<64x32xf32>
    %282 = vector.extract_strided_slice %265 {offsets = [0, 0], sizes = [1, 32], strides = [1, 1]} : vector<4x32xf32> to vector<1x32xf32>
    %283 = vector.broadcast %282 : vector<1x32xf32> to vector<64x32xf32>
    %284 = arith.addf %281, %283 : vector<64x32xf32>
    %c23 = arith.constant 23 : index
    %c0_108 = arith.constant 0 : index
    %c0_109 = arith.constant 0 : index
    %285 = vector.load %arg7[%c23, %c0_108, %c0_109] : memref<24x32x32xbf16, #tpu.memory_space<vmem>>, vector<1x32x32xbf16>
    %286 = vector.shape_cast %285 : vector<1x32x32xbf16> to vector<32x32xbf16>
    %287 = vector.extract_strided_slice %286 {offsets = [0, 0], sizes = [5, 32], strides = [1, 1]} : vector<32x32xbf16> to vector<5x32xbf16>
    %cst_110 = arith.constant dense<0.000000e+00> : vector<64x32xf32>
    %288 = tpu.matmul %19, %287, %cst_110 {dimension_numbers = #tpu.dot_dimension_numbers<[1], [0], [0], [1], [0, 0, 1, 1], [], []>} : vector<64x5xbf16>, vector<5x32xbf16>, vector<64x32xf32> -> vector<64x32xf32>
    %289 = arith.addf %284, %288 : vector<64x32xf32>
    %290 = arith.negf %289 : vector<64x32xf32>
    %291 = math.exp %290 : vector<64x32xf32>
    %cst_111 = arith.constant 1.000000e+00 : f32
    %292 = vector.broadcast %cst_111 : f32 to vector<64x32xf32>
    %293 = arith.addf %292, %291 : vector<64x32xf32>
    %294 = arith.divf %292, %293 : vector<64x32xf32>
    %295 = arith.mulf %289, %294 : vector<64x32xf32>
    %296 = arith.truncf %295 : vector<64x32xf32> to vector<64x32xbf16>
    %c18 = arith.constant 18 : index
    %c0_112 = arith.constant 0 : index
    %c0_113 = arith.constant 0 : index
    %297 = vector.load %arg7[%c18, %c0_112, %c0_113] : memref<24x32x32xbf16, #tpu.memory_space<vmem>>, vector<1x32x32xbf16>
    %298 = vector.shape_cast %297 : vector<1x32x32xbf16> to vector<32x32xbf16>
    %cst_114 = arith.constant dense<0.000000e+00> : vector<64x32xf32>
    %299 = tpu.matmul %296, %298, %cst_114 {dimension_numbers = #tpu.dot_dimension_numbers<[1], [0], [0], [1], [0, 0, 1, 1], [], []>} : vector<64x32xbf16>, vector<32x32xbf16>, vector<64x32xf32> -> vector<64x32xf32>
    %300 = vector.extract_strided_slice %265 {offsets = [1, 0], sizes = [1, 32], strides = [1, 1]} : vector<4x32xf32> to vector<1x32xf32>
    %301 = vector.broadcast %300 : vector<1x32xf32> to vector<64x32xf32>
    %302 = arith.addf %299, %301 : vector<64x32xf32>
    %303 = arith.negf %302 : vector<64x32xf32>
    %304 = math.exp %303 : vector<64x32xf32>
    %cst_115 = arith.constant 1.000000e+00 : f32
    %305 = vector.broadcast %cst_115 : f32 to vector<64x32xf32>
    %306 = arith.addf %305, %304 : vector<64x32xf32>
    %307 = arith.divf %305, %306 : vector<64x32xf32>
    %308 = arith.mulf %302, %307 : vector<64x32xf32>
    %309 = vector.broadcast %3 : vector<64x1xf32> to vector<64x32xf32>
    %310 = arith.mulf %308, %309 : vector<64x32xf32>
    %311 = vector.shape_cast %310 : vector<64x32xf32> to vector<8x8x32xf32>
    %cst_116 = arith.constant dense<0.000000e+00> : vector<8x32xf32>
    %312 = vector.multi_reduction <add>, %311, %cst_116 [1] : vector<8x8x32xf32> to vector<8x32xf32>
    %c19 = arith.constant 19 : index
    %c0_117 = arith.constant 0 : index
    %c0_118 = arith.constant 0 : index
    %313 = vector.load %arg7[%c19, %c0_117, %c0_118] : memref<24x32x32xbf16, #tpu.memory_space<vmem>>, vector<1x32x32xbf16>
    %314 = vector.shape_cast %313 : vector<1x32x32xbf16> to vector<32x32xbf16>
    %cst_119 = arith.constant dense<0.000000e+00> : vector<8x32xf32>
    %315 = tpu.matmul %266, %314, %cst_119 {dimension_numbers = #tpu.dot_dimension_numbers<[1], [0], [0], [1], [0, 0, 1, 1], [], []>} : vector<8x32xbf16>, vector<32x32xbf16>, vector<8x32xf32> -> vector<8x32xf32>
    %316 = arith.truncf %312 : vector<8x32xf32> to vector<8x32xbf16>
    %c20 = arith.constant 20 : index
    %c0_120 = arith.constant 0 : index
    %c0_121 = arith.constant 0 : index
    %317 = vector.load %arg7[%c20, %c0_120, %c0_121] : memref<24x32x32xbf16, #tpu.memory_space<vmem>>, vector<1x32x32xbf16>
    %318 = vector.shape_cast %317 : vector<1x32x32xbf16> to vector<32x32xbf16>
    %cst_122 = arith.constant dense<0.000000e+00> : vector<8x32xf32>
    %319 = tpu.matmul %316, %318, %cst_122 {dimension_numbers = #tpu.dot_dimension_numbers<[1], [0], [0], [1], [0, 0, 1, 1], [], []>} : vector<8x32xbf16>, vector<32x32xbf16>, vector<8x32xf32> -> vector<8x32xf32>
    %320 = arith.addf %315, %319 : vector<8x32xf32>
    %c22 = arith.constant 22 : index
    %c0_123 = arith.constant 0 : index
    %c0_124 = arith.constant 0 : index
    %321 = vector.load %arg7[%c22, %c0_123, %c0_124] : memref<24x32x32xbf16, #tpu.memory_space<vmem>>, vector<1x32x32xbf16>
    %322 = vector.shape_cast %321 : vector<1x32x32xbf16> to vector<32x32xbf16>
    %323 = vector.extract_strided_slice %322 {offsets = [0, 0], sizes = [16, 32], strides = [1, 1]} : vector<32x32xbf16> to vector<16x32xbf16>
    %cst_125 = arith.constant dense<0.000000e+00> : vector<8x32xf32>
    %324 = tpu.matmul %1, %323, %cst_125 {dimension_numbers = #tpu.dot_dimension_numbers<[1], [0], [0], [1], [0, 0, 1, 1], [], []>} : vector<8x16xbf16>, vector<16x32xbf16>, vector<8x32xf32> -> vector<8x32xf32>
    %325 = arith.addf %320, %324 : vector<8x32xf32>
    %326 = vector.extract_strided_slice %265 {offsets = [2, 0], sizes = [1, 32], strides = [1, 1]} : vector<4x32xf32> to vector<1x32xf32>
    %327 = vector.broadcast %326 : vector<1x32xf32> to vector<8x32xf32>
    %328 = arith.addf %325, %327 : vector<8x32xf32>
    %329 = arith.negf %328 : vector<8x32xf32>
    %330 = math.exp %329 : vector<8x32xf32>
    %cst_126 = arith.constant 1.000000e+00 : f32
    %331 = vector.broadcast %cst_126 : f32 to vector<8x32xf32>
    %332 = arith.addf %331, %330 : vector<8x32xf32>
    %333 = arith.divf %331, %332 : vector<8x32xf32>
    %334 = arith.mulf %328, %333 : vector<8x32xf32>
    %335 = arith.truncf %334 : vector<8x32xf32> to vector<8x32xbf16>
    %c21 = arith.constant 21 : index
    %c0_127 = arith.constant 0 : index
    %c0_128 = arith.constant 0 : index
    %336 = vector.load %arg7[%c21, %c0_127, %c0_128] : memref<24x32x32xbf16, #tpu.memory_space<vmem>>, vector<1x32x32xbf16>
    %337 = vector.shape_cast %336 : vector<1x32x32xbf16> to vector<32x32xbf16>
    %cst_129 = arith.constant dense<0.000000e+00> : vector<8x32xf32>
    %338 = tpu.matmul %335, %337, %cst_129 {dimension_numbers = #tpu.dot_dimension_numbers<[1], [0], [0], [1], [0, 0, 1, 1], [], []>} : vector<8x32xbf16>, vector<32x32xbf16>, vector<8x32xf32> -> vector<8x32xf32>
    %339 = arith.addf %263, %338 : vector<8x32xf32>
    %340 = vector.extract_strided_slice %265 {offsets = [3, 0], sizes = [1, 32], strides = [1, 1]} : vector<4x32xf32> to vector<1x32xf32>
    %341 = vector.broadcast %340 : vector<1x32xf32> to vector<8x32xf32>
    %342 = arith.addf %339, %341 : vector<8x32xf32>
    %343 = arith.truncf %342 : vector<8x32xf32> to vector<8x32xbf16>
    %c1_130 = arith.constant 1 : index
    %c0_131 = arith.constant 0 : index
    %c0_132 = arith.constant 0 : index
    %344 = vector.load %arg9[%c1_130, %c0_131, %c0_132] : memref<4x32x32xbf16, #tpu.memory_space<vmem>>, vector<1x32x32xbf16>
    %345 = vector.shape_cast %344 : vector<1x32x32xbf16> to vector<32x32xbf16>
    %cst_133 = arith.constant dense<0.000000e+00> : vector<8x32xf32>
    %346 = tpu.matmul %343, %345, %cst_133 {dimension_numbers = #tpu.dot_dimension_numbers<[1], [0], [0], [1], [0, 0, 1, 1], [], []>} : vector<8x32xbf16>, vector<32x32xbf16>, vector<8x32xf32> -> vector<8x32xf32>
    %c1_134 = arith.constant 1 : index
    %c0_135 = arith.constant 0 : index
    %347 = vector.load %arg10[%c1_134, %c0_135] : memref<6x32xf32, #tpu.memory_space<vmem>>, vector<1x32xf32>
    %348 = vector.broadcast %347 : vector<1x32xf32> to vector<8x32xf32>
    %349 = arith.addf %346, %348 : vector<8x32xf32>
    %350 = arith.negf %349 : vector<8x32xf32>
    %351 = math.exp %350 : vector<8x32xf32>
    %cst_136 = arith.constant 1.000000e+00 : f32
    %352 = vector.broadcast %cst_136 : f32 to vector<8x32xf32>
    %353 = arith.addf %352, %351 : vector<8x32xf32>
    %354 = arith.divf %352, %353 : vector<8x32xf32>
    %355 = arith.mulf %349, %354 : vector<8x32xf32>
    %356 = arith.truncf %355 : vector<8x32xf32> to vector<8x32xbf16>
    %c2_137 = arith.constant 2 : index
    %c0_138 = arith.constant 0 : index
    %c0_139 = arith.constant 0 : index
    %357 = vector.load %arg9[%c2_137, %c0_138, %c0_139] : memref<4x32x32xbf16, #tpu.memory_space<vmem>>, vector<1x32x32xbf16>
    %358 = vector.shape_cast %357 : vector<1x32x32xbf16> to vector<32x32xbf16>
    %cst_140 = arith.constant dense<0.000000e+00> : vector<8x32xf32>
    %359 = tpu.matmul %356, %358, %cst_140 {dimension_numbers = #tpu.dot_dimension_numbers<[1], [0], [0], [1], [0, 0, 1, 1], [], []>} : vector<8x32xbf16>, vector<32x32xbf16>, vector<8x32xf32> -> vector<8x32xf32>
    %c2_141 = arith.constant 2 : index
    %c0_142 = arith.constant 0 : index
    %360 = vector.load %arg10[%c2_141, %c0_142] : memref<6x32xf32, #tpu.memory_space<vmem>>, vector<1x32xf32>
    %361 = vector.broadcast %360 : vector<1x32xf32> to vector<8x32xf32>
    %362 = arith.addf %359, %361 : vector<8x32xf32>
    %c0_143 = arith.constant 0 : index
    %c0_144 = arith.constant 0 : index
    %363 = vector.load %arg5[%c0_143, %c0_144] : memref<8x1xf32, #tpu.memory_space<vmem>>, vector<8x1xf32>
    %364 = vector.broadcast %363 : vector<8x1xf32> to vector<8x32xf32>
    %365 = arith.mulf %362, %364 : vector<8x32xf32>
    %366 = vector.shape_cast %365 : vector<8x32xf32> to vector<1x8x32xf32>
    %cst_145 = arith.constant dense<0.000000e+00> : vector<1x32xf32>
    %367 = vector.multi_reduction <add>, %366, %cst_145 [1] : vector<1x8x32xf32> to vector<1x32xf32>
    %368 = arith.truncf %367 : vector<1x32xf32> to vector<1x32xbf16>
    %c3_146 = arith.constant 3 : index
    %c0_147 = arith.constant 0 : index
    %c0_148 = arith.constant 0 : index
    %369 = vector.load %arg9[%c3_146, %c0_147, %c0_148] : memref<4x32x32xbf16, #tpu.memory_space<vmem>>, vector<1x32x32xbf16>
    %370 = vector.shape_cast %369 : vector<1x32x32xbf16> to vector<32x32xbf16>
    %cst_149 = arith.constant dense<0.000000e+00> : vector<1x32xf32>
    %371 = tpu.matmul %368, %370, %cst_149 {dimension_numbers = #tpu.dot_dimension_numbers<[1], [0], [0], [1], [0, 0, 1, 1], [], []>} : vector<1x32xbf16>, vector<32x32xbf16>, vector<1x32xf32> -> vector<1x32xf32>
    %c3_150 = arith.constant 3 : index
    %c0_151 = arith.constant 0 : index
    %372 = vector.load %arg10[%c3_150, %c0_151] : memref<6x32xf32, #tpu.memory_space<vmem>>, vector<1x32xf32>
    %373 = arith.addf %371, %372 : vector<1x32xf32>
    %374 = arith.negf %373 : vector<1x32xf32>
    %375 = math.exp %374 : vector<1x32xf32>
    %cst_152 = arith.constant 1.000000e+00 : f32
    %376 = vector.broadcast %cst_152 : f32 to vector<1x32xf32>
    %377 = arith.addf %376, %375 : vector<1x32xf32>
    %378 = arith.divf %376, %377 : vector<1x32xf32>
    %379 = arith.mulf %373, %378 : vector<1x32xf32>
    %c4_153 = arith.constant 4 : index
    %c0_154 = arith.constant 0 : index
    %380 = vector.load %arg10[%c4_153, %c0_154] : memref<6x32xf32, #tpu.memory_space<vmem>>, vector<1x32xf32>
    %381 = arith.mulf %379, %380 : vector<1x32xf32>
    %cst_155 = arith.constant dense<0.000000e+00> : vector<1xf32>
    %382 = vector.multi_reduction <add>, %381, %cst_155 [1] : vector<1x32xf32> to vector<1xf32>
    %383 = vector.shape_cast %382 : vector<1xf32> to vector<1x1xf32>
    %c5_156 = arith.constant 5 : index
    %c0_157 = arith.constant 0 : index
    %384 = vector.load %arg10[%c5_156, %c0_157] : memref<6x32xf32, #tpu.memory_space<vmem>>, vector<1x1xf32>
    %385 = arith.addf %383, %384 : vector<1x1xf32>
    %c0_158 = arith.constant 0 : index
    %c0_159 = arith.constant 0 : index
    %c0_160 = arith.constant 0 : index
    %386 = vector.load %arg11[%c0_158, %c0_159, %c0_160] : memref<1x1x1xf32, #tpu.memory_space<vmem>>, vector<1x1x1xf32>
    %387 = vector.shape_cast %386 : vector<1x1x1xf32> to vector<1x1xf32>
    %388 = vector.shape_cast %385 : vector<1x1xf32> to vector<1x1x1xf32>
    tpu.vector_store %arg11[%c0_158, %c0_159, %c0_160], %388 {strides = array<i32>} : memref<1x1x1xf32, #tpu.memory_space<vmem>>, vector<1x1x1xf32>,
    return
  }
  func.func @transform_0(%arg0: i32) -> (i32, i32) {
    %c0_i32 = arith.constant 0 : i32
    %c0_i32_0 = arith.constant 0 : i32
    return %arg0, %c0_i32 : i32, i32
  }
  func.func @transform_1(%arg0: i32) -> (i32, i32) {
    %c0_i32 = arith.constant 0 : i32
    %c0_i32_0 = arith.constant 0 : i32
    return %arg0, %c0_i32 : i32, i32
  }
  func.func @transform_2(%arg0: i32) -> (i32, i32) {
    %c0_i32 = arith.constant 0 : i32
    %c0_i32_0 = arith.constant 0 : i32
    return %arg0, %c0_i32 : i32, i32
  }
  func.func @transform_3(%arg0: i32) -> (i32, i32) {
    %c0_i32 = arith.constant 0 : i32
    %c0_i32_0 = arith.constant 0 : i32
    return %arg0, %c0_i32 : i32, i32
  }
  func.func @transform_4(%arg0: i32) -> (i32, i32) {
    %c0_i32 = arith.constant 0 : i32
    %c0_i32_0 = arith.constant 0 : i32
    return %arg0, %c0_i32 : i32, i32
  }
  func.func @transform_5(%arg0: i32) -> (i32, i32, i32) {
    %c0_i32 = arith.constant 0 : i32
    %c0_i32_0 = arith.constant 0 : i32
    %c0_i32_1 = arith.constant 0 : i32
    %c0_i32_2 = arith.constant 0 : i32
    return %c0_i32, %c0_i32_0, %c0_i32_1 : i32, i32, i32
  }
  func.func @transform_6(%arg0: i32) -> (i32, i32, i32) {
    %c0_i32 = arith.constant 0 : i32
    %c0_i32_0 = arith.constant 0 : i32
    %c0_i32_1 = arith.constant 0 : i32
    %c0_i32_2 = arith.constant 0 : i32
    return %c0_i32, %c0_i32_0, %c0_i32_1 : i32, i32, i32
  }
  func.func @transform_7(%arg0: i32) -> (i32, i32, i32) {
    %c0_i32 = arith.constant 0 : i32
    %c0_i32_0 = arith.constant 0 : i32
    %c0_i32_1 = arith.constant 0 : i32
    %c0_i32_2 = arith.constant 0 : i32
    return %c0_i32, %c0_i32_0, %c0_i32_1 : i32, i32, i32
  }
  func.func @transform_8(%arg0: i32) -> (i32, i32, i32) {
    %c0_i32 = arith.constant 0 : i32
    %c0_i32_0 = arith.constant 0 : i32
    %c0_i32_1 = arith.constant 0 : i32
    %c0_i32_2 = arith.constant 0 : i32
    return %c0_i32, %c0_i32_0, %c0_i32_1 : i32, i32, i32
  }
  func.func @transform_9(%arg0: i32) -> (i32, i32) {
    %c0_i32 = arith.constant 0 : i32
    %c0_i32_0 = arith.constant 0 : i32
    %c0_i32_1 = arith.constant 0 : i32
    return %c0_i32, %c0_i32_0 : i32, i32
  }
  func.func @transform_10(%arg0: i32) -> (i32, i32, i32) {
    %c0_i32 = arith.constant 0 : i32
    %c0_i32_0 = arith.constant 0 : i32
    %c0_i32_1 = arith.constant 0 : i32
    return %arg0, %c0_i32, %c0_i32_0 : i32, i32, i32
  }
}

module attributes {stable_mosaic.version = 11 : i64} {
  func.func @egnn_fused_kernel(%arg0: i32, %arg1: memref<8x16xf32, #tpu.memory_space<vmem>>, %arg2: memref<8x3xf32, #tpu.memory_space<vmem>>, %arg3: memref<64x4xf32, #tpu.memory_space<vmem>>, %arg4: memref<64x1xf32, #tpu.memory_space<vmem>>, %arg5: memref<8x1xf32, #tpu.memory_space<vmem>>, %arg6: memref<4x32x64xbf16, #tpu.memory_space<vmem>>, %arg7: memref<24x32x32xbf16, #tpu.memory_space<vmem>>, %arg8: memref<4x4x32xf32, #tpu.memory_space<vmem>>, %arg9: memref<4x32x32xbf16, #tpu.memory_space<vmem>>, %arg10: memref<6x32xf32, #tpu.memory_space<vmem>>, %arg11: memref<1x1x1xf32, #tpu.memory_space<vmem>>) attributes {dimension_semantics = [#tpu.dimension_semantics<parallel>], iteration_bounds = array<i64: 2>, scalar_prefetch = 0 : i64, scratch_operands = 0 : i64, tpu.core_type = #tpu.core_type<tc>, window_params = [{transform_indices = @transform_0, window_bounds = array<i64: 8, 16>}, {transform_indices = @transform_1, window_bounds = array<i64: 8, 3>}, {transform_indices = @transform_2, window_bounds = array<i64: 64, 4>}, {transform_indices = @transform_3, window_bounds = array<i64: 64, 1>}, {transform_indices = @transform_4, window_bounds = array<i64: 8, 1>}, {pipeline_mode = #tpu.pipeline_mode<synchronous>, transform_indices = @transform_5, window_bounds = array<i64: 4, 32, 64>}, {pipeline_mode = #tpu.pipeline_mode<synchronous>, transform_indices = @transform_6, window_bounds = array<i64: 24, 32, 32>}, {pipeline_mode = #tpu.pipeline_mode<synchronous>, transform_indices = @transform_7, window_bounds = array<i64: 4, 4, 32>}, {pipeline_mode = #tpu.pipeline_mode<synchronous>, transform_indices = @transform_8, window_bounds = array<i64: 4, 32, 32>}, {pipeline_mode = #tpu.pipeline_mode<synchronous>, transform_indices = @transform_9, window_bounds = array<i64: 6, 32>}, {transform_indices = @transform_10, window_bounds = array<i64: 1, 1, 1>}]} {
    %c0 = arith.constant 0 : index
    %c0_0 = arith.constant 0 : index
    %0 = vector.load %arg1[%c0, %c0_0] : memref<8x16xf32, #tpu.memory_space<vmem>>, vector<8x16xf32>
    %1 = arith.truncf %0 : vector<8x16xf32> to vector<8x16xbf16>
    %c0_1 = arith.constant 0 : index
    %c0_2 = arith.constant 0 : index
    %2 = vector.load %arg2[%c0_1, %c0_2] : memref<8x3xf32, #tpu.memory_space<vmem>>, vector<8x3xf32>
    %c0_3 = arith.constant 0 : index
    %c0_4 = arith.constant 0 : index
    %3 = vector.load %arg4[%c0_3, %c0_4] : memref<64x1xf32, #tpu.memory_space<vmem>>, vector<64x1xf32>
    %4 = vector.shape_cast %2 : vector<8x3xf32> to vector<8x1x3xf32>
    %5 = vector.shape_cast %4 : vector<8x1x3xf32> to vector<8x1x3xf32>
    %6 = vector.broadcast %5 : vector<8x1x3xf32> to vector<8x8x3xf32>
    %7 = vector.shape_cast %6 : vector<8x8x3xf32> to vector<64x3xf32>
    %8 = vector.shape_cast %2 : vector<8x3xf32> to vector<1x8x3xf32>
    %9 = vector.shape_cast %8 : vector<1x8x3xf32> to vector<1x1x8x3xf32>
    %10 = vector.shape_cast %9 : vector<1x1x8x3xf32> to vector<1x1x8x3xf32>
    %11 = vector.broadcast %10 : vector<1x1x8x3xf32> to vector<1x8x8x3xf32>
    %12 = vector.shape_cast %11 : vector<1x8x8x3xf32> to vector<64x3xf32>
    %13 = arith.subf %7, %12 : vector<64x3xf32>
    %14 = arith.mulf %13, %13 : vector<64x3xf32>
    %cst = arith.constant dense<0.000000e+00> : vector<64xf32>
    %15 = vector.multi_reduction <add>, %14, %cst [1] : vector<64x3xf32> to vector<64xf32>
    %16 = vector.shape_cast %15 : vector<64xf32> to vector<64x1xf32>
    %c0_5 = arith.constant 0 : index
    %c0_6 = arith.constant 0 : index
    %17 = vector.load %arg3[%c0_5, %c0_6] : memref<64x4xf32, #tpu.memory_space<vmem>>, vector<64x4xf32>
    %18 = tpu.concatenate %16, %17 in 1 : vector<64x1xf32>, vector<64x4xf32> -> vector<64x5xf32>
    %19 = arith.truncf %18 : vector<64x5xf32> to vector<64x5xbf16>
    %c0_7 = arith.constant 0 : index
    %c0_8 = arith.constant 0 : index
    %c0_9 = arith.constant 0 : index
    %20 = vector.load %arg9[%c0_7, %c0_8, %c0_9] : memref<4x32x32xbf16, #tpu.memory_space<vmem>>, vector<1x32x32xbf16>
    %21 = vector.shape_cast %20 : vector<1x32x32xbf16> to vector<32x32xbf16>
    %22 = vector.extract_strided_slice %21 {offsets = [0, 0], sizes = [16, 32], strides = [1, 1]} : vector<32x32xbf16> to vector<16x32xbf16>
    %cst_10 = arith.constant dense<0.000000e+00> : vector<8x32xf32>
    %23 = tpu.matmul %1, %22, %cst_10 {dimension_numbers = #tpu.dot_dimension_numbers<[1], [0], [0], [1], [0, 0, 1, 1], [], []>} : vector<8x16xbf16>, vector<16x32xbf16>, vector<8x32xf32> -> vector<8x32xf32>
    %c0_11 = arith.constant 0 : index
    %c0_12 = arith.constant 0 : index
    %24 = vector.load %arg10[%c0_11, %c0_12] : memref<6x32xf32, #tpu.memory_space<vmem>>, vector<1x32xf32>
    %25 = vector.broadcast %24 : vector<1x32xf32> to vector<8x32xf32>
    %26 = arith.addf %23, %25 : vector<8x32xf32>
    %c0_13 = arith.constant 0 : index
    %c0_14 = arith.constant 0 : index
    %c0_15 = arith.constant 0 : index
    %27 = vector.load %arg8[%c0_13, %c0_14, %c0_15] : memref<4x4x32xf32, #tpu.memory_space<vmem>>, vector<1x4x32xf32>
    %28 = vector.shape_cast %27 : vector<1x4x32xf32> to vector<4x32xf32>
    %29 = arith.truncf %26 : vector<8x32xf32> to vector<8x32xbf16>
    %c0_16 = arith.constant 0 : index
    %c0_17 = arith.constant 0 : index
    %c0_18 = arith.constant 0 : index
    %30 = vector.load %arg6[%c0_16, %c0_17, %c0_18] : memref<4x32x64xbf16, #tpu.memory_space<vmem>>, vector<1x32x64xbf16>
    %31 = vector.shape_cast %30 : vector<1x32x64xbf16> to vector<32x64xbf16>
    %cst_19 = arith.constant dense<0.000000e+00> : vector<8x64xf32>
    %32 = tpu.matmul %29, %31, %cst_19 {dimension_numbers = #tpu.dot_dimension_numbers<[1], [0], [0], [1], [0, 0, 1, 1], [], []>} : vector<8x32xbf16>, vector<32x64xbf16>, vector<8x64xf32> -> vector<8x64xf32>
    %33 = vector.extract_strided_slice %32 {offsets = [0, 0], sizes = [8, 32], strides = [1, 1]} : vector<8x64xf32> to vector<8x32xf32>
    %34 = vector.extract_strided_slice %32 {offsets = [0, 32], sizes = [8, 32], strides = [1, 1]} : vector<8x64xf32> to vector<8x32xf32>
    %35 = vector.shape_cast %33 : vector<8x32xf32> to vector<8x1x32xf32>
    %36 = vector.shape_cast %35 : vector<8x1x32xf32> to vector<8x1x32xf32>
    %37 = vector.broadcast %36 : vector<8x1x32xf32> to vector<8x8x32xf32>
    %38 = vector.shape_cast %37 : vector<8x8x32xf32> to vector<64x32xf32>
    %39 = vector.shape_cast %34 : vector<8x32xf32> to vector<1x8x32xf32>
    %40 = vector.shape_cast %39 : vector<1x8x32xf32> to vector<1x1x8x32xf32>
    %41 = vector.shape_cast %40 : vector<1x1x8x32xf32> to vector<1x1x8x32xf32>
    %42 = vector.broadcast %41 : vector<1x1x8x32xf32> to vector<1x8x8x32xf32>
    %43 = vector.shape_cast %42 : vector<1x8x8x32xf32> to vector<64x32xf32>
    %44 = arith.addf %38, %43 : vector<64x32xf32>
    %45 = vector.extract_strided_slice %28 {offsets = [0, 0], sizes = [1, 32], strides = [1, 1]} : vector<4x32xf32> to vector<1x32xf32>
    %46 = vector.broadcast %45 : vector<1x32xf32> to vector<64x32xf32>
    %47 = arith.addf %44, %46 : vector<64x32xf32>
    %c5 = arith.constant 5 : index
    %c0_20 = arith.constant 0 : index
    %c0_21 = arith.constant 0 : index
    %48 = vector.load %arg7[%c5, %c0_20, %c0_21] : memref<24x32x32xbf16, #tpu.memory_space<vmem>>, vector<1x32x32xbf16>
    %49 = vector.shape_cast %48 : vector<1x32x32xbf16> to vector<32x32xbf16>
    %50 = vector.extract_strided_slice %49 {offsets = [0, 0], sizes = [5, 32], strides = [1, 1]} : vector<32x32xbf16> to vector<5x32xbf16>
    %cst_22 = arith.constant dense<0.000000e+00> : vector<64x32xf32>
    %51 = tpu.matmul %19, %50, %cst_22 {dimension_numbers = #tpu.dot_dimension_numbers<[1], [0], [0], [1], [0, 0, 1, 1], [], []>} : vector<64x5xbf16>, vector<5x32xbf16>, vector<64x32xf32> -> vector<64x32xf32>
    %52 = arith.addf %47, %51 : vector<64x32xf32>
    %53 = arith.negf %52 : vector<64x32xf32>
    %54 = math.exp %53 : vector<64x32xf32>
    %cst_23 = arith.constant 1.000000e+00 : f32
    %55 = vector.broadcast %cst_23 : f32 to vector<64x32xf32>
    %56 = arith.addf %55, %54 : vector<64x32xf32>
    %57 = arith.divf %55, %56 : vector<64x32xf32>
    %58 = arith.mulf %52, %57 : vector<64x32xf32>
    %59 = arith.truncf %58 : vector<64x32xf32> to vector<64x32xbf16>
    %c0_24 = arith.constant 0 : index
    %c0_25 = arith.constant 0 : index
    %c0_26 = arith.constant 0 : index
    %60 = vector.load %arg7[%c0_24, %c0_25, %c0_26] : memref<24x32x32xbf16, #tpu.memory_space<vmem>>, vector<1x32x32xbf16>
    %61 = vector.shape_cast %60 : vector<1x32x32xbf16> to vector<32x32xbf16>
    %cst_27 = arith.constant dense<0.000000e+00> : vector<64x32xf32>
    %62 = tpu.matmul %59, %61, %cst_27 {dimension_numbers = #tpu.dot_dimension_numbers<[1], [0], [0], [1], [0, 0, 1, 1], [], []>} : vector<64x32xbf16>, vector<32x32xbf16>, vector<64x32xf32> -> vector<64x32xf32>
    %63 = vector.extract_strided_slice %28 {offsets = [1, 0], sizes = [1, 32], strides = [1, 1]} : vector<4x32xf32> to vector<1x32xf32>
    %64 = vector.broadcast %63 : vector<1x32xf32> to vector<64x32xf32>
    %65 = arith.addf %62, %64 : vector<64x32xf32>
    %66 = arith.negf %65 : vector<64x32xf32>
    %67 = math.exp %66 : vector<64x32xf32>
    %cst_28 = arith.constant 1.000000e+00 : f32
    %68 = vector.broadcast %cst_28 : f32 to vector<64x32xf32>
    %69 = arith.addf %68, %67 : vector<64x32xf32>
    %70 = arith.divf %68, %69 : vector<64x32xf32>
    %71 = arith.mulf %65, %70 : vector<64x32xf32>
    %72 = vector.broadcast %3 : vector<64x1xf32> to vector<64x32xf32>
    %73 = arith.mulf %71, %72 : vector<64x32xf32>
    %74 = vector.shape_cast %73 : vector<64x32xf32> to vector<8x8x32xf32>
    %cst_29 = arith.constant dense<0.000000e+00> : vector<8x32xf32>
    %75 = vector.multi_reduction <add>, %74, %cst_29 [1] : vector<8x8x32xf32> to vector<8x32xf32>
    %c1 = arith.constant 1 : index
    %c0_30 = arith.constant 0 : index
    %c0_31 = arith.constant 0 : index
    %76 = vector.load %arg7[%c1, %c0_30, %c0_31] : memref<24x32x32xbf16, #tpu.memory_space<vmem>>, vector<1x32x32xbf16>
    %77 = vector.shape_cast %76 : vector<1x32x32xbf16> to vector<32x32xbf16>
    %cst_32 = arith.constant dense<0.000000e+00> : vector<8x32xf32>
    %78 = tpu.matmul %29, %77, %cst_32 {dimension_numbers = #tpu.dot_dimension_numbers<[1], [0], [0], [1], [0, 0, 1, 1], [], []>} : vector<8x32xbf16>, vector<32x32xbf16>, vector<8x32xf32> -> vector<8x32xf32>
    %79 = arith.truncf %75 : vector<8x32xf32> to vector<8x32xbf16>
    %c2 = arith.constant 2 : index
    %c0_33 = arith.constant 0 : index
    %c0_34 = arith.constant 0 : index
    %80 = vector.load %arg7[%c2, %c0_33, %c0_34] : memref<24x32x32xbf16, #tpu.memory_space<vmem>>, vector<1x32x32xbf16>
    %81 = vector.shape_cast %80 : vector<1x32x32xbf16> to vector<32x32xbf16>
    %cst_35 = arith.constant dense<0.000000e+00> : vector<8x32xf32>
    %82 = tpu.matmul %79, %81, %cst_35 {dimension_numbers = #tpu.dot_dimension_numbers<[1], [0], [0], [1], [0, 0, 1, 1], [], []>} : vector<8x32xbf16>, vector<32x32xbf16>, vector<8x32xf32> -> vector<8x32xf32>
    %83 = arith.addf %78, %82 : vector<8x32xf32>
    %c4 = arith.constant 4 : index
    %c0_36 = arith.constant 0 : index
    %c0_37 = arith.constant 0 : index
    %84 = vector.load %arg7[%c4, %c0_36, %c0_37] : memref<24x32x32xbf16, #tpu.memory_space<vmem>>, vector<1x32x32xbf16>
    %85 = vector.shape_cast %84 : vector<1x32x32xbf16> to vector<32x32xbf16>
    %86 = vector.extract_strided_slice %85 {offsets = [0, 0], sizes = [16, 32], strides = [1, 1]} : vector<32x32xbf16> to vector<16x32xbf16>
    %cst_38 = arith.constant dense<0.000000e+00> : vector<8x32xf32>
    %87 = tpu.matmul %1, %86, %cst_38 {dimension_numbers = #tpu.dot_dimension_numbers<[1], [0], [0], [1], [0, 0, 1, 1], [], []>} : vector<8x16xbf16>, vector<16x32xbf16>, vector<8x32xf32> -> vector<8x32xf32>
    %88 = arith.addf %83, %87 : vector<8x32xf32>
    %89 = vector.extract_strided_slice %28 {offsets = [2, 0], sizes = [1, 32], strides = [1, 1]} : vector<4x32xf32> to vector<1x32xf32>
    %90 = vector.broadcast %89 : vector<1x32xf32> to vector<8x32xf32>
    %91 = arith.addf %88, %90 : vector<8x32xf32>
    %92 = arith.negf %91 : vector<8x32xf32>
    %93 = math.exp %92 : vector<8x32xf32>
    %cst_39 = arith.constant 1.000000e+00 : f32
    %94 = vector.broadcast %cst_39 : f32 to vector<8x32xf32>
    %95 = arith.addf %94, %93 : vector<8x32xf32>
    %96 = arith.divf %94, %95 : vector<8x32xf32>
    %97 = arith.mulf %91, %96 : vector<8x32xf32>
    %98 = arith.truncf %97 : vector<8x32xf32> to vector<8x32xbf16>
    %c3 = arith.constant 3 : index
    %c0_40 = arith.constant 0 : index
    %c0_41 = arith.constant 0 : index
    %99 = vector.load %arg7[%c3, %c0_40, %c0_41] : memref<24x32x32xbf16, #tpu.memory_space<vmem>>, vector<1x32x32xbf16>
    %100 = vector.shape_cast %99 : vector<1x32x32xbf16> to vector<32x32xbf16>
    %cst_42 = arith.constant dense<0.000000e+00> : vector<8x32xf32>
    %101 = tpu.matmul %98, %100, %cst_42 {dimension_numbers = #tpu.dot_dimension_numbers<[1], [0], [0], [1], [0, 0, 1, 1], [], []>} : vector<8x32xbf16>, vector<32x32xbf16>, vector<8x32xf32> -> vector<8x32xf32>
    %102 = arith.addf %26, %101 : vector<8x32xf32>
    %103 = vector.extract_strided_slice %28 {offsets = [3, 0], sizes = [1, 32], strides = [1, 1]} : vector<4x32xf32> to vector<1x32xf32>
    %104 = vector.broadcast %103 : vector<1x32xf32> to vector<8x32xf32>
    %105 = arith.addf %102, %104 : vector<8x32xf32>
    %c1_43 = arith.constant 1 : index
    %c0_44 = arith.constant 0 : index
    %c0_45 = arith.constant 0 : index
    %106 = vector.load %arg8[%c1_43, %c0_44, %c0_45] : memref<4x4x32xf32, #tpu.memory_space<vmem>>, vector<1x4x32xf32>
    %107 = vector.shape_cast %106 : vector<1x4x32xf32> to vector<4x32xf32>
    %108 = arith.truncf %105 : vector<8x32xf32> to vector<8x32xbf16>
    %c1_46 = arith.constant 1 : index
    %c0_47 = arith.constant 0 : index
    %c0_48 = arith.constant 0 : index
    %109 = vector.load %arg6[%c1_46, %c0_47, %c0_48] : memref<4x32x64xbf16, #tpu.memory_space<vmem>>, vector<1x32x64xbf16>
    %110 = vector.shape_cast %109 : vector<1x32x64xbf16> to vector<32x64xbf16>
    %cst_49 = arith.constant dense<0.000000e+00> : vector<8x64xf32>
    %111 = tpu.matmul %108, %110, %cst_49 {dimension_numbers = #tpu.dot_dimension_numbers<[1], [0], [0], [1], [0, 0, 1, 1], [], []>} : vector<8x32xbf16>, vector<32x64xbf16>, vector<8x64xf32> -> vector<8x64xf32>
    %112 = vector.extract_strided_slice %111 {offsets = [0, 0], sizes = [8, 32], strides = [1, 1]} : vector<8x64xf32> to vector<8x32xf32>
    %113 = vector.extract_strided_slice %111 {offsets = [0, 32], sizes = [8, 32], strides = [1, 1]} : vector<8x64xf32> to vector<8x32xf32>
    %114 = vector.shape_cast %112 : vector<8x32xf32> to vector<8x1x32xf32>
    %115 = vector.shape_cast %114 : vector<8x1x32xf32> to vector<8x1x32xf32>
    %116 = vector.broadcast %115 : vector<8x1x32xf32> to vector<8x8x32xf32>
    %117 = vector.shape_cast %116 : vector<8x8x32xf32> to vector<64x32xf32>
    %118 = vector.shape_cast %113 : vector<8x32xf32> to vector<1x8x32xf32>
    %119 = vector.shape_cast %118 : vector<1x8x32xf32> to vector<1x1x8x32xf32>
    %120 = vector.shape_cast %119 : vector<1x1x8x32xf32> to vector<1x1x8x32xf32>
    %121 = vector.broadcast %120 : vector<1x1x8x32xf32> to vector<1x8x8x32xf32>
    %122 = vector.shape_cast %121 : vector<1x8x8x32xf32> to vector<64x32xf32>
    %123 = arith.addf %117, %122 : vector<64x32xf32>
    %124 = vector.extract_strided_slice %107 {offsets = [0, 0], sizes = [1, 32], strides = [1, 1]} : vector<4x32xf32> to vector<1x32xf32>
    %125 = vector.broadcast %124 : vector<1x32xf32> to vector<64x32xf32>
    %126 = arith.addf %123, %125 : vector<64x32xf32>
    %c11 = arith.constant 11 : index
    %c0_50 = arith.constant 0 : index
    %c0_51 = arith.constant 0 : index
    %127 = vector.load %arg7[%c11, %c0_50, %c0_51] : memref<24x32x32xbf16, #tpu.memory_space<vmem>>, vector<1x32x32xbf16>
    %128 = vector.shape_cast %127 : vector<1x32x32xbf16> to vector<32x32xbf16>
    %129 = vector.extract_strided_slice %128 {offsets = [0, 0], sizes = [5, 32], strides = [1, 1]} : vector<32x32xbf16> to vector<5x32xbf16>
    %cst_52 = arith.constant dense<0.000000e+00> : vector<64x32xf32>
    %130 = tpu.matmul %19, %129, %cst_52 {dimension_numbers = #tpu.dot_dimension_numbers<[1], [0], [0], [1], [0, 0, 1, 1], [], []>} : vector<64x5xbf16>, vector<5x32xbf16>, vector<64x32xf32> -> vector<64x32xf32>
    %131 = arith.addf %126, %130 : vector<64x32xf32>
    %132 = arith.negf %131 : vector<64x32xf32>
    %133 = math.exp %132 : vector<64x32xf32>
    %cst_53 = arith.constant 1.000000e+00 : f32
    %134 = vector.broadcast %cst_53 : f32 to vector<64x32xf32>
    %135 = arith.addf %134, %133 : vector<64x32xf32>
    %136 = arith.divf %134, %135 : vector<64x32xf32>
    %137 = arith.mulf %131, %136 : vector<64x32xf32>
    %138 = arith.truncf %137 : vector<64x32xf32> to vector<64x32xbf16>
    %c6 = arith.constant 6 : index
    %c0_54 = arith.constant 0 : index
    %c0_55 = arith.constant 0 : index
    %139 = vector.load %arg7[%c6, %c0_54, %c0_55] : memref<24x32x32xbf16, #tpu.memory_space<vmem>>, vector<1x32x32xbf16>
    %140 = vector.shape_cast %139 : vector<1x32x32xbf16> to vector<32x32xbf16>
    %cst_56 = arith.constant dense<0.000000e+00> : vector<64x32xf32>
    %141 = tpu.matmul %138, %140, %cst_56 {dimension_numbers = #tpu.dot_dimension_numbers<[1], [0], [0], [1], [0, 0, 1, 1], [], []>} : vector<64x32xbf16>, vector<32x32xbf16>, vector<64x32xf32> -> vector<64x32xf32>
    %142 = vector.extract_strided_slice %107 {offsets = [1, 0], sizes = [1, 32], strides = [1, 1]} : vector<4x32xf32> to vector<1x32xf32>
    %143 = vector.broadcast %142 : vector<1x32xf32> to vector<64x32xf32>
    %144 = arith.addf %141, %143 : vector<64x32xf32>
    %145 = arith.negf %144 : vector<64x32xf32>
    %146 = math.exp %145 : vector<64x32xf32>
    %cst_57 = arith.constant 1.000000e+00 : f32
    %147 = vector.broadcast %cst_57 : f32 to vector<64x32xf32>
    %148 = arith.addf %147, %146 : vector<64x32xf32>
    %149 = arith.divf %147, %148 : vector<64x32xf32>
    %150 = arith.mulf %144, %149 : vector<64x32xf32>
    %151 = vector.broadcast %3 : vector<64x1xf32> to vector<64x32xf32>
    %152 = arith.mulf %150, %151 : vector<64x32xf32>
    %153 = vector.shape_cast %152 : vector<64x32xf32> to vector<8x8x32xf32>
    %cst_58 = arith.constant dense<0.000000e+00> : vector<8x32xf32>
    %154 = vector.multi_reduction <add>, %153, %cst_58 [1] : vector<8x8x32xf32> to vector<8x32xf32>
    %c7 = arith.constant 7 : index
    %c0_59 = arith.constant 0 : index
    %c0_60 = arith.constant 0 : index
    %155 = vector.load %arg7[%c7, %c0_59, %c0_60] : memref<24x32x32xbf16, #tpu.memory_space<vmem>>, vector<1x32x32xbf16>
    %156 = vector.shape_cast %155 : vector<1x32x32xbf16> to vector<32x32xbf16>
    %cst_61 = arith.constant dense<0.000000e+00> : vector<8x32xf32>
    %157 = tpu.matmul %108, %156, %cst_61 {dimension_numbers = #tpu.dot_dimension_numbers<[1], [0], [0], [1], [0, 0, 1, 1], [], []>} : vector<8x32xbf16>, vector<32x32xbf16>, vector<8x32xf32> -> vector<8x32xf32>
    %158 = arith.truncf %154 : vector<8x32xf32> to vector<8x32xbf16>
    %c8 = arith.constant 8 : index
    %c0_62 = arith.constant 0 : index
    %c0_63 = arith.constant 0 : index
    %159 = vector.load %arg7[%c8, %c0_62, %c0_63] : memref<24x32x32xbf16, #tpu.memory_space<vmem>>, vector<1x32x32xbf16>
    %160 = vector.shape_cast %159 : vector<1x32x32xbf16> to vector<32x32xbf16>
    %cst_64 = arith.constant dense<0.000000e+00> : vector<8x32xf32>
    %161 = tpu.matmul %158, %160, %cst_64 {dimension_numbers = #tpu.dot_dimension_numbers<[1], [0], [0], [1], [0, 0, 1, 1], [], []>} : vector<8x32xbf16>, vector<32x32xbf16>, vector<8x32xf32> -> vector<8x32xf32>
    %162 = arith.addf %157, %161 : vector<8x32xf32>
    %c10 = arith.constant 10 : index
    %c0_65 = arith.constant 0 : index
    %c0_66 = arith.constant 0 : index
    %163 = vector.load %arg7[%c10, %c0_65, %c0_66] : memref<24x32x32xbf16, #tpu.memory_space<vmem>>, vector<1x32x32xbf16>
    %164 = vector.shape_cast %163 : vector<1x32x32xbf16> to vector<32x32xbf16>
    %165 = vector.extract_strided_slice %164 {offsets = [0, 0], sizes = [16, 32], strides = [1, 1]} : vector<32x32xbf16> to vector<16x32xbf16>
    %cst_67 = arith.constant dense<0.000000e+00> : vector<8x32xf32>
    %166 = tpu.matmul %1, %165, %cst_67 {dimension_numbers = #tpu.dot_dimension_numbers<[1], [0], [0], [1], [0, 0, 1, 1], [], []>} : vector<8x16xbf16>, vector<16x32xbf16>, vector<8x32xf32> -> vector<8x32xf32>
    %167 = arith.addf %162, %166 : vector<8x32xf32>
    %168 = vector.extract_strided_slice %107 {offsets = [2, 0], sizes = [1, 32], strides = [1, 1]} : vector<4x32xf32> to vector<1x32xf32>
    %169 = vector.broadcast %168 : vector<1x32xf32> to vector<8x32xf32>
    %170 = arith.addf %167, %169 : vector<8x32xf32>
    %171 = arith.negf %170 : vector<8x32xf32>
    %172 = math.exp %171 : vector<8x32xf32>
    %cst_68 = arith.constant 1.000000e+00 : f32
    %173 = vector.broadcast %cst_68 : f32 to vector<8x32xf32>
    %174 = arith.addf %173, %172 : vector<8x32xf32>
    %175 = arith.divf %173, %174 : vector<8x32xf32>
    %176 = arith.mulf %170, %175 : vector<8x32xf32>
    %177 = arith.truncf %176 : vector<8x32xf32> to vector<8x32xbf16>
    %c9 = arith.constant 9 : index
    %c0_69 = arith.constant 0 : index
    %c0_70 = arith.constant 0 : index
    %178 = vector.load %arg7[%c9, %c0_69, %c0_70] : memref<24x32x32xbf16, #tpu.memory_space<vmem>>, vector<1x32x32xbf16>
    %179 = vector.shape_cast %178 : vector<1x32x32xbf16> to vector<32x32xbf16>
    %cst_71 = arith.constant dense<0.000000e+00> : vector<8x32xf32>
    %180 = tpu.matmul %177, %179, %cst_71 {dimension_numbers = #tpu.dot_dimension_numbers<[1], [0], [0], [1], [0, 0, 1, 1], [], []>} : vector<8x32xbf16>, vector<32x32xbf16>, vector<8x32xf32> -> vector<8x32xf32>
    %181 = arith.addf %105, %180 : vector<8x32xf32>
    %182 = vector.extract_strided_slice %107 {offsets = [3, 0], sizes = [1, 32], strides = [1, 1]} : vector<4x32xf32> to vector<1x32xf32>
    %183 = vector.broadcast %182 : vector<1x32xf32> to vector<8x32xf32>
    %184 = arith.addf %181, %183 : vector<8x32xf32>
    %c2_72 = arith.constant 2 : index
    %c0_73 = arith.constant 0 : index
    %c0_74 = arith.constant 0 : index
    %185 = vector.load %arg8[%c2_72, %c0_73, %c0_74] : memref<4x4x32xf32, #tpu.memory_space<vmem>>, vector<1x4x32xf32>
    %186 = vector.shape_cast %185 : vector<1x4x32xf32> to vector<4x32xf32>
    %187 = arith.truncf %184 : vector<8x32xf32> to vector<8x32xbf16>
    %c2_75 = arith.constant 2 : index
    %c0_76 = arith.constant 0 : index
    %c0_77 = arith.constant 0 : index
    %188 = vector.load %arg6[%c2_75, %c0_76, %c0_77] : memref<4x32x64xbf16, #tpu.memory_space<vmem>>, vector<1x32x64xbf16>
    %189 = vector.shape_cast %188 : vector<1x32x64xbf16> to vector<32x64xbf16>
    %cst_78 = arith.constant dense<0.000000e+00> : vector<8x64xf32>
    %190 = tpu.matmul %187, %189, %cst_78 {dimension_numbers = #tpu.dot_dimension_numbers<[1], [0], [0], [1], [0, 0, 1, 1], [], []>} : vector<8x32xbf16>, vector<32x64xbf16>, vector<8x64xf32> -> vector<8x64xf32>
    %191 = vector.extract_strided_slice %190 {offsets = [0, 0], sizes = [8, 32], strides = [1, 1]} : vector<8x64xf32> to vector<8x32xf32>
    %192 = vector.extract_strided_slice %190 {offsets = [0, 32], sizes = [8, 32], strides = [1, 1]} : vector<8x64xf32> to vector<8x32xf32>
    %193 = vector.shape_cast %191 : vector<8x32xf32> to vector<8x1x32xf32>
    %194 = vector.shape_cast %193 : vector<8x1x32xf32> to vector<8x1x32xf32>
    %195 = vector.broadcast %194 : vector<8x1x32xf32> to vector<8x8x32xf32>
    %196 = vector.shape_cast %195 : vector<8x8x32xf32> to vector<64x32xf32>
    %197 = vector.shape_cast %192 : vector<8x32xf32> to vector<1x8x32xf32>
    %198 = vector.shape_cast %197 : vector<1x8x32xf32> to vector<1x1x8x32xf32>
    %199 = vector.shape_cast %198 : vector<1x1x8x32xf32> to vector<1x1x8x32xf32>
    %200 = vector.broadcast %199 : vector<1x1x8x32xf32> to vector<1x8x8x32xf32>
    %201 = vector.shape_cast %200 : vector<1x8x8x32xf32> to vector<64x32xf32>
    %202 = arith.addf %196, %201 : vector<64x32xf32>
    %203 = vector.extract_strided_slice %186 {offsets = [0, 0], sizes = [1, 32], strides = [1, 1]} : vector<4x32xf32> to vector<1x32xf32>
    %204 = vector.broadcast %203 : vector<1x32xf32> to vector<64x32xf32>
    %205 = arith.addf %202, %204 : vector<64x32xf32>
    %c17 = arith.constant 17 : index
    %c0_79 = arith.constant 0 : index
    %c0_80 = arith.constant 0 : index
    %206 = vector.load %arg7[%c17, %c0_79, %c0_80] : memref<24x32x32xbf16, #tpu.memory_space<vmem>>, vector<1x32x32xbf16>
    %207 = vector.shape_cast %206 : vector<1x32x32xbf16> to vector<32x32xbf16>
    %208 = vector.extract_strided_slice %207 {offsets = [0, 0], sizes = [5, 32], strides = [1, 1]} : vector<32x32xbf16> to vector<5x32xbf16>
    %cst_81 = arith.constant dense<0.000000e+00> : vector<64x32xf32>
    %209 = tpu.matmul %19, %208, %cst_81 {dimension_numbers = #tpu.dot_dimension_numbers<[1], [0], [0], [1], [0, 0, 1, 1], [], []>} : vector<64x5xbf16>, vector<5x32xbf16>, vector<64x32xf32> -> vector<64x32xf32>
    %210 = arith.addf %205, %209 : vector<64x32xf32>
    %211 = arith.negf %210 : vector<64x32xf32>
    %212 = math.exp %211 : vector<64x32xf32>
    %cst_82 = arith.constant 1.000000e+00 : f32
    %213 = vector.broadcast %cst_82 : f32 to vector<64x32xf32>
    %214 = arith.addf %213, %212 : vector<64x32xf32>
    %215 = arith.divf %213, %214 : vector<64x32xf32>
    %216 = arith.mulf %210, %215 : vector<64x32xf32>
    %217 = arith.truncf %216 : vector<64x32xf32> to vector<64x32xbf16>
    %c12 = arith.constant 12 : index
    %c0_83 = arith.constant 0 : index
    %c0_84 = arith.constant 0 : index
    %218 = vector.load %arg7[%c12, %c0_83, %c0_84] : memref<24x32x32xbf16, #tpu.memory_space<vmem>>, vector<1x32x32xbf16>
    %219 = vector.shape_cast %218 : vector<1x32x32xbf16> to vector<32x32xbf16>
    %cst_85 = arith.constant dense<0.000000e+00> : vector<64x32xf32>
    %220 = tpu.matmul %217, %219, %cst_85 {dimension_numbers = #tpu.dot_dimension_numbers<[1], [0], [0], [1], [0, 0, 1, 1], [], []>} : vector<64x32xbf16>, vector<32x32xbf16>, vector<64x32xf32> -> vector<64x32xf32>
    %221 = vector.extract_strided_slice %186 {offsets = [1, 0], sizes = [1, 32], strides = [1, 1]} : vector<4x32xf32> to vector<1x32xf32>
    %222 = vector.broadcast %221 : vector<1x32xf32> to vector<64x32xf32>
    %223 = arith.addf %220, %222 : vector<64x32xf32>
    %224 = arith.negf %223 : vector<64x32xf32>
    %225 = math.exp %224 : vector<64x32xf32>
    %cst_86 = arith.constant 1.000000e+00 : f32
    %226 = vector.broadcast %cst_86 : f32 to vector<64x32xf32>
    %227 = arith.addf %226, %225 : vector<64x32xf32>
    %228 = arith.divf %226, %227 : vector<64x32xf32>
    %229 = arith.mulf %223, %228 : vector<64x32xf32>
    %230 = vector.broadcast %3 : vector<64x1xf32> to vector<64x32xf32>
    %231 = arith.mulf %229, %230 : vector<64x32xf32>
    %232 = vector.shape_cast %231 : vector<64x32xf32> to vector<8x8x32xf32>
    %cst_87 = arith.constant dense<0.000000e+00> : vector<8x32xf32>
    %233 = vector.multi_reduction <add>, %232, %cst_87 [1] : vector<8x8x32xf32> to vector<8x32xf32>
    %c13 = arith.constant 13 : index
    %c0_88 = arith.constant 0 : index
    %c0_89 = arith.constant 0 : index
    %234 = vector.load %arg7[%c13, %c0_88, %c0_89] : memref<24x32x32xbf16, #tpu.memory_space<vmem>>, vector<1x32x32xbf16>
    %235 = vector.shape_cast %234 : vector<1x32x32xbf16> to vector<32x32xbf16>
    %cst_90 = arith.constant dense<0.000000e+00> : vector<8x32xf32>
    %236 = tpu.matmul %187, %235, %cst_90 {dimension_numbers = #tpu.dot_dimension_numbers<[1], [0], [0], [1], [0, 0, 1, 1], [], []>} : vector<8x32xbf16>, vector<32x32xbf16>, vector<8x32xf32> -> vector<8x32xf32>
    %237 = arith.truncf %233 : vector<8x32xf32> to vector<8x32xbf16>
    %c14 = arith.constant 14 : index
    %c0_91 = arith.constant 0 : index
    %c0_92 = arith.constant 0 : index
    %238 = vector.load %arg7[%c14, %c0_91, %c0_92] : memref<24x32x32xbf16, #tpu.memory_space<vmem>>, vector<1x32x32xbf16>
    %239 = vector.shape_cast %238 : vector<1x32x32xbf16> to vector<32x32xbf16>
    %cst_93 = arith.constant dense<0.000000e+00> : vector<8x32xf32>
    %240 = tpu.matmul %237, %239, %cst_93 {dimension_numbers = #tpu.dot_dimension_numbers<[1], [0], [0], [1], [0, 0, 1, 1], [], []>} : vector<8x32xbf16>, vector<32x32xbf16>, vector<8x32xf32> -> vector<8x32xf32>
    %241 = arith.addf %236, %240 : vector<8x32xf32>
    %c16 = arith.constant 16 : index
    %c0_94 = arith.constant 0 : index
    %c0_95 = arith.constant 0 : index
    %242 = vector.load %arg7[%c16, %c0_94, %c0_95] : memref<24x32x32xbf16, #tpu.memory_space<vmem>>, vector<1x32x32xbf16>
    %243 = vector.shape_cast %242 : vector<1x32x32xbf16> to vector<32x32xbf16>
    %244 = vector.extract_strided_slice %243 {offsets = [0, 0], sizes = [16, 32], strides = [1, 1]} : vector<32x32xbf16> to vector<16x32xbf16>
    %cst_96 = arith.constant dense<0.000000e+00> : vector<8x32xf32>
    %245 = tpu.matmul %1, %244, %cst_96 {dimension_numbers = #tpu.dot_dimension_numbers<[1], [0], [0], [1], [0, 0, 1, 1], [], []>} : vector<8x16xbf16>, vector<16x32xbf16>, vector<8x32xf32> -> vector<8x32xf32>
    %246 = arith.addf %241, %245 : vector<8x32xf32>
    %247 = vector.extract_strided_slice %186 {offsets = [2, 0], sizes = [1, 32], strides = [1, 1]} : vector<4x32xf32> to vector<1x32xf32>
    %248 = vector.broadcast %247 : vector<1x32xf32> to vector<8x32xf32>
    %249 = arith.addf %246, %248 : vector<8x32xf32>
    %250 = arith.negf %249 : vector<8x32xf32>
    %251 = math.exp %250 : vector<8x32xf32>
    %cst_97 = arith.constant 1.000000e+00 : f32
    %252 = vector.broadcast %cst_97 : f32 to vector<8x32xf32>
    %253 = arith.addf %252, %251 : vector<8x32xf32>
    %254 = arith.divf %252, %253 : vector<8x32xf32>
    %255 = arith.mulf %249, %254 : vector<8x32xf32>
    %256 = arith.truncf %255 : vector<8x32xf32> to vector<8x32xbf16>
    %c15 = arith.constant 15 : index
    %c0_98 = arith.constant 0 : index
    %c0_99 = arith.constant 0 : index
    %257 = vector.load %arg7[%c15, %c0_98, %c0_99] : memref<24x32x32xbf16, #tpu.memory_space<vmem>>, vector<1x32x32xbf16>
    %258 = vector.shape_cast %257 : vector<1x32x32xbf16> to vector<32x32xbf16>
    %cst_100 = arith.constant dense<0.000000e+00> : vector<8x32xf32>
    %259 = tpu.matmul %256, %258, %cst_100 {dimension_numbers = #tpu.dot_dimension_numbers<[1], [0], [0], [1], [0, 0, 1, 1], [], []>} : vector<8x32xbf16>, vector<32x32xbf16>, vector<8x32xf32> -> vector<8x32xf32>
    %260 = arith.addf %184, %259 : vector<8x32xf32>
    %261 = vector.extract_strided_slice %186 {offsets = [3, 0], sizes = [1, 32], strides = [1, 1]} : vector<4x32xf32> to vector<1x32xf32>
    %262 = vector.broadcast %261 : vector<1x32xf32> to vector<8x32xf32>
    %263 = arith.addf %260, %262 : vector<8x32xf32>
    %c3_101 = arith.constant 3 : index
    %c0_102 = arith.constant 0 : index
    %c0_103 = arith.constant 0 : index
    %264 = vector.load %arg8[%c3_101, %c0_102, %c0_103] : memref<4x4x32xf32, #tpu.memory_space<vmem>>, vector<1x4x32xf32>
    %265 = vector.shape_cast %264 : vector<1x4x32xf32> to vector<4x32xf32>
    %266 = arith.truncf %263 : vector<8x32xf32> to vector<8x32xbf16>
    %c3_104 = arith.constant 3 : index
    %c0_105 = arith.constant 0 : index
    %c0_106 = arith.constant 0 : index
    %267 = vector.load %arg6[%c3_104, %c0_105, %c0_106] : memref<4x32x64xbf16, #tpu.memory_space<vmem>>, vector<1x32x64xbf16>
    %268 = vector.shape_cast %267 : vector<1x32x64xbf16> to vector<32x64xbf16>
    %cst_107 = arith.constant dense<0.000000e+00> : vector<8x64xf32>
    %269 = tpu.matmul %266, %268, %cst_107 {dimension_numbers = #tpu.dot_dimension_numbers<[1], [0], [0], [1], [0, 0, 1, 1], [], []>} : vector<8x32xbf16>, vector<32x64xbf16>, vector<8x64xf32> -> vector<8x64xf32>
    %270 = vector.extract_strided_slice %269 {offsets = [0, 0], sizes = [8, 32], strides = [1, 1]} : vector<8x64xf32> to vector<8x32xf32>
    %271 = vector.extract_strided_slice %269 {offsets = [0, 32], sizes = [8, 32], strides = [1, 1]} : vector<8x64xf32> to vector<8x32xf32>
    %272 = vector.shape_cast %270 : vector<8x32xf32> to vector<8x1x32xf32>
    %273 = vector.shape_cast %272 : vector<8x1x32xf32> to vector<8x1x32xf32>
    %274 = vector.broadcast %273 : vector<8x1x32xf32> to vector<8x8x32xf32>
    %275 = vector.shape_cast %274 : vector<8x8x32xf32> to vector<64x32xf32>
    %276 = vector.shape_cast %271 : vector<8x32xf32> to vector<1x8x32xf32>
    %277 = vector.shape_cast %276 : vector<1x8x32xf32> to vector<1x1x8x32xf32>
    %278 = vector.shape_cast %277 : vector<1x1x8x32xf32> to vector<1x1x8x32xf32>
    %279 = vector.broadcast %278 : vector<1x1x8x32xf32> to vector<1x8x8x32xf32>
    %280 = vector.shape_cast %279 : vector<1x8x8x32xf32> to vector<64x32xf32>
    %281 = arith.addf %275, %280 : vector<64x32xf32>
    %282 = vector.extract_strided_slice %265 {offsets = [0, 0], sizes = [1, 32], strides = [1, 1]} : vector<4x32xf32> to vector<1x32xf32>
    %283 = vector.broadcast %282 : vector<1x32xf32> to vector<64x32xf32>
    %284 = arith.addf %281, %283 : vector<64x32xf32>
    %c23 = arith.constant 23 : index
    %c0_108 = arith.constant 0 : index
    %c0_109 = arith.constant 0 : index
    %285 = vector.load %arg7[%c23, %c0_108, %c0_109] : memref<24x32x32xbf16, #tpu.memory_space<vmem>>, vector<1x32x32xbf16>
    %286 = vector.shape_cast %285 : vector<1x32x32xbf16> to vector<32x32xbf16>
    %287 = vector.extract_strided_slice %286 {offsets = [0, 0], sizes = [5, 32], strides = [1, 1]} : vector<32x32xbf16> to vector<5x32xbf16>
    %cst_110 = arith.constant dense<0.000000e+00> : vector<64x32xf32>
    %288 = tpu.matmul %19, %287, %cst_110 {dimension_numbers = #tpu.dot_dimension_numbers<[1], [0], [0], [1], [0, 0, 1, 1], [], []>} : vector<64x5xbf16>, vector<5x32xbf16>, vector<64x32xf32> -> vector<64x32xf32>
    %289 = arith.addf %284, %288 : vector<64x32xf32>
    %290 = arith.negf %289 : vector<64x32xf32>
    %291 = math.exp %290 : vector<64x32xf32>
    %cst_111 = arith.constant 1.000000e+00 : f32
    %292 = vector.broadcast %cst_111 : f32 to vector<64x32xf32>
    %293 = arith.addf %292, %291 : vector<64x32xf32>
    %294 = arith.divf %292, %293 : vector<64x32xf32>
    %295 = arith.mulf %289, %294 : vector<64x32xf32>
    %296 = arith.truncf %295 : vector<64x32xf32> to vector<64x32xbf16>
    %c18 = arith.constant 18 : index
    %c0_112 = arith.constant 0 : index
    %c0_113 = arith.constant 0 : index
    %297 = vector.load %arg7[%c18, %c0_112, %c0_113] : memref<24x32x32xbf16, #tpu.memory_space<vmem>>, vector<1x32x32xbf16>
    %298 = vector.shape_cast %297 : vector<1x32x32xbf16> to vector<32x32xbf16>
    %cst_114 = arith.constant dense<0.000000e+00> : vector<64x32xf32>
    %299 = tpu.matmul %296, %298, %cst_114 {dimension_numbers = #tpu.dot_dimension_numbers<[1], [0], [0], [1], [0, 0, 1, 1], [], []>} : vector<64x32xbf16>, vector<32x32xbf16>, vector<64x32xf32> -> vector<64x32xf32>
    %300 = vector.extract_strided_slice %265 {offsets = [1, 0], sizes = [1, 32], strides = [1, 1]} : vector<4x32xf32> to vector<1x32xf32>
    %301 = vector.broadcast %300 : vector<1x32xf32> to vector<64x32xf32>
    %302 = arith.addf %299, %301 : vector<64x32xf32>
    %303 = arith.negf %302 : vector<64x32xf32>
    %304 = math.exp %303 : vector<64x32xf32>
    %cst_115 = arith.constant 1.000000e+00 : f32
    %305 = vector.broadcast %cst_115 : f32 to vector<64x32xf32>
    %306 = arith.addf %305, %304 : vector<64x32xf32>
    %307 = arith.divf %305, %306 : vector<64x32xf32>
    %308 = arith.mulf %302, %307 : vector<64x32xf32>
    %309 = vector.broadcast %3 : vector<64x1xf32> to vector<64x32xf32>
    %310 = arith.mulf %308, %309 : vector<64x32xf32>
    %311 = vector.shape_cast %310 : vector<64x32xf32> to vector<8x8x32xf32>
    %cst_116 = arith.constant dense<0.000000e+00> : vector<8x32xf32>
    %312 = vector.multi_reduction <add>, %311, %cst_116 [1] : vector<8x8x32xf32> to vector<8x32xf32>
    %c19 = arith.constant 19 : index
    %c0_117 = arith.constant 0 : index
    %c0_118 = arith.constant 0 : index
    %313 = vector.load %arg7[%c19, %c0_117, %c0_118] : memref<24x32x32xbf16, #tpu.memory_space<vmem>>, vector<1x32x32xbf16>
    %314 = vector.shape_cast %313 : vector<1x32x32xbf16> to vector<32x32xbf16>
    %cst_119 = arith.constant dense<0.000000e+00> : vector<8x32xf32>
    %315 = tpu.matmul %266, %314, %cst_119 {dimension_numbers = #tpu.dot_dimension_numbers<[1], [0], [0], [1], [0, 0, 1, 1], [], []>} : vector<8x32xbf16>, vector<32x32xbf16>, vector<8x32xf32> -> vector<8x32xf32>
    %316 = arith.truncf %312 : vector<8x32xf32> to vector<8x32xbf16>
    %c20 = arith.constant 20 : index
    %c0_120 = arith.constant 0 : index
    %c0_121 = arith.constant 0 : index
    %317 = vector.load %arg7[%c20, %c0_120, %c0_121] : memref<24x32x32xbf16, #tpu.memory_space<vmem>>, vector<1x32x32xbf16>
    %318 = vector.shape_cast %317 : vector<1x32x32xbf16> to vector<32x32xbf16>
    %cst_122 = arith.constant dense<0.000000e+00> : vector<8x32xf32>
    %319 = tpu.matmul %316, %318, %cst_122 {dimension_numbers = #tpu.dot_dimension_numbers<[1], [0], [0], [1], [0, 0, 1, 1], [], []>} : vector<8x32xbf16>, vector<32x32xbf16>, vector<8x32xf32> -> vector<8x32xf32>
    %320 = arith.addf %315, %319 : vector<8x32xf32>
    %c22 = arith.constant 22 : index
    %c0_123 = arith.constant 0 : index
    %c0_124 = arith.constant 0 : index
    %321 = vector.load %arg7[%c22, %c0_123, %c0_124] : memref<24x32x32xbf16, #tpu.memory_space<vmem>>, vector<1x32x32xbf16>
    %322 = vector.shape_cast %321 : vector<1x32x32xbf16> to vector<32x32xbf16>
    %323 = vector.extract_strided_slice %322 {offsets = [0, 0], sizes = [16, 32], strides = [1, 1]} : vector<32x32xbf16> to vector<16x32xbf16>
    %cst_125 = arith.constant dense<0.000000e+00> : vector<8x32xf32>
    %324 = tpu.matmul %1, %323, %cst_125 {dimension_numbers = #tpu.dot_dimension_numbers<[1], [0], [0], [1], [0, 0, 1, 1], [], []>} : vector<8x16xbf16>, vector<16x32xbf16>, vector<8x32xf32> -> vector<8x32xf32>
    %325 = arith.addf %320, %324 : vector<8x32xf32>
    %326 = vector.extract_strided_slice %265 {offsets = [2, 0], sizes = [1, 32], strides = [1, 1]} : vector<4x32xf32> to vector<1x32xf32>
    %327 = vector.broadcast %326 : vector<1x32xf32> to vector<8x32xf32>
    %328 = arith.addf %325, %327 : vector<8x32xf32>
    %329 = arith.negf %328 : vector<8x32xf32>
    %330 = math.exp %329 : vector<8x32xf32>
    %cst_126 = arith.constant 1.000000e+00 : f32
    %331 = vector.broadcast %cst_126 : f32 to vector<8x32xf32>
    %332 = arith.addf %331, %330 : vector<8x32xf32>
    %333 = arith.divf %331, %332 : vector<8x32xf32>
    %334 = arith.mulf %328, %333 : vector<8x32xf32>
    %335 = arith.truncf %334 : vector<8x32xf32> to vector<8x32xbf16>
    %c21 = arith.constant 21 : index
    %c0_127 = arith.constant 0 : index
    %c0_128 = arith.constant 0 : index
    %336 = vector.load %arg7[%c21, %c0_127, %c0_128] : memref<24x32x32xbf16, #tpu.memory_space<vmem>>, vector<1x32x32xbf16>
    %337 = vector.shape_cast %336 : vector<1x32x32xbf16> to vector<32x32xbf16>
    %cst_129 = arith.constant dense<0.000000e+00> : vector<8x32xf32>
    %338 = tpu.matmul %335, %337, %cst_129 {dimension_numbers = #tpu.dot_dimension_numbers<[1], [0], [0], [1], [0, 0, 1, 1], [], []>} : vector<8x32xbf16>, vector<32x32xbf16>, vector<8x32xf32> -> vector<8x32xf32>
    %339 = arith.addf %263, %338 : vector<8x32xf32>
    %340 = vector.extract_strided_slice %265 {offsets = [3, 0], sizes = [1, 32], strides = [1, 1]} : vector<4x32xf32> to vector<1x32xf32>
    %341 = vector.broadcast %340 : vector<1x32xf32> to vector<8x32xf32>
    %342 = arith.addf %339, %341 : vector<8x32xf32>
    %343 = arith.truncf %342 : vector<8x32xf32> to vector<8x32xbf16>
    %c1_130 = arith.constant 1 : index
    %c0_131 = arith.constant 0 : index
    %c0_132 = arith.constant 0 : index
    %344 = vector.load %arg9[%c1_130, %c0_131, %c0_132] : memref<4x32x32xbf16, #tpu.memory_space<vmem>>, vector<1x32x32xbf16>
    %345 = vector.shape_cast %344 : vector<1x32x32xbf16> to vector<32x32xbf16>
    %cst_133 = arith.constant dense<0.000000e+00> : vector<8x32xf32>
    %346 = tpu.matmul %343, %345, %cst_133 {dimension_numbers = #tpu.dot_dimension_numbers<[1], [0], [0], [1], [0, 0, 1, 1], [], []>} : vector<8x32xbf16>, vector<32x32xbf16>, vector<8x32xf32> -> vector<8x32xf32>
    %c1_134 = arith.constant 1 : index
    %c0_135 = arith.constant 0 : index
    %347 = vector.load %arg10[%c1_134, %c0_135] : memref<6x32xf32, #tpu.memory_space<vmem>>, vector<1x32xf32>
    %348 = vector.broadcast %347 : vector<1x32xf32> to vector<8x32xf32>
    %349 = arith.addf %346, %348 : vector<8x32xf32>
    %350 = arith.negf %349 : vector<8x32xf32>
    %351 = math.exp %350 : vector<8x32xf32>
    %cst_136 = arith.constant 1.000000e+00 : f32
    %352 = vector.broadcast %cst_136 : f32 to vector<8x32xf32>
    %353 = arith.addf %352, %351 : vector<8x32xf32>
    %354 = arith.divf %352, %353 : vector<8x32xf32>
    %355 = arith.mulf %349, %354 : vector<8x32xf32>
    %356 = arith.truncf %355 : vector<8x32xf32> to vector<8x32xbf16>
    %c2_137 = arith.constant 2 : index
    %c0_138 = arith.constant 0 : index
    %c0_139 = arith.constant 0 : index
    %357 = vector.load %arg9[%c2_137, %c0_138, %c0_139] : memref<4x32x32xbf16, #tpu.memory_space<vmem>>, vector<1x32x32xbf16>
    %358 = vector.shape_cast %357 : vector<1x32x32xbf16> to vector<32x32xbf16>
    %cst_140 = arith.constant dense<0.000000e+00> : vector<8x32xf32>
    %359 = tpu.matmul %356, %358, %cst_140 {dimension_numbers = #tpu.dot_dimension_numbers<[1], [0], [0], [1], [0, 0, 1, 1], [], []>} : vector<8x32xbf16>, vector<32x32xbf16>, vector<8x32xf32> -> vector<8x32xf32>
    %c2_141 = arith.constant 2 : index
    %c0_142 = arith.constant 0 : index
    %360 = vector.load %arg10[%c2_141, %c0_142] : memref<6x32xf32, #tpu.memory_space<vmem>>, vector<1x32xf32>
    %361 = vector.broadcast %360 : vector<1x32xf32> to vector<8x32xf32>
    %362 = arith.addf %359, %361 : vector<8x32xf32>
    %c0_143 = arith.constant 0 : index
    %c0_144 = arith.constant 0 : index
    %363 = vector.load %arg5[%c0_143, %c0_144] : memref<8x1xf32, #tpu.memory_space<vmem>>, vector<8x1xf32>
    %364 = vector.broadcast %363 : vector<8x1xf32> to vector<8x32xf32>
    %365 = arith.mulf %362, %364 : vector<8x32xf32>
    %366 = vector.shape_cast %365 : vector<8x32xf32> to vector<1x8x32xf32>
    %cst_145 = arith.constant dense<0.000000e+00> : vector<1x32xf32>
    %367 = vector.multi_reduction <add>, %366, %cst_145 [1] : vector<1x8x32xf32> to vector<1x32xf32>
    %368 = arith.truncf %367 : vector<1x32xf32> to vector<1x32xbf16>
    %c3_146 = arith.constant 3 : index
    %c0_147 = arith.constant 0 : index
    %c0_148 = arith.constant 0 : index
    %369 = vector.load %arg9[%c3_146, %c0_147, %c0_148] : memref<4x32x32xbf16, #tpu.memory_space<vmem>>, vector<1x32x32xbf16>
    %370 = vector.shape_cast %369 : vector<1x32x32xbf16> to vector<32x32xbf16>
    %cst_149 = arith.constant dense<0.000000e+00> : vector<1x32xf32>
    %371 = tpu.matmul %368, %370, %cst_149 {dimension_numbers = #tpu.dot_dimension_numbers<[1], [0], [0], [1], [0, 0, 1, 1], [], []>} : vector<1x32xbf16>, vector<32x32xbf16>, vector<1x32xf32> -> vector<1x32xf32>
    %c3_150 = arith.constant 3 : index
    %c0_151 = arith.constant 0 : index
    %372 = vector.load %arg10[%c3_150, %c0_151] : memref<6x32xf32, #tpu.memory_space<vmem>>, vector<1x32xf32>
    %373 = arith.addf %371, %372 : vector<1x32xf32>
    %374 = arith.negf %373 : vector<1x32xf32>
    %375 = math.exp %374 : vector<1x32xf32>
    %cst_152 = arith.constant 1.000000e+00 : f32
    %376 = vector.broadcast %cst_152 : f32 to vector<1x32xf32>
    %377 = arith.addf %376, %375 : vector<1x32xf32>
    %378 = arith.divf %376, %377 : vector<1x32xf32>
    %379 = arith.mulf %373, %378 : vector<1x32xf32>
    %c4_153 = arith.constant 4 : index
    %c0_154 = arith.constant 0 : index
    %380 = vector.load %arg10[%c4_153, %c0_154] : memref<6x32xf32, #tpu.memory_space<vmem>>, vector<1x32xf32>
    %381 = arith.mulf %379, %380 : vector<1x32xf32>
    %cst_155 = arith.constant dense<0.000000e+00> : vector<1xf32>
    %382 = vector.multi_reduction <add>, %381, %cst_155 [1] : vector<1x32xf32> to vector<1xf32>
    %383 = vector.shape_cast %382 : vector<1xf32> to vector<1x1xf32>
    %c5_156 = arith.constant 5 : index
    %c0_157 = arith.constant 0 : index
    %384 = vector.load %arg10[%c5_156, %c0_157] : memref<6x32xf32, #tpu.memory_space<vmem>>, vector<1x1xf32>
    %385 = arith.addf %383, %384 : vector<1x1xf32>
    %c0_158 = arith.constant 0 : index
    %c0_159 = arith.constant 0 : index
    %c0_160 = arith.constant 0 : index
    %386 = vector.load %arg11[%c0_158, %c0_159, %c0_160] : memref<1x1x1xf32, #tpu.memory_space<vmem>>, vector<1x1x1xf32>
    %387 = vector.shape_cast %386 : vector<1x1x1xf32> to vector<1x1xf32>
    %388 = vector.shape_cast %385 : vector<1x1xf32> to vector<1x1x1xf32>
    tpu.vector_store %arg11[%c0_158, %c0_159, %c0_160], %388 {strides = array<i32>} : memref<1x1x1xf32, #tpu.memory_space<vmem>>, vector<1x1x1xf32>,
    return
  }
  func.func @transform_0(%arg0: i32) -> (i32, i32) {
    %c0_i32 = arith.constant 0 : i32
    %c0_i32_0 = arith.constant 0 : i32
    return %arg0, %c0_i32 : i32, i32
  }
  func.func @transform_1(%arg0: i32) -> (i32, i32) {
    %c0_i32 = arith.constant 0 : i32
    %c0_i32_0 = arith.constant 0 : i32
    return %arg0, %c0_i32 : i32, i32
  }
  func.func @transform_2(%arg0: i32) -> (i32, i32) {
    %c0_i32 = arith.constant 0 : i32
    %c0_i32_0 = arith.constant 0 : i32
    return %arg0, %c0_i32 : i32, i32
  }
  func.func @transform_3(%arg0: i32) -> (i32, i32) {
    %c0_i32 = arith.constant 0 : i32
    %c0_i32_0 = arith.constant 0 : i32
    return %arg0, %c0_i32 : i32, i32
  }
  func.func @transform_4(%arg0: i32) -> (i32, i32) {
    %c0_i32 = arith.constant 0 : i32
    %c0_i32_0 = arith.constant 0 : i32
    return %arg0, %c0_i32 : i32, i32
  }
  func.func @transform_5(%arg0: i32) -> (i32, i32, i32) {
    %c0_i32 = arith.constant 0 : i32
    %c0_i32_0 = arith.constant 0 : i32
    %c0_i32_1 = arith.constant 0 : i32
    %c0_i32_2 = arith.constant 0 : i32
    return %c0_i32, %c0_i32_0, %c0_i32_1 : i32, i32, i32
  }
  func.func @transform_6(%arg0: i32) -> (i32, i32, i32) {
    %c0_i32 = arith.constant 0 : i32
    %c0_i32_0 = arith.constant 0 : i32
    %c0_i32_1 = arith.constant 0 : i32
    %c0_i32_2 = arith.constant 0 : i32
    return %c0_i32, %c0_i32_0, %c0_i32_1 : i32, i32, i32
  }
  func.func @transform_7(%arg0: i32) -> (i32, i32, i32) {
    %c0_i32 = arith.constant 0 : i32
    %c0_i32_0 = arith.constant 0 : i32
    %c0_i32_1 = arith.constant 0 : i32
    %c0_i32_2 = arith.constant 0 : i32
    return %c0_i32, %c0_i32_0, %c0_i32_1 : i32, i32, i32
  }
  func.func @transform_8(%arg0: i32) -> (i32, i32, i32) {
    %c0_i32 = arith.constant 0 : i32
    %c0_i32_0 = arith.constant 0 : i32
    %c0_i32_1 = arith.constant 0 : i32
    %c0_i32_2 = arith.constant 0 : i32
    return %c0_i32, %c0_i32_0, %c0_i32_1 : i32, i32, i32
  }
  func.func @transform_9(%arg0: i32) -> (i32, i32) {
    %c0_i32 = arith.constant 0 : i32
    %c0_i32_0 = arith.constant 0 : i32
    %c0_i32_1 = arith.constant 0 : i32
    return %c0_i32, %c0_i32_0 : i32, i32
  }
  func.func @transform_10(%arg0: i32) -> (i32, i32, i32) {
    %c0_i32 = arith.constant 0 : i32
    %c0_i32_0 = arith.constant 0 : i32
    %c0_i32_1 = arith.constant 0 : i32
    return %arg0, %c0_i32, %c0_i32_0 : i32, i32, i32
  }
}

</mosaic_0001>

<bundles_post_ra>
// kernel: tpu_custom_call.1
= control target key start
LH: loop header
LB: loop body
LE: loop exit
PB: predicated region body
PF: predicated region fallthrough
CT: control target
= control target key end

     0   :  { %15 = vsyncpa [#allocation3], 0  ;;  %s5431_s13 = smov 0   ;;  %s6205_s0 = inlined_call_operand.vmem [shape: f32[16,16], index: 0, kind: input, shape index: {}]   ;;  %s6206_s1 = inlined_call_operand.vmem [shape: f32[16,3], index: 1, kind: input, shape index: {}]   ;;  %s6207_s2 = inlined_call_operand.vmem [shape: f32[128,4], index: 2, kind: input, shape index: {}]   ;;  %s6208_s3 = inlined_call_operand.vmem [shape: f32[128,1], index: 3, kind: input, shape index: {}]   ;;  %s6209_s4 = inlined_call_operand.vmem [shape: f32[16,1], index: 4, kind: input, shape index: {}]   ;;  %s6210_s5 = inlined_call_operand.vmem [shape: bf16[4,32,64], index: 5, kind: input, shape index: {}]   ;;  %s6211_s6 = inlined_call_operand.hbm [shape: bf16[24,32,32], index: 6, kind: input, shape index: {}]   ;;  %s6212_s7 = inlined_call_operand.vmem [shape: f32[4,4,32], index: 7, kind: input, shape index: {}]   ;;  %s6213_s8 = inlined_call_operand.vmem [shape: bf16[4,32,32], index: 8, kind: input, shape index: {}]   ;;  %s6214_s9 = inlined_call_operand.vmem [shape: f32[6,32], index: 9, kind: input, shape index: {}]   ;;  %s6215_s10 = inlined_call_operand.vmem [shape: f32[2,1,1], index: 10, kind: output, shape index: {}]  }
   0x1 LB: > { %s5437_s14 = sadd.s32 4294967295, %s5364_s13   ;;  %p4342_p0 = scmp.ge.s32.totalorder %s5364_s13, 1  ;;  %s5364_s13 = sphi %s5431_s13, %s21_s13  }
   0x2   : > { %p287_p1 = scmp.lt.s32.totalorder %s5364_s13, 3  ;;  %s5366_s15 = smov [#allocation2]  }
   0x3   : > { %s302_s16 = sshll.u32 %s5366_s15, 4  ;;  %p6216_p3 = scmp.eq.s32.totalorder %s5437_s14, 0  ;;  %s303_s16 = int_to_ptr.vmem [resolvable:$true] %s302_s16 }
   0x4   : > { %p5441_p2 = pnand %p4342_p0, %p287_p1  ;;  %s5326_s21 = scalar_lea.hbm %s6211_s6, 6144 }
   0x5   : > { %p5327_p6 = scmp.ne.s32.totalorder %s6211_s6, %s5326_s21  ;;  %p5333_p10 = scmp.lt.u32.totalorder %s5326_s21, %s6211_s6 }
   0x6   : > { %s6218_s17 = scalar_select %p5441_p2, 1, 0 }
   0x7   : > { %p4948_p4 = pneg %p5441_p2 }
   0x9   : > { %p5450_p5 = pnand %p6216_p3, %p4948_p4 }
   0xb   : > { %p5328_p7 = pneg %p5450_p5 }
   0xd   : > { %p5329_p8 = pnand %p5328_p7, %p5327_p6 }
   0xf   : > { %p5330_p9 = pneg %p5329_p8 }
  0x11   : > { %p5335_p11 = pnand %p5333_p10, %p5330_p9 }
  0x13   : > { %5338 = shalt.err (!%p5335_p11)
}
  0x14   : > { %s5339_s26 = scalar_lea.vmem %s303_s16, 6144  ;;  %p5347_p1 = scmp.lt.s32.totalorder %s303_s16, %s303_s16 }
  0x15   : > { %p5340_p12 = scmp.ne.s32.totalorder %s303_s16, %s5339_s26  ;;  %p5348_p4 = scmp.lt.s32.totalorder %s5339_s26, %s5339_s26 }
  0x17   : > { %p5342_p13 = pnand %p5340_p12, %p5328_p7  ;;  %p5349_p3 = por %p5348_p4, %p5347_p1 }
  0x19   : > { %p5343_p0 = pneg %p5342_p13 }
  0x1b   : > { %p5350_p2 = pnand %p5349_p3, %p5343_p0 }
  0x1d   : > { %5353 = shalt.err (!%p5350_p2)
}
  0x1e   : > { %s5367_s27 = smov 64   ;;  %s5368_s28 = smov 4  }
  0x1f   : > { %4951 = dma.hbm_to_vmem [thread:$0]  (!%p5450_p5), %s6211_s6, 6144, %s303_s16, [#allocation3], %s5367_s27, %s5367_s27, %s5368_s28  }
  0x20   : > { %p6220_p6 = scmp.ne.s32.totalorder %s6218_s17, 0 }
  0x21   : > { %p6221_p8 = scmp.eq.s32.totalorder (!%p6220_p6), %s5437_s14, 0 }
  0x22   : > { %366 = sbr.rel (%p6220_p6) target bundleno = 5601 (0x15e1), region = 60 }
  0x29   : > { %5359 = dma.done.wait (%p6221_p8), [#allocation3], 6144   ;;  %p6222_p7 = pmov %p6221_p8 }
  0x2a   : > { %p419_p2 = scmp.lt.s32.totalorder %s5437_s14, 1  ;;  %v463_v0 = vlaneseq  ;;  %v5369_v1 = vmov 0.0   ;;  %vm5370_vm0 = vmmov 0   ;;  %v5371_v2 = vmov 1966171168   ;;  %v4994_v7 = vld [vmem:[%s6213_s8] sm:$0xff]  }
  0x2b   : > { %5361 = vsyncadd (%p6222_p7), [#allocation3], 4294961152  ;;  %4674 = vmatprep.subr.bf16.mxu0 %v5369_v1  ;;  %4676 = vmatprep.mubr.msk.bf16.mxu0 %vm5370_vm0, %v5369_v1  ;;  %v461_v3 = vunpack.c.l.s4 %v5371_v2  ;;  %vm655_vm1 = vcmask 130048   ;;  %s4349_s23 = sshll.u32 %s5437_s14, 3  ;;  %v4996_v14 = vld [vmem:[%s6210_s5] sm:$0xff]   ;;  %vm564_vm2 = vcmask 23552  }
  0x2c   : > { %s5481_s11 = scalar_select %p419_p2, %s5437_s14, 1  ;;  %v5483_v4 = vshrl.u32 %v463_v0, 7  ;;  %4680 = vmatprep.subr.bf16.mxu1 %v5369_v1  ;;  %4684 = vmatprep.mubr.msk.bf16.mxu1 %vm5370_vm0, %v5369_v1  ;;  %vm889_vm3 = vcmask 1041408   ;;  %vm890_vm4 = vcmask 1042432   ;;  %vm629_vm5 = vcmask 7168  }
  0x2d   : > { %v462_v5 = vunpack.c.0.s8 %v461_v3  ;;  %4675 = vmatpush3.bf16.msra.mxu0 %v4994_v7  ;;  %4681 = vmatpush3.bf16.msra.mxu1 %v4996_v14  ;;  %p5521_p3 = scmp.lt.s32.totalorder %s4349_s23, 15  ;;  %s5372_s30 = smov 1   ;;  %vm876_vm6 = vcmask 39936   ;;  %vm717_vm7 = vcmask 261120   ;;  %vm1320_vm8 = vcmask 1041409  }
  0x2e   : > { %s5489_s12 = sshll.u32 %s5481_s11, 3  ;;  %v5509_v12 = vsub.s32 0, %v5483_v4  ;;  %4682 = vmatprep.subr.bf16.mxu1 %v5369_v1  ;;  %s5374_s19 = smov 96   ;;  %vm1322_vm9 = vcmask 1042434   ;;  %vm1324_vm10 = vcmask 1043459   ;;  %vm1326_vm11 = vcmask 1044484  }
  0x2f   : > { %s422_s17 = scalar_lea.vmem %s6205_s0, %s5489_s12  ;;  %s426_s20 = scalar_lea.vmem %s6206_s1, %s5489_s12  ;;  %v5500_v6 = vsub.s32 %v462_v5, %v5483_v4  ;;  %vm1328_vm12 = vcmask 1045509   ;;  %vm1330_vm13 = vcmask 1046534   ;;  %vm1332_vm14 = vcmask 1047559  }
  0x30   : > { %v447_v8 = vld [vmem:[%s422_s17] sm:$0xff]  ;;  %s6225_s23 = smov (!%p5521_p3, %s4349_s23), 15  ;;  %s442_s21 = scalar_lea.vmem %s6209_s4, %s5489_s12  ;;  %vm4225_vm15 = vcmask 253952  }
  0x31   : > { %v449_v9 = vld [vmem:[%s426_s20] sm:$0xff]  ;;  %v5505_v10 = vpack.c.bf16 %v447_v8, %v447_v8  ;;  %s4350_s14 = sshll.u32 %s6225_s23, 3  ;;  %s445_s17 = scalar_lea.vmem %s6215_s10, %s5481_s11 }
  0x32   : > { %v466_v11 = vrot.slane %v449_v9, %v5500_v6  ;;  %v459_v13 = vcombine.high %v449_v9, %v449_v9  ;;  %s431_s29 = scalar_lea.vmem %s6207_s2, %s4350_s14  ;;  %s437_s22 = scalar_lea.vmem %s6208_s3, %s4350_s14 }
  0x33   : > { %4677 = vmatmul.mubr.msk.bf16.vlgmr.msra.gmra.mrb[0].mxu0 %vm655_vm1, %v5505_v10  ;;  %v591_v58 = vld [vmem:[%s431_s29 + $0x10] sm:$0xff]  ;;  %v592_v59 = vld [vmem:[%s431_s29 + $0x18] sm:$0xff]  ;;  %v589_v60 = vld [vmem:[%s431_s29] sm:$0xff] }
  0x34   : > { %v482_v15 = vrot.slane %v466_v11, %v5500_v6  ;;  %v474_v16 = vcombine.high %v466_v11, %v466_v11  ;;  %v473_v17 = vrot.slane %v459_v13, %v5500_v6  ;;  %v590_v61 = vld [vmem:[%s431_s29 + $0x8] sm:$0xff]  ;;  %v4977_v62 = vpack.i.bf16 %v592_v59, %v591_v58  ;;  %v593_v63 = vld [vmem:[%s431_s29 + $0x20] sm:$0xff]  ;;  %v595_v5 = vld [vmem:[%s431_s29 + $0x30] sm:$0xff] }
  0x35   : > { %v594_v0 = vld [vmem:[%s431_s29 + $0x28] sm:$0xff]  ;;  %v4972_v2 = vpack.i.bf16 %v590_v61, %v589_v60  ;;  %v596_v7 = vld [vmem:[%s431_s29 + $0x38] sm:$0xff]  ;;  %v875_v11 = vld [vmem:[#allocation2 + $0x50] sm:$0xf]  ;;  %v5373_v13 = vmov 65535  }
  0x36   : > { %v511_v18 = vrot.slane %v482_v15, %v5509_v12  ;;  %v504_v19 = vcombine.high %v482_v15, %v482_v15  ;;  %v496_v20 = vrot.slane %v474_v16, %v5500_v6  ;;  %v489_v21 = vrot.slane %v473_v17, %v5500_v6 }
  0x37   : > { %v475_v22 = vcombine.high %v473_v17, %v473_v17  ;;  %v4982_v3 = vpack.i.bf16 %v594_v0, %v593_v63  ;;  %v4987_v8 = vpack.i.bf16 %v596_v7, %v595_v5  ;;  %v891_v14 = vsel %vm889_vm3, 4294967295, %v5373_v13  ;;  %v4998_v0 = vld [vmem:[#allocation2] sm:$0xff]   ;;  %v451_v13 = vld [vmem:[%s437_s22 + $0x8] sm:$0xff] }
  0x38   : > { %v548_v23 = vsub.f32 %v511_v18, %v449_v9  ;;  %v519_v24 = vrot.slane %v504_v19, %v5509_v12  ;;  %v515_v25 = vrot.slane %v496_v20, %v5509_v12  ;;  %v506_v26 = vcombine.high %v496_v20, %v496_v20 }
  0x39   : > { %v527_v27 = vrot.slane %v489_v21, %v5509_v12  ;;  %v503_v28 = vrot.slane %v475_v22, %v5500_v6  ;;  %v505_v29 = vcombine.high %v489_v21, %v489_v21  ;;  %v5560_v15 = vsel %vm890_vm4, %v891_v14, 0  ;;  %v452_v14 = vld [vmem:[%s437_s22 + $0x10] sm:$0xff] }
  0x3a   : > { %v556_v30 = vmul.f32 %v548_v23, %v548_v23  ;;  %v550_v31 = vsub.f32 %v519_v24, %v449_v9  ;;  %v549_v32 = vsub.f32 %v515_v25, %v449_v9  ;;  %v523_v33 = vrot.slane %v506_v26, %v5509_v12 }
  0x3b   : > { %v552_v34 = vsub.f32 %v527_v27, %v449_v9  ;;  %v531_v35 = vrot.slane %v503_v28, %v5509_v12  ;;  %v535_v36 = vrot.slane %v505_v29, %v5509_v12  ;;  %v507_v37 = vcombine.high %v503_v28, %v503_v28 }
  0x3c   : > { %v565_v38 = vsel %vm564_vm2, %v556_v30, 0.0  ;;  %v558_v39 = vmul.f32 %v550_v31, %v550_v31  ;;  %v557_v40 = vmul.f32 %v549_v32, %v549_v32  ;;  %v551_v41 = vsub.f32 %v523_v33, %v449_v9 }
  0x3d   : > { %566 = vadd.xlane.f32.xlu0 %v565_v38  ;;  %v560_v42 = vmul.f32 %v552_v34, %v552_v34  ;;  %v553_v43 = vsub.f32 %v531_v35, %v449_v9  ;;  %v554_v44 = vsub.f32 %v535_v36, %v449_v9  ;;  %v539_v45 = vrot.slane %v507_v37, %v5509_v12 }
  0x3e   : > { %v571_v46 = vsel %vm564_vm2, %v558_v39, 0.0  ;;  %v568_v47 = vsel %vm564_vm2, %v557_v40, 0.0  ;;  %v559_v48 = vmul.f32 %v551_v41, %v551_v41  ;;  %v894_v16 = vand.u32 %v5560_v15, %v875_v11  ;;  %v450_v11 = vld [vmem:[%s437_s22] sm:$0xff] }
  0x3f   : > { %572 = vadd.xlane.f32.xlu1 %v571_v46  ;;  %v561_v49 = vmul.f32 %v553_v43, %v553_v43  ;;  %v562_v50 = vmul.f32 %v554_v44, %v554_v44  ;;  %v555_v51 = vsub.f32 %v539_v45, %v449_v9  ;;  %v577_v53 = vsel %vm564_vm2, %v560_v42, 0.0  ;;  %v4997_v9 = vld [vmem:[%s6210_s5 + $0x8] sm:$0xff]  }
  0x40   : > { %v574_v52 = vsel %vm564_vm2, %v559_v48, 0.0  ;;  %4683 = vmatpush3.bf16.msra.mxu1 %v4997_v9  ;;  %4688 = vmatprep.subr.bf16.mxu0 %v894_v16  ;;  %v5375_v9 = vmov 0  }
  0x41   : > { %569 = vadd.xlane.f32.xlu0 %v568_v47  ;;  %v580_v54 = vsel %vm564_vm2, %v561_v49, 0.0  ;;  %v563_v55 = vmul.f32 %v555_v51, %v555_v51  ;;  %v583_v56 = vsel %vm564_vm2, %v562_v50, 0.0  ;;  %4689 = vmatpush3.bf16.msra.mxu0 %v894_v16  ;;  %v4354_v49 = vld [vmem:[%s6214_s9] ss:$0 sm:$0xff] }
  0x42   : > { %4710 = vmatprep.subr.bf16.mxu0 %v5369_v1  ;;  %4698 = vmatprep.subr.bf16.mxu1 %v4998_v0  ;;  %v454_v16 = vld [vmem:[%s437_s22 + $0x20] sm:$0xff] }
  0x43   : > { %575 = vadd.xlane.f32.xlu1 %v574_v52  ;;  %v586_v57 = vsel %vm564_vm2, %v563_v55, 0.0  ;;  %4993 = vset.pattern.permute.xlu0 %v5375_v9 }
  0x44   : > { %4992 = vset.pattern.permute.xlu1 %v5375_v9 }
  0x45   : > { %578 = vadd.xlane.f32.xlu0 %v577_v53 }
  0x47   : > { %581 = vadd.xlane.f32.xlu1 %v580_v54 }
  0x49   : > { %584 = vadd.xlane.f32.xlu0 %v583_v56 }
  0x4b   : > { %587 = vadd.xlane.f32.xlu1 %v586_v57 }
  0x5c   : > { %4978 = vrot.lane.b32.xlu1 %v4977_v62, %s5372_s30 }
  0x5f   : > { %4973 = vrot.lane.b32.xlu0 %v4972_v2, %s5372_s30  ;;  %v4999_v2 = vld [vmem:[#allocation2 + $0x8] sm:$0xff]  }
  0x60   : > { %4983 = vrot.lane.b32.xlu1 %v4982_v3, %s5372_s30 }
  0x64   : > { %4988 = vrot.lane.b32.xlu1 %v4987_v8, %s5372_s30 }
  0x68   : > { %1184 = vperm.xlu1 %4992, %v450_v11  }
  0x6c   : > { %1194 = vperm.xlu1 %4992, %v452_v14  }
  0xca   : > { %v567_v17 = vpop.xlane.xlu0 %566 }
  0xcc   : > { %v573_v18 = vpop.xlane.xlu1 %572 }
  0xce   : > { %v570_v19 = vpop.xlane.xlu0 %569 }
  0xd0   : > { %v576_v20 = vpop.xlane.xlu1 %575 }
  0xd2   : > { %v579_v21 = vpop.xlane.xlu0 %578 }
  0xd4   : > { %v582_v22 = vpop.xlane.xlu1 %581 }
  0xd6   : > { %v585_v23 = vpop.xlane.xlu0 %584 }
  0xd8   : > { %v588_v24 = vpop.xlane.xlu1 %587 }
  0xda   : > { %v4974_v25 = vpop.permute.xlu0 %4973 }
  0xdb   : > { %v4976_v26 = vunpack.i.h.bf16 %v4974_v25  ;;  %v4975_v27 = vunpack.i.l.bf16 %v4974_v25 }
  0xdc   : > { %v4979_v28 = vpop.permute.xlu1 %4978 }
  0xdd   : > { %v631_v29 = vsel %vm629_vm5, %v570_v19, %v4976_v26  ;;  %v630_v30 = vsel %vm629_vm5, %v567_v17, %v4975_v27  ;;  %v4981_v31 = vunpack.i.h.bf16 %v4979_v28  ;;  %v4980_v32 = vunpack.i.l.bf16 %v4979_v28  ;;  %v453_v17 = vld [vmem:[%s437_s22 + $0x18] sm:$0xff]  ;;  %v455_v19 = vld [vmem:[%s437_s22 + $0x28] sm:$0xff] }
  0xde   : > { %v5566_v33 = vpack.c.bf16 %v631_v29, %v630_v30  ;;  %1199 = vperm.xlu1 %4992, %v453_v17  }
  0xdf   : > { %v633_v34 = vsel %vm629_vm5, %v576_v20, %v4981_v31  ;;  %v632_v35 = vsel %vm629_vm5, %v573_v18, %v4980_v32  ;;  %v456_v18 = vld [vmem:[%s437_s22 + $0x30] sm:$0xff]  ;;  %v457_v20 = vld [vmem:[%s437_s22 + $0x38] sm:$0xff]  ;;  %v5633_v32 = vld [vmem:[%s6212_s7] sm:$0xf] }
  0xe0   : > { %v5570_v36 = vpack.c.bf16 %v633_v34, %v632_v35  ;;  %4690 = vmatprep.mubr.msk.bf16.mxu0 %vm876_vm6, %v5566_v33  ;;  %v4984_v37 = vpop.permute.xlu1 %4983 }
  0xe1   : > { %v4986_v38 = vunpack.i.h.bf16 %v4984_v37  ;;  %v4985_v39 = vunpack.i.l.bf16 %v4984_v37  ;;  %v865_v37 = vrot.slane %v5633_v32, %v5509_v12 }
  0xe2   : > { %4691 = vmatmul.mubr.msk.bf16.vlgmr.msra.gmra.mrb[4].mxu0 %vm876_vm6, %v5570_v36  ;;  %1209 = vperm.xlu1 %4992, %v455_v19  }
  0xe3   : > { %v635_v40 = vsel %vm629_vm5, %v582_v22, %v4986_v38  ;;  %v634_v41 = vsel %vm629_vm5, %v579_v21, %v4985_v39 }
  0xe4   : > { %v5578_v42 = vpack.c.bf16 %v635_v40, %v634_v41  ;;  %v4989_v43 = vpop.permute.xlu1 %4988 }
  0xe5   : > { %v4991_v44 = vunpack.i.h.bf16 %v4989_v43  ;;  %v4990_v45 = vunpack.i.l.bf16 %v4989_v43 }
  0xe6   : > { %4694 = vmatprep.mubr.msk.bf16.mxu0 %vm876_vm6, %v5578_v42  ;;  %1219 = vperm.xlu1 %4992, %v457_v20  }
  0xe7   : > { %v637_v46 = vsel %vm629_vm5, %v588_v24, %v4991_v44  ;;  %v636_v47 = vsel %vm629_vm5, %v585_v23, %v4990_v45 }
  0xe8   : > { %v5584_v48 = vpack.c.bf16 %v637_v46, %v636_v47 }
  0xea   : > { %4695 = vmatmul.mubr.msk.bf16.gmra.mrb[8].mxu0 %vm876_vm6, %v5584_v48 }
  0xeb   : > { %4714 = vmatprep.mubr.msk.bf16.mxu0 %vm5370_vm0, %v5369_v1 }
 0x106   : > { %v693_v50 = vpop.f32.mrb[0].mxu0 }
 0x107   : > { %v5593_v51 = vadd.f32 %v4354_v49, %v693_v50  ;;  %v4678_v52 = vpop.f32.mrb[1].mxu0 }
 0x108   : > { %v696_v53 = vpop.f32.mrb[2].mxu0 }
 0x109   : > { %v5597_v54 = vpack.c.bf16 %v5593_v51, %v5593_v51  ;;  %v4679_v55 = vpop.f32.mrb[3].mxu0 }
 0x10b   : > { %4685 = vmatmul.mubr.msk.bf16.vlgmr.msra.gmra.mrb[0].mxu1 %vm717_vm7, %v5597_v54 }
 0x10c   : > { %4699 = vmatpush3.bf16.msra.mxu1 %v4998_v0 }
 0x10d   : > { %4700 = vmatprep.subr.bf16.mxu1 %v4999_v2 }
 0x110   : > { %4701 = vmatpush3.bf16.msra.mxu1 %v4999_v2 }
 0x111   : > { %4718 = vmatprep.subr.bf16.mxu1 %v5369_v1 }
 0x1b5   : > { %v5601_v56 = vpop.f32.mrb[4].mxu0 }
 0x1b6   : > { %v5603_v57 = vpop.f32.mrb[5].mxu0 }
 0x1b7   : > { %v5605_v58 = vpop.f32.mrb[6].mxu0 }
 0x1b8   : > { %v5607_v59 = vpop.f32.mrb[7].mxu0 }
 0x1bd   : > { %v5609_v60 = vpop.f32.mrb[8].mxu0 }
 0x1be   : > { %v5611_v61 = vpop.f32.mrb[9].mxu0 }
 0x1bf   : > { %v5613_v62 = vpop.f32.mrb[10].mxu0 }
 0x1c0   : > { %v5615_v63 = vpop.f32.mrb[11].mxu0 }
 0x1de   : > { %v755_v3 = vpop.f32.mrb[0].mxu1 }
 0x1df   : > { %851 = vrot.lane.b32.xlu0 %v755_v3, %s5374_s19  ;;  %v4686_v5 = vpop.f32.mrb[1].mxu1  ;;  %v762_v21 = vcombine.high %v755_v3, %v755_v3  ;;  %v769_v22 = vrot.slane %v755_v3, %v5500_v6 }
 0x1e0   : > { %v758_v7 = vpop.f32.mrb[2].mxu1 }
 0x1e1   : > { %v4687_v8 = vpop.f32.mrb[3].mxu1  ;;  %v776_v23 = vrot.slane %v762_v21, %v5500_v6  ;;  %v777_v24 = vcombine.high %v769_v22, %v769_v22  ;;  %v785_v26 = vrot.slane %v769_v22, %v5500_v6 }
 0x1e3   : > { %1189 = vperm.xlu0 %4993, %v451_v13   ;;  %v778_v25 = vcombine.high %v776_v23, %v776_v23  ;;  %v799_v27 = vrot.slane %v777_v24, %v5500_v6  ;;  %v792_v28 = vrot.slane %v776_v23, %v5500_v6  ;;  %v807_v30 = vcombine.high %v785_v26, %v785_v26 }
 0x1e4   : > { %v814_v38 = vrot.slane %v785_v26, %v5509_v12 }
 0x1e5   : > { %v806_v29 = vrot.slane %v778_v25, %v5500_v6  ;;  %v809_v31 = vcombine.high %v799_v27, %v799_v27  ;;  %v808_v34 = vcombine.high %v792_v28, %v792_v28  ;;  %v818_v39 = vrot.slane %v799_v27, %v5509_v12 }
 0x1e6   : > { %v822_v40 = vrot.slane %v807_v30, %v5509_v12  ;;  %v830_v43 = vrot.slane %v792_v28, %v5509_v12 }
 0x1e7   : > { %1204 = vperm.xlu0 %4993, %v454_v16   ;;  %v810_v35 = vcombine.high %v806_v29, %v806_v29  ;;  %v826_v41 = vrot.slane %v809_v31, %v5509_v12  ;;  %v834_v44 = vrot.slane %v806_v29, %v5509_v12  ;;  %v838_v45 = vrot.slane %v808_v34, %v5509_v12 }
 0x1e9   : > { %v842_v46 = vrot.slane %v810_v35, %v5509_v12 }
 0x1eb   : > { %1214 = vperm.xlu0 %4993, %v456_v18  }
 0x251   : > { %v852_v47 = vpop.permute.xlu0 %851 }
 0x252   : > { %v856_v49 = vadd.f32 %v852_v47, %v822_v40  ;;  %v857_v50 = vadd.f32 %v852_v47, %v826_v41  ;;  %v854_v52 = vadd.f32 %v852_v47, %v814_v38  ;;  %v855_v53 = vadd.f32 %v852_v47, %v818_v39 }
 0x253   : > { %v858_v55 = vadd.f32 %v852_v47, %v830_v43  ;;  %v859_v0 = vadd.f32 %v852_v47, %v834_v44  ;;  %v860_v2 = vadd.f32 %v852_v47, %v838_v45  ;;  %v861_v3 = vadd.f32 %v852_v47, %v842_v46 }
 0x254   : > { %v866_v5 = vadd.f32 %v865_v37, %v854_v52  ;;  %v867_v7 = vadd.f32 %v865_v37, %v855_v53  ;;  %v868_v8 = vadd.f32 %v865_v37, %v856_v49  ;;  %v869_v9 = vadd.f32 %v865_v37, %v857_v50 }
 0x255   : > { %v870_v11 = vadd.f32 %v865_v37, %v858_v55  ;;  %v871_v13 = vadd.f32 %v865_v37, %v859_v0  ;;  %v872_v14 = vadd.f32 %v865_v37, %v860_v2  ;;  %v873_v16 = vadd.f32 %v865_v37, %v861_v3 }
 0x256   : > { %v961_v17 = vadd.f32 %v5603_v57, %v866_v5  ;;  %v962_v18 = vadd.f32 %v5607_v59, %v867_v7  ;;  %v963_v19 = vadd.f32 %v5601_v56, %v868_v8  ;;  %v964_v20 = vadd.f32 %v5605_v58, %v869_v9  ;;  %v5000_v7 = vld [vmem:[#allocation2 + $0x10] sm:$0xff]  }
 0x257   : > { %v965_v21 = vadd.f32 %v5611_v61, %v870_v11  ;;  %v966_v22 = vadd.f32 %v5615_v63, %v871_v13  ;;  %v967_v23 = vadd.f32 %v5609_v60, %v872_v14  ;;  %v968_v24 = vadd.f32 %v5613_v62, %v873_v16 }
 0x258   : > { %v4364_v25 = vmul.f32 -1.442695, %v961_v17  ;;  %v4365_v26 = vmul.f32 -1.442695, %v962_v18  ;;  %v4366_v27 = vmul.f32 -1.442695, %v963_v19 }
 0x259   : > { %v4367_v28 = vmul.f32 -1.442695, %v964_v20  ;;  %v4368_v57 = vmul.f32 -1.442695, %v965_v21  ;;  %v4369_v59 = vmul.f32 -1.442695, %v966_v22 }
 0x25a   : > { %5046 = vpow2.f32 %v4364_v25  ;;  %v4370_v56 = vmul.f32 -1.442695, %v967_v23  ;;  %v4371_v58 = vmul.f32 -1.442695, %v968_v24 }
 0x25b   : > { %5048 = vpow2.f32 %v4365_v26 }
 0x25c   : > { %5050 = vpow2.f32 %v4366_v27 }
 0x25d   : > { %5052 = vpow2.f32 %v4367_v28 }
 0x25e   : > { %5054 = vpow2.f32 %v4368_v57 }
 0x25f   : > { %5056 = vpow2.f32 %v4369_v59 }
 0x260   : > { %5058 = vpow2.f32 %v4370_v56 }
 0x261   : > { %5060 = vpow2.f32 %v4371_v58 }
 0x264   : > { %v5047_v61 = vpop.eup %5046 }
 0x265   : > { %v5049_v60 = vpop.eup %5048  ;;  %v993_v63 = vadd.f32 1.0, %v5047_v61 }
 0x266   : > { %v5051_v62 = vpop.eup %5050  ;;  %v994_v29 = vadd.f32 1.0, %v5049_v60 }
 0x267   : > { %v5053_v30 = vpop.eup %5052  ;;  %5062 = vrcp.f32 %v993_v63  ;;  %v995_v31 = vadd.f32 1.0, %v5051_v62 }
 0x268   : > { %v5055_v34 = vpop.eup %5054  ;;  %5064 = vrcp.f32 %v994_v29  ;;  %v996_v35 = vadd.f32 1.0, %v5053_v30 }
 0x269   : > { %v5057_v37 = vpop.eup %5056  ;;  %5066 = vrcp.f32 %v995_v31  ;;  %v997_v38 = vadd.f32 1.0, %v5055_v34 }
 0x26a   : > { %v5059_v39 = vpop.eup %5058  ;;  %5068 = vrcp.f32 %v996_v35  ;;  %v998_v40 = vadd.f32 1.0, %v5057_v37 }
 0x26b   : > { %v5061_v41 = vpop.eup %5060  ;;  %5070 = vrcp.f32 %v997_v38  ;;  %v999_v43 = vadd.f32 1.0, %v5059_v39 }
 0x26c   : > { %5072 = vrcp.f32 %v998_v40  ;;  %v1000_v44 = vadd.f32 1.0, %v5061_v41 }
 0x26d   : > { %5074 = vrcp.f32 %v999_v43 }
 0x26e   : > { %5076 = vrcp.f32 %v1000_v44 }
 0x271   : > { %v5063_v45 = vpop.eup %5062 }
 0x272   : > { %v5065_v46 = vpop.eup %5064  ;;  %v1017_v47 = vmul.f32 %v5063_v45, %v961_v17 }
 0x273   : > { %v5067_v49 = vpop.eup %5066  ;;  %v1018_v50 = vmul.f32 %v5065_v46, %v962_v18  ;;  %v5001_v18 = vld [vmem:[#allocation2 + $0x18] sm:$0xff]   ;;  %v5696_v46 = vpop.permute.xlu1 %1184 }
 0x274   : > { %v5069_v52 = vpop.eup %5068  ;;  %v1019_v53 = vmul.f32 %v5067_v49, %v963_v19 }
 0x275   : > { %v5071_v55 = vpop.eup %5070  ;;  %v1025_v0 = vpack.c.bf16 %v1018_v50, %v1017_v47  ;;  %v1020_v2 = vmul.f32 %v5069_v52, %v964_v20  ;;  %v5002_v20 = vld [vmem:[#allocation2 + $0x20] sm:$0xff]  }
 0x276   : > { %v5073_v3 = vpop.eup %5072  ;;  %v1021_v5 = vmul.f32 %v5071_v55, %v965_v21  ;;  %4711 = vmatpush3.bf16.msra.mxu0 %v5002_v20  ;;  %v5003_v21 = vld [vmem:[#allocation2 + $0x28] sm:$0xff]  }
 0x277   : > { %v5075_v8 = vpop.eup %5074  ;;  %4702 = vmatprep.mubr.msk.bf16.mxu1 %vm717_vm7, %v1025_v0  ;;  %v1026_v9 = vpack.c.bf16 %v1020_v2, %v1019_v53  ;;  %v1022_v11 = vmul.f32 %v5073_v3, %v966_v22  ;;  %4712 = vmatprep.subr.bf16.mxu0 %v5369_v1  ;;  %v5668_v22 = vsub.s32 1, %v5483_v4 }
 0x278   : > { %v5077_v13 = vpop.eup %5076  ;;  %v1023_v14 = vmul.f32 %v5075_v8, %v967_v23 }
 0x279   : > { %4703 = vmatmul.mubr.msk.bf16.vlgmr.msra.gmra.mrb[4].mxu1 %vm717_vm7, %v1026_v9  ;;  %v1027_v16 = vpack.c.bf16 %v1022_v11, %v1021_v5  ;;  %v1024_v17 = vmul.f32 %v5077_v13, %v968_v24  ;;  %v1036_v23 = vrot.slane %v5633_v32, %v5668_v22  ;;  %v5700_v5 = vpop.permute.xlu1 %1194 }
 0x27a   : > { %4719 = vmatpush3.bf16.msra.mxu1 %v5000_v7  ;;  %4713 = vmatpush3.bf16.msra.mxu0 %v5003_v21 }
 0x27b   : > { %4706 = vmatprep.mubr.msk.bf16.mxu1 %vm717_vm7, %v1027_v16  ;;  %v1028_v19 = vpack.c.bf16 %v1024_v17, %v1023_v14  ;;  %4720 = vmatprep.subr.bf16.mxu1 %v5369_v1  ;;  %v5702_v17 = vpop.permute.xlu0 %1189 }
 0x27c   : > { %4726 = vmatprep.subr.bf16.mxu0 %v5369_v1 }
 0x27d   : > { %v5704_v20 = vpop.permute.xlu1 %1199 }
 0x27e   : > { %4721 = vmatpush3.bf16.msra.mxu1 %v5001_v18 }
 0x27f   : > { %4732 = vmatprep.subr.bf16.mxu1 %v5369_v1 }
 0x281   : > { %4707 = vmatmul.mubr.msk.bf16.gmra.mrb[8].mxu1 %vm717_vm7, %v1028_v19 }
 0x282   : > { %4722 = vmatprep.mubr.msk.bf16.mxu1 %vm5370_vm0, %v5369_v1 }
 0x289   : > { %4723 = vmatmul.mubr.msk.bf16.vlgmr.msra.gmra.mrb[12].mxu1 %vm717_vm7, %v5597_v54 }
 0x28a   : > { %4736 = vmatprep.mubr.msk.bf16.mxu1 %vm5370_vm0, %v5369_v1 }
 0x34c   : > { %v4704_v24 = vpop.f32.mrb[4].mxu1 }
 0x34d   : > { %v5672_v25 = vadd.f32 %v4704_v24, %v1036_v23  ;;  %v1095_v54 = vpop.f32.mrb[5].mxu1 }
 0x34e   : > { %v5674_v26 = vadd.f32 %v1095_v54, %v1036_v23  ;;  %v4705_v27 = vpop.f32.mrb[6].mxu1 }
 0x34f   : > { %v4380_v28 = vmul.f32 -1.442695, %v5672_v25  ;;  %v5677_v57 = vadd.f32 %v4705_v27, %v1036_v23  ;;  %v1098_v59 = vpop.f32.mrb[7].mxu1 }
 0x350   : > { %v4378_v56 = vmul.f32 -1.442695, %v5674_v26  ;;  %v5680_v58 = vadd.f32 %v1098_v59, %v1036_v23 }
 0x351   : > { %5078 = vpow2.f32 %v4380_v28  ;;  %v4381_v61 = vmul.f32 -1.442695, %v5677_v57 }
 0x352   : > { %5080 = vpow2.f32 %v4378_v56  ;;  %v4379_v60 = vmul.f32 -1.442695, %v5680_v58 }
 0x353   : > { %5082 = vpow2.f32 %v4381_v61 }
 0x354   : > { %5084 = vpow2.f32 %v4379_v60  ;;  %v4708_v63 = vpop.f32.mrb[8].mxu1  ;;  %v5712_v60 = vpop.permute.xlu0 %1204 }
 0x355   : > { %v5684_v62 = vadd.f32 %v4708_v63, %v1036_v23  ;;  %v1111_v29 = vpop.f32.mrb[9].mxu1 }
 0x356   : > { %v5686_v30 = vadd.f32 %v1111_v29, %v1036_v23  ;;  %v4709_v31 = vpop.f32.mrb[10].mxu1 }
 0x357   : > { %v4384_v34 = vmul.f32 -1.442695, %v5684_v62  ;;  %v5689_v35 = vadd.f32 %v4709_v31, %v1036_v23  ;;  %v1114_v37 = vpop.f32.mrb[11].mxu1 }
 0x358   : > { %v4382_v38 = vmul.f32 -1.442695, %v5686_v30  ;;  %v5692_v39 = vadd.f32 %v1114_v37, %v1036_v23 }
 0x359   : > { %5086 = vpow2.f32 %v4384_v34  ;;  %v4385_v40 = vmul.f32 -1.442695, %v5689_v35  ;;  %v5717_v34 = vpop.permute.xlu1 %1209 }
 0x35a   : > { %5088 = vpow2.f32 %v4382_v38  ;;  %v4383_v41 = vmul.f32 -1.442695, %v5692_v39 }
 0x35b   : > { %v5079_v43 = vpop.eup %5078  ;;  %5090 = vpow2.f32 %v4385_v40 }
 0x35c   : > { %v5081_v44 = vpop.eup %5080  ;;  %v1152_v45 = vadd.f32 1.0, %v5079_v43  ;;  %5092 = vpow2.f32 %v4383_v41  ;;  %v5698_v47 = vpop.f32.mrb[12].mxu1 }
 0x35d   : > { %v5083_v49 = vpop.eup %5082  ;;  %v1150_v50 = vadd.f32 1.0, %v5081_v44  ;;  %v4724_v52 = vpop.f32.mrb[13].mxu1 }
 0x35e   : > { %v5085_v53 = vpop.eup %5084  ;;  %5094 = vrcp.f32 %v1152_v45  ;;  %v1153_v55 = vadd.f32 1.0, %v5083_v49  ;;  %v1439_v0 = vpop.f32.mrb[14].mxu1 }
 0x35f   : > { %5096 = vrcp.f32 %v1150_v50  ;;  %v1151_v2 = vadd.f32 1.0, %v5085_v53  ;;  %v4725_v3 = vpop.f32.mrb[15].mxu1  ;;  %v5724_v0 = vpop.permute.xlu0 %1214 }
 0x360   : > { %5098 = vrcp.f32 %v1153_v55 }
 0x361   : > { %5100 = vrcp.f32 %v1151_v2 }
 0x363   : > { %v5087_v7 = vpop.eup %5086 }
 0x364   : > { %v5089_v8 = vpop.eup %5088  ;;  %v1156_v9 = vadd.f32 1.0, %v5087_v7 }
 0x365   : > { %v5091_v11 = vpop.eup %5090  ;;  %v1154_v13 = vadd.f32 1.0, %v5089_v8 }
 0x366   : > { %v5093_v14 = vpop.eup %5092  ;;  %5102 = vrcp.f32 %v1156_v9  ;;  %v1157_v16 = vadd.f32 1.0, %v5091_v11 }
 0x367   : > { %5104 = vrcp.f32 %v1154_v13  ;;  %v1155_v18 = vadd.f32 1.0, %v5093_v14  ;;  %v5729_v14 = vpop.permute.xlu1 %1219 }
 0x368   : > { %v5095_v19 = vpop.eup %5094  ;;  %5106 = vrcp.f32 %v1157_v16 }
 0x369   : > { %v5097_v21 = vpop.eup %5096  ;;  %v1176_v23 = vmul.f32 %v5095_v19, %v5672_v25  ;;  %5108 = vrcp.f32 %v1155_v18 }
 0x36a   : > { %v5099_v24 = vpop.eup %5098  ;;  %v1174_v54 = vmul.f32 %v5097_v21, %v5674_v26 }
 0x36b   : > { %v5101_v27 = vpop.eup %5100  ;;  %v1177_v28 = vmul.f32 %v5099_v24, %v5677_v57  ;;  %v1224_v59 = vmul.f32 %v5700_v5, %v1176_v23 }
 0x36c   : > { %v1175_v56 = vmul.f32 %v5101_v27, %v5680_v58  ;;  %v1222_v61 = vmul.f32 %v5696_v46, %v1174_v54 }
 0x36d   : > { %v1244_v63 = vsel %vm717_vm7, %v1224_v59, 0.0  ;;  %v1225_v29 = vmul.f32 %v5704_v20, %v1177_v28 }
 0x36e   : > { %v1230_v25 = vsel %vm717_vm7, %v1222_v61, 0.0  ;;  %v1245_v31 = vrot.slane %v1244_v63, 4  ;;  %v1223_v26 = vmul.f32 %v5702_v17, %v1175_v56 }
 0x36f   : > { %v1231_v57 = vrot.slane %v1230_v25, 4  ;;  %v1251_v37 = vsel %vm717_vm7, %v1225_v29, 0.0 }
 0x370   : > { %v5103_v38 = vpop.eup %5102  ;;  %v1246_v58 = vadd.f32 %v1245_v31, %v1244_v63  ;;  %v1252_v40 = vrot.slane %v1251_v37, 4  ;;  %v1237_v41 = vsel %vm717_vm7, %v1223_v26, 0.0 }
 0x371   : > { %v5105_v43 = vpop.eup %5104  ;;  %v1180_v44 = vmul.f32 %v5103_v38, %v5684_v62  ;;  %v1232_v45 = vadd.f32 %v1231_v57, %v1230_v25  ;;  %v1238_v49 = vrot.slane %v1237_v41, 4 }
 0x372   : > { %v5107_v50 = vpop.eup %5106  ;;  %v1178_v52 = vmul.f32 %v5105_v43, %v5686_v30  ;;  %v1247_v53 = vrot.slane %v1246_v58, 2  ;;  %v1253_v55 = vadd.f32 %v1252_v40, %v1251_v37 }
 0x373   : > { %v5109_v2 = vpop.eup %5108  ;;  %v1181_v3 = vmul.f32 %v5107_v50, %v5689_v35  ;;  %v1233_v7 = vrot.slane %v1232_v45, 2  ;;  %v1239_v8 = vadd.f32 %v1238_v49, %v1237_v41  ;;  %v1228_v9 = vmul.f32 %v5724_v0, %v1180_v44 }
 0x374   : > { %v1179_v11 = vmul.f32 %v5109_v2, %v5692_v39  ;;  %v1248_v13 = vadd.f32 %v1247_v53, %v1246_v58  ;;  %v1254_v62 = vrot.slane %v1253_v55, 2  ;;  %v1226_v16 = vmul.f32 %v5712_v60, %v1178_v52 }
 0x375   : > { %v1234_v30 = vadd.f32 %v1233_v7, %v1232_v45  ;;  %v1240_v18 = vrot.slane %v1239_v8, 2  ;;  %v1229_v19 = vmul.f32 %v5729_v14, %v1181_v3  ;;  %v1272_v21 = vsel %vm717_vm7, %v1228_v9, 0.0 }
 0x376   : > { %v1249_v23 = vrot.slane %v1248_v13, 1  ;;  %v1255_v35 = vadd.f32 %v1254_v62, %v1253_v55  ;;  %v1227_v24 = vmul.f32 %v5717_v34, %v1179_v11  ;;  %v1258_v54 = vsel %vm717_vm7, %v1226_v16, 0.0 }
 0x377   : > { %v1235_v27 = vrot.slane %v1234_v30, 1  ;;  %v1241_v39 = vadd.f32 %v1240_v18, %v1239_v8  ;;  %v1279_v28 = vsel %vm717_vm7, %v1229_v19, 0.0  ;;  %v1259_v59 = vrot.slane %v1258_v54, 4 }
 0x378   : > { %v1250_v56 = vadd.f32 %v1249_v23, %v1248_v13  ;;  %v1256_v61 = vrot.slane %v1255_v35, 1  ;;  %v1265_v63 = vsel %vm717_vm7, %v1227_v24, 0.0  ;;  %v1280_v29 = vrot.slane %v1279_v28, 4 }
 0x379   : > { %v1236_v25 = vadd.f32 %v1235_v27, %v1234_v30  ;;  %v1266_v31 = vrot.slane %v1265_v63, 4  ;;  %v1242_v26 = vrot.slane %v1241_v39, 1  ;;  %v1260_v57 = vadd.f32 %v1259_v59, %v1258_v54 }
 0x37a   : > { %v1257_v37 = vadd.f32 %v1256_v61, %v1255_v35  ;;  %v1281_v38 = vadd.f32 %v1280_v29, %v1279_v28  ;;  %v1273_v58 = vrot.slane %v1272_v21, 4  ;;  %v1293_v45 = vpack.c.bf16 %v1250_v56, %v1250_v56 }
 0x37b   : > { %v1291_v40 = vpack.c.bf16 %v1236_v25, %v1236_v25  ;;  %v1267_v41 = vadd.f32 %v1266_v31, %v1265_v63  ;;  %v1243_v43 = vadd.f32 %v1242_v26, %v1241_v39  ;;  %v1261_v44 = vrot.slane %v1260_v57, 2 }
 0x37c   : > { %v1282_v49 = vrot.slane %v1281_v38, 2  ;;  %v1274_v50 = vadd.f32 %v1273_v58, %v1272_v21  ;;  %v1294_v52 = vpack.c.bf16 %v1257_v37, %v1257_v37  ;;  %v1314_v62 = vunpack.c.l.b16 %v1293_v45  ;;  %v1748_v45 = vld [vmem:[#allocation2 + $0xb0] sm:$0xf] }
 0x37d   : > { %v1268_v53 = vrot.slane %v1267_v41, 2  ;;  %v1292_v55 = vpack.c.bf16 %v1243_v43, %v1243_v43  ;;  %v1262_v2 = vadd.f32 %v1261_v44, %v1260_v57  ;;  %v1312_v8 = vunpack.c.l.b16 %v1291_v40  ;;  %v5004_v40 = vld [vmem:[#allocation2 + $0x40] sm:$0xff]   ;;  %v5005_v43 = vld [vmem:[#allocation2 + $0x30] sm:$0xff]   ;;  %v5006_v44 = vld [vmem:[#allocation2 + $0x38] sm:$0xff]  }
 0x37e   : > { %v1283_v3 = vadd.f32 %v1282_v49, %v1281_v38  ;;  %v1275_v7 = vrot.slane %v1274_v50, 2  ;;  %v1315_v18 = vunpack.c.l.b16 %v1294_v52  ;;  %4733 = vmatpush3.bf16.msra.mxu1 %v5005_v43  ;;  %v1750_v49 = vand.u32 %v1748_v45, %v5560_v15 }
 0x37f   : > { %v1269_v9 = vadd.f32 %v1268_v53, %v1267_v41  ;;  %v1313_v11 = vunpack.c.l.b16 %v1292_v55  ;;  %v1263_v13 = vrot.slane %v1262_v2, 1  ;;  %4734 = vmatprep.subr.bf16.mxu1 %v5369_v1 }
 0x380   : > { %v1284_v16 = vrot.slane %v1283_v3, 1  ;;  %v1276_v30 = vadd.f32 %v1275_v7, %v1274_v50  ;;  %v5007_v50 = vld [vmem:[%s6210_s5 + $0x10] sm:$0xff]   ;;  %v5761_v7 = vsub.s32 2, %v5483_v4 }
 0x381   : > { %v1270_v19 = vrot.slane %v1269_v9, 1  ;;  %v1321_v21 = vsel %vm1320_vm8, %v1313_v11, %v1312_v8  ;;  %v1264_v23 = vadd.f32 %v1263_v13, %v1262_v2 }
 0x382   : > { %v1323_v35 = vsel %vm1322_vm9, %v1314_v62, %v1321_v21  ;;  %v1285_v24 = vadd.f32 %v1284_v16, %v1283_v3  ;;  %v1277_v54 = vrot.slane %v1276_v30, 1  ;;  %4735 = vmatpush3.bf16.msra.mxu1 %v5006_v44  ;;  %v1495_v8 = vrot.slane %v5633_v32, %v5761_v7 }
 0x383   : > { %v1271_v27 = vadd.f32 %v1270_v19, %v1269_v9  ;;  %v1295_v39 = vpack.c.bf16 %v1264_v23, %v1264_v23  ;;  %v1325_v28 = vsel %vm1324_vm10, %v1315_v18, %v1323_v35  ;;  %4748 = vmatprep.subr.bf16.mxu1 %v1750_v49 }
 0x384   : > { %v1278_v59 = vadd.f32 %v1277_v54, %v1276_v30  ;;  %v1298_v61 = vpack.c.bf16 %v1285_v24, %v1285_v24  ;;  %v5008_v24 = vld [vmem:[%s6210_s5 + $0x18] sm:$0xff]   ;;  %v5781_v54 = vsub.s32 3, %v5483_v4 }
 0x385   : > { %v1296_v56 = vpack.c.bf16 %v1271_v27, %v1271_v27  ;;  %v1316_v63 = vunpack.c.l.b16 %v1295_v39 }
 0x386   : > { %v1297_v29 = vpack.c.bf16 %v1278_v59, %v1278_v59  ;;  %v1319_v57 = vunpack.c.l.b16 %v1298_v61  ;;  %v1569_v27 = vrot.slane %v5633_v32, %v5781_v54 }
 0x387   : > { %v1317_v25 = vunpack.c.l.b16 %v1296_v56  ;;  %v1327_v31 = vsel %vm1326_vm11, %v1316_v63, %v1325_v28 }
 0x388   : > { %v1318_v26 = vunpack.c.l.b16 %v1297_v29 }
 0x389   : > { %v1329_v37 = vsel %vm1328_vm12, %v1317_v25, %v1327_v31 }
 0x38a   : > { %v1331_v38 = vsel %vm1330_vm13, %v1318_v26, %v1329_v37 }
 0x38b   : > { %v1333_v58 = vsel %vm1332_vm14, %v1319_v57, %v1331_v38  ;;  %v5009_v38 = vld [vmem:[#allocation2 + $0x60] sm:$0xff]  }
 0x38c   : > { %v1334_v41 = vpack.c.b16 %v1333_v58, %v1333_v58  ;;  %v5010_v58 = vld [vmem:[#allocation2 + $0x68] sm:$0xff]  }
 0x38e   : > { %4715 = vmatmul.mubr.msk.bf16.vlgmr.msra.gmra.mrb[12].mxu0 %vm717_vm7, %v1334_v41 }
 0x38f   : > { %4727 = vmatpush3.bf16.msra.mxu0 %v5004_v40  ;;  %4728 = vmatprep.mubr.msk.bf16.mxu0 %vm5370_vm0, %v5369_v1 }
 0x390   : > { %4740 = vmatprep.subr.bf16.mxu0 %v5369_v1 }
 0x396   : > { %4729 = vmatmul.mubr.msk.bf16.vlgmr.msra.gmra.mrb[16].mxu0 %vm655_vm1, %v5505_v10 }
 0x397   : > { %4744 = vmatprep.mubr.msk.bf16.mxu0 %vm5370_vm0, %v5369_v1  ;;  %4741 = vmatpush3.bf16.msra.mxu0 %v5007_v50 }
 0x398   : > { %4742 = vmatprep.subr.bf16.mxu0 %v5369_v1 }
 0x39b   : > { %4743 = vmatpush3.bf16.msra.mxu0 %v5008_v24 }
 0x39c   : > { %4758 = vmatprep.subr.bf16.mxu0 %v5009_v38 }
 0x461   : > { %v1384_v52 = vpop.f32.mrb[12].mxu0 }
 0x462   : > { %v1437_v53 = vadd.f32 %v5698_v47, %v1384_v52  ;;  %v4716_v55 = vpop.f32.mrb[13].mxu0 }
 0x463   : > { %v1387_v2 = vpop.f32.mrb[14].mxu0 }
 0x464   : > { %v4717_v3 = vpop.f32.mrb[15].mxu0 }
 0x469   : > { %v1485_v9 = vpop.f32.mrb[16].mxu0 }
 0x46a   : > { %v1491_v11 = vadd.f32 %v1485_v9, %v1437_v53  ;;  %v4730_v13 = vpop.f32.mrb[17].mxu0 }
 0x46b   : > { %v1488_v62 = vpop.f32.mrb[18].mxu0  ;;  %v5805_v13 = vld [vmem:[%s6212_s7 + $0x4] sm:$0xf] }
 0x46c   : > { %v1496_v16 = vadd.f32 %v1495_v8, %v1491_v11  ;;  %v4731_v30 = vpop.f32.mrb[19].mxu0 }
 0x46d   : > { %v1738_v30 = vrot.slane %v5805_v13, %v5509_v12 }
 0x46e   : > { %v4394_v18 = vmul.f32 -1.442695, %v1496_v16 }
 0x470   : > { %5110 = vpow2.f32 %v4394_v18 }
 0x47a   : > { %v5111_v19 = vpop.eup %5110 }
 0x47b   : > { %v1500_v21 = vadd.f32 1.0, %v5111_v19 }
 0x47d   : > { %5112 = vrcp.f32 %v1500_v21 }
 0x487   : > { %v5113_v47 = vpop.eup %5112 }
 0x488   : > { %v1503_v23 = vmul.f32 %v5113_v47, %v1496_v16 }
 0x48a   : > { %v1504_v35 = vpack.c.bf16 %v1503_v23, %v1503_v23 }
 0x48c   : > { %4737 = vmatmul.mubr.msk.bf16.vlgmr.msra.gmra.mrb[16].mxu1 %vm717_vm7, %v1504_v35 }
 0x48d   : > { %4750 = vmatprep.mubr.msk.bf16.mxu1 %vm876_vm6, %v5566_v33  ;;  %4749 = vmatpush3.bf16.msra.mxu1 %v1750_v49 }
 0x48e   : > { %4770 = vmatprep.subr.bf16.mxu1 %v5369_v1 }
 0x494   : > { %4751 = vmatmul.mubr.msk.bf16.vlgmr.msra.gmra.mrb[20].mxu1 %vm876_vm6, %v5570_v36 }
 0x495   : > { %4754 = vmatprep.mubr.msk.bf16.mxu1 %vm876_vm6, %v5578_v42 }
 0x49c   : > { %4755 = vmatmul.mubr.msk.bf16.gmra.mrb[24].mxu1 %vm876_vm6, %v5584_v48 }
 0x49d   : > { %4774 = vmatprep.mubr.msk.bf16.mxu1 %vm5370_vm0, %v5369_v1 }
 0x55f   : > { %v1559_v39 = vpop.f32.mrb[16].mxu1 }
 0x560   : > { %v1565_v28 = vadd.f32 %v1559_v39, %v5593_v51  ;;  %v4738_v59 = vpop.f32.mrb[17].mxu1 }
 0x561   : > { %v1562_v56 = vpop.f32.mrb[18].mxu1 }
 0x562   : > { %v5786_v61 = vadd.f32 %v1569_v27, %v1565_v28  ;;  %v4739_v63 = vpop.f32.mrb[19].mxu1 }
 0x564   : > { %v5790_v29 = vpack.c.bf16 %v5786_v61, %v5786_v61 }
 0x566   : > { %4745 = vmatmul.mubr.msk.bf16.vlgmr.msra.gmra.mrb[20].mxu0 %vm717_vm7, %v5790_v29 }
 0x567   : > { %v4752_v4 = vpop.f32.mrb[20].mxu1  ;;  %4759 = vmatpush3.bf16.msra.mxu0 %v5009_v38 }
 0x568   : > { %v1786_v25 = vpop.f32.mrb[21].mxu1  ;;  %4760 = vmatprep.subr.bf16.mxu0 %v5010_v58 }
 0x569   : > { %v4753_v31 = vpop.f32.mrb[22].mxu1 }
 0x56a   : > { %v1789_v26 = vpop.f32.mrb[23].mxu1 }
 0x56b   : > { %4761 = vmatpush3.bf16.msra.mxu0 %v5010_v58 }
 0x56c   : > { %4778 = vmatprep.subr.bf16.mxu0 %v5369_v1 }
 0x56f   : > { %v4756_v32 = vpop.f32.mrb[24].mxu1 }
 0x570   : > { %v1802_v57 = vpop.f32.mrb[25].mxu1 }
 0x571   : > { %v4757_v37 = vpop.f32.mrb[26].mxu1 }
 0x572   : > { %v1805_v51 = vpop.f32.mrb[27].mxu1 }
 0x639   : > { %v1628_v40 = vpop.f32.mrb[20].mxu0 }
 0x63a   : > { %1724 = vrot.lane.b32.xlu0 %v1628_v40, %s5374_s19  ;;  %v4746_v41 = vpop.f32.mrb[21].mxu0  ;;  %v1635_v45 = vcombine.high %v1628_v40, %v1628_v40  ;;  %v1642_v49 = vrot.slane %v1628_v40, %v5500_v6 }
 0x63b   : > { %v1631_v43 = vpop.f32.mrb[22].mxu0 }
 0x63c   : > { %v4747_v44 = vpop.f32.mrb[23].mxu0  ;;  %v1649_v50 = vrot.slane %v1635_v45, %v5500_v6  ;;  %v1650_v52 = vcombine.high %v1642_v49, %v1642_v49  ;;  %v1658_v55 = vrot.slane %v1642_v49, %v5500_v6 }
 0x63e   : > { %v1651_v53 = vcombine.high %v1649_v50, %v1649_v50  ;;  %v1672_v2 = vrot.slane %v1650_v52, %v5500_v6  ;;  %v1665_v3 = vrot.slane %v1649_v50, %v5500_v6  ;;  %v1680_v9 = vcombine.high %v1658_v55, %v1658_v55 }
 0x63f   : > { %v1687_v18 = vrot.slane %v1658_v55, %v5509_v12 }
 0x640   : > { %v1679_v8 = vrot.slane %v1651_v53, %v5500_v6  ;;  %v1682_v11 = vcombine.high %v1672_v2, %v1672_v2  ;;  %v1681_v62 = vcombine.high %v1665_v3, %v1665_v3  ;;  %v1691_v19 = vrot.slane %v1672_v2, %v5509_v12 }
 0x641   : > { %v1695_v21 = vrot.slane %v1680_v9, %v5509_v12  ;;  %v1703_v23 = vrot.slane %v1665_v3, %v5509_v12 }
 0x642   : > { %v1683_v16 = vcombine.high %v1679_v8, %v1679_v8  ;;  %v1699_v47 = vrot.slane %v1682_v11, %v5509_v12  ;;  %v1707_v35 = vrot.slane %v1679_v8, %v5509_v12  ;;  %v1711_v24 = vrot.slane %v1681_v62, %v5509_v12 }
 0x644   : > { %v1715_v27 = vrot.slane %v1683_v16, %v5509_v12 }
 0x6ac   : > { %v1725_v39 = vpop.permute.xlu0 %1724 }
 0x6ad   : > { %v1729_v28 = vadd.f32 %v1725_v39, %v1695_v21  ;;  %v1730_v59 = vadd.f32 %v1725_v39, %v1699_v47  ;;  %v1727_v56 = vadd.f32 %v1725_v39, %v1687_v18  ;;  %v1728_v63 = vadd.f32 %v1725_v39, %v1691_v19 }
 0x6ae   : > { %v1731_v38 = vadd.f32 %v1725_v39, %v1703_v23  ;;  %v1732_v58 = vadd.f32 %v1725_v39, %v1707_v35  ;;  %v1733_v40 = vadd.f32 %v1725_v39, %v1711_v24  ;;  %v1734_v41 = vadd.f32 %v1725_v39, %v1715_v27 }
 0x6af   : > { %v1739_v43 = vadd.f32 %v1738_v30, %v1727_v56  ;;  %v1740_v44 = vadd.f32 %v1738_v30, %v1728_v63  ;;  %v1741_v45 = vadd.f32 %v1738_v30, %v1729_v28  ;;  %v1742_v49 = vadd.f32 %v1738_v30, %v1730_v59 }
 0x6b0   : > { %v1743_v50 = vadd.f32 %v1738_v30, %v1731_v38  ;;  %v1744_v52 = vadd.f32 %v1738_v30, %v1732_v58  ;;  %v1745_v53 = vadd.f32 %v1738_v30, %v1733_v40  ;;  %v1746_v55 = vadd.f32 %v1738_v30, %v1734_v41 }
 0x6b1   : > { %v1817_v2 = vadd.f32 %v1786_v25, %v1739_v43  ;;  %v1818_v3 = vadd.f32 %v1789_v26, %v1740_v44  ;;  %v1819_v8 = vadd.f32 %v4752_v4, %v1741_v45  ;;  %v1820_v9 = vadd.f32 %v4753_v31, %v1742_v49 }
 0x6b2   : > { %v1821_v11 = vadd.f32 %v1802_v57, %v1743_v50  ;;  %v1822_v62 = vadd.f32 %v1805_v51, %v1744_v52  ;;  %v1823_v16 = vadd.f32 %v4756_v32, %v1745_v53  ;;  %v1824_v18 = vadd.f32 %v4757_v37, %v1746_v55 }
 0x6b3   : > { %v4410_v19 = vmul.f32 -1.442695, %v1817_v2  ;;  %v4411_v21 = vmul.f32 -1.442695, %v1818_v3  ;;  %v4412_v47 = vmul.f32 -1.442695, %v1819_v8 }
 0x6b4   : > { %v4413_v23 = vmul.f32 -1.442695, %v1820_v9  ;;  %v4414_v35 = vmul.f32 -1.442695, %v1821_v11  ;;  %v4415_v24 = vmul.f32 -1.442695, %v1822_v62 }
 0x6b5   : > { %5114 = vpow2.f32 %v4410_v19  ;;  %v4416_v27 = vmul.f32 -1.442695, %v1823_v16  ;;  %v4417_v30 = vmul.f32 -1.442695, %v1824_v18 }
 0x6b6   : > { %5116 = vpow2.f32 %v4411_v21 }
 0x6b7   : > { %5118 = vpow2.f32 %v4412_v47 }
 0x6b8   : > { %5120 = vpow2.f32 %v4413_v23  ;;  %v5011_v23 = vld [vmem:[#allocation2 + $0x70] sm:$0xff]  }
 0x6b9   : > { %5122 = vpow2.f32 %v4414_v35 }
 0x6ba   : > { %5124 = vpow2.f32 %v4415_v24 }
 0x6bb   : > { %5126 = vpow2.f32 %v4416_v27 }
 0x6bc   : > { %5128 = vpow2.f32 %v4417_v30 }
 0x6bf   : > { %v5115_v4 = vpop.eup %5114 }
 0x6c0   : > { %v5117_v25 = vpop.eup %5116  ;;  %v1849_v31 = vadd.f32 1.0, %v5115_v4 }
 0x6c1   : > { %v5119_v26 = vpop.eup %5118  ;;  %v1850_v32 = vadd.f32 1.0, %v5117_v25 }
 0x6c2   : > { %v5121_v57 = vpop.eup %5120  ;;  %5130 = vrcp.f32 %v1849_v31  ;;  %v1851_v37 = vadd.f32 1.0, %v5119_v26 }
 0x6c3   : > { %v5123_v51 = vpop.eup %5122  ;;  %5132 = vrcp.f32 %v1850_v32  ;;  %v1852_v39 = vadd.f32 1.0, %v5121_v57 }
 0x6c4   : > { %v5125_v28 = vpop.eup %5124  ;;  %5134 = vrcp.f32 %v1851_v37  ;;  %v1853_v59 = vadd.f32 1.0, %v5123_v51 }
 0x6c5   : > { %v5127_v56 = vpop.eup %5126  ;;  %5136 = vrcp.f32 %v1852_v39  ;;  %v1854_v63 = vadd.f32 1.0, %v5125_v28 }
 0x6c6   : > { %v5129_v38 = vpop.eup %5128  ;;  %5138 = vrcp.f32 %v1853_v59  ;;  %v1855_v58 = vadd.f32 1.0, %v5127_v56 }
 0x6c7   : > { %5140 = vrcp.f32 %v1854_v63  ;;  %v1856_v40 = vadd.f32 1.0, %v5129_v38 }
 0x6c8   : > { %5142 = vrcp.f32 %v1855_v58 }
 0x6c9   : > { %5144 = vrcp.f32 %v1856_v40 }
 0x6cc   : > { %v5131_v41 = vpop.eup %5130 }
 0x6cd   : > { %v5133_v43 = vpop.eup %5132  ;;  %v1873_v44 = vmul.f32 %v5131_v41, %v1817_v2 }
 0x6ce   : > { %v5135_v45 = vpop.eup %5134  ;;  %v1874_v49 = vmul.f32 %v5133_v43, %v1818_v3  ;;  %v5012_v3 = vld [vmem:[#allocation2 + $0x78] sm:$0xff]  }
 0x6cf   : > { %v5137_v50 = vpop.eup %5136  ;;  %v1875_v52 = vmul.f32 %v5135_v45, %v1819_v8 }
 0x6d0   : > { %v5139_v53 = vpop.eup %5138  ;;  %v1881_v55 = vpack.c.bf16 %v1874_v49, %v1873_v44  ;;  %v1876_v19 = vmul.f32 %v5137_v50, %v1820_v9  ;;  %v5013_v9 = vld [vmem:[#allocation2 + $0x80] sm:$0xff]  }
 0x6d1   : > { %v5141_v21 = vpop.eup %5140  ;;  %v1877_v47 = vmul.f32 %v5139_v53, %v1821_v11  ;;  %4771 = vmatpush3.bf16.msra.mxu1 %v5013_v9  ;;  %v5014_v11 = vld [vmem:[#allocation2 + $0x88] sm:$0xff]  }
 0x6d2   : > { %v5143_v35 = vpop.eup %5142  ;;  %4762 = vmatprep.mubr.msk.bf16.mxu0 %vm717_vm7, %v1881_v55  ;;  %v1882_v24 = vpack.c.bf16 %v1876_v19, %v1875_v52  ;;  %v1878_v27 = vmul.f32 %v5141_v21, %v1822_v62  ;;  %4772 = vmatprep.subr.bf16.mxu1 %v5369_v1  ;;  %v1893_v62 = vrot.slane %v5805_v13, %v5668_v22 }
 0x6d3   : > { %v5145_v30 = vpop.eup %5144  ;;  %v1879_v4 = vmul.f32 %v5143_v35, %v1823_v16 }
 0x6d4   : > { %4763 = vmatmul.mubr.msk.bf16.vlgmr.msra.gmra.mrb[24].mxu0 %vm717_vm7, %v1882_v24  ;;  %v1883_v2 = vpack.c.bf16 %v1878_v27, %v1877_v47  ;;  %v1880_v25 = vmul.f32 %v5145_v30, %v1824_v18 }
 0x6d5   : > { %4779 = vmatpush3.bf16.msra.mxu0 %v5011_v23  ;;  %4773 = vmatpush3.bf16.msra.mxu1 %v5014_v11 }
 0x6d6   : > { %4766 = vmatprep.mubr.msk.bf16.mxu0 %vm717_vm7, %v1883_v2  ;;  %v1884_v8 = vpack.c.bf16 %v1880_v25, %v1879_v4  ;;  %4780 = vmatprep.subr.bf16.mxu0 %v5369_v1 }
 0x6d7   : > { %4786 = vmatprep.subr.bf16.mxu1 %v5369_v1 }
 0x6d9   : > { %4781 = vmatpush3.bf16.msra.mxu0 %v5012_v3 }
 0x6da   : > { %4792 = vmatprep.subr.bf16.mxu0 %v5369_v1 }
 0x6dc   : > { %4767 = vmatmul.mubr.msk.bf16.gmra.mrb[28].mxu0 %vm717_vm7, %v1884_v8 }
 0x6dd   : > { %4782 = vmatprep.mubr.msk.bf16.mxu0 %vm5370_vm0, %v5369_v1 }
 0x6e4   : > { %4783 = vmatmul.mubr.msk.bf16.vlgmr.msra.gmra.mrb[32].mxu0 %vm717_vm7, %v5790_v29 }
 0x6e5   : > { %4796 = vmatprep.mubr.msk.bf16.mxu0 %vm5370_vm0, %v5369_v1 }
 0x7a7   : > { %v4764_v16 = vpop.f32.mrb[24].mxu0 }
 0x7a8   : > { %v1961_v18 = vadd.f32 %v4764_v16, %v1893_v62  ;;  %v1952_v31 = vpop.f32.mrb[25].mxu0 }
 0x7a9   : > { %v1953_v26 = vadd.f32 %v1952_v31, %v1893_v62  ;;  %v4765_v32 = vpop.f32.mrb[26].mxu0 }
 0x7aa   : > { %v4426_v29 = vmul.f32 -1.442695, %v1961_v18  ;;  %v1964_v57 = vadd.f32 %v4765_v32, %v1893_v62  ;;  %v1955_v37 = vpop.f32.mrb[27].mxu0 }
 0x7ab   : > { %v4424_v51 = vmul.f32 -1.442695, %v1953_v26  ;;  %v1956_v39 = vadd.f32 %v1955_v37, %v1893_v62 }
 0x7ac   : > { %5146 = vpow2.f32 %v4426_v29  ;;  %v4427_v28 = vmul.f32 -1.442695, %v1964_v57 }
 0x7ad   : > { %5148 = vpow2.f32 %v4424_v51  ;;  %v4425_v59 = vmul.f32 -1.442695, %v1956_v39 }
 0x7ae   : > { %5150 = vpow2.f32 %v4427_v28 }
 0x7af   : > { %5152 = vpow2.f32 %v4425_v59  ;;  %v4768_v56 = vpop.f32.mrb[28].mxu0 }
 0x7b0   : > { %v5833_v63 = vadd.f32 %v4768_v56, %v1893_v62  ;;  %v1968_v38 = vpop.f32.mrb[29].mxu0 }
 0x7b1   : > { %v5835_v58 = vadd.f32 %v1968_v38, %v1893_v62  ;;  %v4769_v40 = vpop.f32.mrb[30].mxu0 }
 0x7b2   : > { %v4430_v41 = vmul.f32 -1.442695, %v5833_v63  ;;  %v5838_v43 = vadd.f32 %v4769_v40, %v1893_v62  ;;  %v1971_v44 = vpop.f32.mrb[31].mxu0 }
 0x7b3   : > { %v4428_v45 = vmul.f32 -1.442695, %v5835_v58  ;;  %v5841_v49 = vadd.f32 %v1971_v44, %v1893_v62 }
 0x7b4   : > { %5154 = vpow2.f32 %v4430_v41  ;;  %v4431_v50 = vmul.f32 -1.442695, %v5838_v43 }
 0x7b5   : > { %5156 = vpow2.f32 %v4428_v45  ;;  %v4429_v52 = vmul.f32 -1.442695, %v5841_v49 }
 0x7b6   : > { %v5147_v53 = vpop.eup %5146  ;;  %5158 = vpow2.f32 %v4431_v50 }
 0x7b7   : > { %v5149_v55 = vpop.eup %5148  ;;  %v2009_v19 = vadd.f32 1.0, %v5147_v53  ;;  %5160 = vpow2.f32 %v4429_v52  ;;  %v5845_v21 = vpop.f32.mrb[32].mxu0 }
 0x7b8   : > { %v5151_v47 = vpop.eup %5150  ;;  %v2007_v23 = vadd.f32 1.0, %v5149_v55  ;;  %v4784_v35 = vpop.f32.mrb[33].mxu0 }
 0x7b9   : > { %v5153_v24 = vpop.eup %5152  ;;  %5162 = vrcp.f32 %v2009_v19  ;;  %v2010_v27 = vadd.f32 1.0, %v5151_v47  ;;  %v2249_v30 = vpop.f32.mrb[34].mxu0 }
 0x7ba   : > { %5164 = vrcp.f32 %v2007_v23  ;;  %v2008_v4 = vadd.f32 1.0, %v5153_v24  ;;  %v4785_v2 = vpop.f32.mrb[35].mxu0 }
 0x7bb   : > { %5166 = vrcp.f32 %v2010_v27 }
 0x7bc   : > { %5168 = vrcp.f32 %v2008_v4 }
 0x7be   : > { %v5155_v25 = vpop.eup %5154 }
 0x7bf   : > { %v5157_v3 = vpop.eup %5156  ;;  %v2013_v8 = vadd.f32 1.0, %v5155_v25 }
 0x7c0   : > { %v5159_v9 = vpop.eup %5158  ;;  %v2011_v11 = vadd.f32 1.0, %v5157_v3 }
 0x7c1   : > { %v5161_v62 = vpop.eup %5160  ;;  %5170 = vrcp.f32 %v2013_v8  ;;  %v2014_v16 = vadd.f32 1.0, %v5159_v9 }
 0x7c2   : > { %5172 = vrcp.f32 %v2011_v11  ;;  %v2012_v31 = vadd.f32 1.0, %v5161_v62 }
 0x7c3   : > { %v5163_v32 = vpop.eup %5162  ;;  %5174 = vrcp.f32 %v2014_v16 }
 0x7c4   : > { %v5165_v29 = vpop.eup %5164  ;;  %v2033_v37 = vmul.f32 %v5163_v32, %v1961_v18  ;;  %5176 = vrcp.f32 %v2012_v31 }
 0x7c5   : > { %v5167_v51 = vpop.eup %5166  ;;  %v2031_v28 = vmul.f32 %v5165_v29, %v1953_v26 }
 0x7c6   : > { %v5169_v59 = vpop.eup %5168  ;;  %v2041_v56 = vmul.f32 %v2033_v37, %v5700_v5  ;;  %v2034_v38 = vmul.f32 %v5167_v51, %v1964_v57 }
 0x7c7   : > { %v2039_v40 = vmul.f32 %v2031_v28, %v5696_v46  ;;  %v2032_v41 = vmul.f32 %v5169_v59, %v1956_v39 }
 0x7c8   : > { %v2061_v44 = vsel %vm717_vm7, %v2041_v56, 0.0  ;;  %v2042_v45 = vmul.f32 %v2034_v38, %v5704_v20 }
 0x7c9   : > { %v2062_v50 = vrot.slane %v2061_v44, 4  ;;  %v2047_v52 = vsel %vm717_vm7, %v2039_v40, 0.0  ;;  %v2040_v53 = vmul.f32 %v2032_v41, %v5702_v17 }
 0x7ca   : > { %v2048_v18 = vrot.slane %v2047_v52, 4  ;;  %v2068_v55 = vsel %vm717_vm7, %v2042_v45, 0.0 }
 0x7cb   : > { %v5171_v26 = vpop.eup %5170  ;;  %v2063_v19 = vadd.f32 %v2062_v50, %v2061_v44  ;;  %v2069_v47 = vrot.slane %v2068_v55, 4  ;;  %v2054_v57 = vsel %vm717_vm7, %v2040_v53, 0.0 }
 0x7cc   : > { %v5173_v23 = vpop.eup %5172  ;;  %v2049_v35 = vadd.f32 %v2048_v18, %v2047_v52  ;;  %v2055_v39 = vrot.slane %v2054_v57, 4  ;;  %v2037_v24 = vmul.f32 %v5171_v26, %v5833_v63 }
 0x7cd   : > { %v5175_v27 = vpop.eup %5174  ;;  %v2064_v30 = vrot.slane %v2063_v19, 2  ;;  %v2070_v4 = vadd.f32 %v2069_v47, %v2068_v55  ;;  %v2035_v2 = vmul.f32 %v5173_v23, %v5835_v58 }
 0x7ce   : > { %v5177_v25 = vpop.eup %5176  ;;  %v2050_v3 = vrot.slane %v2049_v35, 2  ;;  %v2056_v8 = vadd.f32 %v2055_v39, %v2054_v57  ;;  %v2045_v9 = vmul.f32 %v2037_v24, %v5724_v0  ;;  %v2038_v11 = vmul.f32 %v5175_v27, %v5838_v43 }
 0x7cf   : > { %v2065_v62 = vadd.f32 %v2064_v30, %v2063_v19  ;;  %v2071_v16 = vrot.slane %v2070_v4, 2  ;;  %v2043_v31 = vmul.f32 %v2035_v2, %v5712_v60  ;;  %v2036_v32 = vmul.f32 %v5177_v25, %v5841_v49 }
 0x7d0   : > { %v2051_v29 = vadd.f32 %v2050_v3, %v2049_v35  ;;  %v2057_v63 = vrot.slane %v2056_v8, 2  ;;  %v2089_v37 = vsel %vm717_vm7, %v2045_v9, 0.0  ;;  %v2046_v51 = vmul.f32 %v2038_v11, %v5729_v14 }
 0x7d1   : > { %v2066_v58 = vrot.slane %v2065_v62, 1  ;;  %v2072_v28 = vadd.f32 %v2071_v16, %v2070_v4  ;;  %v2090_v59 = vrot.slane %v2089_v37, 4  ;;  %v2075_v56 = vsel %vm717_vm7, %v2043_v31, 0.0 }
 0x7d2   : > { %v2052_v38 = vrot.slane %v2051_v29, 1  ;;  %v2058_v40 = vadd.f32 %v2057_v63, %v2056_v8  ;;  %v2076_v43 = vrot.slane %v2075_v56, 4  ;;  %v2096_v41 = vsel %vm717_vm7, %v2046_v51, 0.0 }
 0x7d3   : > { %v2067_v44 = vadd.f32 %v2066_v58, %v2065_v62  ;;  %v2073_v45 = vrot.slane %v2072_v28, 1  ;;  %v2091_v50 = vadd.f32 %v2090_v59, %v2089_v37  ;;  %v2097_v49 = vrot.slane %v2096_v41, 4 }
 0x7d4   : > { %v2053_v52 = vadd.f32 %v2052_v38, %v2051_v29  ;;  %v2059_v53 = vrot.slane %v2058_v40, 1  ;;  %v2077_v18 = vadd.f32 %v2076_v43, %v2075_v56  ;;  %v2044_v55 = vmul.f32 %v2036_v32, %v5717_v34 }
 0x7d5   : > { %v2074_v26 = vadd.f32 %v2073_v45, %v2072_v28  ;;  %v2092_v19 = vrot.slane %v2091_v50, 2  ;;  %v2098_v47 = vadd.f32 %v2097_v49, %v2096_v41  ;;  %v2110_v24 = vpack.c.bf16 %v2067_v44, %v2067_v44 }
 0x7d6   : > { %v2108_v57 = vpack.c.bf16 %v2053_v52, %v2053_v52  ;;  %v2060_v23 = vadd.f32 %v2059_v53, %v2058_v40  ;;  %v2078_v35 = vrot.slane %v2077_v18, 2  ;;  %v2082_v39 = vsel %vm717_vm7, %v2044_v55, 0.0 }
 0x7d7   : > { %v2111_v27 = vpack.c.bf16 %v2074_v26, %v2074_v26  ;;  %v2093_v30 = vadd.f32 %v2092_v19, %v2091_v50  ;;  %v2099_v4 = vrot.slane %v2098_v47, 2  ;;  %v2083_v3 = vrot.slane %v2082_v39, 4 }
 0x7d8   : > { %v2109_v2 = vpack.c.bf16 %v2060_v23, %v2060_v23  ;;  %v2079_v25 = vadd.f32 %v2078_v35, %v2077_v18  ;;  %v2129_v9 = vunpack.c.l.b16 %v2108_v57  ;;  %v2131_v31 = vunpack.c.l.b16 %v2110_v24  ;;  %v5015_v23 = vld [vmem:[#allocation2 + $0xa0] sm:$0xff]   ;;  %v5017_v24 = vld [vmem:[#allocation2 + $0x98] sm:$0xff]  }
 0x7d9   : > { %v2100_v8 = vadd.f32 %v2099_v4, %v2098_v47  ;;  %v2084_v16 = vadd.f32 %v2083_v3, %v2082_v39  ;;  %v2132_v32 = vunpack.c.l.b16 %v2111_v27  ;;  %v2094_v29 = vrot.slane %v2093_v30, 1  ;;  %v5016_v39 = vld [vmem:[#allocation2 + $0x90] sm:$0xff]   ;;  %v5018_v4 = vld [vmem:[%s6210_s5 + $0x20] sm:$0xff]  }
 0x7da   : > { %v2130_v11 = vunpack.c.l.b16 %v2109_v2  ;;  %v2080_v62 = vrot.slane %v2079_v25, 1  ;;  %4793 = vmatpush3.bf16.msra.mxu0 %v5016_v39  ;;  %v2558_v27 = vld [vmem:[#allocation2 + $0x110] sm:$0xf] }
 0x7db   : > { %v2101_v51 = vrot.slane %v2100_v8, 1  ;;  %v2085_v58 = vrot.slane %v2084_v16, 2  ;;  %v2095_v40 = vadd.f32 %v2094_v29, %v2093_v30  ;;  %4794 = vmatprep.subr.bf16.mxu0 %v5369_v1  ;;  %v2560_v30 = vand.u32 %v2558_v27, %v5560_v15  ;;  %v5021_v27 = vld [vmem:[#allocation2 + $0xc8] sm:$0xff]  }
 0x7dc   : > { %v2137_v63 = vsel %vm1320_vm8, %v2130_v11, %v2129_v9  ;;  %v2081_v37 = vadd.f32 %v2080_v62, %v2079_v25  ;;  %v2305_v11 = vrot.slane %v5805_v13, %v5761_v7 }
 0x7dd   : > { %v2138_v28 = vsel %vm1322_vm9, %v2131_v31, %v2137_v63  ;;  %v2086_v38 = vadd.f32 %v2085_v58, %v2084_v16  ;;  %v2102_v41 = vadd.f32 %v2101_v51, %v2100_v8  ;;  %v2114_v49 = vpack.c.bf16 %v2095_v40, %v2095_v40 }
 0x7de   : > { %v2112_v59 = vpack.c.bf16 %v2081_v37, %v2081_v37  ;;  %v2139_v56 = vsel %vm1324_vm10, %v2132_v32, %v2138_v28  ;;  %4795 = vmatpush3.bf16.msra.mxu0 %v5017_v24  ;;  %v5020_v24 = vld [vmem:[#allocation2 + $0xc0] sm:$0xff]  }
 0x7df   : > { %v2087_v44 = vrot.slane %v2086_v38, 1  ;;  %v2115_v52 = vpack.c.bf16 %v2102_v41, %v2102_v41  ;;  %v2135_v55 = vunpack.c.l.b16 %v2114_v49  ;;  %4808 = vmatprep.subr.bf16.mxu0 %v2560_v30 }
 0x7e0   : > { %v2133_v43 = vunpack.c.l.b16 %v2112_v59 }
 0x7e1   : > { %v2088_v50 = vadd.f32 %v2087_v44, %v2086_v38  ;;  %v2136_v26 = vunpack.c.l.b16 %v2115_v52  ;;  %v2379_v38 = vrot.slane %v5805_v13, %v5781_v54 }
 0x7e2   : > { %v2140_v45 = vsel %vm1326_vm11, %v2133_v43, %v2139_v56  ;;  %v5019_v56 = vld [vmem:[%s6210_s5 + $0x28] sm:$0xff]  }
 0x7e3   : > { %v2113_v53 = vpack.c.bf16 %v2088_v50, %v2088_v50 }
 0x7e5   : > { %v2134_v18 = vunpack.c.l.b16 %v2113_v53 }
 0x7e7   : > { %v2141_v19 = vsel %vm1328_vm12, %v2134_v18, %v2140_v45 }
 0x7e8   : > { %v2142_v47 = vsel %vm1330_vm13, %v2135_v55, %v2141_v19 }
 0x7e9   : > { %v2143_v57 = vsel %vm1332_vm14, %v2136_v26, %v2142_v47 }
 0x7ea   : > { %v2144_v35 = vpack.c.b16 %v2143_v57, %v2143_v57 }
 0x7ec   : > { %4775 = vmatmul.mubr.msk.bf16.vlgmr.msra.gmra.mrb[28].mxu1 %vm717_vm7, %v2144_v35  ;;  %v4140_v35 = vld [vmem:[%s442_s21] sm:$0xff] }
 0x7ed   : > { %4787 = vmatpush3.bf16.msra.mxu1 %v5015_v23  ;;  %4788 = vmatprep.mubr.msk.bf16.mxu1 %vm5370_vm0, %v5369_v1 }
 0x7ee   : > { %4800 = vmatprep.subr.bf16.mxu1 %v5369_v1 }
 0x7f4   : > { %4789 = vmatmul.mubr.msk.bf16.vlgmr.msra.gmra.mrb[32].mxu1 %vm655_vm1, %v5505_v10 }
 0x7f5   : > { %4804 = vmatprep.mubr.msk.bf16.mxu1 %vm5370_vm0, %v5369_v1  ;;  %4801 = vmatpush3.bf16.msra.mxu1 %v5018_v4 }
 0x7f6   : > { %4802 = vmatprep.subr.bf16.mxu1 %v5369_v1 }
 0x7f9   : > { %4803 = vmatpush3.bf16.msra.mxu1 %v5019_v56 }
 0x7fa   : > { %4818 = vmatprep.subr.bf16.mxu1 %v5020_v24 }
 0x8bf   : > { %v2194_v2 = vpop.f32.mrb[28].mxu1 }
 0x8c0   : > { %v2247_v25 = vadd.f32 %v5845_v21, %v2194_v2  ;;  %v4776_v3 = vpop.f32.mrb[29].mxu1 }
 0x8c1   : > { %v2197_v8 = vpop.f32.mrb[30].mxu1 }
 0x8c2   : > { %v4777_v9 = vpop.f32.mrb[31].mxu1 }
 0x8c7   : > { %v2295_v62 = vpop.f32.mrb[32].mxu1 }
 0x8c8   : > { %v2301_v16 = vadd.f32 %v2295_v62, %v2247_v25  ;;  %v4790_v31 = vpop.f32.mrb[33].mxu1 }
 0x8c9   : > { %v2298_v32 = vpop.f32.mrb[34].mxu1 }
 0x8ca   : > { %v2306_v29 = vadd.f32 %v2305_v11, %v2301_v16  ;;  %v4791_v63 = vpop.f32.mrb[35].mxu1  ;;  %v5940_v32 = vld [vmem:[%s6212_s7 + $0x8] sm:$0xf] }
 0x8cc   : > { %v4440_v37 = vmul.f32 -1.442695, %v2306_v29 }
 0x8ce   : > { %5178 = vpow2.f32 %v4440_v37  ;;  %v2548_v37 = vrot.slane %v5940_v32, %v5509_v12 }
 0x8d8   : > { %v5179_v51 = vpop.eup %5178 }
 0x8d9   : > { %v2310_v58 = vadd.f32 1.0, %v5179_v51 }
 0x8db   : > { %5180 = vrcp.f32 %v2310_v58 }
 0x8e5   : > { %v5181_v28 = vpop.eup %5180 }
 0x8e6   : > { %v2313_v59 = vmul.f32 %v5181_v28, %v2306_v29 }
 0x8e8   : > { %v2314_v21 = vpack.c.bf16 %v2313_v59, %v2313_v59 }
 0x8ea   : > { %4797 = vmatmul.mubr.msk.bf16.vlgmr.msra.gmra.mrb[36].mxu0 %vm717_vm7, %v2314_v21 }
 0x8eb   : > { %4810 = vmatprep.mubr.msk.bf16.mxu0 %vm876_vm6, %v5566_v33  ;;  %4809 = vmatpush3.bf16.msra.mxu0 %v2560_v30 }
 0x8ec   : > { %4830 = vmatprep.subr.bf16.mxu0 %v5369_v1 }
 0x8f2   : > { %4811 = vmatmul.mubr.msk.bf16.vlgmr.msra.gmra.mrb[40].mxu0 %vm876_vm6, %v5570_v36 }
 0x8f3   : > { %4814 = vmatprep.mubr.msk.bf16.mxu0 %vm876_vm6, %v5578_v42 }
 0x8fa   : > { %4815 = vmatmul.mubr.msk.bf16.gmra.mrb[44].mxu0 %vm876_vm6, %v5584_v48 }
 0x8fb   : > { %4834 = vmatprep.mubr.msk.bf16.mxu0 %vm5370_vm0, %v5369_v1 }
 0x9bd   : > { %v2369_v40 = vpop.f32.mrb[36].mxu0 }
 0x9be   : > { %v2375_v43 = vadd.f32 %v2369_v40, %v5786_v61  ;;  %v4798_v41 = vpop.f32.mrb[37].mxu0 }
 0x9bf   : > { %v2372_v44 = vpop.f32.mrb[38].mxu0 }
 0x9c0   : > { %v5909_v45 = vadd.f32 %v2379_v38, %v2375_v43  ;;  %v4799_v50 = vpop.f32.mrb[39].mxu0 }
 0x9c2   : > { %v5913_v49 = vpack.c.bf16 %v5909_v45, %v5909_v45 }
 0x9c4   : > { %4805 = vmatmul.mubr.msk.bf16.vlgmr.msra.gmra.mrb[36].mxu1 %vm717_vm7, %v5913_v49 }
 0x9c5   : > { %v5917_v52 = vpop.f32.mrb[40].mxu0  ;;  %4819 = vmatpush3.bf16.msra.mxu1 %v5020_v24 }
 0x9c6   : > { %v2596_v53 = vpop.f32.mrb[41].mxu0  ;;  %4820 = vmatprep.subr.bf16.mxu1 %v5021_v27 }
 0x9c7   : > { %v5919_v13 = vpop.f32.mrb[42].mxu0 }
 0x9c8   : > { %v2599_v18 = vpop.f32.mrb[43].mxu0 }
 0x9c9   : > { %4821 = vmatpush3.bf16.msra.mxu1 %v5021_v27 }
 0x9ca   : > { %4838 = vmatprep.subr.bf16.mxu1 %v5369_v1 }
 0x9cd   : > { %v5921_v55 = vpop.f32.mrb[44].mxu0 }
 0x9ce   : > { %v2612_v61 = vpop.f32.mrb[45].mxu0 }
 0x9cf   : > { %v5923_v26 = vpop.f32.mrb[46].mxu0 }
 0x9d0   : > { %v2615_v19 = vpop.f32.mrb[47].mxu0 }
 0xa97   : > { %v2438_v47 = vpop.f32.mrb[36].mxu1 }
 0xa98   : > { %2534 = vrot.lane.b32.xlu1 %v2438_v47, %s5374_s19  ;;  %v4806_v57 = vpop.f32.mrb[37].mxu1  ;;  %v2445_v30 = vcombine.high %v2438_v47, %v2438_v47  ;;  %v2452_v4 = vrot.slane %v2438_v47, %v5500_v6 }
 0xa99   : > { %v2441_v23 = vpop.f32.mrb[38].mxu1 }
 0xa9a   : > { %v4807_v39 = vpop.f32.mrb[39].mxu1  ;;  %v2459_v2 = vrot.slane %v2445_v30, %v5500_v6  ;;  %v2460_v25 = vcombine.high %v2452_v4, %v2452_v4  ;;  %v2468_v8 = vrot.slane %v2452_v4, %v5500_v6 }
 0xa9c   : > { %4143 = vperm.xlu1 %4992, %v4140_v35   ;;  %v2461_v3 = vcombine.high %v2459_v2, %v2459_v2  ;;  %v2482_v9 = vrot.slane %v2460_v25, %v5500_v6  ;;  %v2475_v11 = vrot.slane %v2459_v2, %v5500_v6  ;;  %v2490_v16 = vcombine.high %v2468_v8, %v2468_v8 }
 0xa9d   : > { %v2497_v51 = vrot.slane %v2468_v8, %v5509_v12 }
 0xa9e   : > { %v2489_v62 = vrot.slane %v2461_v3, %v5500_v6  ;;  %v2492_v31 = vcombine.high %v2482_v9, %v2482_v9  ;;  %v2491_v29 = vcombine.high %v2475_v11, %v2475_v11  ;;  %v2501_v58 = vrot.slane %v2482_v9, %v5509_v12 }
 0xa9f   : > { %v2505_v28 = vrot.slane %v2490_v16, %v5509_v12  ;;  %v2513_v21 = vrot.slane %v2475_v11, %v5509_v12 }
 0xaa0   : > { %v2493_v63 = vcombine.high %v2489_v62, %v2489_v62  ;;  %v2509_v59 = vrot.slane %v2492_v31, %v5509_v12  ;;  %v2517_v56 = vrot.slane %v2489_v62, %v5509_v12  ;;  %v2521_v38 = vrot.slane %v2491_v29, %v5509_v12 }
 0xaa2   : > { %v2525_v40 = vrot.slane %v2493_v63, %v5509_v12 }
 0xb0a   : > { %v2535_v43 = vpop.permute.xlu1 %2534 }
 0xb0b   : > { %v2539_v41 = vadd.f32 %v2535_v43, %v2505_v28  ;;  %v2540_v44 = vadd.f32 %v2535_v43, %v2509_v59  ;;  %v2537_v50 = vadd.f32 %v2535_v43, %v2497_v51  ;;  %v2538_v47 = vadd.f32 %v2535_v43, %v2501_v58 }
 0xb0c   : > { %v2541_v57 = vadd.f32 %v2535_v43, %v2513_v21  ;;  %v2542_v23 = vadd.f32 %v2535_v43, %v2517_v56  ;;  %v2543_v35 = vadd.f32 %v2535_v43, %v2521_v38  ;;  %v2544_v39 = vadd.f32 %v2535_v43, %v2525_v40 }
 0xb0d   : > { %v2549_v24 = vadd.f32 %v2548_v37, %v2537_v50  ;;  %v2550_v27 = vadd.f32 %v2548_v37, %v2538_v47  ;;  %v2551_v30 = vadd.f32 %v2548_v37, %v2539_v41  ;;  %v2552_v4 = vadd.f32 %v2548_v37, %v2540_v44 }
 0xb0e   : > { %v2553_v2 = vadd.f32 %v2548_v37, %v2541_v57  ;;  %v2554_v25 = vadd.f32 %v2548_v37, %v2542_v23  ;;  %v2555_v3 = vadd.f32 %v2548_v37, %v2543_v35  ;;  %v2556_v8 = vadd.f32 %v2548_v37, %v2544_v39 }
 0xb0f   : > { %v2627_v9 = vadd.f32 %v2596_v53, %v2549_v24  ;;  %v2628_v11 = vadd.f32 %v2599_v18, %v2550_v27  ;;  %v2629_v62 = vadd.f32 %v5917_v52, %v2551_v30  ;;  %v2630_v16 = vadd.f32 %v5919_v13, %v2552_v4 }
 0xb10   : > { %v2631_v31 = vadd.f32 %v2612_v61, %v2553_v2  ;;  %v2632_v29 = vadd.f32 %v2615_v19, %v2554_v25  ;;  %v2633_v63 = vadd.f32 %v5921_v55, %v2555_v3  ;;  %v2634_v51 = vadd.f32 %v5923_v26, %v2556_v8 }
 0xb11   : > { %v4456_v58 = vmul.f32 -1.442695, %v2627_v9  ;;  %v4457_v28 = vmul.f32 -1.442695, %v2628_v11  ;;  %v4458_v59 = vmul.f32 -1.442695, %v2629_v62 }
 0xb12   : > { %v4459_v21 = vmul.f32 -1.442695, %v2630_v16  ;;  %v4460_v56 = vmul.f32 -1.442695, %v2631_v31  ;;  %v4461_v37 = vmul.f32 -1.442695, %v2632_v29 }
 0xb13   : > { %5182 = vpow2.f32 %v4456_v58  ;;  %v4462_v53 = vmul.f32 -1.442695, %v2633_v63  ;;  %v4463_v52 = vmul.f32 -1.442695, %v2634_v51 }
 0xb14   : > { %5184 = vpow2.f32 %v4457_v28 }
 0xb15   : > { %5186 = vpow2.f32 %v4458_v59 }
 0xb16   : > { %5188 = vpow2.f32 %v4459_v21  ;;  %v5022_v21 = vld [vmem:[#allocation2 + $0xd0] sm:$0xff]  }
 0xb17   : > { %5190 = vpow2.f32 %v4460_v56 }
 0xb18   : > { %5192 = vpow2.f32 %v4461_v37 }
 0xb19   : > { %5194 = vpow2.f32 %v4462_v53 }
 0xb1a   : > { %5196 = vpow2.f32 %v4463_v52 }
 0xb1d   : > { %v5183_v13 = vpop.eup %5182 }
 0xb1e   : > { %v5185_v18 = vpop.eup %5184  ;;  %v2659_v55 = vadd.f32 1.0, %v5183_v13 }
 0xb1f   : > { %v5187_v61 = vpop.eup %5186  ;;  %v2660_v26 = vadd.f32 1.0, %v5185_v18 }
 0xb20   : > { %v5189_v19 = vpop.eup %5188  ;;  %5198 = vrcp.f32 %v2659_v55  ;;  %v2661_v38 = vadd.f32 1.0, %v5187_v61 }
 0xb21   : > { %v5191_v40 = vpop.eup %5190  ;;  %5200 = vrcp.f32 %v2660_v26  ;;  %v2662_v43 = vadd.f32 1.0, %v5189_v19 }
 0xb22   : > { %v5193_v41 = vpop.eup %5192  ;;  %5202 = vrcp.f32 %v2661_v38  ;;  %v2663_v44 = vadd.f32 1.0, %v5191_v40 }
 0xb23   : > { %v5195_v50 = vpop.eup %5194  ;;  %5204 = vrcp.f32 %v2662_v43  ;;  %v2664_v47 = vadd.f32 1.0, %v5193_v41 }
 0xb24   : > { %v5197_v57 = vpop.eup %5196  ;;  %5206 = vrcp.f32 %v2663_v44  ;;  %v2665_v23 = vadd.f32 1.0, %v5195_v50 }
 0xb25   : > { %5208 = vrcp.f32 %v2664_v47  ;;  %v2666_v35 = vadd.f32 1.0, %v5197_v57 }
 0xb26   : > { %5210 = vrcp.f32 %v2665_v23 }
 0xb27   : > { %5212 = vrcp.f32 %v2666_v35 }
 0xb2a   : > { %v5199_v39 = vpop.eup %5198 }
 0xb2b   : > { %v5201_v24 = vpop.eup %5200  ;;  %v2683_v27 = vmul.f32 %v5199_v39, %v2627_v9 }
 0xb2c   : > { %v5203_v30 = vpop.eup %5202  ;;  %v2684_v4 = vmul.f32 %v5201_v24, %v2628_v11  ;;  %v5023_v11 = vld [vmem:[#allocation2 + $0xd8] sm:$0xff]  }
 0xb2d   : > { %v5205_v2 = vpop.eup %5204  ;;  %v2685_v25 = vmul.f32 %v5203_v30, %v2629_v62 }
 0xb2e   : > { %v5207_v3 = vpop.eup %5206  ;;  %v2691_v8 = vpack.c.bf16 %v2684_v4, %v2683_v27  ;;  %v2686_v58 = vmul.f32 %v5205_v2, %v2630_v16  ;;  %v5024_v16 = vld [vmem:[#allocation2 + $0xe0] sm:$0xff]  }
 0xb2f   : > { %v5209_v28 = vpop.eup %5208  ;;  %v2687_v59 = vmul.f32 %v5207_v3, %v2631_v31  ;;  %4831 = vmatpush3.bf16.msra.mxu0 %v5024_v16  ;;  %v5025_v31 = vld [vmem:[#allocation2 + $0xe8] sm:$0xff]  }
 0xb30   : > { %v5211_v56 = vpop.eup %5210  ;;  %4822 = vmatprep.mubr.msk.bf16.mxu1 %vm717_vm7, %v2691_v8  ;;  %v2692_v37 = vpack.c.bf16 %v2686_v58, %v2685_v25  ;;  %v2688_v53 = vmul.f32 %v5209_v28, %v2632_v29  ;;  %4832 = vmatprep.subr.bf16.mxu0 %v5369_v1  ;;  %v2703_v29 = vrot.slane %v5940_v32, %v5668_v22 }
 0xb31   : > { %v5213_v52 = vpop.eup %5212  ;;  %v2689_v13 = vmul.f32 %v5211_v56, %v2633_v63 }
 0xb32   : > { %4823 = vmatmul.mubr.msk.bf16.vlgmr.msra.gmra.mrb[40].mxu1 %vm717_vm7, %v2692_v37  ;;  %v2693_v9 = vpack.c.bf16 %v2688_v53, %v2687_v59  ;;  %v2690_v18 = vmul.f32 %v5213_v52, %v2634_v51 }
 0xb33   : > { %4839 = vmatpush3.bf16.msra.mxu1 %v5022_v21  ;;  %4833 = vmatpush3.bf16.msra.mxu0 %v5025_v31 }
 0xb34   : > { %4826 = vmatprep.mubr.msk.bf16.mxu1 %vm717_vm7, %v2693_v9  ;;  %v2694_v62 = vpack.c.bf16 %v2690_v18, %v2689_v13  ;;  %4840 = vmatprep.subr.bf16.mxu1 %v5369_v1 }
 0xb35   : > { %4846 = vmatprep.subr.bf16.mxu0 %v5369_v1 }
 0xb37   : > { %4841 = vmatpush3.bf16.msra.mxu1 %v5023_v11 }
 0xb38   : > { %4852 = vmatprep.subr.bf16.mxu1 %v5369_v1 }
 0xb3a   : > { %4827 = vmatmul.mubr.msk.bf16.gmra.mrb[44].mxu1 %vm717_vm7, %v2694_v62 }
 0xb3b   : > { %4842 = vmatprep.mubr.msk.bf16.mxu1 %vm5370_vm0, %v5369_v1 }
 0xb42   : > { %4843 = vmatmul.mubr.msk.bf16.vlgmr.msra.gmra.mrb[48].mxu1 %vm717_vm7, %v5913_v49 }
 0xb43   : > { %4856 = vmatprep.mubr.msk.bf16.mxu1 %vm5370_vm0, %v5369_v1 }
 0xc05   : > { %v4824_v63 = vpop.f32.mrb[40].mxu1 }
 0xc06   : > { %v2771_v51 = vadd.f32 %v4824_v63, %v2703_v29  ;;  %v2762_v55 = vpop.f32.mrb[41].mxu1 }
 0xc07   : > { %v2763_v61 = vadd.f32 %v2762_v55, %v2703_v29  ;;  %v4825_v26 = vpop.f32.mrb[42].mxu1 }
 0xc08   : > { %v4472_v49 = vmul.f32 -1.442695, %v2771_v51  ;;  %v2774_v19 = vadd.f32 %v4825_v26, %v2703_v29  ;;  %v2765_v38 = vpop.f32.mrb[43].mxu1 }
 0xc09   : > { %v4470_v40 = vmul.f32 -1.442695, %v2763_v61  ;;  %v2766_v43 = vadd.f32 %v2765_v38, %v2703_v29 }
 0xc0a   : > { %5214 = vpow2.f32 %v4472_v49  ;;  %v4473_v41 = vmul.f32 -1.442695, %v2774_v19 }
 0xc0b   : > { %5216 = vpow2.f32 %v4470_v40  ;;  %v4471_v44 = vmul.f32 -1.442695, %v2766_v43 }
 0xc0c   : > { %5218 = vpow2.f32 %v4473_v41 }
 0xc0d   : > { %5220 = vpow2.f32 %v4471_v44  ;;  %v4828_v50 = vpop.f32.mrb[44].mxu1 }
 0xc0e   : > { %v5972_v47 = vadd.f32 %v4828_v50, %v2703_v29  ;;  %v2778_v57 = vpop.f32.mrb[45].mxu1 }
 0xc0f   : > { %v5974_v23 = vadd.f32 %v2778_v57, %v2703_v29  ;;  %v4829_v35 = vpop.f32.mrb[46].mxu1 }
 0xc10   : > { %v4476_v39 = vmul.f32 -1.442695, %v5972_v47  ;;  %v5977_v24 = vadd.f32 %v4829_v35, %v2703_v29  ;;  %v2781_v27 = vpop.f32.mrb[47].mxu1 }
 0xc11   : > { %v4474_v30 = vmul.f32 -1.442695, %v5974_v23  ;;  %v5980_v4 = vadd.f32 %v2781_v27, %v2703_v29 }
 0xc12   : > { %5222 = vpow2.f32 %v4476_v39  ;;  %v4477_v2 = vmul.f32 -1.442695, %v5977_v24 }
 0xc13   : > { %5224 = vpow2.f32 %v4474_v30  ;;  %v4475_v25 = vmul.f32 -1.442695, %v5980_v4 }
 0xc14   : > { %v5215_v3 = vpop.eup %5214  ;;  %5226 = vpow2.f32 %v4477_v2 }
 0xc15   : > { %v5217_v8 = vpop.eup %5216  ;;  %v2819_v58 = vadd.f32 1.0, %v5215_v3  ;;  %5228 = vpow2.f32 %v4475_v25  ;;  %v5984_v28 = vpop.f32.mrb[48].mxu1 }
 0xc16   : > { %v5219_v59 = vpop.eup %5218  ;;  %v2817_v21 = vadd.f32 1.0, %v5217_v8  ;;  %v4844_v56 = vpop.f32.mrb[49].mxu1 }
 0xc17   : > { %v5221_v37 = vpop.eup %5220  ;;  %5230 = vrcp.f32 %v2819_v58  ;;  %v2820_v53 = vadd.f32 1.0, %v5219_v59  ;;  %v3059_v52 = vpop.f32.mrb[50].mxu1 }
 0xc18   : > { %5232 = vrcp.f32 %v2817_v21  ;;  %v2818_v13 = vadd.f32 1.0, %v5221_v37  ;;  %v4845_v9 = vpop.f32.mrb[51].mxu1 }
 0xc19   : > { %5234 = vrcp.f32 %v2820_v53 }
 0xc1a   : > { %5236 = vrcp.f32 %v2818_v13 }
 0xc1c   : > { %v5223_v18 = vpop.eup %5222 }
 0xc1d   : > { %v5225_v11 = vpop.eup %5224  ;;  %v2823_v62 = vadd.f32 1.0, %v5223_v18 }
 0xc1e   : > { %v5227_v16 = vpop.eup %5226  ;;  %v2821_v31 = vadd.f32 1.0, %v5225_v11 }
 0xc1f   : > { %v5229_v29 = vpop.eup %5228  ;;  %5238 = vrcp.f32 %v2823_v62  ;;  %v2824_v63 = vadd.f32 1.0, %v5227_v16 }
 0xc20   : > { %5240 = vrcp.f32 %v2821_v31  ;;  %v2822_v55 = vadd.f32 1.0, %v5229_v29 }
 0xc21   : > { %v5231_v26 = vpop.eup %5230  ;;  %5242 = vrcp.f32 %v2824_v63 }
 0xc22   : > { %v5233_v49 = vpop.eup %5232  ;;  %v2843_v38 = vmul.f32 %v5231_v26, %v2771_v51  ;;  %5244 = vrcp.f32 %v2822_v55 }
 0xc23   : > { %v5235_v40 = vpop.eup %5234  ;;  %v2841_v41 = vmul.f32 %v5233_v49, %v2763_v61 }
 0xc24   : > { %v5237_v44 = vpop.eup %5236  ;;  %v2851_v50 = vmul.f32 %v2843_v38, %v5700_v5  ;;  %v2844_v57 = vmul.f32 %v5235_v40, %v2774_v19 }
 0xc25   : > { %v2849_v35 = vmul.f32 %v2841_v41, %v5696_v46  ;;  %v2842_v39 = vmul.f32 %v5237_v44, %v2766_v43 }
 0xc26   : > { %v2871_v27 = vsel %vm717_vm7, %v2851_v50, 0.0  ;;  %v2852_v30 = vmul.f32 %v2844_v57, %v5704_v20 }
 0xc27   : > { %v2872_v2 = vrot.slane %v2871_v27, 4  ;;  %v2857_v25 = vsel %vm717_vm7, %v2849_v35, 0.0  ;;  %v2850_v3 = vmul.f32 %v2842_v39, %v5702_v17 }
 0xc28   : > { %v2858_v51 = vrot.slane %v2857_v25, 4  ;;  %v2878_v8 = vsel %vm717_vm7, %v2852_v30, 0.0 }
 0xc29   : > { %v5239_v61 = vpop.eup %5238  ;;  %v2873_v58 = vadd.f32 %v2872_v2, %v2871_v27  ;;  %v2879_v59 = vrot.slane %v2878_v8, 4  ;;  %v2864_v19 = vsel %vm717_vm7, %v2850_v3, 0.0 }
 0xc2a   : > { %v5241_v21 = vpop.eup %5240  ;;  %v2859_v56 = vadd.f32 %v2858_v51, %v2857_v25  ;;  %v2865_v43 = vrot.slane %v2864_v19, 4  ;;  %v2847_v37 = vmul.f32 %v5239_v61, %v5972_v47 }
 0xc2b   : > { %v5243_v53 = vpop.eup %5242  ;;  %v2874_v52 = vrot.slane %v2873_v58, 2  ;;  %v2880_v13 = vadd.f32 %v2879_v59, %v2878_v8  ;;  %v2845_v9 = vmul.f32 %v5241_v21, %v5974_v23 }
 0xc2c   : > { %v5245_v18 = vpop.eup %5244  ;;  %v2860_v11 = vrot.slane %v2859_v56, 2  ;;  %v2866_v62 = vadd.f32 %v2865_v43, %v2864_v19  ;;  %v2855_v16 = vmul.f32 %v2847_v37, %v5724_v0  ;;  %v2848_v31 = vmul.f32 %v5243_v53, %v5977_v24 }
 0xc2d   : > { %v2875_v29 = vadd.f32 %v2874_v52, %v2873_v58  ;;  %v2881_v63 = vrot.slane %v2880_v13, 2  ;;  %v2853_v55 = vmul.f32 %v2845_v9, %v5712_v60  ;;  %v2846_v26 = vmul.f32 %v5245_v18, %v5980_v4 }
 0xc2e   : > { %v2861_v49 = vadd.f32 %v2860_v11, %v2859_v56  ;;  %v2867_v47 = vrot.slane %v2866_v62, 2  ;;  %v2899_v38 = vsel %vm717_vm7, %v2855_v16, 0.0  ;;  %v2856_v40 = vmul.f32 %v2848_v31, %v5729_v14 }
 0xc2f   : > { %v2876_v23 = vrot.slane %v2875_v29, 1  ;;  %v2882_v41 = vadd.f32 %v2881_v63, %v2880_v13  ;;  %v2900_v44 = vrot.slane %v2899_v38, 4  ;;  %v2885_v50 = vsel %vm717_vm7, %v2853_v55, 0.0 }
 0xc30   : > { %v2862_v57 = vrot.slane %v2861_v49, 1  ;;  %v2868_v35 = vadd.f32 %v2867_v47, %v2866_v62  ;;  %v2886_v24 = vrot.slane %v2885_v50, 4  ;;  %v2906_v39 = vsel %vm717_vm7, %v2856_v40, 0.0 }
 0xc31   : > { %v2877_v27 = vadd.f32 %v2876_v23, %v2875_v29  ;;  %v2883_v30 = vrot.slane %v2882_v41, 1  ;;  %v2901_v2 = vadd.f32 %v2900_v44, %v2899_v38  ;;  %v2907_v4 = vrot.slane %v2906_v39, 4 }
 0xc32   : > { %v2863_v25 = vadd.f32 %v2862_v57, %v2861_v49  ;;  %v2869_v3 = vrot.slane %v2868_v35, 1  ;;  %v2887_v51 = vadd.f32 %v2886_v24, %v2885_v50  ;;  %v2854_v8 = vmul.f32 %v2846_v26, %v5717_v34 }
 0xc33   : > { %v2884_v61 = vadd.f32 %v2883_v30, %v2882_v41  ;;  %v2902_v58 = vrot.slane %v2901_v2, 2  ;;  %v2908_v59 = vadd.f32 %v2907_v4, %v2906_v39  ;;  %v2920_v37 = vpack.c.bf16 %v2877_v27, %v2877_v27 }
 0xc34   : > { %v2918_v19 = vpack.c.bf16 %v2863_v25, %v2863_v25  ;;  %v2870_v21 = vadd.f32 %v2869_v3, %v2868_v35  ;;  %v2888_v56 = vrot.slane %v2887_v51, 2  ;;  %v2892_v43 = vsel %vm717_vm7, %v2854_v8, 0.0 }
 0xc35   : > { %v2921_v53 = vpack.c.bf16 %v2884_v61, %v2884_v61  ;;  %v2903_v52 = vadd.f32 %v2902_v58, %v2901_v2  ;;  %v2909_v13 = vrot.slane %v2908_v59, 2  ;;  %v2893_v11 = vrot.slane %v2892_v43, 4 }
 0xc36   : > { %v2919_v9 = vpack.c.bf16 %v2870_v21, %v2870_v21  ;;  %v2889_v18 = vadd.f32 %v2888_v56, %v2887_v51  ;;  %v2939_v16 = vunpack.c.l.b16 %v2918_v19  ;;  %v2941_v55 = vunpack.c.l.b16 %v2920_v37  ;;  %v5026_v21 = vld [vmem:[#allocation2 + $0x100] sm:$0xff]   ;;  %v5028_v37 = vld [vmem:[#allocation2 + $0xf8] sm:$0xff]  }
 0xc37   : > { %v2910_v62 = vadd.f32 %v2909_v13, %v2908_v59  ;;  %v2894_v63 = vadd.f32 %v2893_v11, %v2892_v43  ;;  %v2942_v26 = vunpack.c.l.b16 %v2921_v53  ;;  %v2904_v49 = vrot.slane %v2903_v52, 1  ;;  %v5027_v43 = vld [vmem:[#allocation2 + $0xf0] sm:$0xff]  }
 0xc38   : > { %v2940_v31 = vunpack.c.l.b16 %v2919_v9  ;;  %v2890_v29 = vrot.slane %v2889_v18, 1  ;;  %4853 = vmatpush3.bf16.msra.mxu1 %v5027_v43  ;;  %v3368_v53 = vld [vmem:[#allocation2 + $0x170] sm:$0xf] }
 0xc39   : > { %v2911_v40 = vrot.slane %v2910_v62, 1  ;;  %v2895_v23 = vrot.slane %v2894_v63, 2  ;;  %v2905_v35 = vadd.f32 %v2904_v49, %v2903_v52  ;;  %4854 = vmatprep.subr.bf16.mxu1 %v5369_v1  ;;  %v3370_v52 = vand.u32 %v3368_v53, %v5560_v15  ;;  %v5029_v13 = vld [vmem:[%s6210_s5 + $0x30] sm:$0xff]  }
 0xc3a   : > { %v2947_v47 = vsel %vm1320_vm8, %v2940_v31, %v2939_v16  ;;  %v2891_v38 = vadd.f32 %v2890_v29, %v2889_v18  ;;  %v3115_v31 = vrot.slane %v5940_v32, %v5761_v7 }
 0xc3b   : > { %v2948_v41 = vsel %vm1322_vm9, %v2941_v55, %v2947_v47  ;;  %v2896_v57 = vadd.f32 %v2895_v23, %v2894_v63  ;;  %v2912_v39 = vadd.f32 %v2911_v40, %v2910_v62  ;;  %v2924_v4 = vpack.c.bf16 %v2905_v35, %v2905_v35 }
 0xc3c   : > { %v2922_v44 = vpack.c.bf16 %v2891_v38, %v2891_v38  ;;  %v2949_v50 = vsel %vm1324_vm10, %v2942_v26, %v2948_v41  ;;  %4855 = vmatpush3.bf16.msra.mxu1 %v5028_v37 }
 0xc3d   : > { %v2897_v27 = vrot.slane %v2896_v57, 1  ;;  %v2925_v25 = vpack.c.bf16 %v2912_v39, %v2912_v39  ;;  %v2945_v8 = vunpack.c.l.b16 %v2924_v4  ;;  %4868 = vmatprep.subr.bf16.mxu1 %v3370_v52 }
 0xc3e   : > { %v2943_v24 = vunpack.c.l.b16 %v2922_v44  ;;  %v5030_v44 = vld [vmem:[%s6210_s5 + $0x38] sm:$0xff]  }
 0xc3f   : > { %v2898_v2 = vadd.f32 %v2897_v27, %v2896_v57  ;;  %v2946_v61 = vunpack.c.l.b16 %v2925_v25 }
 0xc40   : > { %v2950_v30 = vsel %vm1326_vm11, %v2943_v24, %v2949_v50 }
 0xc41   : > { %v2923_v3 = vpack.c.bf16 %v2898_v2, %v2898_v2 }
 0xc43   : > { %v2944_v51 = vunpack.c.l.b16 %v2923_v3  ;;  %v5031_v3 = vld [vmem:[#allocation2 + $0x120] sm:$0xff]  }
 0xc45   : > { %v2951_v58 = vsel %vm1328_vm12, %v2944_v51, %v2950_v30  ;;  %v5032_v51 = vld [vmem:[#allocation2 + $0x128] sm:$0xff]  }
 0xc46   : > { %v2952_v59 = vsel %vm1330_vm13, %v2945_v8, %v2951_v58 }
 0xc47   : > { %v2953_v19 = vsel %vm1332_vm14, %v2946_v61, %v2952_v59 }
 0xc48   : > { %v2954_v56 = vpack.c.b16 %v2953_v19, %v2953_v19 }
 0xc4a   : > { %4835 = vmatmul.mubr.msk.bf16.vlgmr.msra.gmra.mrb[48].mxu0 %vm717_vm7, %v2954_v56 }
 0xc4b   : > { %4847 = vmatpush3.bf16.msra.mxu0 %v5026_v21  ;;  %4848 = vmatprep.mubr.msk.bf16.mxu0 %vm5370_vm0, %v5369_v1 }
 0xc4c   : > { %4860 = vmatprep.subr.bf16.mxu0 %v5369_v1 }
 0xc52   : > { %4849 = vmatmul.mubr.msk.bf16.vlgmr.msra.gmra.mrb[52].mxu0 %vm655_vm1, %v5505_v10 }
 0xc53   : > { %4864 = vmatprep.mubr.msk.bf16.mxu0 %vm5370_vm0, %v5369_v1  ;;  %4861 = vmatpush3.bf16.msra.mxu0 %v5029_v13 }
 0xc54   : > { %4862 = vmatprep.subr.bf16.mxu0 %v5369_v1 }
 0xc57   : > { %4863 = vmatpush3.bf16.msra.mxu0 %v5030_v44 }
 0xc58   : > { %4878 = vmatprep.subr.bf16.mxu0 %v5031_v3 }
 0xd1d   : > { %v3004_v9 = vpop.f32.mrb[48].mxu0 }
 0xd1e   : > { %v3057_v18 = vadd.f32 %v5984_v28, %v3004_v9  ;;  %v4836_v11 = vpop.f32.mrb[49].mxu0 }
 0xd1f   : > { %v3007_v62 = vpop.f32.mrb[50].mxu0 }
 0xd20   : > { %v4837_v16 = vpop.f32.mrb[51].mxu0  ;;  %v6067_v62 = vld [vmem:[%s6212_s7 + $0xc] sm:$0xf] }
 0xd25   : > { %v3105_v29 = vpop.f32.mrb[52].mxu0 }
 0xd26   : > { %v3111_v63 = vadd.f32 %v3105_v29, %v3057_v18  ;;  %v4850_v15 = vpop.f32.mrb[53].mxu0  ;;  %v3358_v29 = vrot.slane %v6067_v62, %v5509_v12 }
 0xd27   : > { %v3108_v55 = vpop.f32.mrb[54].mxu0 }
 0xd28   : > { %v3116_v26 = vadd.f32 %v3115_v31, %v3111_v63  ;;  %v4851_v49 = vpop.f32.mrb[55].mxu0 }
 0xd2a   : > { %v4486_v47 = vmul.f32 -1.442695, %v3116_v26 }
 0xd2c   : > { %5246 = vpow2.f32 %v4486_v47 }
 0xd36   : > { %v5247_v38 = vpop.eup %5246 }
 0xd37   : > { %v3120_v40 = vadd.f32 1.0, %v5247_v38 }
 0xd39   : > { %5248 = vrcp.f32 %v3120_v40 }
 0xd43   : > { %v5249_v23 = vpop.eup %5248 }
 0xd44   : > { %v3123_v41 = vmul.f32 %v5249_v23, %v3116_v26 }
 0xd46   : > { %v3124_v28 = vpack.c.bf16 %v3123_v41, %v3123_v41 }
 0xd48   : > { %4857 = vmatmul.mubr.msk.bf16.vlgmr.msra.gmra.mrb[52].mxu1 %vm717_vm7, %v3124_v28 }
 0xd49   : > { %4870 = vmatprep.mubr.msk.bf16.mxu1 %vm876_vm6, %v5566_v33  ;;  %4869 = vmatpush3.bf16.msra.mxu1 %v3370_v52  ;;  %v3189_v33 = vrot.slane %v5940_v32, %v5781_v54 }
 0xd4a   : > { %4890 = vmatprep.subr.bf16.mxu1 %v5369_v1 }
 0xd50   : > { %4871 = vmatmul.mubr.msk.bf16.vlgmr.msra.gmra.mrb[56].mxu1 %vm876_vm6, %v5570_v36 }
 0xd51   : > { %4874 = vmatprep.mubr.msk.bf16.mxu1 %vm876_vm6, %v5578_v42 }
 0xd58   : > { %4875 = vmatmul.mubr.msk.bf16.gmra.mrb[60].mxu1 %vm876_vm6, %v5584_v48 }
 0xd59   : > { %4894 = vmatprep.mubr.msk.bf16.mxu1 %vm5370_vm0, %v5369_v1 }
 0xe1b   : > { %v3179_v50 = vpop.f32.mrb[52].mxu1 }
 0xe1c   : > { %v3185_v36 = vadd.f32 %v3179_v50, %v5909_v45  ;;  %v4858_v57 = vpop.f32.mrb[53].mxu1 }
 0xe1d   : > { %v3182_v35 = vpop.f32.mrb[54].mxu1 }
 0xe1e   : > { %v6048_v42 = vadd.f32 %v3189_v33, %v3185_v36  ;;  %v4859_v24 = vpop.f32.mrb[55].mxu1 }
 0xe20   : > { %v6052_v48 = vpack.c.bf16 %v6048_v42, %v6048_v42 }
 0xe22   : > { %4865 = vmatmul.mubr.msk.bf16.vlgmr.msra.gmra.mrb[56].mxu0 %vm717_vm7, %v6052_v48 }
 0xe23   : > { %v4872_v39 = vpop.f32.mrb[56].mxu1  ;;  %4879 = vmatpush3.bf16.msra.mxu0 %v5031_v3 }
 0xe24   : > { %v3406_v27 = vpop.f32.mrb[57].mxu1  ;;  %4880 = vmatprep.subr.bf16.mxu0 %v5032_v51 }
 0xe25   : > { %v4873_v30 = vpop.f32.mrb[58].mxu1 }
 0xe26   : > { %v3409_v2 = vpop.f32.mrb[59].mxu1 }
 0xe27   : > { %4881 = vmatpush3.bf16.msra.mxu0 %v5032_v51 }
 0xe28   : > { %4898 = vmatprep.subr.bf16.mxu0 %v5369_v1 }
 0xe2b   : > { %v4876_v32 = vpop.f32.mrb[60].mxu1 }
 0xe2c   : > { %v3422_v4 = vpop.f32.mrb[61].mxu1 }
 0xe2d   : > { %v4877_v25 = vpop.f32.mrb[62].mxu1 }
 0xe2e   : > { %v3425_v45 = vpop.f32.mrb[63].mxu1 }
 0xef5   : > { %v3248_v8 = vpop.f32.mrb[56].mxu0 }
 0xef6   : > { %3344 = vrot.lane.b32.xlu0 %v3248_v8, %s5374_s19  ;;  %v4866_v61 = vpop.f32.mrb[57].mxu0  ;;  %v3255_v19 = vcombine.high %v3248_v8, %v3248_v8  ;;  %v3262_v21 = vrot.slane %v3248_v8, %v5500_v6 }
 0xef7   : > { %v3251_v58 = vpop.f32.mrb[58].mxu0 }
 0xef8   : > { %v4867_v59 = vpop.f32.mrb[59].mxu0  ;;  %v3269_v56 = vrot.slane %v3255_v19, %v5500_v6  ;;  %v3270_v43 = vcombine.high %v3262_v21, %v3262_v21  ;;  %v3278_v53 = vrot.slane %v3262_v21, %v5500_v6 }
 0xefa   : > { %v3271_v37 = vcombine.high %v3269_v56, %v3269_v56  ;;  %v3292_v52 = vrot.slane %v3270_v43, %v5500_v6  ;;  %v3285_v13 = vrot.slane %v3269_v56, %v5500_v6  ;;  %v3300_v18 = vcombine.high %v3278_v53, %v3278_v53 }
 0xefb   : > { %v3307_v63 = vrot.slane %v3278_v53, %v5509_v12 }
 0xefc   : > { %v3299_v9 = vrot.slane %v3271_v37, %v5500_v6  ;;  %v3302_v11 = vcombine.high %v3292_v52, %v3292_v52  ;;  %v3301_v16 = vcombine.high %v3285_v13, %v3285_v13  ;;  %v3311_v15 = vrot.slane %v3292_v52, %v5509_v12 }
 0xefd   : > { %v3315_v55 = vrot.slane %v3300_v18, %v5509_v12  ;;  %v3323_v26 = vrot.slane %v3285_v13, %v5509_v12 }
 0xefe   : > { %v3303_v31 = vcombine.high %v3299_v9, %v3299_v9  ;;  %v3319_v6 = vrot.slane %v3302_v11, %v5509_v12  ;;  %v3327_v49 = vrot.slane %v3299_v9, %v5509_v12  ;;  %v3331_v47 = vrot.slane %v3301_v16, %v5509_v12 }
 0xf00   : > { %v3335_v38 = vrot.slane %v3303_v31, %v5509_v12 }
 0xf68   : > { %v3345_v40 = vpop.permute.xlu0 %3344 }
 0xf69   : > { %v3349_v23 = vadd.f32 %v3345_v40, %v3315_v55  ;;  %v3350_v41 = vadd.f32 %v3345_v40, %v3319_v6  ;;  %v3347_v28 = vadd.f32 %v3345_v40, %v3307_v63  ;;  %v3348_v44 = vadd.f32 %v3345_v40, %v3311_v15 }
 0xf6a   : > { %v3351_v33 = vadd.f32 %v3345_v40, %v3323_v26  ;;  %v3352_v50 = vadd.f32 %v3345_v40, %v3327_v49  ;;  %v3353_v36 = vadd.f32 %v3345_v40, %v3331_v47  ;;  %v3354_v57 = vadd.f32 %v3345_v40, %v3335_v38 }
 0xf6b   : > { %v3359_v35 = vadd.f32 %v3358_v29, %v3347_v28  ;;  %v3360_v24 = vadd.f32 %v3358_v29, %v3348_v44  ;;  %v3361_v3 = vadd.f32 %v3358_v29, %v3349_v23  ;;  %v3362_v51 = vadd.f32 %v3358_v29, %v3350_v41 }
 0xf6c   : > { %v3363_v8 = vadd.f32 %v3358_v29, %v3351_v33  ;;  %v3364_v61 = vadd.f32 %v3358_v29, %v3352_v50  ;;  %v3365_v58 = vadd.f32 %v3358_v29, %v3353_v36  ;;  %v3366_v59 = vadd.f32 %v3358_v29, %v3354_v57 }
 0xf6d   : > { %v3437_v19 = vadd.f32 %v3406_v27, %v3359_v35  ;;  %v3438_v21 = vadd.f32 %v3409_v2, %v3360_v24  ;;  %v3439_v12 = vadd.f32 %v4872_v39, %v3361_v3  ;;  %v3440_v56 = vadd.f32 %v4873_v30, %v3362_v51 }
 0xf6e   : > { %v3441_v43 = vadd.f32 %v3422_v4, %v3363_v8  ;;  %v3442_v37 = vadd.f32 %v3425_v45, %v3364_v61  ;;  %v3443_v53 = vadd.f32 %v4876_v32, %v3365_v58  ;;  %v3444_v52 = vadd.f32 %v4877_v25, %v3366_v59  ;;  %v5033_v8 = vld [vmem:[#allocation2 + $0x130] sm:$0xff]  }
 0xf6f   : > { %v4502_v13 = vmul.f32 -1.442695, %v3437_v19  ;;  %v4503_v9 = vmul.f32 -1.442695, %v3438_v21  ;;  %v4504_v18 = vmul.f32 -1.442695, %v3439_v12 }
 0xf70   : > { %v4505_v11 = vmul.f32 -1.442695, %v3440_v56  ;;  %v4506_v16 = vmul.f32 -1.442695, %v3441_v43  ;;  %v4507_v31 = vmul.f32 -1.442695, %v3442_v37 }
 0xf71   : > { %5250 = vpow2.f32 %v4502_v13  ;;  %v4508_v63 = vmul.f32 -1.442695, %v3443_v53  ;;  %v4509_v29 = vmul.f32 -1.442695, %v3444_v52 }
 0xf72   : > { %5252 = vpow2.f32 %v4503_v9 }
 0xf73   : > { %5254 = vpow2.f32 %v4504_v18 }
 0xf74   : > { %5256 = vpow2.f32 %v4505_v11 }
 0xf75   : > { %5258 = vpow2.f32 %v4506_v16 }
 0xf76   : > { %5260 = vpow2.f32 %v4507_v31 }
 0xf77   : > { %5262 = vpow2.f32 %v4508_v63 }
 0xf78   : > { %5264 = vpow2.f32 %v4509_v29 }
 0xf7b   : > { %v5251_v39 = vpop.eup %5250 }
 0xf7c   : > { %v5253_v27 = vpop.eup %5252  ;;  %v3469_v30 = vadd.f32 1.0, %v5251_v39 }
 0xf7d   : > { %v5255_v2 = vpop.eup %5254  ;;  %v3470_v32 = vadd.f32 1.0, %v5253_v27 }
 0xf7e   : > { %v5257_v4 = vpop.eup %5256  ;;  %5266 = vrcp.f32 %v3469_v30  ;;  %v3471_v25 = vadd.f32 1.0, %v5255_v2 }
 0xf7f   : > { %v5259_v45 = vpop.eup %5258  ;;  %5268 = vrcp.f32 %v3470_v32  ;;  %v3472_v15 = vadd.f32 1.0, %v5257_v4 }
 0xf80   : > { %v5261_v55 = vpop.eup %5260  ;;  %5270 = vrcp.f32 %v3471_v25  ;;  %v3473_v6 = vadd.f32 1.0, %v5259_v45 }
 0xf81   : > { %v5263_v26 = vpop.eup %5262  ;;  %5272 = vrcp.f32 %v3472_v15  ;;  %v3474_v49 = vadd.f32 1.0, %v5261_v55 }
 0xf82   : > { %v5265_v47 = vpop.eup %5264  ;;  %5274 = vrcp.f32 %v3473_v6  ;;  %v3475_v38 = vadd.f32 1.0, %v5263_v26 }
 0xf83   : > { %5276 = vrcp.f32 %v3474_v49  ;;  %v3476_v40 = vadd.f32 1.0, %v5265_v47 }
 0xf84   : > { %5278 = vrcp.f32 %v3475_v38 }
 0xf85   : > { %5280 = vrcp.f32 %v3476_v40 }
 0xf88   : > { %v5267_v23 = vpop.eup %5266 }
 0xf89   : > { %v5269_v41 = vpop.eup %5268  ;;  %v3493_v28 = vmul.f32 %v5267_v23, %v3437_v19 }
 0xf8a   : > { %v5271_v44 = vpop.eup %5270  ;;  %v3494_v33 = vmul.f32 %v5269_v41, %v3438_v21  ;;  %v5034_v21 = vld [vmem:[#allocation2 + $0x138] sm:$0xff]  }
 0xf8b   : > { %v5273_v50 = vpop.eup %5272  ;;  %v3495_v36 = vmul.f32 %v5271_v44, %v3439_v12 }
 0xf8c   : > { %v5275_v57 = vpop.eup %5274  ;;  %v3501_v35 = vpack.c.bf16 %v3494_v33, %v3493_v28  ;;  %v3496_v24 = vmul.f32 %v5273_v50, %v3440_v56  ;;  %v5035_v56 = vld [vmem:[#allocation2 + $0x140] sm:$0xff]  }
 0xf8d   : > { %v5277_v3 = vpop.eup %5276  ;;  %v3497_v51 = vmul.f32 %v5275_v57, %v3441_v43  ;;  %4891 = vmatpush3.bf16.msra.mxu1 %v5035_v56  ;;  %v5036_v43 = vld [vmem:[#allocation2 + $0x148] sm:$0xff]  }
 0xf8e   : > { %v5279_v61 = vpop.eup %5278  ;;  %4882 = vmatprep.mubr.msk.bf16.mxu0 %vm717_vm7, %v3501_v35  ;;  %v3502_v58 = vpack.c.bf16 %v3496_v24, %v3495_v36  ;;  %v3498_v59 = vmul.f32 %v5277_v3, %v3442_v37  ;;  %4892 = vmatprep.subr.bf16.mxu1 %v5369_v1  ;;  %v3513_v37 = vrot.slane %v6067_v62, %v5668_v22 }
 0xf8f   : > { %v5281_v13 = vpop.eup %5280  ;;  %v3499_v9 = vmul.f32 %v5279_v61, %v3443_v53 }
 0xf90   : > { %4883 = vmatmul.mubr.msk.bf16.vlgmr.msra.gmra.mrb[60].mxu0 %vm717_vm7, %v3502_v58  ;;  %v3503_v19 = vpack.c.bf16 %v3498_v59, %v3497_v51  ;;  %v3500_v18 = vmul.f32 %v5281_v13, %v3444_v52 }
 0xf91   : > { %4899 = vmatpush3.bf16.msra.mxu0 %v5033_v8  ;;  %4893 = vmatpush3.bf16.msra.mxu1 %v5036_v43 }
 0xf92   : > { %4886 = vmatprep.mubr.msk.bf16.mxu0 %vm717_vm7, %v3503_v19  ;;  %v3504_v12 = vpack.c.bf16 %v3500_v18, %v3499_v9  ;;  %4900 = vmatprep.subr.bf16.mxu0 %v5369_v1 }
 0xf93   : > { %4906 = vmatprep.subr.bf16.mxu1 %v5369_v1 }
 0xf95   : > { %4901 = vmatpush3.bf16.msra.mxu0 %v5034_v21 }
 0xf96   : > { %4912 = vmatprep.subr.bf16.mxu0 %v5369_v1 }
 0xf98   : > { %4887 = vmatmul.mubr.msk.bf16.gmra.mrb[64].mxu0 %vm717_vm7, %v3504_v12 }
 0xf99   : > { %4902 = vmatprep.mubr.msk.bf16.mxu0 %vm5370_vm0, %v5369_v1 }
 0xfa0   : > { %4903 = vmatmul.mubr.msk.bf16.vlgmr.msra.gmra.mrb[68].mxu0 %vm717_vm7, %v6052_v48 }
 0xfa1   : > { %4916 = vmatprep.mubr.msk.bf16.mxu0 %vm5370_vm0, %v5369_v1 }
0x1063   : > { %v4884_v53 = vpop.f32.mrb[60].mxu0 }
0x1064   : > { %v3581_v52 = vadd.f32 %v4884_v53, %v3513_v37  ;;  %v3572_v11 = vpop.f32.mrb[61].mxu0 }
0x1065   : > { %v3573_v16 = vadd.f32 %v3572_v11, %v3513_v37  ;;  %v4885_v31 = vpop.f32.mrb[62].mxu0 }
0x1066   : > { %v4518_v48 = vmul.f32 -1.442695, %v3581_v52  ;;  %v3584_v63 = vadd.f32 %v4885_v31, %v3513_v37  ;;  %v3575_v29 = vpop.f32.mrb[63].mxu0 }
0x1067   : > { %v4516_v39 = vmul.f32 -1.442695, %v3573_v16  ;;  %v3576_v27 = vadd.f32 %v3575_v29, %v3513_v37 }
0x1068   : > { %5282 = vpow2.f32 %v4518_v48  ;;  %v4519_v30 = vmul.f32 -1.442695, %v3584_v63 }
0x1069   : > { %5284 = vpow2.f32 %v4516_v39  ;;  %v4517_v2 = vmul.f32 -1.442695, %v3576_v27 }
0x106a   : > { %5286 = vpow2.f32 %v4519_v30 }
0x106b   : > { %5288 = vpow2.f32 %v4517_v2  ;;  %v4888_v32 = vpop.f32.mrb[64].mxu0 }
0x106c   : > { %v6095_v4 = vadd.f32 %v4888_v32, %v3513_v37  ;;  %v3588_v22 = vpop.f32.mrb[65].mxu0 }
0x106d   : > { %v6097_v25 = vadd.f32 %v3588_v22, %v3513_v37  ;;  %v4889_v45 = vpop.f32.mrb[66].mxu0 }
0x106e   : > { %v4522_v15 = vmul.f32 -1.442695, %v6095_v4  ;;  %v6100_v55 = vadd.f32 %v4889_v45, %v3513_v37  ;;  %v3591_v6 = vpop.f32.mrb[67].mxu0 }
0x106f   : > { %v4520_v26 = vmul.f32 -1.442695, %v6097_v25  ;;  %v6103_v49 = vadd.f32 %v3591_v6, %v3513_v37 }
0x1070   : > { %5290 = vpow2.f32 %v4522_v15  ;;  %v4523_v47 = vmul.f32 -1.442695, %v6100_v55 }
0x1071   : > { %5292 = vpow2.f32 %v4520_v26  ;;  %v4521_v38 = vmul.f32 -1.442695, %v6103_v49 }
0x1072   : > { %v5283_v40 = vpop.eup %5282  ;;  %5294 = vpow2.f32 %v4523_v47 }
0x1073   : > { %v5285_v23 = vpop.eup %5284  ;;  %v3629_v41 = vadd.f32 1.0, %v5283_v40  ;;  %5296 = vpow2.f32 %v4521_v38  ;;  %v6107_v28 = vpop.f32.mrb[68].mxu0 }
0x1074   : > { %v5287_v44 = vpop.eup %5286  ;;  %v3627_v33 = vadd.f32 1.0, %v5285_v23  ;;  %v4904_v50 = vpop.f32.mrb[69].mxu0 }
0x1075   : > { %v5289_v36 = vpop.eup %5288  ;;  %5298 = vrcp.f32 %v3629_v41  ;;  %v3630_v57 = vadd.f32 1.0, %v5287_v44  ;;  %v3869_v35 = vpop.f32.mrb[70].mxu0 }
0x1076   : > { %5300 = vrcp.f32 %v3627_v33  ;;  %v3628_v24 = vadd.f32 1.0, %v5289_v36  ;;  %v4905_v3 = vpop.f32.mrb[71].mxu0 }
0x1077   : > { %5302 = vrcp.f32 %v3630_v57 }
0x1078   : > { %5304 = vrcp.f32 %v3628_v24 }
0x107a   : > { %v5291_v51 = vpop.eup %5290 }
0x107b   : > { %v5293_v8 = vpop.eup %5292  ;;  %v3633_v61 = vadd.f32 1.0, %v5291_v51 }
0x107c   : > { %v5295_v58 = vpop.eup %5294  ;;  %v3631_v59 = vadd.f32 1.0, %v5293_v8 }
0x107d   : > { %v5297_v13 = vpop.eup %5296  ;;  %5306 = vrcp.f32 %v3633_v61  ;;  %v3634_v9 = vadd.f32 1.0, %v5295_v58 }
0x107e   : > { %5308 = vrcp.f32 %v3631_v59  ;;  %v3632_v19 = vadd.f32 1.0, %v5297_v13 }
0x107f   : > { %v5299_v18 = vpop.eup %5298  ;;  %5310 = vrcp.f32 %v3634_v9 }
0x1080   : > { %v5301_v21 = vpop.eup %5300  ;;  %v3653_v12 = vmul.f32 %v5299_v18, %v3581_v52  ;;  %5312 = vrcp.f32 %v3632_v19 }
0x1081   : > { %v5303_v56 = vpop.eup %5302  ;;  %v3651_v43 = vmul.f32 %v5301_v21, %v3573_v16 }
0x1082   : > { %v5305_v37 = vpop.eup %5304  ;;  %v3661_v53 = vmul.f32 %v3653_v12, %v5700_v5  ;;  %v3654_v11 = vmul.f32 %v5303_v56, %v3584_v63 }
0x1083   : > { %v3659_v31 = vmul.f32 %v3651_v43, %v5696_v46  ;;  %v3652_v48 = vmul.f32 %v5305_v37, %v3576_v27 }
0x1084   : > { %v3681_v29 = vsel %vm717_vm7, %v3661_v53, 0.0  ;;  %v3662_v39 = vmul.f32 %v3654_v11, %v5704_v20 }
0x1085   : > { %v3682_v30 = vrot.slane %v3681_v29, 4  ;;  %v3667_v2 = vsel %vm717_vm7, %v3659_v31, 0.0  ;;  %v3660_v32 = vmul.f32 %v3652_v48, %v5702_v17 }
0x1086   : > { %v3668_v52 = vrot.slane %v3667_v2, 4  ;;  %v3688_v22 = vsel %vm717_vm7, %v3662_v39, 0.0 }
0x1087   : > { %v5307_v16 = vpop.eup %5306  ;;  %v3683_v45 = vadd.f32 %v3682_v30, %v3681_v29  ;;  %v3689_v15 = vrot.slane %v3688_v22, 4  ;;  %v3674_v5 = vsel %vm717_vm7, %v3660_v32, 0.0 }
0x1088   : > { %v5309_v63 = vpop.eup %5308  ;;  %v3669_v46 = vadd.f32 %v3668_v52, %v3667_v2  ;;  %v3675_v27 = vrot.slane %v3674_v5, 4  ;;  %v3657_v6 = vmul.f32 %v5307_v16, %v6095_v4 }
0x1089   : > { %v5311_v26 = vpop.eup %5310  ;;  %v3684_v20 = vrot.slane %v3683_v45, 2  ;;  %v3690_v47 = vadd.f32 %v3689_v15, %v3688_v22  ;;  %v3655_v38 = vmul.f32 %v5309_v63, %v6097_v25 }
0x108a   : > { %v5313_v40 = vpop.eup %5312  ;;  %v3670_v17 = vrot.slane %v3669_v46, 2  ;;  %v3676_v23 = vadd.f32 %v3675_v27, %v3674_v5  ;;  %v3665_v41 = vmul.f32 %v3657_v6, %v5724_v0  ;;  %v3658_v44 = vmul.f32 %v5311_v26, %v6100_v55 }
0x108b   : > { %v3685_v33 = vadd.f32 %v3684_v20, %v3683_v45  ;;  %v3691_v50 = vrot.slane %v3690_v47, 2  ;;  %v3663_v36 = vmul.f32 %v3655_v38, %v5712_v60  ;;  %v3656_v57 = vmul.f32 %v5313_v40, %v6103_v49 }
0x108c   : > { %v3671_v35 = vadd.f32 %v3670_v17, %v3669_v46  ;;  %v3677_v4 = vrot.slane %v3676_v23, 2  ;;  %v3709_v24 = vsel %vm717_vm7, %v3665_v41, 0.0  ;;  %v3666_v3 = vmul.f32 %v3658_v44, %v5729_v14 }
0x108d   : > { %v3686_v25 = vrot.slane %v3685_v33, 1  ;;  %v3692_v51 = vadd.f32 %v3691_v50, %v3690_v47  ;;  %v3710_v8 = vrot.slane %v3709_v24, 4  ;;  %v3695_v61 = vsel %vm717_vm7, %v3663_v36, 0.0 }
0x108e   : > { %v3672_v0 = vrot.slane %v3671_v35, 1  ;;  %v3678_v58 = vadd.f32 %v3677_v4, %v3676_v23  ;;  %v3696_v55 = vrot.slane %v3695_v61, 4  ;;  %v3716_v59 = vsel %vm717_vm7, %v3666_v3, 0.0 }
0x108f   : > { %v3687_v13 = vadd.f32 %v3686_v25, %v3685_v33  ;;  %v3693_v60 = vrot.slane %v3692_v51, 1  ;;  %v3711_v9 = vadd.f32 %v3710_v8, %v3709_v24  ;;  %v3717_v49 = vrot.slane %v3716_v59, 4 }
0x1090   : > { %v3673_v19 = vadd.f32 %v3672_v0, %v3671_v35  ;;  %v3679_v18 = vrot.slane %v3678_v58, 1  ;;  %v3697_v21 = vadd.f32 %v3696_v55, %v3695_v61  ;;  %v3664_v12 = vmul.f32 %v3656_v57, %v5717_v34  ;;  %v5037_v0 = vld [vmem:[#allocation2 + $0x160] sm:$0xff]   ;;  %v5038_v55 = vld [vmem:[#allocation2 + $0x150] sm:$0xff]  }
0x1091   : > { %v3694_v14 = vadd.f32 %v3693_v60, %v3692_v51  ;;  %v3712_v56 = vrot.slane %v3711_v9, 2  ;;  %v3718_v43 = vadd.f32 %v3717_v49, %v3716_v59  ;;  %v3730_v48 = vpack.c.bf16 %v3687_v13, %v3687_v13  ;;  %4913 = vmatpush3.bf16.msra.mxu0 %v5038_v55  ;;  %v5039_v59 = vld [vmem:[#allocation2 + $0x158] sm:$0xff]   ;;  %v5040_v13 = vld [vmem:[%s6213_s8 + $0x10] sm:$0xff]  }
0x1092   : > { %v3728_v37 = vpack.c.bf16 %v3673_v19, %v3673_v19  ;;  %v3680_v53 = vadd.f32 %v3679_v18, %v3678_v58  ;;  %v3698_v11 = vrot.slane %v3697_v21, 2  ;;  %v3702_v31 = vsel %vm717_vm7, %v3664_v12, 0.0  ;;  %4914 = vmatprep.subr.bf16.mxu0 %v5369_v1 }
0x1093   : > { %v3731_v29 = vpack.c.bf16 %v3694_v14, %v3694_v14  ;;  %v3713_v39 = vadd.f32 %v3712_v56, %v3711_v9  ;;  %v3719_v30 = vrot.slane %v3718_v43, 2  ;;  %v3703_v52 = vrot.slane %v3702_v31, 4 }
0x1094   : > { %v3729_v2 = vpack.c.bf16 %v3680_v53, %v3680_v53  ;;  %v3699_v32 = vadd.f32 %v3698_v11, %v3697_v21  ;;  %v3749_v16 = vunpack.c.l.b16 %v3728_v37  ;;  %v3751_v5 = vunpack.c.l.b16 %v3730_v48 }
0x1095   : > { %v3720_v22 = vadd.f32 %v3719_v30, %v3718_v43  ;;  %v3704_v34 = vadd.f32 %v3703_v52, %v3702_v31  ;;  %v3752_v63 = vunpack.c.l.b16 %v3731_v29  ;;  %v3714_v46 = vrot.slane %v3713_v39, 1  ;;  %4915 = vmatpush3.bf16.msra.mxu0 %v5039_v59 }
0x1096   : > { %v3750_v45 = vunpack.c.l.b16 %v3729_v2  ;;  %v3700_v15 = vrot.slane %v3699_v32, 1  ;;  %4928 = vmatprep.subr.bf16.mxu0 %v5369_v1  ;;  %v3925_v18 = vrot.slane %v6067_v62, %v5761_v7  ;;  %v5041_v7 = vld [vmem:[%s6213_s8 + $0x18] sm:$0xff]  }
0x1097   : > { %v3721_v26 = vrot.slane %v3720_v22, 1  ;;  %v3705_v20 = vrot.slane %v3704_v34, 2  ;;  %v3715_v23 = vadd.f32 %v3714_v46, %v3713_v39  ;;  %v3999_v39 = vrot.slane %v6067_v62, %v5781_v54  ;;  %v5043_v54 = vld [vmem:[%s6213_s8 + $0x28] sm:$0xff]  }
0x1098   : > { %v3757_v27 = vsel %vm1320_vm8, %v3750_v45, %v3749_v16  ;;  %v3701_v6 = vadd.f32 %v3700_v15, %v3699_v32  ;;  %v5042_v15 = vld [vmem:[%s6213_s8 + $0x20] sm:$0xff]  }
0x1099   : > { %v3758_v47 = vsel %vm1322_vm9, %v3751_v5, %v3757_v27  ;;  %v3706_v17 = vadd.f32 %v3705_v20, %v3704_v34  ;;  %v3722_v44 = vadd.f32 %v3721_v26, %v3720_v22  ;;  %v3734_v57 = vpack.c.bf16 %v3715_v23, %v3715_v23  ;;  %v4549_v23 = vld [vmem:[%s6214_s9 + $0x2] ss:$0 sm:$0xff] }
0x109a   : > { %v3732_v38 = vpack.c.bf16 %v3701_v6, %v3701_v6  ;;  %v3759_v40 = vsel %vm1324_vm10, %v3752_v63, %v3758_v47 }
0x109b   : > { %v3707_v33 = vrot.slane %v3706_v17, 1  ;;  %v3735_v35 = vpack.c.bf16 %v3722_v44, %v3722_v44  ;;  %v3755_v3 = vunpack.c.l.b16 %v3734_v57 }
0x109c   : > { %v3753_v41 = vunpack.c.l.b16 %v3732_v38 }
0x109d   : > { %v3708_v36 = vadd.f32 %v3707_v33, %v3706_v17  ;;  %v3756_v25 = vunpack.c.l.b16 %v3735_v35  ;;  %v5045_v17 = vld [vmem:[%s6213_s8 + $0x38] sm:$0xff]  }
0x109e   : > { %v3760_v50 = vsel %vm1326_vm11, %v3753_v41, %v3759_v40  ;;  %v5044_v40 = vld [vmem:[%s6213_s8 + $0x30] sm:$0xff]  }
0x109f   : > { %v3733_v4 = vpack.c.bf16 %v3708_v36, %v3708_v36 }
0x10a1   : > { %v3754_v24 = vunpack.c.l.b16 %v3733_v4 }
0x10a3   : > { %v3761_v51 = vsel %vm1328_vm12, %v3754_v24, %v3760_v50  ;;  %v4144_v50 = vpop.permute.xlu1 %4143 }
0x10a4   : > { %v3762_v8 = vsel %vm1330_vm13, %v3755_v3, %v3761_v51 }
0x10a5   : > { %v3763_v61 = vsel %vm1332_vm14, %v3756_v25, %v3762_v8 }
0x10a6   : > { %v3764_v58 = vpack.c.b16 %v3763_v61, %v3763_v61 }
0x10a8   : > { %4895 = vmatmul.mubr.msk.bf16.vlgmr.msra.gmra.mrb[64].mxu1 %vm717_vm7, %v3764_v58 }
0x10a9   : > { %4907 = vmatpush3.bf16.msra.mxu1 %v5037_v0  ;;  %4908 = vmatprep.mubr.msk.bf16.mxu1 %vm5370_vm0, %v5369_v1  ;;  %v4160_v0 = vld [vmem:[%s6214_s9 + $0x3] sm:$0x1] }
0x10aa   : > { %4920 = vmatprep.subr.bf16.mxu1 %v5369_v1 }
0x10b0   : > { %4909 = vmatmul.mubr.msk.bf16.vlgmr.msra.gmra.mrb[68].mxu1 %vm655_vm1, %v5505_v10 }
0x10b1   : > { %4924 = vmatprep.mubr.msk.bf16.mxu1 %vm5370_vm0, %v5369_v1  ;;  %4921 = vmatpush3.bf16.msra.mxu1 %v5040_v13 }
0x10b2   : > { %4922 = vmatprep.subr.bf16.mxu1 %v5369_v1 }
0x10b5   : > { %4923 = vmatpush3.bf16.msra.mxu1 %v5041_v7 }
0x10b6   : > { %4936 = vmatprep.subr.bf16.mxu1 %v5369_v1 }
0x117b   : > { %v3814_v60 = vpop.f32.mrb[64].mxu1 }
0x117c   : > { %v3867_v10 = vadd.f32 %v6107_v28, %v3814_v60  ;;  %v4896_v9 = vpop.f32.mrb[65].mxu1 }
0x117d   : > { %v3817_v49 = vpop.f32.mrb[66].mxu1 }
0x117e   : > { %v4897_v19 = vpop.f32.mrb[67].mxu1 }
0x1183   : > { %v3915_v21 = vpop.f32.mrb[68].mxu1 }
0x1184   : > { %v3921_v12 = vadd.f32 %v3915_v21, %v3867_v10  ;;  %v4910_v14 = vpop.f32.mrb[69].mxu1 }
0x1185   : > { %v3918_v56 = vpop.f32.mrb[70].mxu1 }
0x1186   : > { %v3926_v43 = vadd.f32 %v3925_v18, %v3921_v12  ;;  %v4911_v37 = vpop.f32.mrb[71].mxu1  ;;  %v4223_v18 = vld [vmem:[%s6214_s9 + $0x4] sm:$0x1]  ;;  %v4229_v56 = vld [vmem:[%s6214_s9 + $0x5] sm:$0x1] }
0x1188   : > { %v4532_v53 = vmul.f32 -1.442695, %v3926_v43 }
0x118a   : > { %5314 = vpow2.f32 %v4532_v53 }
0x1194   : > { %v5315_v11 = vpop.eup %5314 }
0x1195   : > { %v3930_v31 = vadd.f32 1.0, %v5315_v11 }
0x1197   : > { %5316 = vrcp.f32 %v3930_v31 }
0x11a1   : > { %v5317_v48 = vpop.eup %5316 }
0x11a2   : > { %v3933_v29 = vmul.f32 %v5317_v48, %v3926_v43 }
0x11a4   : > { %v3934_v28 = vpack.c.bf16 %v3933_v29, %v3933_v29 }
0x11a6   : > { %4917 = vmatmul.mubr.msk.bf16.vlgmr.msra.gmra.mrb[72].mxu0 %vm717_vm7, %v3934_v28 }
0x11a7   : > { %4932 = vmatprep.mubr.msk.bf16.mxu0 %vm5370_vm0, %v5369_v1  ;;  %4929 = vmatpush3.bf16.msra.mxu0 %v5042_v15 }
0x11a8   : > { %4930 = vmatprep.subr.bf16.mxu0 %v5369_v1 }
0x11ab   : > { %4931 = vmatpush3.bf16.msra.mxu0 %v5043_v54 }
0x1279   : > { %v3989_v30 = vpop.f32.mrb[72].mxu0 }
0x127a   : > { %v3995_v2 = vadd.f32 %v3989_v30, %v6048_v42  ;;  %v4918_v32 = vpop.f32.mrb[73].mxu0  ;;  %v4540_v42 = vld [vmem:[%s6214_s9 + $0x1] ss:$0 sm:$0xff] }
0x127b   : > { %v3992_v52 = vpop.f32.mrb[74].mxu0 }
0x127c   : > { %v4000_v22 = vadd.f32 %v3999_v39, %v3995_v2  ;;  %v4919_v16 = vpop.f32.mrb[75].mxu0 }
0x127e   : > { %v4001_v45 = vpack.c.bf16 %v4000_v22, %v4000_v22 }
0x1280   : > { %4925 = vmatmul.mubr.msk.bf16.vlgmr.msra.gmra.mrb[72].mxu1 %vm717_vm7, %v4001_v45 }
0x1281   : > { %4940 = vmatprep.mubr.msk.bf16.mxu1 %vm5370_vm0, %v5369_v1  ;;  %4937 = vmatpush3.bf16.msra.mxu1 %v5044_v40  ;;  %vm4231_vm0 = vcmask 0  }
0x1282   : > { %4938 = vmatprep.subr.bf16.mxu1 %v5369_v1 }
0x1285   : > { %4939 = vmatpush3.bf16.msra.mxu1 %v5045_v17 }
0x1353   : > { %v4061_v62 = vpop.f32.mrb[72].mxu1 }
0x1354   : > { %v4062_v34 = vadd.f32 %v4540_v42, %v4061_v62  ;;  %v4926_v5 = vpop.f32.mrb[73].mxu1 }
0x1355   : > { %v4064_v63 = vpop.f32.mrb[74].mxu1 }
0x1356   : > { %v4544_v46 = vmul.f32 -1.442695, %v4062_v34  ;;  %v4927_v27 = vpop.f32.mrb[75].mxu1 }
0x1358   : > { %5318 = vpow2.f32 %v4544_v46 }
0x1362   : > { %v5319_v6 = vpop.eup %5318 }
0x1363   : > { %v4070_v26 = vadd.f32 1.0, %v5319_v6 }
0x1365   : > { %5320 = vrcp.f32 %v4070_v26 }
0x136f   : > { %v5321_v20 = vpop.eup %5320 }
0x1370   : > { %v4073_v47 = vmul.f32 %v5321_v20, %v4062_v34 }
0x1372   : > { %v4074_v38 = vpack.c.bf16 %v4073_v47, %v4073_v47 }
0x1374   : > { %4933 = vmatmul.mubr.msk.bf16.vlgmr.msra.gmra.mrb[76].mxu0 %vm717_vm7, %v4074_v38 }
0x1447   : > { %v4134_v41 = vpop.f32.mrb[76].mxu0 }
0x1448   : > { %v4135_v44 = vadd.f32 %v4549_v23, %v4134_v41  ;;  %v4934_v33 = vpop.f32.mrb[77].mxu0 }
0x1449   : > { %v4137_v36 = vpop.f32.mrb[78].mxu0 }
0x144a   : > { %v4146_v57 = vmul.f32 %v4144_v50, %v4135_v44  ;;  %v4935_v35 = vpop.f32.mrb[79].mxu0 }
0x144c   : > { %v4147_v4 = vsel %vm717_vm7, %v4146_v57, 0.0 }
0x144d   : > { %v4148_v24 = vrot.slane %v4147_v4, 4 }
0x144f   : > { %v4149_v1 = vadd.f32 %v4148_v24, %v4147_v4 }
0x1451   : > { %v4150_v3 = vrot.slane %v4149_v1, 2 }
0x1453   : > { %v4151_v25 = vadd.f32 %v4150_v3, %v4149_v1 }
0x1455   : > { %v4152_v51 = vrot.slane %v4151_v25, 1 }
0x1457   : > { %v4153_v8 = vadd.f32 %v4152_v51, %v4151_v25 }
0x1459   : > { %v4154_v61 = vpack.c.bf16 %v4153_v8, %v4153_v8 }
0x145b   : > { %4941 = vmatmul.mubr.msk.bf16.vlgmr.msra.gmra.mrb[76].mxu1 %vm717_vm7, %v4154_v61 }
0x152e   : > { %v4210_v58 = vpop.f32.mrb[76].mxu1 }
0x152f   : > { %v4211_v55 = vadd.f32 %v4210_v58, %v4160_v0  ;;  %v4942_v59 = vpop.f32.mrb[77].mxu1 }
0x1530   : > { %v4213_v13 = vpop.f32.mrb[78].mxu1 }
0x1531   : > { %v4560_v60 = vmul.f32 -1.442695, %v4211_v55  ;;  %v4943_v10 = vpop.f32.mrb[79].mxu1 }
0x1533   : > { %5322 = vpow2.f32 %v4560_v60 }
0x153d   : > { %v5323_v9 = vpop.eup %5322 }
0x153e   : > { %v4219_v49 = vadd.f32 1.0, %v5323_v9 }
0x1540   : > { %5324 = vrcp.f32 %v4219_v49 }
0x154a   : > { %v5325_v19 = vpop.eup %5324 }
0x154b   : > { %v4222_v21 = vmul.f32 %v5325_v19, %v4211_v55 }
0x154d   : > { %v4224_v12 = vmul.f32 %v4223_v18, %v4222_v21 }
0x154f   : > { %v4226_v14 = vsel %vm4225_vm15, %v4224_v12, 0.0 }
0x1550   : > { %4227 = vadd.xlane.f32.xlu0 %v4226_v14 }
0x15dd   : > { %v4228_v43 = vpop.xlane.xlu0 %4227 }
0x15de   : > { %v4230_v37 = vadd.f32 %v4229_v56, %v4228_v43 }
0x15e0   : > { %4232 = vst.msk [vmem:[%s445_s17] sm:$0x1] %vm4231_vm0, %v4230_v37 }
0x15e1 PF: > { %s21_s13 = sadd.s32 1, %s5364_s13  }
0x15e2   : > { %p18_p5 = scmp.ge.s32.totalorder %s21_s13, 4  }
0x15e4   :  { %20 = sbr.rel (!%p18_p5) target bundleno = 1 (0x1), region = 139 }
0x15eb   :  { %4250 = vsyncpa [#allocation3], 1 }
0x15ec   :  { %4252 = vsyncpa [#allocation3 + $0x1], 1 }

// kernel: tpu_custom_call.1
= control target key start
LH: loop header
LB: loop body
LE: loop exit
PB: predicated region body
PF: predicated region fallthrough
CT: control target
= control target key end

     0   :  { %15 = vsyncpa [#allocation3], 0  ;;  %s5431_s13 = smov 0   ;;  %s6205_s0 = inlined_call_operand.vmem [shape: f32[16,16], index: 0, kind: input, shape index: {}]   ;;  %s6206_s1 = inlined_call_operand.vmem [shape: f32[16,3], index: 1, kind: input, shape index: {}]   ;;  %s6207_s2 = inlined_call_operand.vmem [shape: f32[128,4], index: 2, kind: input, shape index: {}]   ;;  %s6208_s3 = inlined_call_operand.vmem [shape: f32[128,1], index: 3, kind: input, shape index: {}]   ;;  %s6209_s4 = inlined_call_operand.vmem [shape: f32[16,1], index: 4, kind: input, shape index: {}]   ;;  %s6210_s5 = inlined_call_operand.vmem [shape: bf16[4,32,64], index: 5, kind: input, shape index: {}]   ;;  %s6211_s6 = inlined_call_operand.hbm [shape: bf16[24,32,32], index: 6, kind: input, shape index: {}]   ;;  %s6212_s7 = inlined_call_operand.vmem [shape: f32[4,4,32], index: 7, kind: input, shape index: {}]   ;;  %s6213_s8 = inlined_call_operand.vmem [shape: bf16[4,32,32], index: 8, kind: input, shape index: {}]   ;;  %s6214_s9 = inlined_call_operand.vmem [shape: f32[6,32], index: 9, kind: input, shape index: {}]   ;;  %s6215_s10 = inlined_call_operand.vmem [shape: f32[2,1,1], index: 10, kind: output, shape index: {}]  }
   0x1 LB: > { %s5437_s14 = sadd.s32 4294967295, %s5364_s13   ;;  %p4342_p0 = scmp.ge.s32.totalorder %s5364_s13, 1  ;;  %s5364_s13 = sphi %s5431_s13, %s21_s13  }
   0x2   : > { %p287_p1 = scmp.lt.s32.totalorder %s5364_s13, 3  ;;  %s5366_s15 = smov [#allocation2]  }
   0x3   : > { %s302_s16 = sshll.u32 %s5366_s15, 4  ;;  %p6216_p3 = scmp.eq.s32.totalorder %s5437_s14, 0  ;;  %s303_s16 = int_to_ptr.vmem [resolvable:$true] %s302_s16 }
   0x4   : > { %p5441_p2 = pnand %p4342_p0, %p287_p1  ;;  %s5326_s21 = scalar_lea.hbm %s6211_s6, 6144 }
   0x5   : > { %p5327_p6 = scmp.ne.s32.totalorder %s6211_s6, %s5326_s21  ;;  %p5333_p10 = scmp.lt.u32.totalorder %s5326_s21, %s6211_s6 }
   0x6   : > { %s6218_s17 = scalar_select %p5441_p2, 1, 0 }
   0x7   : > { %p4948_p4 = pneg %p5441_p2 }
   0x9   : > { %p5450_p5 = pnand %p6216_p3, %p4948_p4 }
   0xb   : > { %p5328_p7 = pneg %p5450_p5 }
   0xd   : > { %p5329_p8 = pnand %p5328_p7, %p5327_p6 }
   0xf   : > { %p5330_p9 = pneg %p5329_p8 }
  0x11   : > { %p5335_p11 = pnand %p5333_p10, %p5330_p9 }
  0x13   : > { %5338 = shalt.err (!%p5335_p11)
}
  0x14   : > { %s5339_s26 = scalar_lea.vmem %s303_s16, 6144  ;;  %p5347_p1 = scmp.lt.s32.totalorder %s303_s16, %s303_s16 }
  0x15   : > { %p5340_p12 = scmp.ne.s32.totalorder %s303_s16, %s5339_s26  ;;  %p5348_p4 = scmp.lt.s32.totalorder %s5339_s26, %s5339_s26 }
  0x17   : > { %p5342_p13 = pnand %p5340_p12, %p5328_p7  ;;  %p5349_p3 = por %p5348_p4, %p5347_p1 }
  0x19   : > { %p5343_p0 = pneg %p5342_p13 }
  0x1b   : > { %p5350_p2 = pnand %p5349_p3, %p5343_p0 }
  0x1d   : > { %5353 = shalt.err (!%p5350_p2)
}
  0x1e   : > { %s5367_s27 = smov 64   ;;  %s5368_s28 = smov 4  }
  0x1f   : > { %4951 = dma.hbm_to_vmem [thread:$0]  (!%p5450_p5), %s6211_s6, 6144, %s303_s16, [#allocation3], %s5367_s27, %s5367_s27, %s5368_s28  }
  0x20   : > { %p6220_p6 = scmp.ne.s32.totalorder %s6218_s17, 0 }
  0x21   : > { %p6221_p8 = scmp.eq.s32.totalorder (!%p6220_p6), %s5437_s14, 0 }
  0x22   : > { %366 = sbr.rel (%p6220_p6) target bundleno = 5601 (0x15e1), region = 60 }
  0x29   : > { %5359 = dma.done.wait (%p6221_p8), [#allocation3], 6144   ;;  %p6222_p7 = pmov %p6221_p8 }
  0x2a   : > { %p419_p2 = scmp.lt.s32.totalorder %s5437_s14, 1  ;;  %v463_v0 = vlaneseq  ;;  %v5369_v1 = vmov 0.0   ;;  %vm5370_vm0 = vmmov 0   ;;  %v5371_v2 = vmov 1966171168   ;;  %v4994_v7 = vld [vmem:[%s6213_s8] sm:$0xff]  }
  0x2b   : > { %5361 = vsyncadd (%p6222_p7), [#allocation3], 4294961152  ;;  %4674 = vmatprep.subr.bf16.mxu0 %v5369_v1  ;;  %4676 = vmatprep.mubr.msk.bf16.mxu0 %vm5370_vm0, %v5369_v1  ;;  %v461_v3 = vunpack.c.l.s4 %v5371_v2  ;;  %vm655_vm1 = vcmask 130048   ;;  %s4349_s23 = sshll.u32 %s5437_s14, 3  ;;  %v4996_v14 = vld [vmem:[%s6210_s5] sm:$0xff]   ;;  %vm564_vm2 = vcmask 23552  }
  0x2c   : > { %s5481_s11 = scalar_select %p419_p2, %s5437_s14, 1  ;;  %v5483_v4 = vshrl.u32 %v463_v0, 7  ;;  %4680 = vmatprep.subr.bf16.mxu1 %v5369_v1  ;;  %4684 = vmatprep.mubr.msk.bf16.mxu1 %vm5370_vm0, %v5369_v1  ;;  %vm889_vm3 = vcmask 1041408   ;;  %vm890_vm4 = vcmask 1042432   ;;  %vm629_vm5 = vcmask 7168  }
  0x2d   : > { %v462_v5 = vunpack.c.0.s8 %v461_v3  ;;  %4675 = vmatpush3.bf16.msra.mxu0 %v4994_v7  ;;  %4681 = vmatpush3.bf16.msra.mxu1 %v4996_v14  ;;  %p5521_p3 = scmp.lt.s32.totalorder %s4349_s23, 15  ;;  %s5372_s30 = smov 1   ;;  %vm876_vm6 = vcmask 39936   ;;  %vm717_vm7 = vcmask 261120   ;;  %vm1320_vm8 = vcmask 1041409  }
  0x2e   : > { %s5489_s12 = sshll.u32 %s5481_s11, 3  ;;  %v5509_v12 = vsub.s32 0, %v5483_v4  ;;  %4682 = vmatprep.subr.bf16.mxu1 %v5369_v1  ;;  %s5374_s19 = smov 96   ;;  %vm1322_vm9 = vcmask 1042434   ;;  %vm1324_vm10 = vcmask 1043459   ;;  %vm1326_vm11 = vcmask 1044484  }
  0x2f   : > { %s422_s17 = scalar_lea.vmem %s6205_s0, %s5489_s12  ;;  %s426_s20 = scalar_lea.vmem %s6206_s1, %s5489_s12  ;;  %v5500_v6 = vsub.s32 %v462_v5, %v5483_v4  ;;  %vm1328_vm12 = vcmask 1045509   ;;  %vm1330_vm13 = vcmask 1046534   ;;  %vm1332_vm14 = vcmask 1047559  }
  0x30   : > { %v447_v8 = vld [vmem:[%s422_s17] sm:$0xff]  ;;  %s6225_s23 = smov (!%p5521_p3, %s4349_s23), 15  ;;  %s442_s21 = scalar_lea.vmem %s6209_s4, %s5489_s12  ;;  %vm4225_vm15 = vcmask 253952  }
  0x31   : > { %v449_v9 = vld [vmem:[%s426_s20] sm:$0xff]  ;;  %v5505_v10 = vpack.c.bf16 %v447_v8, %v447_v8  ;;  %s4350_s14 = sshll.u32 %s6225_s23, 3  ;;  %s445_s17 = scalar_lea.vmem %s6215_s10, %s5481_s11 }
  0x32   : > { %v466_v11 = vrot.slane %v449_v9, %v5500_v6  ;;  %v459_v13 = vcombine.high %v449_v9, %v449_v9  ;;  %s431_s29 = scalar_lea.vmem %s6207_s2, %s4350_s14  ;;  %s437_s22 = scalar_lea.vmem %s6208_s3, %s4350_s14 }
  0x33   : > { %4677 = vmatmul.mubr.msk.bf16.vlgmr.msra.gmra.mrb[0].mxu0 %vm655_vm1, %v5505_v10  ;;  %v591_v58 = vld [vmem:[%s431_s29 + $0x10] sm:$0xff]  ;;  %v592_v59 = vld [vmem:[%s431_s29 + $0x18] sm:$0xff]  ;;  %v589_v60 = vld [vmem:[%s431_s29] sm:$0xff] }
  0x34   : > { %v482_v15 = vrot.slane %v466_v11, %v5500_v6  ;;  %v474_v16 = vcombine.high %v466_v11, %v466_v11  ;;  %v473_v17 = vrot.slane %v459_v13, %v5500_v6  ;;  %v590_v61 = vld [vmem:[%s431_s29 + $0x8] sm:$0xff]  ;;  %v4977_v62 = vpack.i.bf16 %v592_v59, %v591_v58  ;;  %v593_v63 = vld [vmem:[%s431_s29 + $0x20] sm:$0xff]  ;;  %v595_v5 = vld [vmem:[%s431_s29 + $0x30] sm:$0xff] }
  0x35   : > { %v594_v0 = vld [vmem:[%s431_s29 + $0x28] sm:$0xff]  ;;  %v4972_v2 = vpack.i.bf16 %v590_v61, %v589_v60  ;;  %v596_v7 = vld [vmem:[%s431_s29 + $0x38] sm:$0xff]  ;;  %v875_v11 = vld [vmem:[#allocation2 + $0x50] sm:$0xf]  ;;  %v5373_v13 = vmov 65535  }
  0x36   : > { %v511_v18 = vrot.slane %v482_v15, %v5509_v12  ;;  %v504_v19 = vcombine.high %v482_v15, %v482_v15  ;;  %v496_v20 = vrot.slane %v474_v16, %v5500_v6  ;;  %v489_v21 = vrot.slane %v473_v17, %v5500_v6 }
  0x37   : > { %v475_v22 = vcombine.high %v473_v17, %v473_v17  ;;  %v4982_v3 = vpack.i.bf16 %v594_v0, %v593_v63  ;;  %v4987_v8 = vpack.i.bf16 %v596_v7, %v595_v5  ;;  %v891_v14 = vsel %vm889_vm3, 4294967295, %v5373_v13  ;;  %v4998_v0 = vld [vmem:[#allocation2] sm:$0xff]   ;;  %v451_v13 = vld [vmem:[%s437_s22 + $0x8] sm:$0xff] }
  0x38   : > { %v548_v23 = vsub.f32 %v511_v18, %v449_v9  ;;  %v519_v24 = vrot.slane %v504_v19, %v5509_v12  ;;  %v515_v25 = vrot.slane %v496_v20, %v5509_v12  ;;  %v506_v26 = vcombine.high %v496_v20, %v496_v20 }
  0x39   : > { %v527_v27 = vrot.slane %v489_v21, %v5509_v12  ;;  %v503_v28 = vrot.slane %v475_v22, %v5500_v6  ;;  %v505_v29 = vcombine.high %v489_v21, %v489_v21  ;;  %v5560_v15 = vsel %vm890_vm4, %v891_v14, 0  ;;  %v452_v14 = vld [vmem:[%s437_s22 + $0x10] sm:$0xff] }
  0x3a   : > { %v556_v30 = vmul.f32 %v548_v23, %v548_v23  ;;  %v550_v31 = vsub.f32 %v519_v24, %v449_v9  ;;  %v549_v32 = vsub.f32 %v515_v25, %v449_v9  ;;  %v523_v33 = vrot.slane %v506_v26, %v5509_v12 }
  0x3b   : > { %v552_v34 = vsub.f32 %v527_v27, %v449_v9  ;;  %v531_v35 = vrot.slane %v503_v28, %v5509_v12  ;;  %v535_v36 = vrot.slane %v505_v29, %v5509_v12  ;;  %v507_v37 = vcombine.high %v503_v28, %v503_v28 }
  0x3c   : > { %v565_v38 = vsel %vm564_vm2, %v556_v30, 0.0  ;;  %v558_v39 = vmul.f32 %v550_v31, %v550_v31  ;;  %v557_v40 = vmul.f32 %v549_v32, %v549_v32  ;;  %v551_v41 = vsub.f32 %v523_v33, %v449_v9 }
  0x3d   : > { %566 = vadd.xlane.f32.xlu0 %v565_v38  ;;  %v560_v42 = vmul.f32 %v552_v34, %v552_v34  ;;  %v553_v43 = vsub.f32 %v531_v35, %v449_v9  ;;  %v554_v44 = vsub.f32 %v535_v36, %v449_v9  ;;  %v539_v45 = vrot.slane %v507_v37, %v5509_v12 }
  0x3e   : > { %v571_v46 = vsel %vm564_vm2, %v558_v39, 0.0  ;;  %v568_v47 = vsel %vm564_vm2, %v557_v40, 0.0  ;;  %v559_v48 = vmul.f32 %v551_v41, %v551_v41  ;;  %v894_v16 = vand.u32 %v5560_v15, %v875_v11  ;;  %v450_v11 = vld [vmem:[%s437_s22] sm:$0xff] }
  0x3f   : > { %572 = vadd.xlane.f32.xlu1 %v571_v46  ;;  %v561_v49 = vmul.f32 %v553_v43, %v553_v43  ;;  %v562_v50 = vmul.f32 %v554_v44, %v554_v44  ;;  %v555_v51 = vsub.f32 %v539_v45, %v449_v9  ;;  %v577_v53 = vsel %vm564_vm2, %v560_v42, 0.0  ;;  %v4997_v9 = vld [vmem:[%s6210_s5 + $0x8] sm:$0xff]  }
  0x40   : > { %v574_v52 = vsel %vm564_vm2, %v559_v48, 0.0  ;;  %4683 = vmatpush3.bf16.msra.mxu1 %v4997_v9  ;;  %4688 = vmatprep.subr.bf16.mxu0 %v894_v16  ;;  %v5375_v9 = vmov 0  }
  0x41   : > { %569 = vadd.xlane.f32.xlu0 %v568_v47  ;;  %v580_v54 = vsel %vm564_vm2, %v561_v49, 0.0  ;;  %v563_v55 = vmul.f32 %v555_v51, %v555_v51  ;;  %v583_v56 = vsel %vm564_vm2, %v562_v50, 0.0  ;;  %4689 = vmatpush3.bf16.msra.mxu0 %v894_v16  ;;  %v4354_v49 = vld [vmem:[%s6214_s9] ss:$0 sm:$0xff] }
  0x42   : > { %4710 = vmatprep.subr.bf16.mxu0 %v5369_v1  ;;  %4698 = vmatprep.subr.bf16.mxu1 %v4998_v0  ;;  %v454_v16 = vld [vmem:[%s437_s22 + $0x20] sm:$0xff] }
  0x43   : > { %575 = vadd.xlane.f32.xlu1 %v574_v52  ;;  %v586_v57 = vsel %vm564_vm2, %v563_v55, 0.0  ;;  %4993 = vset.pattern.permute.xlu0 %v5375_v9 }
  0x44   : > { %4992 = vset.pattern.permute.xlu1 %v5375_v9 }
  0x45   : > { %578 = vadd.xlane.f32.xlu0 %v577_v53 }
  0x47   : > { %581 = vadd.xlane.f32.xlu1 %v580_v54 }
  0x49   : > { %584 = vadd.xlane.f32.xlu0 %v583_v56 }
  0x4b   : > { %587 = vadd.xlane.f32.xlu1 %v586_v57 }
  0x5c   : > { %4978 = vrot.lane.b32.xlu1 %v4977_v62, %s5372_s30 }
  0x5f   : > { %4973 = vrot.lane.b32.xlu0 %v4972_v2, %s5372_s30  ;;  %v4999_v2 = vld [vmem:[#allocation2 + $0x8] sm:$0xff]  }
  0x60   : > { %4983 = vrot.lane.b32.xlu1 %v4982_v3, %s5372_s30 }
  0x64   : > { %4988 = vrot.lane.b32.xlu1 %v4987_v8, %s5372_s30 }
  0x68   : > { %1184 = vperm.xlu1 %4992, %v450_v11  }
  0x6c   : > { %1194 = vperm.xlu1 %4992, %v452_v14  }
  0xca   : > { %v567_v17 = vpop.xlane.xlu0 %566 }
  0xcc   : > { %v573_v18 = vpop.xlane.xlu1 %572 }
  0xce   : > { %v570_v19 = vpop.xlane.xlu0 %569 }
  0xd0   : > { %v576_v20 = vpop.xlane.xlu1 %575 }
  0xd2   : > { %v579_v21 = vpop.xlane.xlu0 %578 }
  0xd4   : > { %v582_v22 = vpop.xlane.xlu1 %581 }
  0xd6   : > { %v585_v23 = vpop.xlane.xlu0 %584 }
  0xd8   : > { %v588_v24 = vpop.xlane.xlu1 %587 }
  0xda   : > { %v4974_v25 = vpop.permute.xlu0 %4973 }
  0xdb   : > { %v4976_v26 = vunpack.i.h.bf16 %v4974_v25  ;;  %v4975_v27 = vunpack.i.l.bf16 %v4974_v25 }
  0xdc   : > { %v4979_v28 = vpop.permute.xlu1 %4978 }
  0xdd   : > { %v631_v29 = vsel %vm629_vm5, %v570_v19, %v4976_v26  ;;  %v630_v30 = vsel %vm629_vm5, %v567_v17, %v4975_v27  ;;  %v4981_v31 = vunpack.i.h.bf16 %v4979_v28  ;;  %v4980_v32 = vunpack.i.l.bf16 %v4979_v28  ;;  %v453_v17 = vld [vmem:[%s437_s22 + $0x18] sm:$0xff]  ;;  %v455_v19 = vld [vmem:[%s437_s22 + $0x28] sm:$0xff] }
  0xde   : > { %v5566_v33 = vpack.c.bf16 %v631_v29, %v630_v30  ;;  %1199 = vperm.xlu1 %4992, %v453_v17  }
  0xdf   : > { %v633_v34 = vsel %vm629_vm5, %v576_v20, %v4981_v31  ;;  %v632_v35 = vsel %vm629_vm5, %v573_v18, %v4980_v32  ;;  %v456_v18 = vld [vmem:[%s437_s22 + $0x30] sm:$0xff]  ;;  %v457_v20 = vld [vmem:[%s437_s22 + $0x38] sm:$0xff]  ;;  %v5633_v32 = vld [vmem:[%s6212_s7] sm:$0xf] }
  0xe0   : > { %v5570_v36 = vpack.c.bf16 %v633_v34, %v632_v35  ;;  %4690 = vmatprep.mubr.msk.bf16.mxu0 %vm876_vm6, %v5566_v33  ;;  %v4984_v37 = vpop.permute.xlu1 %4983 }
  0xe1   : > { %v4986_v38 = vunpack.i.h.bf16 %v4984_v37  ;;  %v4985_v39 = vunpack.i.l.bf16 %v4984_v37  ;;  %v865_v37 = vrot.slane %v5633_v32, %v5509_v12 }
  0xe2   : > { %4691 = vmatmul.mubr.msk.bf16.vlgmr.msra.gmra.mrb[4].mxu0 %vm876_vm6, %v5570_v36  ;;  %1209 = vperm.xlu1 %4992, %v455_v19  }
  0xe3   : > { %v635_v40 = vsel %vm629_vm5, %v582_v22, %v4986_v38  ;;  %v634_v41 = vsel %vm629_vm5, %v579_v21, %v4985_v39 }
  0xe4   : > { %v5578_v42 = vpack.c.bf16 %v635_v40, %v634_v41  ;;  %v4989_v43 = vpop.permute.xlu1 %4988 }
  0xe5   : > { %v4991_v44 = vunpack.i.h.bf16 %v4989_v43  ;;  %v4990_v45 = vunpack.i.l.bf16 %v4989_v43 }
  0xe6   : > { %4694 = vmatprep.mubr.msk.bf16.mxu0 %vm876_vm6, %v5578_v42  ;;  %1219 = vperm.xlu1 %4992, %v457_v20  }
  0xe7   : > { %v637_v46 = vsel %vm629_vm5, %v588_v24, %v4991_v44  ;;  %v636_v47 = vsel %vm629_vm5, %v585_v23, %v4990_v45 }
  0xe8   : > { %v5584_v48 = vpack.c.bf16 %v637_v46, %v636_v47 }
  0xea   : > { %4695 = vmatmul.mubr.msk.bf16.gmra.mrb[8].mxu0 %vm876_vm6, %v5584_v48 }
  0xeb   : > { %4714 = vmatprep.mubr.msk.bf16.mxu0 %vm5370_vm0, %v5369_v1 }
 0x106   : > { %v693_v50 = vpop.f32.mrb[0].mxu0 }
 0x107   : > { %v5593_v51 = vadd.f32 %v4354_v49, %v693_v50  ;;  %v4678_v52 = vpop.f32.mrb[1].mxu0 }
 0x108   : > { %v696_v53 = vpop.f32.mrb[2].mxu0 }
 0x109   : > { %v5597_v54 = vpack.c.bf16 %v5593_v51, %v5593_v51  ;;  %v4679_v55 = vpop.f32.mrb[3].mxu0 }
 0x10b   : > { %4685 = vmatmul.mubr.msk.bf16.vlgmr.msra.gmra.mrb[0].mxu1 %vm717_vm7, %v5597_v54 }
 0x10c   : > { %4699 = vmatpush3.bf16.msra.mxu1 %v4998_v0 }
 0x10d   : > { %4700 = vmatprep.subr.bf16.mxu1 %v4999_v2 }
 0x110   : > { %4701 = vmatpush3.bf16.msra.mxu1 %v4999_v2 }
 0x111   : > { %4718 = vmatprep.subr.bf16.mxu1 %v5369_v1 }
 0x1b5   : > { %v5601_v56 = vpop.f32.mrb[4].mxu0 }
 0x1b6   : > { %v5603_v57 = vpop.f32.mrb[5].mxu0 }
 0x1b7   : > { %v5605_v58 = vpop.f32.mrb[6].mxu0 }
 0x1b8   : > { %v5607_v59 = vpop.f32.mrb[7].mxu0 }
 0x1bd   : > { %v5609_v60 = vpop.f32.mrb[8].mxu0 }
 0x1be   : > { %v5611_v61 = vpop.f32.mrb[9].mxu0 }
 0x1bf   : > { %v5613_v62 = vpop.f32.mrb[10].mxu0 }
 0x1c0   : > { %v5615_v63 = vpop.f32.mrb[11].mxu0 }
 0x1de   : > { %v755_v3 = vpop.f32.mrb[0].mxu1 }
 0x1df   : > { %851 = vrot.lane.b32.xlu0 %v755_v3, %s5374_s19  ;;  %v4686_v5 = vpop.f32.mrb[1].mxu1  ;;  %v762_v21 = vcombine.high %v755_v3, %v755_v3  ;;  %v769_v22 = vrot.slane %v755_v3, %v5500_v6 }
 0x1e0   : > { %v758_v7 = vpop.f32.mrb[2].mxu1 }
 0x1e1   : > { %v4687_v8 = vpop.f32.mrb[3].mxu1  ;;  %v776_v23 = vrot.slane %v762_v21, %v5500_v6  ;;  %v777_v24 = vcombine.high %v769_v22, %v769_v22  ;;  %v785_v26 = vrot.slane %v769_v22, %v5500_v6 }
 0x1e3   : > { %1189 = vperm.xlu0 %4993, %v451_v13   ;;  %v778_v25 = vcombine.high %v776_v23, %v776_v23  ;;  %v799_v27 = vrot.slane %v777_v24, %v5500_v6  ;;  %v792_v28 = vrot.slane %v776_v23, %v5500_v6  ;;  %v807_v30 = vcombine.high %v785_v26, %v785_v26 }
 0x1e4   : > { %v814_v38 = vrot.slane %v785_v26, %v5509_v12 }
 0x1e5   : > { %v806_v29 = vrot.slane %v778_v25, %v5500_v6  ;;  %v809_v31 = vcombine.high %v799_v27, %v799_v27  ;;  %v808_v34 = vcombine.high %v792_v28, %v792_v28  ;;  %v818_v39 = vrot.slane %v799_v27, %v5509_v12 }
 0x1e6   : > { %v822_v40 = vrot.slane %v807_v30, %v5509_v12  ;;  %v830_v43 = vrot.slane %v792_v28, %v5509_v12 }
 0x1e7   : > { %1204 = vperm.xlu0 %4993, %v454_v16   ;;  %v810_v35 = vcombine.high %v806_v29, %v806_v29  ;;  %v826_v41 = vrot.slane %v809_v31, %v5509_v12  ;;  %v834_v44 = vrot.slane %v806_v29, %v5509_v12  ;;  %v838_v45 = vrot.slane %v808_v34, %v5509_v12 }
 0x1e9   : > { %v842_v46 = vrot.slane %v810_v35, %v5509_v12 }
 0x1eb   : > { %1214 = vperm.xlu0 %4993, %v456_v18  }
 0x251   : > { %v852_v47 = vpop.permute.xlu0 %851 }
 0x252   : > { %v856_v49 = vadd.f32 %v852_v47, %v822_v40  ;;  %v857_v50 = vadd.f32 %v852_v47, %v826_v41  ;;  %v854_v52 = vadd.f32 %v852_v47, %v814_v38  ;;  %v855_v53 = vadd.f32 %v852_v47, %v818_v39 }
 0x253   : > { %v858_v55 = vadd.f32 %v852_v47, %v830_v43  ;;  %v859_v0 = vadd.f32 %v852_v47, %v834_v44  ;;  %v860_v2 = vadd.f32 %v852_v47, %v838_v45  ;;  %v861_v3 = vadd.f32 %v852_v47, %v842_v46 }
 0x254   : > { %v866_v5 = vadd.f32 %v865_v37, %v854_v52  ;;  %v867_v7 = vadd.f32 %v865_v37, %v855_v53  ;;  %v868_v8 = vadd.f32 %v865_v37, %v856_v49  ;;  %v869_v9 = vadd.f32 %v865_v37, %v857_v50 }
 0x255   : > { %v870_v11 = vadd.f32 %v865_v37, %v858_v55  ;;  %v871_v13 = vadd.f32 %v865_v37, %v859_v0  ;;  %v872_v14 = vadd.f32 %v865_v37, %v860_v2  ;;  %v873_v16 = vadd.f32 %v865_v37, %v861_v3 }
 0x256   : > { %v961_v17 = vadd.f32 %v5603_v57, %v866_v5  ;;  %v962_v18 = vadd.f32 %v5607_v59, %v867_v7  ;;  %v963_v19 = vadd.f32 %v5601_v56, %v868_v8  ;;  %v964_v20 = vadd.f32 %v5605_v58, %v869_v9  ;;  %v5000_v7 = vld [vmem:[#allocation2 + $0x10] sm:$0xff]  }
 0x257   : > { %v965_v21 = vadd.f32 %v5611_v61, %v870_v11  ;;  %v966_v22 = vadd.f32 %v5615_v63, %v871_v13  ;;  %v967_v23 = vadd.f32 %v5609_v60, %v872_v14  ;;  %v968_v24 = vadd.f32 %v5613_v62, %v873_v16 }
 0x258   : > { %v4364_v25 = vmul.f32 -1.442695, %v961_v17  ;;  %v4365_v26 = vmul.f32 -1.442695, %v962_v18  ;;  %v4366_v27 = vmul.f32 -1.442695, %v963_v19 }
 0x259   : > { %v4367_v28 = vmul.f32 -1.442695, %v964_v20  ;;  %v4368_v57 = vmul.f32 -1.442695, %v965_v21  ;;  %v4369_v59 = vmul.f32 -1.442695, %v966_v22 }
 0x25a   : > { %5046 = vpow2.f32 %v4364_v25  ;;  %v4370_v56 = vmul.f32 -1.442695, %v967_v23  ;;  %v4371_v58 = vmul.f32 -1.442695, %v968_v24 }
 0x25b   : > { %5048 = vpow2.f32 %v4365_v26 }
 0x25c   : > { %5050 = vpow2.f32 %v4366_v27 }
 0x25d   : > { %5052 = vpow2.f32 %v4367_v28 }
 0x25e   : > { %5054 = vpow2.f32 %v4368_v57 }
 0x25f   : > { %5056 = vpow2.f32 %v4369_v59 }
 0x260   : > { %5058 = vpow2.f32 %v4370_v56 }
 0x261   : > { %5060 = vpow2.f32 %v4371_v58 }
 0x264   : > { %v5047_v61 = vpop.eup %5046 }
 0x265   : > { %v5049_v60 = vpop.eup %5048  ;;  %v993_v63 = vadd.f32 1.0, %v5047_v61 }
 0x266   : > { %v5051_v62 = vpop.eup %5050  ;;  %v994_v29 = vadd.f32 1.0, %v5049_v60 }
 0x267   : > { %v5053_v30 = vpop.eup %5052  ;;  %5062 = vrcp.f32 %v993_v63  ;;  %v995_v31 = vadd.f32 1.0, %v5051_v62 }
 0x268   : > { %v5055_v34 = vpop.eup %5054  ;;  %5064 = vrcp.f32 %v994_v29  ;;  %v996_v35 = vadd.f32 1.0, %v5053_v30 }
 0x269   : > { %v5057_v37 = vpop.eup %5056  ;;  %5066 = vrcp.f32 %v995_v31  ;;  %v997_v38 = vadd.f32 1.0, %v5055_v34 }
 0x26a   : > { %v5059_v39 = vpop.eup %5058  ;;  %5068 = vrcp.f32 %v996_v35  ;;  %v998_v40 = vadd.f32 1.0, %v5057_v37 }
 0x26b   : > { %v5061_v41 = vpop.eup %5060  ;;  %5070 = vrcp.f32 %v997_v38  ;;  %v999_v43 = vadd.f32 1.0, %v5059_v39 }
 0x26c   : > { %5072 = vrcp.f32 %v998_v40  ;;  %v1000_v44 = vadd.f32 1.0, %v5061_v41 }
 0x26d   : > { %5074 = vrcp.f32 %v999_v43 }
 0x26e   : > { %5076 = vrcp.f32 %v1000_v44 }
 0x271   : > { %v5063_v45 = vpop.eup %5062 }
 0x272   : > { %v5065_v46 = vpop.eup %5064  ;;  %v1017_v47 = vmul.f32 %v5063_v45, %v961_v17 }
 0x273   : > { %v5067_v49 = vpop.eup %5066  ;;  %v1018_v50 = vmul.f32 %v5065_v46, %v962_v18  ;;  %v5001_v18 = vld [vmem:[#allocation2 + $0x18] sm:$0xff]   ;;  %v5696_v46 = vpop.permute.xlu1 %1184 }
 0x274   : > { %v5069_v52 = vpop.eup %5068  ;;  %v1019_v53 = vmul.f32 %v5067_v49, %v963_v19 }
 0x275   : > { %v5071_v55 = vpop.eup %5070  ;;  %v1025_v0 = vpack.c.bf16 %v1018_v50, %v1017_v47  ;;  %v1020_v2 = vmul.f32 %v5069_v52, %v964_v20  ;;  %v5002_v20 = vld [vmem:[#allocation2 + $0x20] sm:$0xff]  }
 0x276   : > { %v5073_v3 = vpop.eup %5072  ;;  %v1021_v5 = vmul.f32 %v5071_v55, %v965_v21  ;;  %4711 = vmatpush3.bf16.msra.mxu0 %v5002_v20  ;;  %v5003_v21 = vld [vmem:[#allocation2 + $0x28] sm:$0xff]  }
 0x277   : > { %v5075_v8 = vpop.eup %5074  ;;  %4702 = vmatprep.mubr.msk.bf16.mxu1 %vm717_vm7, %v1025_v0  ;;  %v1026_v9 = vpack.c.bf16 %v1020_v2, %v1019_v53  ;;  %v1022_v11 = vmul.f32 %v5073_v3, %v966_v22  ;;  %4712 = vmatprep.subr.bf16.mxu0 %v5369_v1  ;;  %v5668_v22 = vsub.s32 1, %v5483_v4 }
 0x278   : > { %v5077_v13 = vpop.eup %5076  ;;  %v1023_v14 = vmul.f32 %v5075_v8, %v967_v23 }
 0x279   : > { %4703 = vmatmul.mubr.msk.bf16.vlgmr.msra.gmra.mrb[4].mxu1 %vm717_vm7, %v1026_v9  ;;  %v1027_v16 = vpack.c.bf16 %v1022_v11, %v1021_v5  ;;  %v1024_v17 = vmul.f32 %v5077_v13, %v968_v24  ;;  %v1036_v23 = vrot.slane %v5633_v32, %v5668_v22  ;;  %v5700_v5 = vpop.permute.xlu1 %1194 }
 0x27a   : > { %4719 = vmatpush3.bf16.msra.mxu1 %v5000_v7  ;;  %4713 = vmatpush3.bf16.msra.mxu0 %v5003_v21 }
 0x27b   : > { %4706 = vmatprep.mubr.msk.bf16.mxu1 %vm717_vm7, %v1027_v16  ;;  %v1028_v19 = vpack.c.bf16 %v1024_v17, %v1023_v14  ;;  %4720 = vmatprep.subr.bf16.mxu1 %v5369_v1  ;;  %v5702_v17 = vpop.permute.xlu0 %1189 }
 0x27c   : > { %4726 = vmatprep.subr.bf16.mxu0 %v5369_v1 }
 0x27d   : > { %v5704_v20 = vpop.permute.xlu1 %1199 }
 0x27e   : > { %4721 = vmatpush3.bf16.msra.mxu1 %v5001_v18 }
 0x27f   : > { %4732 = vmatprep.subr.bf16.mxu1 %v5369_v1 }
 0x281   : > { %4707 = vmatmul.mubr.msk.bf16.gmra.mrb[8].mxu1 %vm717_vm7, %v1028_v19 }
 0x282   : > { %4722 = vmatprep.mubr.msk.bf16.mxu1 %vm5370_vm0, %v5369_v1 }
 0x289   : > { %4723 = vmatmul.mubr.msk.bf16.vlgmr.msra.gmra.mrb[12].mxu1 %vm717_vm7, %v5597_v54 }
 0x28a   : > { %4736 = vmatprep.mubr.msk.bf16.mxu1 %vm5370_vm0, %v5369_v1 }
 0x34c   : > { %v4704_v24 = vpop.f32.mrb[4].mxu1 }
 0x34d   : > { %v5672_v25 = vadd.f32 %v4704_v24, %v1036_v23  ;;  %v1095_v54 = vpop.f32.mrb[5].mxu1 }
 0x34e   : > { %v5674_v26 = vadd.f32 %v1095_v54, %v1036_v23  ;;  %v4705_v27 = vpop.f32.mrb[6].mxu1 }
 0x34f   : > { %v4380_v28 = vmul.f32 -1.442695, %v5672_v25  ;;  %v5677_v57 = vadd.f32 %v4705_v27, %v1036_v23  ;;  %v1098_v59 = vpop.f32.mrb[7].mxu1 }
 0x350   : > { %v4378_v56 = vmul.f32 -1.442695, %v5674_v26  ;;  %v5680_v58 = vadd.f32 %v1098_v59, %v1036_v23 }
 0x351   : > { %5078 = vpow2.f32 %v4380_v28  ;;  %v4381_v61 = vmul.f32 -1.442695, %v5677_v57 }
 0x352   : > { %5080 = vpow2.f32 %v4378_v56  ;;  %v4379_v60 = vmul.f32 -1.442695, %v5680_v58 }
 0x353   : > { %5082 = vpow2.f32 %v4381_v61 }
 0x354   : > { %5084 = vpow2.f32 %v4379_v60  ;;  %v4708_v63 = vpop.f32.mrb[8].mxu1  ;;  %v5712_v60 = vpop.permute.xlu0 %1204 }
 0x355   : > { %v5684_v62 = vadd.f32 %v4708_v63, %v1036_v23  ;;  %v1111_v29 = vpop.f32.mrb[9].mxu1 }
 0x356   : > { %v5686_v30 = vadd.f32 %v1111_v29, %v1036_v23  ;;  %v4709_v31 = vpop.f32.mrb[10].mxu1 }
 0x357   : > { %v4384_v34 = vmul.f32 -1.442695, %v5684_v62  ;;  %v5689_v35 = vadd.f32 %v4709_v31, %v1036_v23  ;;  %v1114_v37 = vpop.f32.mrb[11].mxu1 }
 0x358   : > { %v4382_v38 = vmul.f32 -1.442695, %v5686_v30  ;;  %v5692_v39 = vadd.f32 %v1114_v37, %v1036_v23 }
 0x359   : > { %5086 = vpow2.f32 %v4384_v34  ;;  %v4385_v40 = vmul.f32 -1.442695, %v5689_v35  ;;  %v5717_v34 = vpop.permute.xlu1 %1209 }
 0x35a   : > { %5088 = vpow2.f32 %v4382_v38  ;;  %v4383_v41 = vmul.f32 -1.442695, %v5692_v39 }
 0x35b   : > { %v5079_v43 = vpop.eup %5078  ;;  %5090 = vpow2.f32 %v4385_v40 }
 0x35c   : > { %v5081_v44 = vpop.eup %5080  ;;  %v1152_v45 = vadd.f32 1.0, %v5079_v43  ;;  %5092 = vpow2.f32 %v4383_v41  ;;  %v5698_v47 = vpop.f32.mrb[12].mxu1 }
 0x35d   : > { %v5083_v49 = vpop.eup %5082  ;;  %v1150_v50 = vadd.f32 1.0, %v5081_v44  ;;  %v4724_v52 = vpop.f32.mrb[13].mxu1 }
 0x35e   : > { %v5085_v53 = vpop.eup %5084  ;;  %5094 = vrcp.f32 %v1152_v45  ;;  %v1153_v55 = vadd.f32 1.0, %v5083_v49  ;;  %v1439_v0 = vpop.f32.mrb[14].mxu1 }
 0x35f   : > { %5096 = vrcp.f32 %v1150_v50  ;;  %v1151_v2 = vadd.f32 1.0, %v5085_v53  ;;  %v4725_v3 = vpop.f32.mrb[15].mxu1  ;;  %v5724_v0 = vpop.permute.xlu0 %1214 }
 0x360   : > { %5098 = vrcp.f32 %v1153_v55 }
 0x361   : > { %5100 = vrcp.f32 %v1151_v2 }
 0x363   : > { %v5087_v7 = vpop.eup %5086 }
 0x364   : > { %v5089_v8 = vpop.eup %5088  ;;  %v1156_v9 = vadd.f32 1.0, %v5087_v7 }
 0x365   : > { %v5091_v11 = vpop.eup %5090  ;;  %v1154_v13 = vadd.f32 1.0, %v5089_v8 }
 0x366   : > { %v5093_v14 = vpop.eup %5092  ;;  %5102 = vrcp.f32 %v1156_v9  ;;  %v1157_v16 = vadd.f32 1.0, %v5091_v11 }
 0x367   : > { %5104 = vrcp.f32 %v1154_v13  ;;  %v1155_v18 = vadd.f32 1.0, %v5093_v14  ;;  %v5729_v14 = vpop.permute.xlu1 %1219 }
 0x368   : > { %v5095_v19 = vpop.eup %5094  ;;  %5106 = vrcp.f32 %v1157_v16 }
 0x369   : > { %v5097_v21 = vpop.eup %5096  ;;  %v1176_v23 = vmul.f32 %v5095_v19, %v5672_v25  ;;  %5108 = vrcp.f32 %v1155_v18 }
 0x36a   : > { %v5099_v24 = vpop.eup %5098  ;;  %v1174_v54 = vmul.f32 %v5097_v21, %v5674_v26 }
 0x36b   : > { %v5101_v27 = vpop.eup %5100  ;;  %v1177_v28 = vmul.f32 %v5099_v24, %v5677_v57  ;;  %v1224_v59 = vmul.f32 %v5700_v5, %v1176_v23 }
 0x36c   : > { %v1175_v56 = vmul.f32 %v5101_v27, %v5680_v58  ;;  %v1222_v61 = vmul.f32 %v5696_v46, %v1174_v54 }
 0x36d   : > { %v1244_v63 = vsel %vm717_vm7, %v1224_v59, 0.0  ;;  %v1225_v29 = vmul.f32 %v5704_v20, %v1177_v28 }
 0x36e   : > { %v1230_v25 = vsel %vm717_vm7, %v1222_v61, 0.0  ;;  %v1245_v31 = vrot.slane %v1244_v63, 4  ;;  %v1223_v26 = vmul.f32 %v5702_v17, %v1175_v56 }
 0x36f   : > { %v1231_v57 = vrot.slane %v1230_v25, 4  ;;  %v1251_v37 = vsel %vm717_vm7, %v1225_v29, 0.0 }
 0x370   : > { %v5103_v38 = vpop.eup %5102  ;;  %v1246_v58 = vadd.f32 %v1245_v31, %v1244_v63  ;;  %v1252_v40 = vrot.slane %v1251_v37, 4  ;;  %v1237_v41 = vsel %vm717_vm7, %v1223_v26, 0.0 }
 0x371   : > { %v5105_v43 = vpop.eup %5104  ;;  %v1180_v44 = vmul.f32 %v5103_v38, %v5684_v62  ;;  %v1232_v45 = vadd.f32 %v1231_v57, %v1230_v25  ;;  %v1238_v49 = vrot.slane %v1237_v41, 4 }
 0x372   : > { %v5107_v50 = vpop.eup %5106  ;;  %v1178_v52 = vmul.f32 %v5105_v43, %v5686_v30  ;;  %v1247_v53 = vrot.slane %v1246_v58, 2  ;;  %v1253_v55 = vadd.f32 %v1252_v40, %v1251_v37 }
 0x373   : > { %v5109_v2 = vpop.eup %5108  ;;  %v1181_v3 = vmul.f32 %v5107_v50, %v5689_v35  ;;  %v1233_v7 = vrot.slane %v1232_v45, 2  ;;  %v1239_v8 = vadd.f32 %v1238_v49, %v1237_v41  ;;  %v1228_v9 = vmul.f32 %v5724_v0, %v1180_v44 }
 0x374   : > { %v1179_v11 = vmul.f32 %v5109_v2, %v5692_v39  ;;  %v1248_v13 = vadd.f32 %v1247_v53, %v1246_v58  ;;  %v1254_v62 = vrot.slane %v1253_v55, 2  ;;  %v1226_v16 = vmul.f32 %v5712_v60, %v1178_v52 }
 0x375   : > { %v1234_v30 = vadd.f32 %v1233_v7, %v1232_v45  ;;  %v1240_v18 = vrot.slane %v1239_v8, 2  ;;  %v1229_v19 = vmul.f32 %v5729_v14, %v1181_v3  ;;  %v1272_v21 = vsel %vm717_vm7, %v1228_v9, 0.0 }
 0x376   : > { %v1249_v23 = vrot.slane %v1248_v13, 1  ;;  %v1255_v35 = vadd.f32 %v1254_v62, %v1253_v55  ;;  %v1227_v24 = vmul.f32 %v5717_v34, %v1179_v11  ;;  %v1258_v54 = vsel %vm717_vm7, %v1226_v16, 0.0 }
 0x377   : > { %v1235_v27 = vrot.slane %v1234_v30, 1  ;;  %v1241_v39 = vadd.f32 %v1240_v18, %v1239_v8  ;;  %v1279_v28 = vsel %vm717_vm7, %v1229_v19, 0.0  ;;  %v1259_v59 = vrot.slane %v1258_v54, 4 }
 0x378   : > { %v1250_v56 = vadd.f32 %v1249_v23, %v1248_v13  ;;  %v1256_v61 = vrot.slane %v1255_v35, 1  ;;  %v1265_v63 = vsel %vm717_vm7, %v1227_v24, 0.0  ;;  %v1280_v29 = vrot.slane %v1279_v28, 4 }
 0x379   : > { %v1236_v25 = vadd.f32 %v1235_v27, %v1234_v30  ;;  %v1266_v31 = vrot.slane %v1265_v63, 4  ;;  %v1242_v26 = vrot.slane %v1241_v39, 1  ;;  %v1260_v57 = vadd.f32 %v1259_v59, %v1258_v54 }
 0x37a   : > { %v1257_v37 = vadd.f32 %v1256_v61, %v1255_v35  ;;  %v1281_v38 = vadd.f32 %v1280_v29, %v1279_v28  ;;  %v1273_v58 = vrot.slane %v1272_v21, 4  ;;  %v1293_v45 = vpack.c.bf16 %v1250_v56, %v1250_v56 }
 0x37b   : > { %v1291_v40 = vpack.c.bf16 %v1236_v25, %v1236_v25  ;;  %v1267_v41 = vadd.f32 %v1266_v31, %v1265_v63  ;;  %v1243_v43 = vadd.f32 %v1242_v26, %v1241_v39  ;;  %v1261_v44 = vrot.slane %v1260_v57, 2 }
 0x37c   : > { %v1282_v49 = vrot.slane %v1281_v38, 2  ;;  %v1274_v50 = vadd.f32 %v1273_v58, %v1272_v21  ;;  %v1294_v52 = vpack.c.bf16 %v1257_v37, %v1257_v37  ;;  %v1314_v62 = vunpack.c.l.b16 %v1293_v45  ;;  %v1748_v45 = vld [vmem:[#allocation2 + $0xb0] sm:$0xf] }
 0x37d   : > { %v1268_v53 = vrot.slane %v1267_v41, 2  ;;  %v1292_v55 = vpack.c.bf16 %v1243_v43, %v1243_v43  ;;  %v1262_v2 = vadd.f32 %v1261_v44, %v1260_v57  ;;  %v1312_v8 = vunpack.c.l.b16 %v1291_v40  ;;  %v5004_v40 = vld [vmem:[#allocation2 + $0x40] sm:$0xff]   ;;  %v5005_v43 = vld [vmem:[#allocation2 + $0x30] sm:$0xff]   ;;  %v5006_v44 = vld [vmem:[#allocation2 + $0x38] sm:$0xff]  }
 0x37e   : > { %v1283_v3 = vadd.f32 %v1282_v49, %v1281_v38  ;;  %v1275_v7 = vrot.slane %v1274_v50, 2  ;;  %v1315_v18 = vunpack.c.l.b16 %v1294_v52  ;;  %4733 = vmatpush3.bf16.msra.mxu1 %v5005_v43  ;;  %v1750_v49 = vand.u32 %v1748_v45, %v5560_v15 }
 0x37f   : > { %v1269_v9 = vadd.f32 %v1268_v53, %v1267_v41  ;;  %v1313_v11 = vunpack.c.l.b16 %v1292_v55  ;;  %v1263_v13 = vrot.slane %v1262_v2, 1  ;;  %4734 = vmatprep.subr.bf16.mxu1 %v5369_v1 }
 0x380   : > { %v1284_v16 = vrot.slane %v1283_v3, 1  ;;  %v1276_v30 = vadd.f32 %v1275_v7, %v1274_v50  ;;  %v5007_v50 = vld [vmem:[%s6210_s5 + $0x10] sm:$0xff]   ;;  %v5761_v7 = vsub.s32 2, %v5483_v4 }
 0x381   : > { %v1270_v19 = vrot.slane %v1269_v9, 1  ;;  %v1321_v21 = vsel %vm1320_vm8, %v1313_v11, %v1312_v8  ;;  %v1264_v23 = vadd.f32 %v1263_v13, %v1262_v2 }
 0x382   : > { %v1323_v35 = vsel %vm1322_vm9, %v1314_v62, %v1321_v21  ;;  %v1285_v24 = vadd.f32 %v1284_v16, %v1283_v3  ;;  %v1277_v54 = vrot.slane %v1276_v30, 1  ;;  %4735 = vmatpush3.bf16.msra.mxu1 %v5006_v44  ;;  %v1495_v8 = vrot.slane %v5633_v32, %v5761_v7 }
 0x383   : > { %v1271_v27 = vadd.f32 %v1270_v19, %v1269_v9  ;;  %v1295_v39 = vpack.c.bf16 %v1264_v23, %v1264_v23  ;;  %v1325_v28 = vsel %vm1324_vm10, %v1315_v18, %v1323_v35  ;;  %4748 = vmatprep.subr.bf16.mxu1 %v1750_v49 }
 0x384   : > { %v1278_v59 = vadd.f32 %v1277_v54, %v1276_v30  ;;  %v1298_v61 = vpack.c.bf16 %v1285_v24, %v1285_v24  ;;  %v5008_v24 = vld [vmem:[%s6210_s5 + $0x18] sm:$0xff]   ;;  %v5781_v54 = vsub.s32 3, %v5483_v4 }
 0x385   : > { %v1296_v56 = vpack.c.bf16 %v1271_v27, %v1271_v27  ;;  %v1316_v63 = vunpack.c.l.b16 %v1295_v39 }
 0x386   : > { %v1297_v29 = vpack.c.bf16 %v1278_v59, %v1278_v59  ;;  %v1319_v57 = vunpack.c.l.b16 %v1298_v61  ;;  %v1569_v27 = vrot.slane %v5633_v32, %v5781_v54 }
 0x387   : > { %v1317_v25 = vunpack.c.l.b16 %v1296_v56  ;;  %v1327_v31 = vsel %vm1326_vm11, %v1316_v63, %v1325_v28 }
 0x388   : > { %v1318_v26 = vunpack.c.l.b16 %v1297_v29 }
 0x389   : > { %v1329_v37 = vsel %vm1328_vm12, %v1317_v25, %v1327_v31 }
 0x38a   : > { %v1331_v38 = vsel %vm1330_vm13, %v1318_v26, %v1329_v37 }
 0x38b   : > { %v1333_v58 = vsel %vm1332_vm14, %v1319_v57, %v1331_v38  ;;  %v5009_v38 = vld [vmem:[#allocation2 + $0x60] sm:$0xff]  }
 0x38c   : > { %v1334_v41 = vpack.c.b16 %v1333_v58, %v1333_v58  ;;  %v5010_v58 = vld [vmem:[#allocation2 + $0x68] sm:$0xff]  }
 0x38e   : > { %4715 = vmatmul.mubr.msk.bf16.vlgmr.msra.gmra.mrb[12].mxu0 %vm717_vm7, %v1334_v41 }
 0x38f   : > { %4727 = vmatpush3.bf16.msra.mxu0 %v5004_v40  ;;  %4728 = vmatprep.mubr.msk.bf16.mxu0 %vm5370_vm0, %v5369_v1 }
 0x390   : > { %4740 = vmatprep.subr.bf16.mxu0 %v5369_v1 }
 0x396   : > { %4729 = vmatmul.mubr.msk.bf16.vlgmr.msra.gmra.mrb[16].mxu0 %vm655_vm1, %v5505_v10 }
 0x397   : > { %4744 = vmatprep.mubr.msk.bf16.mxu0 %vm5370_vm0, %v5369_v1  ;;  %4741 = vmatpush3.bf16.msra.mxu0 %v5007_v50 }
 0x398   : > { %4742 = vmatprep.subr.bf16.mxu0 %v5369_v1 }
 0x39b   : > { %4743 = vmatpush3.bf16.msra.mxu0 %v5008_v24 }
 0x39c   : > { %4758 = vmatprep.subr.bf16.mxu0 %v5009_v38 }
 0x461   : > { %v1384_v52 = vpop.f32.mrb[12].mxu0 }
 0x462   : > { %v1437_v53 = vadd.f32 %v5698_v47, %v1384_v52  ;;  %v4716_v55 = vpop.f32.mrb[13].mxu0 }
 0x463   : > { %v1387_v2 = vpop.f32.mrb[14].mxu0 }
 0x464   : > { %v4717_v3 = vpop.f32.mrb[15].mxu0 }
 0x469   : > { %v1485_v9 = vpop.f32.mrb[16].mxu0 }
 0x46a   : > { %v1491_v11 = vadd.f32 %v1485_v9, %v1437_v53  ;;  %v4730_v13 = vpop.f32.mrb[17].mxu0 }
 0x46b   : > { %v1488_v62 = vpop.f32.mrb[18].mxu0  ;;  %v5805_v13 = vld [vmem:[%s6212_s7 + $0x4] sm:$0xf] }
 0x46c   : > { %v1496_v16 = vadd.f32 %v1495_v8, %v1491_v11  ;;  %v4731_v30 = vpop.f32.mrb[19].mxu0 }
 0x46d   : > { %v1738_v30 = vrot.slane %v5805_v13, %v5509_v12 }
 0x46e   : > { %v4394_v18 = vmul.f32 -1.442695, %v1496_v16 }
 0x470   : > { %5110 = vpow2.f32 %v4394_v18 }
 0x47a   : > { %v5111_v19 = vpop.eup %5110 }
 0x47b   : > { %v1500_v21 = vadd.f32 1.0, %v5111_v19 }
 0x47d   : > { %5112 = vrcp.f32 %v1500_v21 }
 0x487   : > { %v5113_v47 = vpop.eup %5112 }
 0x488   : > { %v1503_v23 = vmul.f32 %v5113_v47, %v1496_v16 }
 0x48a   : > { %v1504_v35 = vpack.c.bf16 %v1503_v23, %v1503_v23 }
 0x48c   : > { %4737 = vmatmul.mubr.msk.bf16.vlgmr.msra.gmra.mrb[16].mxu1 %vm717_vm7, %v1504_v35 }
 0x48d   : > { %4750 = vmatprep.mubr.msk.bf16.mxu1 %vm876_vm6, %v5566_v33  ;;  %4749 = vmatpush3.bf16.msra.mxu1 %v1750_v49 }
 0x48e   : > { %4770 = vmatprep.subr.bf16.mxu1 %v5369_v1 }
 0x494   : > { %4751 = vmatmul.mubr.msk.bf16.vlgmr.msra.gmra.mrb[20].mxu1 %vm876_vm6, %v5570_v36 }
 0x495   : > { %4754 = vmatprep.mubr.msk.bf16.mxu1 %vm876_vm6, %v5578_v42 }
 0x49c   : > { %4755 = vmatmul.mubr.msk.bf16.gmra.mrb[24].mxu1 %vm876_vm6, %v5584_v48 }
 0x49d   : > { %4774 = vmatprep.mubr.msk.bf16.mxu1 %vm5370_vm0, %v5369_v1 }
 0x55f   : > { %v1559_v39 = vpop.f32.mrb[16].mxu1 }
 0x560   : > { %v1565_v28 = vadd.f32 %v1559_v39, %v5593_v51  ;;  %v4738_v59 = vpop.f32.mrb[17].mxu1 }
 0x561   : > { %v1562_v56 = vpop.f32.mrb[18].mxu1 }
 0x562   : > { %v5786_v61 = vadd.f32 %v1569_v27, %v1565_v28  ;;  %v4739_v63 = vpop.f32.mrb[19].mxu1 }
 0x564   : > { %v5790_v29 = vpack.c.bf16 %v5786_v61, %v5786_v61 }
 0x566   : > { %4745 = vmatmul.mubr.msk.bf16.vlgmr.msra.gmra.mrb[20].mxu0 %vm717_vm7, %v5790_v29 }
 0x567   : > { %v4752_v4 = vpop.f32.mrb[20].mxu1  ;;  %4759 = vmatpush3.bf16.msra.mxu0 %v5009_v38 }
 0x568   : > { %v1786_v25 = vpop.f32.mrb[21].mxu1  ;;  %4760 = vmatprep.subr.bf16.mxu0 %v5010_v58 }
 0x569   : > { %v4753_v31 = vpop.f32.mrb[22].mxu1 }
 0x56a   : > { %v1789_v26 = vpop.f32.mrb[23].mxu1 }
 0x56b   : > { %4761 = vmatpush3.bf16.msra.mxu0 %v5010_v58 }
 0x56c   : > { %4778 = vmatprep.subr.bf16.mxu0 %v5369_v1 }
 0x56f   : > { %v4756_v32 = vpop.f32.mrb[24].mxu1 }
 0x570   : > { %v1802_v57 = vpop.f32.mrb[25].mxu1 }
 0x571   : > { %v4757_v37 = vpop.f32.mrb[26].mxu1 }
 0x572   : > { %v1805_v51 = vpop.f32.mrb[27].mxu1 }
 0x639   : > { %v1628_v40 = vpop.f32.mrb[20].mxu0 }
 0x63a   : > { %1724 = vrot.lane.b32.xlu0 %v1628_v40, %s5374_s19  ;;  %v4746_v41 = vpop.f32.mrb[21].mxu0  ;;  %v1635_v45 = vcombine.high %v1628_v40, %v1628_v40  ;;  %v1642_v49 = vrot.slane %v1628_v40, %v5500_v6 }
 0x63b   : > { %v1631_v43 = vpop.f32.mrb[22].mxu0 }
 0x63c   : > { %v4747_v44 = vpop.f32.mrb[23].mxu0  ;;  %v1649_v50 = vrot.slane %v1635_v45, %v5500_v6  ;;  %v1650_v52 = vcombine.high %v1642_v49, %v1642_v49  ;;  %v1658_v55 = vrot.slane %v1642_v49, %v5500_v6 }
 0x63e   : > { %v1651_v53 = vcombine.high %v1649_v50, %v1649_v50  ;;  %v1672_v2 = vrot.slane %v1650_v52, %v5500_v6  ;;  %v1665_v3 = vrot.slane %v1649_v50, %v5500_v6  ;;  %v1680_v9 = vcombine.high %v1658_v55, %v1658_v55 }
 0x63f   : > { %v1687_v18 = vrot.slane %v1658_v55, %v5509_v12 }
 0x640   : > { %v1679_v8 = vrot.slane %v1651_v53, %v5500_v6  ;;  %v1682_v11 = vcombine.high %v1672_v2, %v1672_v2  ;;  %v1681_v62 = vcombine.high %v1665_v3, %v1665_v3  ;;  %v1691_v19 = vrot.slane %v1672_v2, %v5509_v12 }
 0x641   : > { %v1695_v21 = vrot.slane %v1680_v9, %v5509_v12  ;;  %v1703_v23 = vrot.slane %v1665_v3, %v5509_v12 }
 0x642   : > { %v1683_v16 = vcombine.high %v1679_v8, %v1679_v8  ;;  %v1699_v47 = vrot.slane %v1682_v11, %v5509_v12  ;;  %v1707_v35 = vrot.slane %v1679_v8, %v5509_v12  ;;  %v1711_v24 = vrot.slane %v1681_v62, %v5509_v12 }
 0x644   : > { %v1715_v27 = vrot.slane %v1683_v16, %v5509_v12 }
 0x6ac   : > { %v1725_v39 = vpop.permute.xlu0 %1724 }
 0x6ad   : > { %v1729_v28 = vadd.f32 %v1725_v39, %v1695_v21  ;;  %v1730_v59 = vadd.f32 %v1725_v39, %v1699_v47  ;;  %v1727_v56 = vadd.f32 %v1725_v39, %v1687_v18  ;;  %v1728_v63 = vadd.f32 %v1725_v39, %v1691_v19 }
 0x6ae   : > { %v1731_v38 = vadd.f32 %v1725_v39, %v1703_v23  ;;  %v1732_v58 = vadd.f32 %v1725_v39, %v1707_v35  ;;  %v1733_v40 = vadd.f32 %v1725_v39, %v1711_v24  ;;  %v1734_v41 = vadd.f32 %v1725_v39, %v1715_v27 }
 0x6af   : > { %v1739_v43 = vadd.f32 %v1738_v30, %v1727_v56  ;;  %v1740_v44 = vadd.f32 %v1738_v30, %v1728_v63  ;;  %v1741_v45 = vadd.f32 %v1738_v30, %v1729_v28  ;;  %v1742_v49 = vadd.f32 %v1738_v30, %v1730_v59 }
 0x6b0   : > { %v1743_v50 = vadd.f32 %v1738_v30, %v1731_v38  ;;  %v1744_v52 = vadd.f32 %v1738_v30, %v1732_v58  ;;  %v1745_v53 = vadd.f32 %v1738_v30, %v1733_v40  ;;  %v1746_v55 = vadd.f32 %v1738_v30, %v1734_v41 }
 0x6b1   : > { %v1817_v2 = vadd.f32 %v1786_v25, %v1739_v43  ;;  %v1818_v3 = vadd.f32 %v1789_v26, %v1740_v44  ;;  %v1819_v8 = vadd.f32 %v4752_v4, %v1741_v45  ;;  %v1820_v9 = vadd.f32 %v4753_v31, %v1742_v49 }
 0x6b2   : > { %v1821_v11 = vadd.f32 %v1802_v57, %v1743_v50  ;;  %v1822_v62 = vadd.f32 %v1805_v51, %v1744_v52  ;;  %v1823_v16 = vadd.f32 %v4756_v32, %v1745_v53  ;;  %v1824_v18 = vadd.f32 %v4757_v37, %v1746_v55 }
 0x6b3   : > { %v4410_v19 = vmul.f32 -1.442695, %v1817_v2  ;;  %v4411_v21 = vmul.f32 -1.442695, %v1818_v3  ;;  %v4412_v47 = vmul.f32 -1.442695, %v1819_v8 }
 0x6b4   : > { %v4413_v23 = vmul.f32 -1.442695, %v1820_v9  ;;  %v4414_v35 = vmul.f32 -1.442695, %v1821_v11  ;;  %v4415_v24 = vmul.f32 -1.442695, %v1822_v62 }
 0x6b5   : > { %5114 = vpow2.f32 %v4410_v19  ;;  %v4416_v27 = vmul.f32 -1.442695, %v1823_v16  ;;  %v4417_v30 = vmul.f32 -1.442695, %v1824_v18 }
 0x6b6   : > { %5116 = vpow2.f32 %v4411_v21 }
 0x6b7   : > { %5118 = vpow2.f32 %v4412_v47 }
 0x6b8   : > { %5120 = vpow2.f32 %v4413_v23  ;;  %v5011_v23 = vld [vmem:[#allocation2 + $0x70] sm:$0xff]  }
 0x6b9   : > { %5122 = vpow2.f32 %v4414_v35 }
 0x6ba   : > { %5124 = vpow2.f32 %v4415_v24 }
 0x6bb   : > { %5126 = vpow2.f32 %v4416_v27 }
 0x6bc   : > { %5128 = vpow2.f32 %v4417_v30 }
 0x6bf   : > { %v5115_v4 = vpop.eup %5114 }
 0x6c0   : > { %v5117_v25 = vpop.eup %5116  ;;  %v1849_v31 = vadd.f32 1.0, %v5115_v4 }
 0x6c1   : > { %v5119_v26 = vpop.eup %5118  ;;  %v1850_v32 = vadd.f32 1.0, %v5117_v25 }
 0x6c2   : > { %v5121_v57 = vpop.eup %5120  ;;  %5130 = vrcp.f32 %v1849_v31  ;;  %v1851_v37 = vadd.f32 1.0, %v5119_v26 }
 0x6c3   : > { %v5123_v51 = vpop.eup %5122  ;;  %5132 = vrcp.f32 %v1850_v32  ;;  %v1852_v39 = vadd.f32 1.0, %v5121_v57 }
 0x6c4   : > { %v5125_v28 = vpop.eup %5124  ;;  %5134 = vrcp.f32 %v1851_v37  ;;  %v1853_v59 = vadd.f32 1.0, %v5123_v51 }
 0x6c5   : > { %v5127_v56 = vpop.eup %5126  ;;  %5136 = vrcp.f32 %v1852_v39  ;;  %v1854_v63 = vadd.f32 1.0, %v5125_v28 }
 0x6c6   : > { %v5129_v38 = vpop.eup %5128  ;;  %5138 = vrcp.f32 %v1853_v59  ;;  %v1855_v58 = vadd.f32 1.0, %v5127_v56 }
 0x6c7   : > { %5140 = vrcp.f32 %v1854_v63  ;;  %v1856_v40 = vadd.f32 1.0, %v5129_v38 }
 0x6c8   : > { %5142 = vrcp.f32 %v1855_v58 }
 0x6c9   : > { %5144 = vrcp.f32 %v1856_v40 }
 0x6cc   : > { %v5131_v41 = vpop.eup %5130 }
 0x6cd   : > { %v5133_v43 = vpop.eup %5132  ;;  %v1873_v44 = vmul.f32 %v5131_v41, %v1817_v2 }
 0x6ce   : > { %v5135_v45 = vpop.eup %5134  ;;  %v1874_v49 = vmul.f32 %v5133_v43, %v1818_v3  ;;  %v5012_v3 = vld [vmem:[#allocation2 + $0x78] sm:$0xff]  }
 0x6cf   : > { %v5137_v50 = vpop.eup %5136  ;;  %v1875_v52 = vmul.f32 %v5135_v45, %v1819_v8 }
 0x6d0   : > { %v5139_v53 = vpop.eup %5138  ;;  %v1881_v55 = vpack.c.bf16 %v1874_v49, %v1873_v44  ;;  %v1876_v19 = vmul.f32 %v5137_v50, %v1820_v9  ;;  %v5013_v9 = vld [vmem:[#allocation2 + $0x80] sm:$0xff]  }
 0x6d1   : > { %v5141_v21 = vpop.eup %5140  ;;  %v1877_v47 = vmul.f32 %v5139_v53, %v1821_v11  ;;  %4771 = vmatpush3.bf16.msra.mxu1 %v5013_v9  ;;  %v5014_v11 = vld [vmem:[#allocation2 + $0x88] sm:$0xff]  }
 0x6d2   : > { %v5143_v35 = vpop.eup %5142  ;;  %4762 = vmatprep.mubr.msk.bf16.mxu0 %vm717_vm7, %v1881_v55  ;;  %v1882_v24 = vpack.c.bf16 %v1876_v19, %v1875_v52  ;;  %v1878_v27 = vmul.f32 %v5141_v21, %v1822_v62  ;;  %4772 = vmatprep.subr.bf16.mxu1 %v5369_v1  ;;  %v1893_v62 = vrot.slane %v5805_v13, %v5668_v22 }
 0x6d3   : > { %v5145_v30 = vpop.eup %5144  ;;  %v1879_v4 = vmul.f32 %v5143_v35, %v1823_v16 }
 0x6d4   : > { %4763 = vmatmul.mubr.msk.bf16.vlgmr.msra.gmra.mrb[24].mxu0 %vm717_vm7, %v1882_v24  ;;  %v1883_v2 = vpack.c.bf16 %v1878_v27, %v1877_v47  ;;  %v1880_v25 = vmul.f32 %v5145_v30, %v1824_v18 }
 0x6d5   : > { %4779 = vmatpush3.bf16.msra.mxu0 %v5011_v23  ;;  %4773 = vmatpush3.bf16.msra.mxu1 %v5014_v11 }
 0x6d6   : > { %4766 = vmatprep.mubr.msk.bf16.mxu0 %vm717_vm7, %v1883_v2  ;;  %v1884_v8 = vpack.c.bf16 %v1880_v25, %v1879_v4  ;;  %4780 = vmatprep.subr.bf16.mxu0 %v5369_v1 }
 0x6d7   : > { %4786 = vmatprep.subr.bf16.mxu1 %v5369_v1 }
 0x6d9   : > { %4781 = vmatpush3.bf16.msra.mxu0 %v5012_v3 }
 0x6da   : > { %4792 = vmatprep.subr.bf16.mxu0 %v5369_v1 }
 0x6dc   : > { %4767 = vmatmul.mubr.msk.bf16.gmra.mrb[28].mxu0 %vm717_vm7, %v1884_v8 }
 0x6dd   : > { %4782 = vmatprep.mubr.msk.bf16.mxu0 %vm5370_vm0, %v5369_v1 }
 0x6e4   : > { %4783 = vmatmul.mubr.msk.bf16.vlgmr.msra.gmra.mrb[32].mxu0 %vm717_vm7, %v5790_v29 }
 0x6e5   : > { %4796 = vmatprep.mubr.msk.bf16.mxu0 %vm5370_vm0, %v5369_v1 }
 0x7a7   : > { %v4764_v16 = vpop.f32.mrb[24].mxu0 }
 0x7a8   : > { %v1961_v18 = vadd.f32 %v4764_v16, %v1893_v62  ;;  %v1952_v31 = vpop.f32.mrb[25].mxu0 }
 0x7a9   : > { %v1953_v26 = vadd.f32 %v1952_v31, %v1893_v62  ;;  %v4765_v32 = vpop.f32.mrb[26].mxu0 }
 0x7aa   : > { %v4426_v29 = vmul.f32 -1.442695, %v1961_v18  ;;  %v1964_v57 = vadd.f32 %v4765_v32, %v1893_v62  ;;  %v1955_v37 = vpop.f32.mrb[27].mxu0 }
 0x7ab   : > { %v4424_v51 = vmul.f32 -1.442695, %v1953_v26  ;;  %v1956_v39 = vadd.f32 %v1955_v37, %v1893_v62 }
 0x7ac   : > { %5146 = vpow2.f32 %v4426_v29  ;;  %v4427_v28 = vmul.f32 -1.442695, %v1964_v57 }
 0x7ad   : > { %5148 = vpow2.f32 %v4424_v51  ;;  %v4425_v59 = vmul.f32 -1.442695, %v1956_v39 }
 0x7ae   : > { %5150 = vpow2.f32 %v4427_v28 }
 0x7af   : > { %5152 = vpow2.f32 %v4425_v59  ;;  %v4768_v56 = vpop.f32.mrb[28].mxu0 }
 0x7b0   : > { %v5833_v63 = vadd.f32 %v4768_v56, %v1893_v62  ;;  %v1968_v38 = vpop.f32.mrb[29].mxu0 }
 0x7b1   : > { %v5835_v58 = vadd.f32 %v1968_v38, %v1893_v62  ;;  %v4769_v40 = vpop.f32.mrb[30].mxu0 }
 0x7b2   : > { %v4430_v41 = vmul.f32 -1.442695, %v5833_v63  ;;  %v5838_v43 = vadd.f32 %v4769_v40, %v1893_v62  ;;  %v1971_v44 = vpop.f32.mrb[31].mxu0 }
 0x7b3   : > { %v4428_v45 = vmul.f32 -1.442695, %v5835_v58  ;;  %v5841_v49 = vadd.f32 %v1971_v44, %v1893_v62 }
 0x7b4   : > { %5154 = vpow2.f32 %v4430_v41  ;;  %v4431_v50 = vmul.f32 -1.442695, %v5838_v43 }
 0x7b5   : > { %5156 = vpow2.f32 %v4428_v45  ;;  %v4429_v52 = vmul.f32 -1.442695, %v5841_v49 }
 0x7b6   : > { %v5147_v53 = vpop.eup %5146  ;;  %5158 = vpow2.f32 %v4431_v50 }
 0x7b7   : > { %v5149_v55 = vpop.eup %5148  ;;  %v2009_v19 = vadd.f32 1.0, %v5147_v53  ;;  %5160 = vpow2.f32 %v4429_v52  ;;  %v5845_v21 = vpop.f32.mrb[32].mxu0 }
 0x7b8   : > { %v5151_v47 = vpop.eup %5150  ;;  %v2007_v23 = vadd.f32 1.0, %v5149_v55  ;;  %v4784_v35 = vpop.f32.mrb[33].mxu0 }
 0x7b9   : > { %v5153_v24 = vpop.eup %5152  ;;  %5162 = vrcp.f32 %v2009_v19  ;;  %v2010_v27 = vadd.f32 1.0, %v5151_v47  ;;  %v2249_v30 = vpop.f32.mrb[34].mxu0 }
 0x7ba   : > { %5164 = vrcp.f32 %v2007_v23  ;;  %v2008_v4 = vadd.f32 1.0, %v5153_v24  ;;  %v4785_v2 = vpop.f32.mrb[35].mxu0 }
 0x7bb   : > { %5166 = vrcp.f32 %v2010_v27 }
 0x7bc   : > { %5168 = vrcp.f32 %v2008_v4 }
 0x7be   : > { %v5155_v25 = vpop.eup %5154 }
 0x7bf   : > { %v5157_v3 = vpop.eup %5156  ;;  %v2013_v8 = vadd.f32 1.0, %v5155_v25 }
 0x7c0   : > { %v5159_v9 = vpop.eup %5158  ;;  %v2011_v11 = vadd.f32 1.0, %v5157_v3 }
 0x7c1   : > { %v5161_v62 = vpop.eup %5160  ;;  %5170 = vrcp.f32 %v2013_v8  ;;  %v2014_v16 = vadd.f32 1.0, %v5159_v9 }
 0x7c2   : > { %5172 = vrcp.f32 %v2011_v11  ;;  %v2012_v31 = vadd.f32 1.0, %v5161_v62 }
 0x7c3   : > { %v5163_v32 = vpop.eup %5162  ;;  %5174 = vrcp.f32 %v2014_v16 }
 0x7c4   : > { %v5165_v29 = vpop.eup %5164  ;;  %v2033_v37 = vmul.f32 %v5163_v32, %v1961_v18  ;;  %5176 = vrcp.f32 %v2012_v31 }
 0x7c5   : > { %v5167_v51 = vpop.eup %5166  ;;  %v2031_v28 = vmul.f32 %v5165_v29, %v1953_v26 }
 0x7c6   : > { %v5169_v59 = vpop.eup %5168  ;;  %v2041_v56 = vmul.f32 %v2033_v37, %v5700_v5  ;;  %v2034_v38 = vmul.f32 %v5167_v51, %v1964_v57 }
 0x7c7   : > { %v2039_v40 = vmul.f32 %v2031_v28, %v5696_v46  ;;  %v2032_v41 = vmul.f32 %v5169_v59, %v1956_v39 }
 0x7c8   : > { %v2061_v44 = vsel %vm717_vm7, %v2041_v56, 0.0  ;;  %v2042_v45 = vmul.f32 %v2034_v38, %v5704_v20 }
 0x7c9   : > { %v2062_v50 = vrot.slane %v2061_v44, 4  ;;  %v2047_v52 = vsel %vm717_vm7, %v2039_v40, 0.0  ;;  %v2040_v53 = vmul.f32 %v2032_v41, %v5702_v17 }
 0x7ca   : > { %v2048_v18 = vrot.slane %v2047_v52, 4  ;;  %v2068_v55 = vsel %vm717_vm7, %v2042_v45, 0.0 }
 0x7cb   : > { %v5171_v26 = vpop.eup %5170  ;;  %v2063_v19 = vadd.f32 %v2062_v50, %v2061_v44  ;;  %v2069_v47 = vrot.slane %v2068_v55, 4  ;;  %v2054_v57 = vsel %vm717_vm7, %v2040_v53, 0.0 }
 0x7cc   : > { %v5173_v23 = vpop.eup %5172  ;;  %v2049_v35 = vadd.f32 %v2048_v18, %v2047_v52  ;;  %v2055_v39 = vrot.slane %v2054_v57, 4  ;;  %v2037_v24 = vmul.f32 %v5171_v26, %v5833_v63 }
 0x7cd   : > { %v5175_v27 = vpop.eup %5174  ;;  %v2064_v30 = vrot.slane %v2063_v19, 2  ;;  %v2070_v4 = vadd.f32 %v2069_v47, %v2068_v55  ;;  %v2035_v2 = vmul.f32 %v5173_v23, %v5835_v58 }
 0x7ce   : > { %v5177_v25 = vpop.eup %5176  ;;  %v2050_v3 = vrot.slane %v2049_v35, 2  ;;  %v2056_v8 = vadd.f32 %v2055_v39, %v2054_v57  ;;  %v2045_v9 = vmul.f32 %v2037_v24, %v5724_v0  ;;  %v2038_v11 = vmul.f32 %v5175_v27, %v5838_v43 }
 0x7cf   : > { %v2065_v62 = vadd.f32 %v2064_v30, %v2063_v19  ;;  %v2071_v16 = vrot.slane %v2070_v4, 2  ;;  %v2043_v31 = vmul.f32 %v2035_v2, %v5712_v60  ;;  %v2036_v32 = vmul.f32 %v5177_v25, %v5841_v49 }
 0x7d0   : > { %v2051_v29 = vadd.f32 %v2050_v3, %v2049_v35  ;;  %v2057_v63 = vrot.slane %v2056_v8, 2  ;;  %v2089_v37 = vsel %vm717_vm7, %v2045_v9, 0.0  ;;  %v2046_v51 = vmul.f32 %v2038_v11, %v5729_v14 }
 0x7d1   : > { %v2066_v58 = vrot.slane %v2065_v62, 1  ;;  %v2072_v28 = vadd.f32 %v2071_v16, %v2070_v4  ;;  %v2090_v59 = vrot.slane %v2089_v37, 4  ;;  %v2075_v56 = vsel %vm717_vm7, %v2043_v31, 0.0 }
 0x7d2   : > { %v2052_v38 = vrot.slane %v2051_v29, 1  ;;  %v2058_v40 = vadd.f32 %v2057_v63, %v2056_v8  ;;  %v2076_v43 = vrot.slane %v2075_v56, 4  ;;  %v2096_v41 = vsel %vm717_vm7, %v2046_v51, 0.0 }
 0x7d3   : > { %v2067_v44 = vadd.f32 %v2066_v58, %v2065_v62  ;;  %v2073_v45 = vrot.slane %v2072_v28, 1  ;;  %v2091_v50 = vadd.f32 %v2090_v59, %v2089_v37  ;;  %v2097_v49 = vrot.slane %v2096_v41, 4 }
 0x7d4   : > { %v2053_v52 = vadd.f32 %v2052_v38, %v2051_v29  ;;  %v2059_v53 = vrot.slane %v2058_v40, 1  ;;  %v2077_v18 = vadd.f32 %v2076_v43, %v2075_v56  ;;  %v2044_v55 = vmul.f32 %v2036_v32, %v5717_v34 }
 0x7d5   : > { %v2074_v26 = vadd.f32 %v2073_v45, %v2072_v28  ;;  %v2092_v19 = vrot.slane %v2091_v50, 2  ;;  %v2098_v47 = vadd.f32 %v2097_v49, %v2096_v41  ;;  %v2110_v24 = vpack.c.bf16 %v2067_v44, %v2067_v44 }
 0x7d6   : > { %v2108_v57 = vpack.c.bf16 %v2053_v52, %v2053_v52  ;;  %v2060_v23 = vadd.f32 %v2059_v53, %v2058_v40  ;;  %v2078_v35 = vrot.slane %v2077_v18, 2  ;;  %v2082_v39 = vsel %vm717_vm7, %v2044_v55, 0.0 }
 0x7d7   : > { %v2111_v27 = vpack.c.bf16 %v2074_v26, %v2074_v26  ;;  %v2093_v30 = vadd.f32 %v2092_v19, %v2091_v50  ;;  %v2099_v4 = vrot.slane %v2098_v47, 2  ;;  %v2083_v3 = vrot.slane %v2082_v39, 4 }
 0x7d8   : > { %v2109_v2 = vpack.c.bf16 %v2060_v23, %v2060_v23  ;;  %v2079_v25 = vadd.f32 %v2078_v35, %v2077_v18  ;;  %v2129_v9 = vunpack.c.l.b16 %v2108_v57  ;;  %v2131_v31 = vunpack.c.l.b16 %v2110_v24  ;;  %v5015_v23 = vld [vmem:[#allocation2 + $0xa0] sm:$0xff]   ;;  %v5017_v24 = vld [vmem:[#allocation2 + $0x98] sm:$0xff]  }
 0x7d9   : > { %v2100_v8 = vadd.f32 %v2099_v4, %v2098_v47  ;;  %v2084_v16 = vadd.f32 %v2083_v3, %v2082_v39  ;;  %v2132_v32 = vunpack.c.l.b16 %v2111_v27  ;;  %v2094_v29 = vrot.slane %v2093_v30, 1  ;;  %v5016_v39 = vld [vmem:[#allocation2 + $0x90] sm:$0xff]   ;;  %v5018_v4 = vld [vmem:[%s6210_s5 + $0x20] sm:$0xff]  }
 0x7da   : > { %v2130_v11 = vunpack.c.l.b16 %v2109_v2  ;;  %v2080_v62 = vrot.slane %v2079_v25, 1  ;;  %4793 = vmatpush3.bf16.msra.mxu0 %v5016_v39  ;;  %v2558_v27 = vld [vmem:[#allocation2 + $0x110] sm:$0xf] }
 0x7db   : > { %v2101_v51 = vrot.slane %v2100_v8, 1  ;;  %v2085_v58 = vrot.slane %v2084_v16, 2  ;;  %v2095_v40 = vadd.f32 %v2094_v29, %v2093_v30  ;;  %4794 = vmatprep.subr.bf16.mxu0 %v5369_v1  ;;  %v2560_v30 = vand.u32 %v2558_v27, %v5560_v15  ;;  %v5021_v27 = vld [vmem:[#allocation2 + $0xc8] sm:$0xff]  }
 0x7dc   : > { %v2137_v63 = vsel %vm1320_vm8, %v2130_v11, %v2129_v9  ;;  %v2081_v37 = vadd.f32 %v2080_v62, %v2079_v25  ;;  %v2305_v11 = vrot.slane %v5805_v13, %v5761_v7 }
 0x7dd   : > { %v2138_v28 = vsel %vm1322_vm9, %v2131_v31, %v2137_v63  ;;  %v2086_v38 = vadd.f32 %v2085_v58, %v2084_v16  ;;  %v2102_v41 = vadd.f32 %v2101_v51, %v2100_v8  ;;  %v2114_v49 = vpack.c.bf16 %v2095_v40, %v2095_v40 }
 0x7de   : > { %v2112_v59 = vpack.c.bf16 %v2081_v37, %v2081_v37  ;;  %v2139_v56 = vsel %vm1324_vm10, %v2132_v32, %v2138_v28  ;;  %4795 = vmatpush3.bf16.msra.mxu0 %v5017_v24  ;;  %v5020_v24 = vld [vmem:[#allocation2 + $0xc0] sm:$0xff]  }
 0x7df   : > { %v2087_v44 = vrot.slane %v2086_v38, 1  ;;  %v2115_v52 = vpack.c.bf16 %v2102_v41, %v2102_v41  ;;  %v2135_v55 = vunpack.c.l.b16 %v2114_v49  ;;  %4808 = vmatprep.subr.bf16.mxu0 %v2560_v30 }
 0x7e0   : > { %v2133_v43 = vunpack.c.l.b16 %v2112_v59 }
 0x7e1   : > { %v2088_v50 = vadd.f32 %v2087_v44, %v2086_v38  ;;  %v2136_v26 = vunpack.c.l.b16 %v2115_v52  ;;  %v2379_v38 = vrot.slane %v5805_v13, %v5781_v54 }
 0x7e2   : > { %v2140_v45 = vsel %vm1326_vm11, %v2133_v43, %v2139_v56  ;;  %v5019_v56 = vld [vmem:[%s6210_s5 + $0x28] sm:$0xff]  }
 0x7e3   : > { %v2113_v53 = vpack.c.bf16 %v2088_v50, %v2088_v50 }
 0x7e5   : > { %v2134_v18 = vunpack.c.l.b16 %v2113_v53 }
 0x7e7   : > { %v2141_v19 = vsel %vm1328_vm12, %v2134_v18, %v2140_v45 }
 0x7e8   : > { %v2142_v47 = vsel %vm1330_vm13, %v2135_v55, %v2141_v19 }
 0x7e9   : > { %v2143_v57 = vsel %vm1332_vm14, %v2136_v26, %v2142_v47 }
 0x7ea   : > { %v2144_v35 = vpack.c.b16 %v2143_v57, %v2143_v57 }
 0x7ec   : > { %4775 = vmatmul.mubr.msk.bf16.vlgmr.msra.gmra.mrb[28].mxu1 %vm717_vm7, %v2144_v35  ;;  %v4140_v35 = vld [vmem:[%s442_s21] sm:$0xff] }
 0x7ed   : > { %4787 = vmatpush3.bf16.msra.mxu1 %v5015_v23  ;;  %4788 = vmatprep.mubr.msk.bf16.mxu1 %vm5370_vm0, %v5369_v1 }
 0x7ee   : > { %4800 = vmatprep.subr.bf16.mxu1 %v5369_v1 }
 0x7f4   : > { %4789 = vmatmul.mubr.msk.bf16.vlgmr.msra.gmra.mrb[32].mxu1 %vm655_vm1, %v5505_v10 }
 0x7f5   : > { %4804 = vmatprep.mubr.msk.bf16.mxu1 %vm5370_vm0, %v5369_v1  ;;  %4801 = vmatpush3.bf16.msra.mxu1 %v5018_v4 }
 0x7f6   : > { %4802 = vmatprep.subr.bf16.mxu1 %v5369_v1 }
 0x7f9   : > { %4803 = vmatpush3.bf16.msra.mxu1 %v5019_v56 }
 0x7fa   : > { %4818 = vmatprep.subr.bf16.mxu1 %v5020_v24 }
 0x8bf   : > { %v2194_v2 = vpop.f32.mrb[28].mxu1 }
 0x8c0   : > { %v2247_v25 = vadd.f32 %v5845_v21, %v2194_v2  ;;  %v4776_v3 = vpop.f32.mrb[29].mxu1 }
 0x8c1   : > { %v2197_v8 = vpop.f32.mrb[30].mxu1 }
 0x8c2   : > { %v4777_v9 = vpop.f32.mrb[31].mxu1 }
 0x8c7   : > { %v2295_v62 = vpop.f32.mrb[32].mxu1 }
 0x8c8   : > { %v2301_v16 = vadd.f32 %v2295_v62, %v2247_v25  ;;  %v4790_v31 = vpop.f32.mrb[33].mxu1 }
 0x8c9   : > { %v2298_v32 = vpop.f32.mrb[34].mxu1 }
 0x8ca   : > { %v2306_v29 = vadd.f32 %v2305_v11, %v2301_v16  ;;  %v4791_v63 = vpop.f32.mrb[35].mxu1  ;;  %v5940_v32 = vld [vmem:[%s6212_s7 + $0x8] sm:$0xf] }
 0x8cc   : > { %v4440_v37 = vmul.f32 -1.442695, %v2306_v29 }
 0x8ce   : > { %5178 = vpow2.f32 %v4440_v37  ;;  %v2548_v37 = vrot.slane %v5940_v32, %v5509_v12 }
 0x8d8   : > { %v5179_v51 = vpop.eup %5178 }
 0x8d9   : > { %v2310_v58 = vadd.f32 1.0, %v5179_v51 }
 0x8db   : > { %5180 = vrcp.f32 %v2310_v58 }
 0x8e5   : > { %v5181_v28 = vpop.eup %5180 }
 0x8e6   : > { %v2313_v59 = vmul.f32 %v5181_v28, %v2306_v29 }
 0x8e8   : > { %v2314_v21 = vpack.c.bf16 %v2313_v59, %v2313_v59 }
 0x8ea   : > { %4797 = vmatmul.mubr.msk.bf16.vlgmr.msra.gmra.mrb[36].mxu0 %vm717_vm7, %v2314_v21 }
 0x8eb   : > { %4810 = vmatprep.mubr.msk.bf16.mxu0 %vm876_vm6, %v5566_v33  ;;  %4809 = vmatpush3.bf16.msra.mxu0 %v2560_v30 }
 0x8ec   : > { %4830 = vmatprep.subr.bf16.mxu0 %v5369_v1 }
 0x8f2   : > { %4811 = vmatmul.mubr.msk.bf16.vlgmr.msra.gmra.mrb[40].mxu0 %vm876_vm6, %v5570_v36 }
 0x8f3   : > { %4814 = vmatprep.mubr.msk.bf16.mxu0 %vm876_vm6, %v5578_v42 }
 0x8fa   : > { %4815 = vmatmul.mubr.msk.bf16.gmra.mrb[44].mxu0 %vm876_vm6, %v5584_v48 }
 0x8fb   : > { %4834 = vmatprep.mubr.msk.bf16.mxu0 %vm5370_vm0, %v5369_v1 }
 0x9bd   : > { %v2369_v40 = vpop.f32.mrb[36].mxu0 }
 0x9be   : > { %v2375_v43 = vadd.f32 %v2369_v40, %v5786_v61  ;;  %v4798_v41 = vpop.f32.mrb[37].mxu0 }
 0x9bf   : > { %v2372_v44 = vpop.f32.mrb[38].mxu0 }
 0x9c0   : > { %v5909_v45 = vadd.f32 %v2379_v38, %v2375_v43  ;;  %v4799_v50 = vpop.f32.mrb[39].mxu0 }
 0x9c2   : > { %v5913_v49 = vpack.c.bf16 %v5909_v45, %v5909_v45 }
 0x9c4   : > { %4805 = vmatmul.mubr.msk.bf16.vlgmr.msra.gmra.mrb[36].mxu1 %vm717_vm7, %v5913_v49 }
 0x9c5   : > { %v5917_v52 = vpop.f32.mrb[40].mxu0  ;;  %4819 = vmatpush3.bf16.msra.mxu1 %v5020_v24 }
 0x9c6   : > { %v2596_v53 = vpop.f32.mrb[41].mxu0  ;;  %4820 = vmatprep.subr.bf16.mxu1 %v5021_v27 }
 0x9c7   : > { %v5919_v13 = vpop.f32.mrb[42].mxu0 }
 0x9c8   : > { %v2599_v18 = vpop.f32.mrb[43].mxu0 }
 0x9c9   : > { %4821 = vmatpush3.bf16.msra.mxu1 %v5021_v27 }
 0x9ca   : > { %4838 = vmatprep.subr.bf16.mxu1 %v5369_v1 }
 0x9cd   : > { %v5921_v55 = vpop.f32.mrb[44].mxu0 }
 0x9ce   : > { %v2612_v61 = vpop.f32.mrb[45].mxu0 }
 0x9cf   : > { %v5923_v26 = vpop.f32.mrb[46].mxu0 }
 0x9d0   : > { %v2615_v19 = vpop.f32.mrb[47].mxu0 }
 0xa97   : > { %v2438_v47 = vpop.f32.mrb[36].mxu1 }
 0xa98   : > { %2534 = vrot.lane.b32.xlu1 %v2438_v47, %s5374_s19  ;;  %v4806_v57 = vpop.f32.mrb[37].mxu1  ;;  %v2445_v30 = vcombine.high %v2438_v47, %v2438_v47  ;;  %v2452_v4 = vrot.slane %v2438_v47, %v5500_v6 }
 0xa99   : > { %v2441_v23 = vpop.f32.mrb[38].mxu1 }
 0xa9a   : > { %v4807_v39 = vpop.f32.mrb[39].mxu1  ;;  %v2459_v2 = vrot.slane %v2445_v30, %v5500_v6  ;;  %v2460_v25 = vcombine.high %v2452_v4, %v2452_v4  ;;  %v2468_v8 = vrot.slane %v2452_v4, %v5500_v6 }
 0xa9c   : > { %4143 = vperm.xlu1 %4992, %v4140_v35   ;;  %v2461_v3 = vcombine.high %v2459_v2, %v2459_v2  ;;  %v2482_v9 = vrot.slane %v2460_v25, %v5500_v6  ;;  %v2475_v11 = vrot.slane %v2459_v2, %v5500_v6  ;;  %v2490_v16 = vcombine.high %v2468_v8, %v2468_v8 }
 0xa9d   : > { %v2497_v51 = vrot.slane %v2468_v8, %v5509_v12 }
 0xa9e   : > { %v2489_v62 = vrot.slane %v2461_v3, %v5500_v6  ;;  %v2492_v31 = vcombine.high %v2482_v9, %v2482_v9  ;;  %v2491_v29 = vcombine.high %v2475_v11, %v2475_v11  ;;  %v2501_v58 = vrot.slane %v2482_v9, %v5509_v12 }
 0xa9f   : > { %v2505_v28 = vrot.slane %v2490_v16, %v5509_v12  ;;  %v2513_v21 = vrot.slane %v2475_v11, %v5509_v12 }
 0xaa0   : > { %v2493_v63 = vcombine.high %v2489_v62, %v2489_v62  ;;  %v2509_v59 = vrot.slane %v2492_v31, %v5509_v12  ;;  %v2517_v56 = vrot.slane %v2489_v62, %v5509_v12  ;;  %v2521_v38 = vrot.slane %v2491_v29, %v5509_v12 }
 0xaa2   : > { %v2525_v40 = vrot.slane %v2493_v63, %v5509_v12 }
 0xb0a   : > { %v2535_v43 = vpop.permute.xlu1 %2534 }
 0xb0b   : > { %v2539_v41 = vadd.f32 %v2535_v43, %v2505_v28  ;;  %v2540_v44 = vadd.f32 %v2535_v43, %v2509_v59  ;;  %v2537_v50 = vadd.f32 %v2535_v43, %v2497_v51  ;;  %v2538_v47 = vadd.f32 %v2535_v43, %v2501_v58 }
 0xb0c   : > { %v2541_v57 = vadd.f32 %v2535_v43, %v2513_v21  ;;  %v2542_v23 = vadd.f32 %v2535_v43, %v2517_v56  ;;  %v2543_v35 = vadd.f32 %v2535_v43, %v2521_v38  ;;  %v2544_v39 = vadd.f32 %v2535_v43, %v2525_v40 }
 0xb0d   : > { %v2549_v24 = vadd.f32 %v2548_v37, %v2537_v50  ;;  %v2550_v27 = vadd.f32 %v2548_v37, %v2538_v47  ;;  %v2551_v30 = vadd.f32 %v2548_v37, %v2539_v41  ;;  %v2552_v4 = vadd.f32 %v2548_v37, %v2540_v44 }
 0xb0e   : > { %v2553_v2 = vadd.f32 %v2548_v37, %v2541_v57  ;;  %v2554_v25 = vadd.f32 %v2548_v37, %v2542_v23  ;;  %v2555_v3 = vadd.f32 %v2548_v37, %v2543_v35  ;;  %v2556_v8 = vadd.f32 %v2548_v37, %v2544_v39 }
 0xb0f   : > { %v2627_v9 = vadd.f32 %v2596_v53, %v2549_v24  ;;  %v2628_v11 = vadd.f32 %v2599_v18, %v2550_v27  ;;  %v2629_v62 = vadd.f32 %v5917_v52, %v2551_v30  ;;  %v2630_v16 = vadd.f32 %v5919_v13, %v2552_v4 }
 0xb10   : > { %v2631_v31 = vadd.f32 %v2612_v61, %v2553_v2  ;;  %v2632_v29 = vadd.f32 %v2615_v19, %v2554_v25  ;;  %v2633_v63 = vadd.f32 %v5921_v55, %v2555_v3  ;;  %v2634_v51 = vadd.f32 %v5923_v26, %v2556_v8 }
 0xb11   : > { %v4456_v58 = vmul.f32 -1.442695, %v2627_v9  ;;  %v4457_v28 = vmul.f32 -1.442695, %v2628_v11  ;;  %v4458_v59 = vmul.f32 -1.442695, %v2629_v62 }
 0xb12   : > { %v4459_v21 = vmul.f32 -1.442695, %v2630_v16  ;;  %v4460_v56 = vmul.f32 -1.442695, %v2631_v31  ;;  %v4461_v37 = vmul.f32 -1.442695, %v2632_v29 }
 0xb13   : > { %5182 = vpow2.f32 %v4456_v58  ;;  %v4462_v53 = vmul.f32 -1.442695, %v2633_v63  ;;  %v4463_v52 = vmul.f32 -1.442695, %v2634_v51 }
 0xb14   : > { %5184 = vpow2.f32 %v4457_v28 }
 0xb15   : > { %5186 = vpow2.f32 %v4458_v59 }
 0xb16   : > { %5188 = vpow2.f32 %v4459_v21  ;;  %v5022_v21 = vld [vmem:[#allocation2 + $0xd0] sm:$0xff]  }
 0xb17   : > { %5190 = vpow2.f32 %v4460_v56 }
 0xb18   : > { %5192 = vpow2.f32 %v4461_v37 }
 0xb19   : > { %5194 = vpow2.f32 %v4462_v53 }
 0xb1a   : > { %5196 = vpow2.f32 %v4463_v52 }
 0xb1d   : > { %v5183_v13 = vpop.eup %5182 }
 0xb1e   : > { %v5185_v18 = vpop.eup %5184  ;;  %v2659_v55 = vadd.f32 1.0, %v5183_v13 }
 0xb1f   : > { %v5187_v61 = vpop.eup %5186  ;;  %v2660_v26 = vadd.f32 1.0, %v5185_v18 }
 0xb20   : > { %v5189_v19 = vpop.eup %5188  ;;  %5198 = vrcp.f32 %v2659_v55  ;;  %v2661_v38 = vadd.f32 1.0, %v5187_v61 }
 0xb21   : > { %v5191_v40 = vpop.eup %5190  ;;  %5200 = vrcp.f32 %v2660_v26  ;;  %v2662_v43 = vadd.f32 1.0, %v5189_v19 }
 0xb22   : > { %v5193_v41 = vpop.eup %5192  ;;  %5202 = vrcp.f32 %v2661_v38  ;;  %v2663_v44 = vadd.f32 1.0, %v5191_v40 }
 0xb23   : > { %v5195_v50 = vpop.eup %5194  ;;  %5204 = vrcp.f32 %v2662_v43  ;;  %v2664_v47 = vadd.f32 1.0, %v5193_v41 }
 0xb24   : > { %v5197_v57 = vpop.eup %5196  ;;  %5206 = vrcp.f32 %v2663_v44  ;;  %v2665_v23 = vadd.f32 1.0, %v5195_v50 }
 0xb25   : > { %5208 = vrcp.f32 %v2664_v47  ;;  %v2666_v35 = vadd.f32 1.0, %v5197_v57 }
 0xb26   : > { %5210 = vrcp.f32 %v2665_v23 }
 0xb27   : > { %5212 = vrcp.f32 %v2666_v35 }
 0xb2a   : > { %v5199_v39 = vpop.eup %5198 }
 0xb2b   : > { %v5201_v24 = vpop.eup %5200  ;;  %v2683_v27 = vmul.f32 %v5199_v39, %v2627_v9 }
 0xb2c   : > { %v5203_v30 = vpop.eup %5202  ;;  %v2684_v4 = vmul.f32 %v5201_v24, %v2628_v11  ;;  %v5023_v11 = vld [vmem:[#allocation2 + $0xd8] sm:$0xff]  }
 0xb2d   : > { %v5205_v2 = vpop.eup %5204  ;;  %v2685_v25 = vmul.f32 %v5203_v30, %v2629_v62 }
 0xb2e   : > { %v5207_v3 = vpop.eup %5206  ;;  %v2691_v8 = vpack.c.bf16 %v2684_v4, %v2683_v27  ;;  %v2686_v58 = vmul.f32 %v5205_v2, %v2630_v16  ;;  %v5024_v16 = vld [vmem:[#allocation2 + $0xe0] sm:$0xff]  }
 0xb2f   : > { %v5209_v28 = vpop.eup %5208  ;;  %v2687_v59 = vmul.f32 %v5207_v3, %v2631_v31  ;;  %4831 = vmatpush3.bf16.msra.mxu0 %v5024_v16  ;;  %v5025_v31 = vld [vmem:[#allocation2 + $0xe8] sm:$0xff]  }
 0xb30   : > { %v5211_v56 = vpop.eup %5210  ;;  %4822 = vmatprep.mubr.msk.bf16.mxu1 %vm717_vm7, %v2691_v8  ;;  %v2692_v37 = vpack.c.bf16 %v2686_v58, %v2685_v25  ;;  %v2688_v53 = vmul.f32 %v5209_v28, %v2632_v29  ;;  %4832 = vmatprep.subr.bf16.mxu0 %v5369_v1  ;;  %v2703_v29 = vrot.slane %v5940_v32, %v5668_v22 }
 0xb31   : > { %v5213_v52 = vpop.eup %5212  ;;  %v2689_v13 = vmul.f32 %v5211_v56, %v2633_v63 }
 0xb32   : > { %4823 = vmatmul.mubr.msk.bf16.vlgmr.msra.gmra.mrb[40].mxu1 %vm717_vm7, %v2692_v37  ;;  %v2693_v9 = vpack.c.bf16 %v2688_v53, %v2687_v59  ;;  %v2690_v18 = vmul.f32 %v5213_v52, %v2634_v51 }
 0xb33   : > { %4839 = vmatpush3.bf16.msra.mxu1 %v5022_v21  ;;  %4833 = vmatpush3.bf16.msra.mxu0 %v5025_v31 }
 0xb34   : > { %4826 = vmatprep.mubr.msk.bf16.mxu1 %vm717_vm7, %v2693_v9  ;;  %v2694_v62 = vpack.c.bf16 %v2690_v18, %v2689_v13  ;;  %4840 = vmatprep.subr.bf16.mxu1 %v5369_v1 }
 0xb35   : > { %4846 = vmatprep.subr.bf16.mxu0 %v5369_v1 }
 0xb37   : > { %4841 = vmatpush3.bf16.msra.mxu1 %v5023_v11 }
 0xb38   : > { %4852 = vmatprep.subr.bf16.mxu1 %v5369_v1 }
 0xb3a   : > { %4827 = vmatmul.mubr.msk.bf16.gmra.mrb[44].mxu1 %vm717_vm7, %v2694_v62 }
 0xb3b   : > { %4842 = vmatprep.mubr.msk.bf16.mxu1 %vm5370_vm0, %v5369_v1 }
 0xb42   : > { %4843 = vmatmul.mubr.msk.bf16.vlgmr.msra.gmra.mrb[48].mxu1 %vm717_vm7, %v5913_v49 }
 0xb43   : > { %4856 = vmatprep.mubr.msk.bf16.mxu1 %vm5370_vm0, %v5369_v1 }
 0xc05   : > { %v4824_v63 = vpop.f32.mrb[40].mxu1 }
 0xc06   : > { %v2771_v51 = vadd.f32 %v4824_v63, %v2703_v29  ;;  %v2762_v55 = vpop.f32.mrb[41].mxu1 }
 0xc07   : > { %v2763_v61 = vadd.f32 %v2762_v55, %v2703_v29  ;;  %v4825_v26 = vpop.f32.mrb[42].mxu1 }
 0xc08   : > { %v4472_v49 = vmul.f32 -1.442695, %v2771_v51  ;;  %v2774_v19 = vadd.f32 %v4825_v26, %v2703_v29  ;;  %v2765_v38 = vpop.f32.mrb[43].mxu1 }
 0xc09   : > { %v4470_v40 = vmul.f32 -1.442695, %v2763_v61  ;;  %v2766_v43 = vadd.f32 %v2765_v38, %v2703_v29 }
 0xc0a   : > { %5214 = vpow2.f32 %v4472_v49  ;;  %v4473_v41 = vmul.f32 -1.442695, %v2774_v19 }
 0xc0b   : > { %5216 = vpow2.f32 %v4470_v40  ;;  %v4471_v44 = vmul.f32 -1.442695, %v2766_v43 }
 0xc0c   : > { %5218 = vpow2.f32 %v4473_v41 }
 0xc0d   : > { %5220 = vpow2.f32 %v4471_v44  ;;  %v4828_v50 = vpop.f32.mrb[44].mxu1 }
 0xc0e   : > { %v5972_v47 = vadd.f32 %v4828_v50, %v2703_v29  ;;  %v2778_v57 = vpop.f32.mrb[45].mxu1 }
 0xc0f   : > { %v5974_v23 = vadd.f32 %v2778_v57, %v2703_v29  ;;  %v4829_v35 = vpop.f32.mrb[46].mxu1 }
 0xc10   : > { %v4476_v39 = vmul.f32 -1.442695, %v5972_v47  ;;  %v5977_v24 = vadd.f32 %v4829_v35, %v2703_v29  ;;  %v2781_v27 = vpop.f32.mrb[47].mxu1 }
 0xc11   : > { %v4474_v30 = vmul.f32 -1.442695, %v5974_v23  ;;  %v5980_v4 = vadd.f32 %v2781_v27, %v2703_v29 }
 0xc12   : > { %5222 = vpow2.f32 %v4476_v39  ;;  %v4477_v2 = vmul.f32 -1.442695, %v5977_v24 }
 0xc13   : > { %5224 = vpow2.f32 %v4474_v30  ;;  %v4475_v25 = vmul.f32 -1.442695, %v5980_v4 }
 0xc14   : > { %v5215_v3 = vpop.eup %5214  ;;  %5226 = vpow2.f32 %v4477_v2 }
 0xc15   : > { %v5217_v8 = vpop.eup %5216  ;;  %v2819_v58 = vadd.f32 1.0, %v5215_v3  ;;  %5228 = vpow2.f32 %v4475_v25  ;;  %v5984_v28 = vpop.f32.mrb[48].mxu1 }
 0xc16   : > { %v5219_v59 = vpop.eup %5218  ;;  %v2817_v21 = vadd.f32 1.0, %v5217_v8  ;;  %v4844_v56 = vpop.f32.mrb[49].mxu1 }
 0xc17   : > { %v5221_v37 = vpop.eup %5220  ;;  %5230 = vrcp.f32 %v2819_v58  ;;  %v2820_v53 = vadd.f32 1.0, %v5219_v59  ;;  %v3059_v52 = vpop.f32.mrb[50].mxu1 }
 0xc18   : > { %5232 = vrcp.f32 %v2817_v21  ;;  %v2818_v13 = vadd.f32 1.0, %v5221_v37  ;;  %v4845_v9 = vpop.f32.mrb[51].mxu1 }
 0xc19   : > { %5234 = vrcp.f32 %v2820_v53 }
 0xc1a   : > { %5236 = vrcp.f32 %v2818_v13 }
 0xc1c   : > { %v5223_v18 = vpop.eup %5222 }
 0xc1d   : > { %v5225_v11 = vpop.eup %5224  ;;  %v2823_v62 = vadd.f32 1.0, %v5223_v18 }
 0xc1e   : > { %v5227_v16 = vpop.eup %5226  ;;  %v2821_v31 = vadd.f32 1.0, %v5225_v11 }
 0xc1f   : > { %v5229_v29 = vpop.eup %5228  ;;  %5238 = vrcp.f32 %v2823_v62  ;;  %v2824_v63 = vadd.f32 1.0, %v5227_v16 }
 0xc20   : > { %5240 = vrcp.f32 %v2821_v31  ;;  %v2822_v55 = vadd.f32 1.0, %v5229_v29 }
 0xc21   : > { %v5231_v26 = vpop.eup %5230  ;;  %5242 = vrcp.f32 %v2824_v63 }
 0xc22   : > { %v5233_v49 = vpop.eup %5232  ;;  %v2843_v38 = vmul.f32 %v5231_v26, %v2771_v51  ;;  %5244 = vrcp.f32 %v2822_v55 }
 0xc23   : > { %v5235_v40 = vpop.eup %5234  ;;  %v2841_v41 = vmul.f32 %v5233_v49, %v2763_v61 }
 0xc24   : > { %v5237_v44 = vpop.eup %5236  ;;  %v2851_v50 = vmul.f32 %v2843_v38, %v5700_v5  ;;  %v2844_v57 = vmul.f32 %v5235_v40, %v2774_v19 }
 0xc25   : > { %v2849_v35 = vmul.f32 %v2841_v41, %v5696_v46  ;;  %v2842_v39 = vmul.f32 %v5237_v44, %v2766_v43 }
 0xc26   : > { %v2871_v27 = vsel %vm717_vm7, %v2851_v50, 0.0  ;;  %v2852_v30 = vmul.f32 %v2844_v57, %v5704_v20 }
 0xc27   : > { %v2872_v2 = vrot.slane %v2871_v27, 4  ;;  %v2857_v25 = vsel %vm717_vm7, %v2849_v35, 0.0  ;;  %v2850_v3 = vmul.f32 %v2842_v39, %v5702_v17 }
 0xc28   : > { %v2858_v51 = vrot.slane %v2857_v25, 4  ;;  %v2878_v8 = vsel %vm717_vm7, %v2852_v30, 0.0 }
 0xc29   : > { %v5239_v61 = vpop.eup %5238  ;;  %v2873_v58 = vadd.f32 %v2872_v2, %v2871_v27  ;;  %v2879_v59 = vrot.slane %v2878_v8, 4  ;;  %v2864_v19 = vsel %vm717_vm7, %v2850_v3, 0.0 }
 0xc2a   : > { %v5241_v21 = vpop.eup %5240  ;;  %v2859_v56 = vadd.f32 %v2858_v51, %v2857_v25  ;;  %v2865_v43 = vrot.slane %v2864_v19, 4  ;;  %v2847_v37 = vmul.f32 %v5239_v61, %v5972_v47 }
 0xc2b   : > { %v5243_v53 = vpop.eup %5242  ;;  %v2874_v52 = vrot.slane %v2873_v58, 2  ;;  %v2880_v13 = vadd.f32 %v2879_v59, %v2878_v8  ;;  %v2845_v9 = vmul.f32 %v5241_v21, %v5974_v23 }
 0xc2c   : > { %v5245_v18 = vpop.eup %5244  ;;  %v2860_v11 = vrot.slane %v2859_v56, 2  ;;  %v2866_v62 = vadd.f32 %v2865_v43, %v2864_v19  ;;  %v2855_v16 = vmul.f32 %v2847_v37, %v5724_v0  ;;  %v2848_v31 = vmul.f32 %v5243_v53, %v5977_v24 }
 0xc2d   : > { %v2875_v29 = vadd.f32 %v2874_v52, %v2873_v58  ;;  %v2881_v63 = vrot.slane %v2880_v13, 2  ;;  %v2853_v55 = vmul.f32 %v2845_v9, %v5712_v60  ;;  %v2846_v26 = vmul.f32 %v5245_v18, %v5980_v4 }
 0xc2e   : > { %v2861_v49 = vadd.f32 %v2860_v11, %v2859_v56  ;;  %v2867_v47 = vrot.slane %v2866_v62, 2  ;;  %v2899_v38 = vsel %vm717_vm7, %v2855_v16, 0.0  ;;  %v2856_v40 = vmul.f32 %v2848_v31, %v5729_v14 }
 0xc2f   : > { %v2876_v23 = vrot.slane %v2875_v29, 1  ;;  %v2882_v41 = vadd.f32 %v2881_v63, %v2880_v13  ;;  %v2900_v44 = vrot.slane %v2899_v38, 4  ;;  %v2885_v50 = vsel %vm717_vm7, %v2853_v55, 0.0 }
 0xc30   : > { %v2862_v57 = vrot.slane %v2861_v49, 1  ;;  %v2868_v35 = vadd.f32 %v2867_v47, %v2866_v62  ;;  %v2886_v24 = vrot.slane %v2885_v50, 4  ;;  %v2906_v39 = vsel %vm717_vm7, %v2856_v40, 0.0 }
 0xc31   : > { %v2877_v27 = vadd.f32 %v2876_v23, %v2875_v29  ;;  %v2883_v30 = vrot.slane %v2882_v41, 1  ;;  %v2901_v2 = vadd.f32 %v2900_v44, %v2899_v38  ;;  %v2907_v4 = vrot.slane %v2906_v39, 4 }
 0xc32   : > { %v2863_v25 = vadd.f32 %v2862_v57, %v2861_v49  ;;  %v2869_v3 = vrot.slane %v2868_v35, 1  ;;  %v2887_v51 = vadd.f32 %v2886_v24, %v2885_v50  ;;  %v2854_v8 = vmul.f32 %v2846_v26, %v5717_v34 }
 0xc33   : > { %v2884_v61 = vadd.f32 %v2883_v30, %v2882_v41  ;;  %v2902_v58 = vrot.slane %v2901_v2, 2  ;;  %v2908_v59 = vadd.f32 %v2907_v4, %v2906_v39  ;;  %v2920_v37 = vpack.c.bf16 %v2877_v27, %v2877_v27 }
 0xc34   : > { %v2918_v19 = vpack.c.bf16 %v2863_v25, %v2863_v25  ;;  %v2870_v21 = vadd.f32 %v2869_v3, %v2868_v35  ;;  %v2888_v56 = vrot.slane %v2887_v51, 2  ;;  %v2892_v43 = vsel %vm717_vm7, %v2854_v8, 0.0 }
 0xc35   : > { %v2921_v53 = vpack.c.bf16 %v2884_v61, %v2884_v61  ;;  %v2903_v52 = vadd.f32 %v2902_v58, %v2901_v2  ;;  %v2909_v13 = vrot.slane %v2908_v59, 2  ;;  %v2893_v11 = vrot.slane %v2892_v43, 4 }
 0xc36   : > { %v2919_v9 = vpack.c.bf16 %v2870_v21, %v2870_v21  ;;  %v2889_v18 = vadd.f32 %v2888_v56, %v2887_v51  ;;  %v2939_v16 = vunpack.c.l.b16 %v2918_v19  ;;  %v2941_v55 = vunpack.c.l.b16 %v2920_v37  ;;  %v5026_v21 = vld [vmem:[#allocation2 + $0x100] sm:$0xff]   ;;  %v5028_v37 = vld [vmem:[#allocation2 + $0xf8] sm:$0xff]  }
 0xc37   : > { %v2910_v62 = vadd.f32 %v2909_v13, %v2908_v59  ;;  %v2894_v63 = vadd.f32 %v2893_v11, %v2892_v43  ;;  %v2942_v26 = vunpack.c.l.b16 %v2921_v53  ;;  %v2904_v49 = vrot.slane %v2903_v52, 1  ;;  %v5027_v43 = vld [vmem:[#allocation2 + $0xf0] sm:$0xff]  }
 0xc38   : > { %v2940_v31 = vunpack.c.l.b16 %v2919_v9  ;;  %v2890_v29 = vrot.slane %v2889_v18, 1  ;;  %4853 = vmatpush3.bf16.msra.mxu1 %v5027_v43  ;;  %v3368_v53 = vld [vmem:[#allocation2 + $0x170] sm:$0xf] }
 0xc39   : > { %v2911_v40 = vrot.slane %v2910_v62, 1  ;;  %v2895_v23 = vrot.slane %v2894_v63, 2  ;;  %v2905_v35 = vadd.f32 %v2904_v49, %v2903_v52  ;;  %4854 = vmatprep.subr.bf16.mxu1 %v5369_v1  ;;  %v3370_v52 = vand.u32 %v3368_v53, %v5560_v15  ;;  %v5029_v13 = vld [vmem:[%s6210_s5 + $0x30] sm:$0xff]  }
 0xc3a   : > { %v2947_v47 = vsel %vm1320_vm8, %v2940_v31, %v2939_v16  ;;  %v2891_v38 = vadd.f32 %v2890_v29, %v2889_v18  ;;  %v3115_v31 = vrot.slane %v5940_v32, %v5761_v7 }
 0xc3b   : > { %v2948_v41 = vsel %vm1322_vm9, %v2941_v55, %v2947_v47  ;;  %v2896_v57 = vadd.f32 %v2895_v23, %v2894_v63  ;;  %v2912_v39 = vadd.f32 %v2911_v40, %v2910_v62  ;;  %v2924_v4 = vpack.c.bf16 %v2905_v35, %v2905_v35 }
 0xc3c   : > { %v2922_v44 = vpack.c.bf16 %v2891_v38, %v2891_v38  ;;  %v2949_v50 = vsel %vm1324_vm10, %v2942_v26, %v2948_v41  ;;  %4855 = vmatpush3.bf16.msra.mxu1 %v5028_v37 }
 0xc3d   : > { %v2897_v27 = vrot.slane %v2896_v57, 1  ;;  %v2925_v25 = vpack.c.bf16 %v2912_v39, %v2912_v39  ;;  %v2945_v8 = vunpack.c.l.b16 %v2924_v4  ;;  %4868 = vmatprep.subr.bf16.mxu1 %v3370_v52 }
 0xc3e   : > { %v2943_v24 = vunpack.c.l.b16 %v2922_v44  ;;  %v5030_v44 = vld [vmem:[%s6210_s5 + $0x38] sm:$0xff]  }
 0xc3f   : > { %v2898_v2 = vadd.f32 %v2897_v27, %v2896_v57  ;;  %v2946_v61 = vunpack.c.l.b16 %v2925_v25 }
 0xc40   : > { %v2950_v30 = vsel %vm1326_vm11, %v2943_v24, %v2949_v50 }
 0xc41   : > { %v2923_v3 = vpack.c.bf16 %v2898_v2, %v2898_v2 }
 0xc43   : > { %v2944_v51 = vunpack.c.l.b16 %v2923_v3  ;;  %v5031_v3 = vld [vmem:[#allocation2 + $0x120] sm:$0xff]  }
 0xc45   : > { %v2951_v58 = vsel %vm1328_vm12, %v2944_v51, %v2950_v30  ;;  %v5032_v51 = vld [vmem:[#allocation2 + $0x128] sm:$0xff]  }
 0xc46   : > { %v2952_v59 = vsel %vm1330_vm13, %v2945_v8, %v2951_v58 }
 0xc47   : > { %v2953_v19 = vsel %vm1332_vm14, %v2946_v61, %v2952_v59 }
 0xc48   : > { %v2954_v56 = vpack.c.b16 %v2953_v19, %v2953_v19 }
 0xc4a   : > { %4835 = vmatmul.mubr.msk.bf16.vlgmr.msra.gmra.mrb[48].mxu0 %vm717_vm7, %v2954_v56 }
 0xc4b   : > { %4847 = vmatpush3.bf16.msra.mxu0 %v5026_v21  ;;  %4848 = vmatprep.mubr.msk.bf16.mxu0 %vm5370_vm0, %v5369_v1 }
 0xc4c   : > { %4860 = vmatprep.subr.bf16.mxu0 %v5369_v1 }
 0xc52   : > { %4849 = vmatmul.mubr.msk.bf16.vlgmr.msra.gmra.mrb[52].mxu0 %vm655_vm1, %v5505_v10 }
 0xc53   : > { %4864 = vmatprep.mubr.msk.bf16.mxu0 %vm5370_vm0, %v5369_v1  ;;  %4861 = vmatpush3.bf16.msra.mxu0 %v5029_v13 }
 0xc54   : > { %4862 = vmatprep.subr.bf16.mxu0 %v5369_v1 }
 0xc57   : > { %4863 = vmatpush3.bf16.msra.mxu0 %v5030_v44 }
 0xc58   : > { %4878 = vmatprep.subr.bf16.mxu0 %v5031_v3 }
 0xd1d   : > { %v3004_v9 = vpop.f32.mrb[48].mxu0 }
 0xd1e   : > { %v3057_v18 = vadd.f32 %v5984_v28, %v3004_v9  ;;  %v4836_v11 = vpop.f32.mrb[49].mxu0 }
 0xd1f   : > { %v3007_v62 = vpop.f32.mrb[50].mxu0 }
 0xd20   : > { %v4837_v16 = vpop.f32.mrb[51].mxu0  ;;  %v6067_v62 = vld [vmem:[%s6212_s7 + $0xc] sm:$0xf] }
 0xd25   : > { %v3105_v29 = vpop.f32.mrb[52].mxu0 }
 0xd26   : > { %v3111_v63 = vadd.f32 %v3105_v29, %v3057_v18  ;;  %v4850_v15 = vpop.f32.mrb[53].mxu0  ;;  %v3358_v29 = vrot.slane %v6067_v62, %v5509_v12 }
 0xd27   : > { %v3108_v55 = vpop.f32.mrb[54].mxu0 }
 0xd28   : > { %v3116_v26 = vadd.f32 %v3115_v31, %v3111_v63  ;;  %v4851_v49 = vpop.f32.mrb[55].mxu0 }
 0xd2a   : > { %v4486_v47 = vmul.f32 -1.442695, %v3116_v26 }
 0xd2c   : > { %5246 = vpow2.f32 %v4486_v47 }
 0xd36   : > { %v5247_v38 = vpop.eup %5246 }
 0xd37   : > { %v3120_v40 = vadd.f32 1.0, %v5247_v38 }
 0xd39   : > { %5248 = vrcp.f32 %v3120_v40 }
 0xd43   : > { %v5249_v23 = vpop.eup %5248 }
 0xd44   : > { %v3123_v41 = vmul.f32 %v5249_v23, %v3116_v26 }
 0xd46   : > { %v3124_v28 = vpack.c.bf16 %v3123_v41, %v3123_v41 }
 0xd48   : > { %4857 = vmatmul.mubr.msk.bf16.vlgmr.msra.gmra.mrb[52].mxu1 %vm717_vm7, %v3124_v28 }
 0xd49   : > { %4870 = vmatprep.mubr.msk.bf16.mxu1 %vm876_vm6, %v5566_v33  ;;  %4869 = vmatpush3.bf16.msra.mxu1 %v3370_v52  ;;  %v3189_v33 = vrot.slane %v5940_v32, %v5781_v54 }
 0xd4a   : > { %4890 = vmatprep.subr.bf16.mxu1 %v5369_v1 }
 0xd50   : > { %4871 = vmatmul.mubr.msk.bf16.vlgmr.msra.gmra.mrb[56].mxu1 %vm876_vm6, %v5570_v36 }
 0xd51   : > { %4874 = vmatprep.mubr.msk.bf16.mxu1 %vm876_vm6, %v5578_v42 }
 0xd58   : > { %4875 = vmatmul.mubr.msk.bf16.gmra.mrb[60].mxu1 %vm876_vm6, %v5584_v48 }
 0xd59   : > { %4894 = vmatprep.mubr.msk.bf16.mxu1 %vm5370_vm0, %v5369_v1 }
 0xe1b   : > { %v3179_v50 = vpop.f32.mrb[52].mxu1 }
 0xe1c   : > { %v3185_v36 = vadd.f32 %v3179_v50, %v5909_v45  ;;  %v4858_v57 = vpop.f32.mrb[53].mxu1 }
 0xe1d   : > { %v3182_v35 = vpop.f32.mrb[54].mxu1 }
 0xe1e   : > { %v6048_v42 = vadd.f32 %v3189_v33, %v3185_v36  ;;  %v4859_v24 = vpop.f32.mrb[55].mxu1 }
 0xe20   : > { %v6052_v48 = vpack.c.bf16 %v6048_v42, %v6048_v42 }
 0xe22   : > { %4865 = vmatmul.mubr.msk.bf16.vlgmr.msra.gmra.mrb[56].mxu0 %vm717_vm7, %v6052_v48 }
 0xe23   : > { %v4872_v39 = vpop.f32.mrb[56].mxu1  ;;  %4879 = vmatpush3.bf16.msra.mxu0 %v5031_v3 }
 0xe24   : > { %v3406_v27 = vpop.f32.mrb[57].mxu1  ;;  %4880 = vmatprep.subr.bf16.mxu0 %v5032_v51 }
 0xe25   : > { %v4873_v30 = vpop.f32.mrb[58].mxu1 }
 0xe26   : > { %v3409_v2 = vpop.f32.mrb[59].mxu1 }
 0xe27   : > { %4881 = vmatpush3.bf16.msra.mxu0 %v5032_v51 }
 0xe28   : > { %4898 = vmatprep.subr.bf16.mxu0 %v5369_v1 }
 0xe2b   : > { %v4876_v32 = vpop.f32.mrb[60].mxu1 }
 0xe2c   : > { %v3422_v4 = vpop.f32.mrb[61].mxu1 }
 0xe2d   : > { %v4877_v25 = vpop.f32.mrb[62].mxu1 }
 0xe2e   : > { %v3425_v45 = vpop.f32.mrb[63].mxu1 }
 0xef5   : > { %v3248_v8 = vpop.f32.mrb[56].mxu0 }
 0xef6   : > { %3344 = vrot.lane.b32.xlu0 %v3248_v8, %s5374_s19  ;;  %v4866_v61 = vpop.f32.mrb[57].mxu0  ;;  %v3255_v19 = vcombine.high %v3248_v8, %v3248_v8  ;;  %v3262_v21 = vrot.slane %v3248_v8, %v5500_v6 }
 0xef7   : > { %v3251_v58 = vpop.f32.mrb[58].mxu0 }
 0xef8   : > { %v4867_v59 = vpop.f32.mrb[59].mxu0  ;;  %v3269_v56 = vrot.slane %v3255_v19, %v5500_v6  ;;  %v3270_v43 = vcombine.high %v3262_v21, %v3262_v21  ;;  %v3278_v53 = vrot.slane %v3262_v21, %v5500_v6 }
 0xefa   : > { %v3271_v37 = vcombine.high %v3269_v56, %v3269_v56  ;;  %v3292_v52 = vrot.slane %v3270_v43, %v5500_v6  ;;  %v3285_v13 = vrot.slane %v3269_v56, %v5500_v6  ;;  %v3300_v18 = vcombine.high %v3278_v53, %v3278_v53 }
 0xefb   : > { %v3307_v63 = vrot.slane %v3278_v53, %v5509_v12 }
 0xefc   : > { %v3299_v9 = vrot.slane %v3271_v37, %v5500_v6  ;;  %v3302_v11 = vcombine.high %v3292_v52, %v3292_v52  ;;  %v3301_v16 = vcombine.high %v3285_v13, %v3285_v13  ;;  %v3311_v15 = vrot.slane %v3292_v52, %v5509_v12 }
 0xefd   : > { %v3315_v55 = vrot.slane %v3300_v18, %v5509_v12  ;;  %v3323_v26 = vrot.slane %v3285_v13, %v5509_v12 }
 0xefe   : > { %v3303_v31 = vcombine.high %v3299_v9, %v3299_v9  ;;  %v3319_v6 = vrot.slane %v3302_v11, %v5509_v12  ;;  %v3327_v49 = vrot.slane %v3299_v9, %v5509_v12  ;;  %v3331_v47 = vrot.slane %v3301_v16, %v5509_v12 }
 0xf00   : > { %v3335_v38 = vrot.slane %v3303_v31, %v5509_v12 }
 0xf68   : > { %v3345_v40 = vpop.permute.xlu0 %3344 }
 0xf69   : > { %v3349_v23 = vadd.f32 %v3345_v40, %v3315_v55  ;;  %v3350_v41 = vadd.f32 %v3345_v40, %v3319_v6  ;;  %v3347_v28 = vadd.f32 %v3345_v40, %v3307_v63  ;;  %v3348_v44 = vadd.f32 %v3345_v40, %v3311_v15 }
 0xf6a   : > { %v3351_v33 = vadd.f32 %v3345_v40, %v3323_v26  ;;  %v3352_v50 = vadd.f32 %v3345_v40, %v3327_v49  ;;  %v3353_v36 = vadd.f32 %v3345_v40, %v3331_v47  ;;  %v3354_v57 = vadd.f32 %v3345_v40, %v3335_v38 }
 0xf6b   : > { %v3359_v35 = vadd.f32 %v3358_v29, %v3347_v28  ;;  %v3360_v24 = vadd.f32 %v3358_v29, %v3348_v44  ;;  %v3361_v3 = vadd.f32 %v3358_v29, %v3349_v23  ;;  %v3362_v51 = vadd.f32 %v3358_v29, %v3350_v41 }
 0xf6c   : > { %v3363_v8 = vadd.f32 %v3358_v29, %v3351_v33  ;;  %v3364_v61 = vadd.f32 %v3358_v29, %v3352_v50  ;;  %v3365_v58 = vadd.f32 %v3358_v29, %v3353_v36  ;;  %v3366_v59 = vadd.f32 %v3358_v29, %v3354_v57 }
 0xf6d   : > { %v3437_v19 = vadd.f32 %v3406_v27, %v3359_v35  ;;  %v3438_v21 = vadd.f32 %v3409_v2, %v3360_v24  ;;  %v3439_v12 = vadd.f32 %v4872_v39, %v3361_v3  ;;  %v3440_v56 = vadd.f32 %v4873_v30, %v3362_v51 }
 0xf6e   : > { %v3441_v43 = vadd.f32 %v3422_v4, %v3363_v8  ;;  %v3442_v37 = vadd.f32 %v3425_v45, %v3364_v61  ;;  %v3443_v53 = vadd.f32 %v4876_v32, %v3365_v58  ;;  %v3444_v52 = vadd.f32 %v4877_v25, %v3366_v59  ;;  %v5033_v8 = vld [vmem:[#allocation2 + $0x130] sm:$0xff]  }
 0xf6f   : > { %v4502_v13 = vmul.f32 -1.442695, %v3437_v19  ;;  %v4503_v9 = vmul.f32 -1.442695, %v3438_v21  ;;  %v4504_v18 = vmul.f32 -1.442695, %v3439_v12 }
 0xf70   : > { %v4505_v11 = vmul.f32 -1.442695, %v3440_v56  ;;  %v4506_v16 = vmul.f32 -1.442695, %v3441_v43  ;;  %v4507_v31 = vmul.f32 -1.442695, %v3442_v37 }
 0xf71   : > { %5250 = vpow2.f32 %v4502_v13  ;;  %v4508_v63 = vmul.f32 -1.442695, %v3443_v53  ;;  %v4509_v29 = vmul.f32 -1.442695, %v3444_v52 }
 0xf72   : > { %5252 = vpow2.f32 %v4503_v9 }
 0xf73   : > { %5254 = vpow2.f32 %v4504_v18 }
 0xf74   : > { %5256 = vpow2.f32 %v4505_v11 }
 0xf75   : > { %5258 = vpow2.f32 %v4506_v16 }
 0xf76   : > { %5260 = vpow2.f32 %v4507_v31 }
 0xf77   : > { %5262 = vpow2.f32 %v4508_v63 }
 0xf78   : > { %5264 = vpow2.f32 %v4509_v29 }
 0xf7b   : > { %v5251_v39 = vpop.eup %5250 }
 0xf7c   : > { %v5253_v27 = vpop.eup %5252  ;;  %v3469_v30 = vadd.f32 1.0, %v5251_v39 }
 0xf7d   : > { %v5255_v2 = vpop.eup %5254  ;;  %v3470_v32 = vadd.f32 1.0, %v5253_v27 }
 0xf7e   : > { %v5257_v4 = vpop.eup %5256  ;;  %5266 = vrcp.f32 %v3469_v30  ;;  %v3471_v25 = vadd.f32 1.0, %v5255_v2 }
 0xf7f   : > { %v5259_v45 = vpop.eup %5258  ;;  %5268 = vrcp.f32 %v3470_v32  ;;  %v3472_v15 = vadd.f32 1.0, %v5257_v4 }
 0xf80   : > { %v5261_v55 = vpop.eup %5260  ;;  %5270 = vrcp.f32 %v3471_v25  ;;  %v3473_v6 = vadd.f32 1.0, %v5259_v45 }
 0xf81   : > { %v5263_v26 = vpop.eup %5262  ;;  %5272 = vrcp.f32 %v3472_v15  ;;  %v3474_v49 = vadd.f32 1.0, %v5261_v55 }
 0xf82   : > { %v5265_v47 = vpop.eup %5264  ;;  %5274 = vrcp.f32 %v3473_v6  ;;  %v3475_v38 = vadd.f32 1.0, %v5263_v26 }
 0xf83   : > { %5276 = vrcp.f32 %v3474_v49  ;;  %v3476_v40 = vadd.f32 1.0, %v5265_v47 }
 0xf84   : > { %5278 = vrcp.f32 %v3475_v38 }
 0xf85   : > { %5280 = vrcp.f32 %v3476_v40 }
 0xf88   : > { %v5267_v23 = vpop.eup %5266 }
 0xf89   : > { %v5269_v41 = vpop.eup %5268  ;;  %v3493_v28 = vmul.f32 %v5267_v23, %v3437_v19 }
 0xf8a   : > { %v5271_v44 = vpop.eup %5270  ;;  %v3494_v33 = vmul.f32 %v5269_v41, %v3438_v21  ;;  %v5034_v21 = vld [vmem:[#allocation2 + $0x138] sm:$0xff]  }
 0xf8b   : > { %v5273_v50 = vpop.eup %5272  ;;  %v3495_v36 = vmul.f32 %v5271_v44, %v3439_v12 }
 0xf8c   : > { %v5275_v57 = vpop.eup %5274  ;;  %v3501_v35 = vpack.c.bf16 %v3494_v33, %v3493_v28  ;;  %v3496_v24 = vmul.f32 %v5273_v50, %v3440_v56  ;;  %v5035_v56 = vld [vmem:[#allocation2 + $0x140] sm:$0xff]  }
 0xf8d   : > { %v5277_v3 = vpop.eup %5276  ;;  %v3497_v51 = vmul.f32 %v5275_v57, %v3441_v43  ;;  %4891 = vmatpush3.bf16.msra.mxu1 %v5035_v56  ;;  %v5036_v43 = vld [vmem:[#allocation2 + $0x148] sm:$0xff]  }
 0xf8e   : > { %v5279_v61 = vpop.eup %5278  ;;  %4882 = vmatprep.mubr.msk.bf16.mxu0 %vm717_vm7, %v3501_v35  ;;  %v3502_v58 = vpack.c.bf16 %v3496_v24, %v3495_v36  ;;  %v3498_v59 = vmul.f32 %v5277_v3, %v3442_v37  ;;  %4892 = vmatprep.subr.bf16.mxu1 %v5369_v1  ;;  %v3513_v37 = vrot.slane %v6067_v62, %v5668_v22 }
 0xf8f   : > { %v5281_v13 = vpop.eup %5280  ;;  %v3499_v9 = vmul.f32 %v5279_v61, %v3443_v53 }
 0xf90   : > { %4883 = vmatmul.mubr.msk.bf16.vlgmr.msra.gmra.mrb[60].mxu0 %vm717_vm7, %v3502_v58  ;;  %v3503_v19 = vpack.c.bf16 %v3498_v59, %v3497_v51  ;;  %v3500_v18 = vmul.f32 %v5281_v13, %v3444_v52 }
 0xf91   : > { %4899 = vmatpush3.bf16.msra.mxu0 %v5033_v8  ;;  %4893 = vmatpush3.bf16.msra.mxu1 %v5036_v43 }
 0xf92   : > { %4886 = vmatprep.mubr.msk.bf16.mxu0 %vm717_vm7, %v3503_v19  ;;  %v3504_v12 = vpack.c.bf16 %v3500_v18, %v3499_v9  ;;  %4900 = vmatprep.subr.bf16.mxu0 %v5369_v1 }
 0xf93   : > { %4906 = vmatprep.subr.bf16.mxu1 %v5369_v1 }
 0xf95   : > { %4901 = vmatpush3.bf16.msra.mxu0 %v5034_v21 }
 0xf96   : > { %4912 = vmatprep.subr.bf16.mxu0 %v5369_v1 }
 0xf98   : > { %4887 = vmatmul.mubr.msk.bf16.gmra.mrb[64].mxu0 %vm717_vm7, %v3504_v12 }
 0xf99   : > { %4902 = vmatprep.mubr.msk.bf16.mxu0 %vm5370_vm0, %v5369_v1 }
 0xfa0   : > { %4903 = vmatmul.mubr.msk.bf16.vlgmr.msra.gmra.mrb[68].mxu0 %vm717_vm7, %v6052_v48 }
 0xfa1   : > { %4916 = vmatprep.mubr.msk.bf16.mxu0 %vm5370_vm0, %v5369_v1 }
0x1063   : > { %v4884_v53 = vpop.f32.mrb[60].mxu0 }
0x1064   : > { %v3581_v52 = vadd.f32 %v4884_v53, %v3513_v37  ;;  %v3572_v11 = vpop.f32.mrb[61].mxu0 }
0x1065   : > { %v3573_v16 = vadd.f32 %v3572_v11, %v3513_v37  ;;  %v4885_v31 = vpop.f32.mrb[62].mxu0 }
0x1066   : > { %v4518_v48 = vmul.f32 -1.442695, %v3581_v52  ;;  %v3584_v63 = vadd.f32 %v4885_v31, %v3513_v37  ;;  %v3575_v29 = vpop.f32.mrb[63].mxu0 }
0x1067   : > { %v4516_v39 = vmul.f32 -1.442695, %v3573_v16  ;;  %v3576_v27 = vadd.f32 %v3575_v29, %v3513_v37 }
0x1068   : > { %5282 = vpow2.f32 %v4518_v48  ;;  %v4519_v30 = vmul.f32 -1.442695, %v3584_v63 }
0x1069   : > { %5284 = vpow2.f32 %v4516_v39  ;;  %v4517_v2 = vmul.f32 -1.442695, %v3576_v27 }
0x106a   : > { %5286 = vpow2.f32 %v4519_v30 }
0x106b   : > { %5288 = vpow2.f32 %v4517_v2  ;;  %v4888_v32 = vpop.f32.mrb[64].mxu0 }
0x106c   : > { %v6095_v4 = vadd.f32 %v4888_v32, %v3513_v37  ;;  %v3588_v22 = vpop.f32.mrb[65].mxu0 }
0x106d   : > { %v6097_v25 = vadd.f32 %v3588_v22, %v3513_v37  ;;  %v4889_v45 = vpop.f32.mrb[66].mxu0 }
0x106e   : > { %v4522_v15 = vmul.f32 -1.442695, %v6095_v4  ;;  %v6100_v55 = vadd.f32 %v4889_v45, %v3513_v37  ;;  %v3591_v6 = vpop.f32.mrb[67].mxu0 }
0x106f   : > { %v4520_v26 = vmul.f32 -1.442695, %v6097_v25  ;;  %v6103_v49 = vadd.f32 %v3591_v6, %v3513_v37 }
0x1070   : > { %5290 = vpow2.f32 %v4522_v15  ;;  %v4523_v47 = vmul.f32 -1.442695, %v6100_v55 }
0x1071   : > { %5292 = vpow2.f32 %v4520_v26  ;;  %v4521_v38 = vmul.f32 -1.442695, %v6103_v49 }
0x1072   : > { %v5283_v40 = vpop.eup %5282  ;;  %5294 = vpow2.f32 %v4523_v47 }
0x1073   : > { %v5285_v23 = vpop.eup %5284  ;;  %v3629_v41 = vadd.f32 1.0, %v5283_v40  ;;  %5296 = vpow2.f32 %v4521_v38  ;;  %v6107_v28 = vpop.f32.mrb[68].mxu0 }
0x1074   : > { %v5287_v44 = vpop.eup %5286  ;;  %v3627_v33 = vadd.f32 1.0, %v5285_v23  ;;  %v4904_v50 = vpop.f32.mrb[69].mxu0 }
0x1075   : > { %v5289_v36 = vpop.eup %5288  ;;  %5298 = vrcp.f32 %v3629_v41  ;;  %v3630_v57 = vadd.f32 1.0, %v5287_v44  ;;  %v3869_v35 = vpop.f32.mrb[70].mxu0 }
0x1076   : > { %5300 = vrcp.f32 %v3627_v33  ;;  %v3628_v24 = vadd.f32 1.0, %v5289_v36  ;;  %v4905_v3 = vpop.f32.mrb[71].mxu0 }
0x1077   : > { %5302 = vrcp.f32 %v3630_v57 }
0x1078   : > { %5304 = vrcp.f32 %v3628_v24 }
0x107a   : > { %v5291_v51 = vpop.eup %5290 }
0x107b   : > { %v5293_v8 = vpop.eup %5292  ;;  %v3633_v61 = vadd.f32 1.0, %v5291_v51 }
0x107c   : > { %v5295_v58 = vpop.eup %5294  ;;  %v3631_v59 = vadd.f32 1.0, %v5293_v8 }
0x107d   : > { %v5297_v13 = vpop.eup %5296  ;;  %5306 = vrcp.f32 %v3633_v61  ;;  %v3634_v9 = vadd.f32 1.0, %v5295_v58 }
0x107e   : > { %5308 = vrcp.f32 %v3631_v59  ;;  %v3632_v19 = vadd.f32 1.0, %v5297_v13 }
0x107f   : > { %v5299_v18 = vpop.eup %5298  ;;  %5310 = vrcp.f32 %v3634_v9 }
0x1080   : > { %v5301_v21 = vpop.eup %5300  ;;  %v3653_v12 = vmul.f32 %v5299_v18, %v3581_v52  ;;  %5312 = vrcp.f32 %v3632_v19 }
0x1081   : > { %v5303_v56 = vpop.eup %5302  ;;  %v3651_v43 = vmul.f32 %v5301_v21, %v3573_v16 }
0x1082   : > { %v5305_v37 = vpop.eup %5304  ;;  %v3661_v53 = vmul.f32 %v3653_v12, %v5700_v5  ;;  %v3654_v11 = vmul.f32 %v5303_v56, %v3584_v63 }
0x1083   : > { %v3659_v31 = vmul.f32 %v3651_v43, %v5696_v46  ;;  %v3652_v48 = vmul.f32 %v5305_v37, %v3576_v27 }
0x1084   : > { %v3681_v29 = vsel %vm717_vm7, %v3661_v53, 0.0  ;;  %v3662_v39 = vmul.f32 %v3654_v11, %v5704_v20 }
0x1085   : > { %v3682_v30 = vrot.slane %v3681_v29, 4  ;;  %v3667_v2 = vsel %vm717_vm7, %v3659_v31, 0.0  ;;  %v3660_v32 = vmul.f32 %v3652_v48, %v5702_v17 }
0x1086   : > { %v3668_v52 = vrot.slane %v3667_v2, 4  ;;  %v3688_v22 = vsel %vm717_vm7, %v3662_v39, 0.0 }
0x1087   : > { %v5307_v16 = vpop.eup %5306  ;;  %v3683_v45 = vadd.f32 %v3682_v30, %v3681_v29  ;;  %v3689_v15 = vrot.slane %v3688_v22, 4  ;;  %v3674_v5 = vsel %vm717_vm7, %v3660_v32, 0.0 }
0x1088   : > { %v5309_v63 = vpop.eup %5308  ;;  %v3669_v46 = vadd.f32 %v3668_v52, %v3667_v2  ;;  %v3675_v27 = vrot.slane %v3674_v5, 4  ;;  %v3657_v6 = vmul.f32 %v5307_v16, %v6095_v4 }
0x1089   : > { %v5311_v26 = vpop.eup %5310  ;;  %v3684_v20 = vrot.slane %v3683_v45, 2  ;;  %v3690_v47 = vadd.f32 %v3689_v15, %v3688_v22  ;;  %v3655_v38 = vmul.f32 %v5309_v63, %v6097_v25 }
0x108a   : > { %v5313_v40 = vpop.eup %5312  ;;  %v3670_v17 = vrot.slane %v3669_v46, 2  ;;  %v3676_v23 = vadd.f32 %v3675_v27, %v3674_v5  ;;  %v3665_v41 = vmul.f32 %v3657_v6, %v5724_v0  ;;  %v3658_v44 = vmul.f32 %v5311_v26, %v6100_v55 }
0x108b   : > { %v3685_v33 = vadd.f32 %v3684_v20, %v3683_v45  ;;  %v3691_v50 = vrot.slane %v3690_v47, 2  ;;  %v3663_v36 = vmul.f32 %v3655_v38, %v5712_v60  ;;  %v3656_v57 = vmul.f32 %v5313_v40, %v6103_v49 }
0x108c   : > { %v3671_v35 = vadd.f32 %v3670_v17, %v3669_v46  ;;  %v3677_v4 = vrot.slane %v3676_v23, 2  ;;  %v3709_v24 = vsel %vm717_vm7, %v3665_v41, 0.0  ;;  %v3666_v3 = vmul.f32 %v3658_v44, %v5729_v14 }
0x108d   : > { %v3686_v25 = vrot.slane %v3685_v33, 1  ;;  %v3692_v51 = vadd.f32 %v3691_v50, %v3690_v47  ;;  %v3710_v8 = vrot.slane %v3709_v24, 4  ;;  %v3695_v61 = vsel %vm717_vm7, %v3663_v36, 0.0 }
0x108e   : > { %v3672_v0 = vrot.slane %v3671_v35, 1  ;;  %v3678_v58 = vadd.f32 %v3677_v4, %v3676_v23  ;;  %v3696_v55 = vrot.slane %v3695_v61, 4  ;;  %v3716_v59 = vsel %vm717_vm7, %v3666_v3, 0.0 }
0x108f   : > { %v3687_v13 = vadd.f32 %v3686_v25, %v3685_v33  ;;  %v3693_v60 = vrot.slane %v3692_v51, 1  ;;  %v3711_v9 = vadd.f32 %v3710_v8, %v3709_v24  ;;  %v3717_v49 = vrot.slane %v3716_v59, 4 }
0x1090   : > { %v3673_v19 = vadd.f32 %v3672_v0, %v3671_v35  ;;  %v3679_v18 = vrot.slane %v3678_v58, 1  ;;  %v3697_v21 = vadd.f32 %v3696_v55, %v3695_v61  ;;  %v3664_v12 = vmul.f32 %v3656_v57, %v5717_v34  ;;  %v5037_v0 = vld [vmem:[#allocation2 + $0x160] sm:$0xff]   ;;  %v5038_v55 = vld [vmem:[#allocation2 + $0x150] sm:$0xff]  }
0x1091   : > { %v3694_v14 = vadd.f32 %v3693_v60, %v3692_v51  ;;  %v3712_v56 = vrot.slane %v3711_v9, 2  ;;  %v3718_v43 = vadd.f32 %v3717_v49, %v3716_v59  ;;  %v3730_v48 = vpack.c.bf16 %v3687_v13, %v3687_v13  ;;  %4913 = vmatpush3.bf16.msra.mxu0 %v5038_v55  ;;  %v5039_v59 = vld [vmem:[#allocation2 + $0x158] sm:$0xff]   ;;  %v5040_v13 = vld [vmem:[%s6213_s8 + $0x10] sm:$0xff]  }
0x1092   : > { %v3728_v37 = vpack.c.bf16 %v3673_v19, %v3673_v19  ;;  %v3680_v53 = vadd.f32 %v3679_v18, %v3678_v58  ;;  %v3698_v11 = vrot.slane %v3697_v21, 2  ;;  %v3702_v31 = vsel %vm717_vm7, %v3664_v12, 0.0  ;;  %4914 = vmatprep.subr.bf16.mxu0 %v5369_v1 }
0x1093   : > { %v3731_v29 = vpack.c.bf16 %v3694_v14, %v3694_v14  ;;  %v3713_v39 = vadd.f32 %v3712_v56, %v3711_v9  ;;  %v3719_v30 = vrot.slane %v3718_v43, 2  ;;  %v3703_v52 = vrot.slane %v3702_v31, 4 }
0x1094   : > { %v3729_v2 = vpack.c.bf16 %v3680_v53, %v3680_v53  ;;  %v3699_v32 = vadd.f32 %v3698_v11, %v3697_v21  ;;  %v3749_v16 = vunpack.c.l.b16 %v3728_v37  ;;  %v3751_v5 = vunpack.c.l.b16 %v3730_v48 }
0x1095   : > { %v3720_v22 = vadd.f32 %v3719_v30, %v3718_v43  ;;  %v3704_v34 = vadd.f32 %v3703_v52, %v3702_v31  ;;  %v3752_v63 = vunpack.c.l.b16 %v3731_v29  ;;  %v3714_v46 = vrot.slane %v3713_v39, 1  ;;  %4915 = vmatpush3.bf16.msra.mxu0 %v5039_v59 }
0x1096   : > { %v3750_v45 = vunpack.c.l.b16 %v3729_v2  ;;  %v3700_v15 = vrot.slane %v3699_v32, 1  ;;  %4928 = vmatprep.subr.bf16.mxu0 %v5369_v1  ;;  %v3925_v18 = vrot.slane %v6067_v62, %v5761_v7  ;;  %v5041_v7 = vld [vmem:[%s6213_s8 + $0x18] sm:$0xff]  }
0x1097   : > { %v3721_v26 = vrot.slane %v3720_v22, 1  ;;  %v3705_v20 = vrot.slane %v3704_v34, 2  ;;  %v3715_v23 = vadd.f32 %v3714_v46, %v3713_v39  ;;  %v3999_v39 = vrot.slane %v6067_v62, %v5781_v54  ;;  %v5043_v54 = vld [vmem:[%s6213_s8 + $0x28] sm:$0xff]  }
0x1098   : > { %v3757_v27 = vsel %vm1320_vm8, %v3750_v45, %v3749_v16  ;;  %v3701_v6 = vadd.f32 %v3700_v15, %v3699_v32  ;;  %v5042_v15 = vld [vmem:[%s6213_s8 + $0x20] sm:$0xff]  }
0x1099   : > { %v3758_v47 = vsel %vm1322_vm9, %v3751_v5, %v3757_v27  ;;  %v3706_v17 = vadd.f32 %v3705_v20, %v3704_v34  ;;  %v3722_v44 = vadd.f32 %v3721_v26, %v3720_v22  ;;  %v3734_v57 = vpack.c.bf16 %v3715_v23, %v3715_v23  ;;  %v4549_v23 = vld [vmem:[%s6214_s9 + $0x2] ss:$0 sm:$0xff] }
0x109a   : > { %v3732_v38 = vpack.c.bf16 %v3701_v6, %v3701_v6  ;;  %v3759_v40 = vsel %vm1324_vm10, %v3752_v63, %v3758_v47 }
0x109b   : > { %v3707_v33 = vrot.slane %v3706_v17, 1  ;;  %v3735_v35 = vpack.c.bf16 %v3722_v44, %v3722_v44  ;;  %v3755_v3 = vunpack.c.l.b16 %v3734_v57 }
0x109c   : > { %v3753_v41 = vunpack.c.l.b16 %v3732_v38 }
0x109d   : > { %v3708_v36 = vadd.f32 %v3707_v33, %v3706_v17  ;;  %v3756_v25 = vunpack.c.l.b16 %v3735_v35  ;;  %v5045_v17 = vld [vmem:[%s6213_s8 + $0x38] sm:$0xff]  }
0x109e   : > { %v3760_v50 = vsel %vm1326_vm11, %v3753_v41, %v3759_v40  ;;  %v5044_v40 = vld [vmem:[%s6213_s8 + $0x30] sm:$0xff]  }
0x109f   : > { %v3733_v4 = vpack.c.bf16 %v3708_v36, %v3708_v36 }
0x10a1   : > { %v3754_v24 = vunpack.c.l.b16 %v3733_v4 }
0x10a3   : > { %v3761_v51 = vsel %vm1328_vm12, %v3754_v24, %v3760_v50  ;;  %v4144_v50 = vpop.permute.xlu1 %4143 }
0x10a4   : > { %v3762_v8 = vsel %vm1330_vm13, %v3755_v3, %v3761_v51 }
0x10a5   : > { %v3763_v61 = vsel %vm1332_vm14, %v3756_v25, %v3762_v8 }
0x10a6   : > { %v3764_v58 = vpack.c.b16 %v3763_v61, %v3763_v61 }
0x10a8   : > { %4895 = vmatmul.mubr.msk.bf16.vlgmr.msra.gmra.mrb[64].mxu1 %vm717_vm7, %v3764_v58 }
0x10a9   : > { %4907 = vmatpush3.bf16.msra.mxu1 %v5037_v0  ;;  %4908 = vmatprep.mubr.msk.bf16.mxu1 %vm5370_vm0, %v5369_v1  ;;  %v4160_v0 = vld [vmem:[%s6214_s9 + $0x3] sm:$0x1] }
0x10aa   : > { %4920 = vmatprep.subr.bf16.mxu1 %v5369_v1 }
0x10b0   : > { %4909 = vmatmul.mubr.msk.bf16.vlgmr.msra.gmra.mrb[68].mxu1 %vm655_vm1, %v5505_v10 }
0x10b1   : > { %4924 = vmatprep.mubr.msk.bf16.mxu1 %vm5370_vm0, %v5369_v1  ;;  %4921 = vmatpush3.bf16.msra.mxu1 %v5040_v13 }
0x10b2   : > { %4922 = vmatprep.subr.bf16.mxu1 %v5369_v1 }
0x10b5   : > { %4923 = vmatpush3.bf16.msra.mxu1 %v5041_v7 }
0x10b6   : > { %4936 = vmatprep.subr.bf16.mxu1 %v5369_v1 }
0x117b   : > { %v3814_v60 = vpop.f32.mrb[64].mxu1 }
0x117c   : > { %v3867_v10 = vadd.f32 %v6107_v28, %v3814_v60  ;;  %v4896_v9 = vpop.f32.mrb[65].mxu1 }
0x117d   : > { %v3817_v49 = vpop.f32.mrb[66].mxu1 }
0x117e   : > { %v4897_v19 = vpop.f32.mrb[67].mxu1 }
0x1183   : > { %v3915_v21 = vpop.f32.mrb[68].mxu1 }
0x1184   : > { %v3921_v12 = vadd.f32 %v3915_v21, %v3867_v10  ;;  %v4910_v14 = vpop.f32.mrb[69].mxu1 }
0x1185   : > { %v3918_v56 = vpop.f32.mrb[70].mxu1 }
0x1186   : > { %v3926_v43 = vadd.f32 %v3925_v18, %v3921_v12  ;;  %v4911_v37 = vpop.f32.mrb[71].mxu1  ;;  %v4223_v18 = vld [vmem:[%s6214_s9 + $0x4] sm:$0x1]  ;;  %v4229_v56 = vld [vmem:[%s6214_s9 + $0x5] sm:$0x1] }
0x1188   : > { %v4532_v53 = vmul.f32 -1.442695, %v3926_v43 }
0x118a   : > { %5314 = vpow2.f32 %v4532_v53 }
0x1194   : > { %v5315_v11 = vpop.eup %5314 }
0x1195   : > { %v3930_v31 = vadd.f32 1.0, %v5315_v11 }
0x1197   : > { %5316 = vrcp.f32 %v3930_v31 }
0x11a1   : > { %v5317_v48 = vpop.eup %5316 }
0x11a2   : > { %v3933_v29 = vmul.f32 %v5317_v48, %v3926_v43 }
0x11a4   : > { %v3934_v28 = vpack.c.bf16 %v3933_v29, %v3933_v29 }
0x11a6   : > { %4917 = vmatmul.mubr.msk.bf16.vlgmr.msra.gmra.mrb[72].mxu0 %vm717_vm7, %v3934_v28 }
0x11a7   : > { %4932 = vmatprep.mubr.msk.bf16.mxu0 %vm5370_vm0, %v5369_v1  ;;  %4929 = vmatpush3.bf16.msra.mxu0 %v5042_v15 }
0x11a8   : > { %4930 = vmatprep.subr.bf16.mxu0 %v5369_v1 }
0x11ab   : > { %4931 = vmatpush3.bf16.msra.mxu0 %v5043_v54 }
0x1279   : > { %v3989_v30 = vpop.f32.mrb[72].mxu0 }
0x127a   : > { %v3995_v2 = vadd.f32 %v3989_v30, %v6048_v42  ;;  %v4918_v32 = vpop.f32.mrb[73].mxu0  ;;  %v4540_v42 = vld [vmem:[%s6214_s9 + $0x1] ss:$0 sm:$0xff] }
0x127b   : > { %v3992_v52 = vpop.f32.mrb[74].mxu0 }
0x127c   : > { %v4000_v22 = vadd.f32 %v3999_v39, %v3995_v2  ;;  %v4919_v16 = vpop.f32.mrb[75].mxu0 }
0x127e   : > { %v4001_v45 = vpack.c.bf16 %v4000_v22, %v4000_v22 }
0x1280   : > { %4925 = vmatmul.mubr.msk.bf16.vlgmr.msra.gmra.mrb[72].mxu1 %vm717_vm7, %v4001_v45 }
0x1281   : > { %4940 = vmatprep.mubr.msk.bf16.mxu1 %vm5370_vm0, %v5369_v1  ;;  %4937 = vmatpush3.bf16.msra.mxu1 %v5044_v40  ;;  %vm4231_vm0 = vcmask 0  }
0x1282   : > { %4938 = vmatprep.subr.bf16.mxu1 %v5369_v1 }
0x1285   : > { %4939 = vmatpush3.bf16.msra.mxu1 %v5045_v17 }
0x1353   : > { %v4061_v62 = vpop.f32.mrb[72].mxu1 }
0x1354   : > { %v4062_v34 = vadd.f32 %v4540_v42, %v4061_v62  ;;  %v4926_v5 = vpop.f32.mrb[73].mxu1 }
0x1355   : > { %v4064_v63 = vpop.f32.mrb[74].mxu1 }
0x1356   : > { %v4544_v46 = vmul.f32 -1.442695, %v4062_v34  ;;  %v4927_v27 = vpop.f32.mrb[75].mxu1 }
0x1358   : > { %5318 = vpow2.f32 %v4544_v46 }
0x1362   : > { %v5319_v6 = vpop.eup %5318 }
0x1363   : > { %v4070_v26 = vadd.f32 1.0, %v5319_v6 }
0x1365   : > { %5320 = vrcp.f32 %v4070_v26 }
0x136f   : > { %v5321_v20 = vpop.eup %5320 }
0x1370   : > { %v4073_v47 = vmul.f32 %v5321_v20, %v4062_v34 }
0x1372   : > { %v4074_v38 = vpack.c.bf16 %v4073_v47, %v4073_v47 }
0x1374   : > { %4933 = vmatmul.mubr.msk.bf16.vlgmr.msra.gmra.mrb[76].mxu0 %vm717_vm7, %v4074_v38 }
0x1447   : > { %v4134_v41 = vpop.f32.mrb[76].mxu0 }
0x1448   : > { %v4135_v44 = vadd.f32 %v4549_v23, %v4134_v41  ;;  %v4934_v33 = vpop.f32.mrb[77].mxu0 }
0x1449   : > { %v4137_v36 = vpop.f32.mrb[78].mxu0 }
0x144a   : > { %v4146_v57 = vmul.f32 %v4144_v50, %v4135_v44  ;;  %v4935_v35 = vpop.f32.mrb[79].mxu0 }
0x144c   : > { %v4147_v4 = vsel %vm717_vm7, %v4146_v57, 0.0 }
0x144d   : > { %v4148_v24 = vrot.slane %v4147_v4, 4 }
0x144f   : > { %v4149_v1 = vadd.f32 %v4148_v24, %v4147_v4 }
0x1451   : > { %v4150_v3 = vrot.slane %v4149_v1, 2 }
0x1453   : > { %v4151_v25 = vadd.f32 %v4150_v3, %v4149_v1 }
0x1455   : > { %v4152_v51 = vrot.slane %v4151_v25, 1 }
0x1457   : > { %v4153_v8 = vadd.f32 %v4152_v51, %v4151_v25 }
0x1459   : > { %v4154_v61 = vpack.c.bf16 %v4153_v8, %v4153_v8 }
0x145b   : > { %4941 = vmatmul.mubr.msk.bf16.vlgmr.msra.gmra.mrb[76].mxu1 %vm717_vm7, %v4154_v61 }
0x152e   : > { %v4210_v58 = vpop.f32.mrb[76].mxu1 }
0x152f   : > { %v4211_v55 = vadd.f32 %v4210_v58, %v4160_v0  ;;  %v4942_v59 = vpop.f32.mrb[77].mxu1 }
0x1530   : > { %v4213_v13 = vpop.f32.mrb[78].mxu1 }
0x1531   : > { %v4560_v60 = vmul.f32 -1.442695, %v4211_v55  ;;  %v4943_v10 = vpop.f32.mrb[79].mxu1 }
0x1533   : > { %5322 = vpow2.f32 %v4560_v60 }
0x153d   : > { %v5323_v9 = vpop.eup %5322 }
0x153e   : > { %v4219_v49 = vadd.f32 1.0, %v5323_v9 }
0x1540   : > { %5324 = vrcp.f32 %v4219_v49 }
0x154a   : > { %v5325_v19 = vpop.eup %5324 }
0x154b   : > { %v4222_v21 = vmul.f32 %v5325_v19, %v4211_v55 }
0x154d   : > { %v4224_v12 = vmul.f32 %v4223_v18, %v4222_v21 }
0x154f   : > { %v4226_v14 = vsel %vm4225_vm15, %v4224_v12, 0.0 }
0x1550   : > { %4227 = vadd.xlane.f32.xlu0 %v4226_v14 }
0x15dd   : > { %v4228_v43 = vpop.xlane.xlu0 %4227 }
0x15de   : > { %v4230_v37 = vadd.f32 %v4229_v56, %v4228_v43 }
0x15e0   : > { %4232 = vst.msk [vmem:[%s445_s17] sm:$0x1] %vm4231_vm0, %v4230_v37 }
0x15e1 PF: > { %s21_s13 = sadd.s32 1, %s5364_s13  }
0x15e2   : > { %p18_p5 = scmp.ge.s32.totalorder %s21_s13, 4  }
0x15e4   :  { %20 = sbr.rel (!%p18_p5) target bundleno = 1 (0x1), region = 139 }
0x15eb   :  { %4250 = vsyncpa [#allocation3], 1 }
0x15ec   :  { %4252 = vsyncpa [#allocation3 + $0x1], 1 }

</bundles_post_ra>
